<compile_context>
chip_gen: v6e
topology: v6e:2x2x1
jax: 0.10.0
libtpu: 0.0.40
codegen_flags: <defaults>
</compile_context>

<pallas_src>
import functools

import jax
import jax.numpy as jnp
from jax.experimental import pallas as pl
from jax.experimental.pallas import tpu as pltpu

EPS = 1e-5
LANE = 128


# ------------------------------ small helpers ------------------------------ #

def _round_up(v, m):
    return (v + m - 1) // m * m


def _vmem_limit_bytes():
    """Generation-aware scoped-VMEM budget (v7x has 64 MiB physical, v5e/v6e 128 MiB)."""
    try:
        cap = int(pltpu.get_tpu_info().vmem_capacity_bytes)
    except Exception:  # pragma: no cover - conservative fallback
        cap = 64 * 1024 * 1024
    return int(max(32 * 1024 * 1024, min(cap * 3 // 4, 100 * 1024 * 1024)))


def _compiler_params():
    return pltpu.CompilerParams(dimension_semantics=("parallel",),
                                vmem_limit_bytes=_vmem_limit_bytes())


def _pad_last(a, size):
    pads = [(0, 0)] * (a.ndim - 1) + [(0, size - a.shape[-1])]
    return jnp.pad(a, pads)


def _pad_w(w, ci_p, co_p):
    pads = [(0, 0)] * (w.ndim - 2) + [(0, ci_p - w.shape[-2]),
                                      (0, co_p - w.shape[-1])]
    return jnp.pad(w, pads).astype(jnp.bfloat16)


def _pick_images_per_step(n, rows):
    """Images per grid step so the GEMM M dim is >= 256 (but bounded ~2K rows)."""
    best = 1
    for cand in range(1, n + 1):
        if n % cand == 0 and cand * rows <= 2048:
            best = cand
            if cand * rows >= 256:
                break
    return best


def _affine(psum, psq, gamma, beta, m):
    """Reduce per-step partial stats in f32; fold batch stats + gamma/beta into
    per-channel scale / shift (training-mode BatchNorm, like the PyTorch module)."""
    ssum = jnp.sum(psum.astype(jnp.float32), axis=0)
    ssq = jnp.sum(psq.astype(jnp.float32), axis=0)
    mean = ssum / m
    var = jnp.maximum(ssq / m - mean * mean, 0.0)
    scale = gamma * jax.lax.rsqrt(var + EPS)
    shift = beta - mean * scale
    return scale.reshape(1, -1), shift.reshape(1, -1)


# ------------------------------ Pallas kernels ------------------------------ #

def _conv1_kernel(stride, bt, Ho, Wo, Pw, has_ds, *refs):
    """Implicit-GEMM 3x3 conv (stride via space-to-depth phase planes) with
    per-step BN partial stats; optionally fuses the 1x1 strided downsample.

    Each tap is a CONTIGUOUS slice of the flattened padded phase plane
    (Ho*Pw extended rows); the Pw-Wo garbage columns are dropped once."""
    if has_ds:
        (ph_ref, w_ref, xs_ref, wds_ref,
         y_ref, psum_ref, psq_ref, yd_ref, dsum_ref, dsq_ref) = refs
    else:
        ph_ref, w_ref, y_ref, psum_ref, psq_ref = refs

    ci = ph_ref.shape[-1]
    co = w_ref.shape[-1]
    mext = Ho * Pw

    acc = jnp.zeros((bt * mext, co), jnp.float32)
    for dy in range(3):
        for dx in range(3):
            p = (dy % stride) * stride + (dx % stride)      # phase plane
            off = (dy // stride) * Pw + (dx // stride)       # flat offset in plane
            tap = ph_ref[p, :, off:off + mext, :].reshape(bt * mext, ci)
            acc = acc + jnp.dot(tap, w_ref[dy * 3 + dx],
                                preferred_element_type=jnp.float32)

    # drop the padded-width garbage columns once
    valid = acc.reshape(bt, Ho, Pw, co)[:, :, :Wo, :].reshape(bt * Ho * Wo, co)
    y_ref[...] = valid.astype(y_ref.dtype)
    psum_ref[...] = jnp.sum(valid, axis=0, keepdims=True)
    psq_ref[...] = jnp.sum(valid * valid, axis=0, keepdims=True)

    if has_ds:
        accd = jnp.dot(xs_ref[...], wds_ref[...],
                       preferred_element_type=jnp.float32)
        yd_ref[...] = accd.astype(yd_ref.dtype)
        dsum_ref[...] = jnp.sum(accd, axis=0, keepdims=True)
        dsq_ref[...] = jnp.sum(accd * accd, axis=0, keepdims=True)


def _conv2_fused_kernel(bt, Ho, Wo, y1_ref, sc_ref, sh_ref, w_ref,
                        y2_ref, psum_ref, psq_ref, pad_ref):
    """Fused bn1 + ReLU + zero-pad + 3x3 stride-1 conv + BN partial stats.
    The normalized activation is built in a zero-padded VMEM scratch, removing
    the separate bn/ReLU kernel and the wrapper-side jnp.pad HBM round trips."""
    co = w_ref.shape[-1]
    a = jnp.maximum(y1_ref[...].astype(jnp.float32) * sc_ref[...] + sh_ref[...],
                    0.0)
    pad_ref[...] = jnp.zeros_like(pad_ref)
    pad_ref[:, 1:1 + Ho, 1:1 + Wo, :] = a.reshape(bt, Ho, Wo, co).astype(pad_ref.dtype)

    acc = jnp.zeros((bt * Ho * Wo, co), jnp.float32)
    # (conv2 taps still use 2-D window slices of the VMEM scratch; the flat-slab
    #  trick used for conv1 could also be applied here for wide feature maps.)
    for dy in range(3):
        for dx in range(3):
            patch = pad_ref[:, dy:dy + Ho, dx:dx + Wo, :].reshape(bt * Ho * Wo, co)
            acc = acc + jnp.dot(patch, w_ref[dy * 3 + dx],
                                preferred_element_type=jnp.float32)

    y2_ref[...] = acc.astype(y2_ref.dtype)
    psum_ref[...] = jnp.sum(acc, axis=0, keepdims=True)
    psq_ref[...] = jnp.sum(acc * acc, axis=0, keepdims=True)


def _residual_kernel(has_ds, *refs):
    """bn2 + (bn_downsample or identity) residual add + ReLU (elementwise)."""
    if has_ds:
        y2_ref, sc_ref, sh_ref, yd_ref, scd_ref, shd_ref, o_ref = refs
        ident = yd_ref[...].astype(jnp.float32) * scd_ref[...] + shd_ref[...]
    else:
        y2_ref, sc_ref, sh_ref, id_ref, o_ref = refs
        ident = id_ref[...].astype(jnp.float32)
    out = y2_ref[...].astype(jnp.float32) * sc_ref[...] + sh_ref[...] + ident
    o_ref[...] = jnp.maximum(out, 0.0).astype(o_ref.dtype)


# ------------------------------ pallas_call glue ---------------------------- #

def _conv1_call(phases, w1p, bt, Ho, Wo, Pw, stride, xs=None, wds=None):
    ss, n_img, Lp, ci = phases.shape
    co = w1p.shape[-1]
    n_steps = n_img // bt
    tile_m = bt * Ho * Wo
    m = n_img * Ho * Wo
    has_ds = xs is not None

    row_ci = pl.BlockSpec((tile_m, ci), lambda n: (n, 0))
    row_co = pl.BlockSpec((tile_m, co), lambda n: (n, 0))
    stat = pl.BlockSpec((1, co), lambda n: (n, 0))
    ph_spec = pl.BlockSpec((ss, bt, Lp, ci), lambda n: (0, n, 0, 0))
    w_spec = pl.BlockSpec((9, ci, co), lambda n: (0, 0, 0))

    in_specs = [ph_spec, w_spec]
    inputs = [phases, w1p]
    out_shape = [jax.ShapeDtypeStruct((m, co), jnp.bfloat16),
                 jax.ShapeDtypeStruct((n_steps, co), jnp.float32),
                 jax.ShapeDtypeStruct((n_steps, co), jnp.float32)]
    out_specs = [row_co, stat, stat]
    if has_ds:
        in_specs += [row_ci, pl.BlockSpec((ci, co), lambda n: (0, 0))]
        inputs += [xs, wds]
        out_shape += [jax.ShapeDtypeStruct((m, co), jnp.bfloat16),
                      jax.ShapeDtypeStruct((n_steps, co), jnp.float32),
                      jax.ShapeDtypeStruct((n_steps, co), jnp.float32)]
        out_specs += [row_co, stat, stat]

    return pl.pallas_call(
        functools.partial(_conv1_kernel, stride, bt, Ho, Wo, Pw, has_ds),
        grid=(n_steps,),
        in_specs=in_specs,
        out_specs=out_specs,
        out_shape=out_shape,
        compiler_params=_compiler_params(),
    )(*inputs)


def _conv2_call(y1, scale1, shift1, w2p, bt, Ho, Wo):
    m, co = y1.shape
    tile_m = bt * Ho * Wo
    n_steps = m // tile_m
    row = pl.BlockSpec((tile_m, co), lambda n: (n, 0))
    vec = pl.BlockSpec((1, co), lambda n: (0, 0))
    stat = pl.BlockSpec((1, co), lambda n: (n, 0))
    w_spec = pl.BlockSpec((9, co, co), lambda n: (0, 0, 0))
    return pl.pallas_call(
        functools.partial(_conv2_fused_kernel, bt, Ho, Wo),
        grid=(n_steps,),
        in_specs=[row, vec, vec, w_spec],
        out_specs=[row, stat, stat],
        out_shape=[jax.ShapeDtypeStruct((m, co), jnp.bfloat16),
                   jax.ShapeDtypeStruct((n_steps, co), jnp.float32),
                   jax.ShapeDtypeStruct((n_steps, co), jnp.float32)],
        scratch_shapes=[pltpu.VMEM((bt, Ho + 2, Wo + 2, co), jnp.bfloat16)],
        compiler_params=_compiler_params(),
    )(y1, scale1, shift1, w2p)


def _residual_call(y2, scale2, shift2, ident, tile_m, scaled=None, shiftd=None):
    m, co = y2.shape
    n_steps = m // tile_m
    has_ds = scaled is not None
    row = pl.BlockSpec((tile_m, co), lambda n: (n, 0))
    rowi = pl.BlockSpec((tile_m, ident.shape[-1]), lambda n: (n, 0))
    vec = pl.BlockSpec((1, co), lambda n: (0, 0))
    if has_ds:
        in_specs = [row, vec, vec, row, vec, vec]
        inputs = [y2, scale2, shift2, ident, scaled, shiftd]
    else:
        in_specs = [row, vec, vec, rowi]
        inputs = [y2, scale2, shift2, ident]
    return pl.pallas_call(
        functools.partial(_residual_kernel, has_ds),
        grid=(n_steps,),
        in_specs=in_specs,
        out_specs=row,
        out_shape=jax.ShapeDtypeStruct((m, co), jnp.float32),
        compiler_params=_compiler_params(),
    )(*inputs)


# ------------------------------ forward wrapper ----------------------------- #

def resblock_forward(x_nchw, params, stride):
    assert stride in (1, 2)
    N, Cin, H, W = x_nchw.shape
    Cout = params["w1"].shape[-1]
    has_ds = (stride != 1) or (Cin != Cout)
    ci_p = _round_up(Cin, LANE)
    co_p = _round_up(Cout, LANE)
    Ho = (H - 1) // stride + 1
    Wo = (W - 1) // stride + 1
    m = N * Ho * Wo
    bt = _pick_images_per_step(N, Ho * Wo)          # images per grid step
    tile_m = bt * Ho * Wo

    x = jnp.transpose(x_nchw, (0, 2, 3, 1)).astype(jnp.float32)    # NCHW -> NHWC
    x_cp = _pad_last(x, ci_p)

    # ---- conv1 input: space-to-depth phase planes, flattened (+ zero tail) --
    e = 2 // stride
    Ph, Pw = Ho + e, Wo + e
    ss = stride * stride
    xp = jnp.pad(x_cp, ((0, 0), (1, stride * Ph - H - 1),
                        (1, stride * Pw - W - 1), (0, 0)))
    phases = (xp.reshape(N, Ph, stride, Pw, stride, ci_p)
                .transpose(2, 4, 0, 1, 3, 5)
                .reshape(ss, N, Ph * Pw, ci_p))
    Lp = _round_up((Ph + 1) * Pw, 8)                # room for the last tap slice
    phases = jnp.pad(phases,
                     ((0, 0), (0, 0), (0, Lp - Ph * Pw), (0, 0))).astype(jnp.bfloat16)
    w1p = _pad_w(params["w1"].reshape(9, Cin, Cout), ci_p, co_p)

    if has_ds:
        xs = x_cp[:, ::stride, ::stride, :].reshape(m, ci_p).astype(jnp.bfloat16)
        wdsp = _pad_w(params["wds"], ci_p, co_p)
        y1, s1, q1, yd, sd, qd = _conv1_call(phases, w1p, bt, Ho, Wo, Pw, stride,
                                             xs=xs, wds=wdsp)
    else:
        y1, s1, q1 = _conv1_call(phases, w1p, bt, Ho, Wo, Pw, stride)
        yd = sd = qd = None

    scale1, shift1 = _affine(s1, q1, _pad_last(params["g1"], co_p),
                             _pad_last(params["b1"], co_p), m)

    # ---- conv2 with fused bn1 + ReLU + zero-pad (no extra HBM round trips) --
    w2p = _pad_w(params["w2"].reshape(9, Cout, Cout), co_p, co_p)
    y2, s2, q2 = _conv2_call(y1, scale1, shift1, w2p, bt, Ho, Wo)
    scale2, shift2 = _affine(s2, q2, _pad_last(params["g2"], co_p),
                             _pad_last(params["b2"], co_p), m)

    # ---- bn2 + residual add + ReLU ------------------------------------------
    if has_ds:
        scaled, shiftd = _affine(sd, qd, _pad_last(params["gds"], co_p),
                                 _pad_last(params["bds"], co_p), m)
        out = _residual_call(y2, scale2, shift2, yd, tile_m, scaled, shiftd)
    else:
        ident = x_cp.reshape(m, ci_p).astype(jnp.bfloat16)   # stride 1, Cin == Cout
        out = _residual_call(y2, scale2, shift2, ident, tile_m)

    out = out.reshape(N, Ho, Wo, co_p)[..., :Cout]
    return jnp.transpose(out, (0, 3, 1, 2))                   # NHWC -> NCHW


# ----------------------------- pure-JAX reference --------------------------- #

def _q(a):
    """bf16 round-trip so the reference sees the same MXU input precision."""
    return a.astype(jnp.bfloat16).astype(jnp.float32)


def _ref_bn(y, gamma, beta):
    mean = y.mean(axis=(0, 2, 3), keepdims=True)
    var = ((y - mean) ** 2).mean(axis=(0, 2, 3), keepdims=True)
    return ((y - mean) * jax.lax.rsqrt(var + EPS)
            * gamma.reshape(1, -1, 1, 1) + beta.reshape(1, -1, 1, 1))


def ref_resblock(x_nchw, params, stride):
    dn = ("NCHW", "HWIO", "NCHW")

    def conv(a, w, s, pad):
        return jax.lax.conv_general_dilated(_q(a), _q(w), window_strides=(s, s),
                                            padding=pad, dimension_numbers=dn)

    Cin = x_nchw.shape[1]
    Cout = params["w1"].shape[-1]
    out = conv(x_nchw, params["w1"], stride, ((1, 1), (1, 1)))
    out = jnp.maximum(_ref_bn(out, params["g1"], params["b1"]), 0.0)
    out = conv(out, params["w2"], 1, ((1, 1), (1, 1)))
    out = _ref_bn(out, params["g2"], params["b2"])
    if stride != 1 or Cin != Cout:
        identity = conv(x_nchw, params["wds"].reshape(1, 1, Cin, Cout),
                        stride, "VALID")
        identity = _ref_bn(identity, params["gds"], params["bds"])
    else:
        identity = x_nchw
    return jnp.maximum(out + identity, 0.0)


# ----------------------------------- main ----------------------------------- #

if __name__ == "__main__":
    def make_params(key, cin, cout, has_ds):
        ks = jax.random.split(key, 7)
        p = {
            "w1": 0.1 * jax.random.normal(ks[0], (3, 3, cin, cout), jnp.float32),
            "g1": 1.0 + 0.1 * jax.random.normal(ks[1], (cout,), jnp.float32),
            "b1": 0.1 * jax.random.normal(ks[2], (cout,), jnp.float32),
            "w2": 0.1 * jax.random.normal(ks[3], (3, 3, cout, cout), jnp.float32),
            "g2": 1.0 + 0.1 * jax.random.normal(ks[4], (cout,), jnp.float32),
            "b2": 0.1 * jax.random.normal(ks[5], (cout,), jnp.float32),
        }
        if has_ds:
            p["wds"] = 0.1 * jax.random.normal(ks[6], (cin, cout), jnp.float32)
            p["gds"] = jnp.ones((cout,), jnp.float32)
            p["bds"] = jnp.zeros((cout,), jnp.float32)
        return p

    key = jax.random.PRNGKey(0)
    k1, k2, k3, k4 = jax.random.split(key, 4)
    fwd = jax.jit(resblock_forward, static_argnums=(2,))

    # Case 1: stride-2 block with 1x1 downsample path (2, 4, 16, 16) -> (2, 8, 8, 8)
    x1 = jax.random.normal(k1, (2, 4, 16, 16), jnp.float32)
    p1 = make_params(k2, 4, 8, True)
    y1 = jax.block_until_ready(fwd(x1, p1, 2))
    r1 = ref_resblock(x1, p1, 2)
    assert y1.shape == r1.shape == (2, 8, 8, 8), (y1.shape, r1.shape)
    err1 = float(jnp.max(jnp.abs(y1 - r1)))
    assert jnp.allclose(y1, r1, atol=1e-2, rtol=1e-2), err1   # bf16 intermediates

    # Case 2: stride-1 identity block (2, 8, 8, 8) -> (2, 8, 8, 8)
    x2 = jax.random.normal(k3, (2, 8, 8, 8), jnp.float32)
    p2 = make_params(k4, 8, 8, False)
    y2 = jax.block_until_ready(fwd(x2, p2, 1))
    r2 = ref_resblock(x2, p2, 1)
    assert y2.shape == r2.shape == (2, 8, 8, 8), (y2.shape, r2.shape)
    err2 = float(jnp.max(jnp.abs(y2 - r2)))
    assert jnp.allclose(y2, r2, atol=1e-2, rtol=1e-2), err2

    print("KERNEL_OK")
</pallas_src>

<mosaic_0001>
module attributes {stable_mosaic.version = 11 : i64} {
  func.func @_conv1_kernel(%arg0: i32, %arg1: memref<4x2x96x128xbf16, #tpu.memory_space<vmem>>, %arg2: memref<9x128x128xbf16, #tpu.memory_space<vmem>>, %arg3: memref<128x128xbf16, #tpu.memory_space<vmem>>, %arg4: memref<128x128xbf16, #tpu.memory_space<vmem>>, %arg5: memref<128x128xbf16, #tpu.memory_space<vmem>>, %arg6: memref<1x128xf32, #tpu.memory_space<vmem>>, %arg7: memref<1x128xf32, #tpu.memory_space<vmem>>, %arg8: memref<128x128xbf16, #tpu.memory_space<vmem>>, %arg9: memref<1x128xf32, #tpu.memory_space<vmem>>, %arg10: memref<1x128xf32, #tpu.memory_space<vmem>>) attributes {dimension_semantics = [#tpu.dimension_semantics<parallel>], iteration_bounds = array<i64: 1>, scalar_prefetch = 0 : i64, scratch_operands = 0 : i64, tpu.core_type = #tpu.core_type<tc>, window_params = [{transform_indices = @transform_0, window_bounds = array<i64: 4, 2, 96, 128>}, {pipeline_mode = #tpu.pipeline_mode<synchronous>, transform_indices = @transform_1, window_bounds = array<i64: 9, 128, 128>}, {transform_indices = @transform_2, window_bounds = array<i64: 128, 128>}, {pipeline_mode = #tpu.pipeline_mode<synchronous>, transform_indices = @transform_3, window_bounds = array<i64: 128, 128>}, {transform_indices = @transform_4, window_bounds = array<i64: 128, 128>}, {transform_indices = @transform_5, window_bounds = array<i64: 1, 128>}, {transform_indices = @transform_6, window_bounds = array<i64: 1, 128>}, {transform_indices = @transform_7, window_bounds = array<i64: 128, 128>}, {transform_indices = @transform_8, window_bounds = array<i64: 1, 128>}, {transform_indices = @transform_9, window_bounds = array<i64: 1, 128>}]} {
    %cst = arith.constant 0.000000e+00 : f32
    %0 = vector.broadcast %cst : f32 to vector<144x128xf32>
    %c0 = arith.constant 0 : index
    %c0_0 = arith.constant 0 : index
    %c0_1 = arith.constant 0 : index
    %c0_2 = arith.constant 0 : index
    %1 = vector.load %arg1[%c0, %c0_0, %c0_1, %c0_2] : memref<4x2x96x128xbf16, #tpu.memory_space<vmem>>, vector<1x2x72x128xbf16>
    %2 = vector.shape_cast %1 : vector<1x2x72x128xbf16> to vector<2x72x128xbf16>
    %3 = vector.shape_cast %2 : vector<2x72x128xbf16> to vector<144x128xbf16>
    %c0_3 = arith.constant 0 : index
    %c0_4 = arith.constant 0 : index
    %c0_5 = arith.constant 0 : index
    %4 = vector.load %arg2[%c0_3, %c0_4, %c0_5] : memref<9x128x128xbf16, #tpu.memory_space<vmem>>, vector<1x128x128xbf16>
    %5 = vector.shape_cast %4 : vector<1x128x128xbf16> to vector<128x128xbf16>
    %cst_6 = arith.constant dense<0.000000e+00> : vector<144x128xf32>
    %6 = tpu.matmul %3, %5, %cst_6 {dimension_numbers = #tpu.dot_dimension_numbers<[1], [0], [0], [1], [0, 0, 1, 1], [], []>} : vector<144x128xbf16>, vector<128x128xbf16>, vector<144x128xf32> -> vector<144x128xf32>
    %7 = arith.addf %0, %6 : vector<144x128xf32>
    %c1 = arith.constant 1 : index
    %c0_7 = arith.constant 0 : index
    %c0_8 = arith.constant 0 : index
    %c0_9 = arith.constant 0 : index
    %8 = vector.load %arg1[%c1, %c0_7, %c0_8, %c0_9] : memref<4x2x96x128xbf16, #tpu.memory_space<vmem>>, vector<1x2x72x128xbf16>
    %9 = vector.shape_cast %8 : vector<1x2x72x128xbf16> to vector<2x72x128xbf16>
    %10 = vector.shape_cast %9 : vector<2x72x128xbf16> to vector<144x128xbf16>
    %c1_10 = arith.constant 1 : index
    %c0_11 = arith.constant 0 : index
    %c0_12 = arith.constant 0 : index
    %11 = vector.load %arg2[%c1_10, %c0_11, %c0_12] : memref<9x128x128xbf16, #tpu.memory_space<vmem>>, vector<1x128x128xbf16>
    %12 = vector.shape_cast %11 : vector<1x128x128xbf16> to vector<128x128xbf16>
    %cst_13 = arith.constant dense<0.000000e+00> : vector<144x128xf32>
    %13 = tpu.matmul %10, %12, %cst_13 {dimension_numbers = #tpu.dot_dimension_numbers<[1], [0], [0], [1], [0, 0, 1, 1], [], []>} : vector<144x128xbf16>, vector<128x128xbf16>, vector<144x128xf32> -> vector<144x128xf32>
    %14 = arith.addf %7, %13 : vector<144x128xf32>
    %c0_14 = arith.constant 0 : index
    %c0_15 = arith.constant 0 : index
    %c1_16 = arith.constant 1 : index
    %c0_17 = arith.constant 0 : index
    %15 = vector.load %arg1[%c0_14, %c0_15, %c1_16, %c0_17] : memref<4x2x96x128xbf16, #tpu.memory_space<vmem>>, vector<1x2x72x128xbf16>
    %16 = vector.shape_cast %15 : vector<1x2x72x128xbf16> to vector<2x72x128xbf16>
    %17 = vector.shape_cast %16 : vector<2x72x128xbf16> to vector<144x128xbf16>
    %c2 = arith.constant 2 : index
    %c0_18 = arith.constant 0 : index
    %c0_19 = arith.constant 0 : index
    %18 = vector.load %arg2[%c2, %c0_18, %c0_19] : memref<9x128x128xbf16, #tpu.memory_space<vmem>>, vector<1x128x128xbf16>
    %19 = vector.shape_cast %18 : vector<1x128x128xbf16> to vector<128x128xbf16>
    %cst_20 = arith.constant dense<0.000000e+00> : vector<144x128xf32>
    %20 = tpu.matmul %17, %19, %cst_20 {dimension_numbers = #tpu.dot_dimension_numbers<[1], [0], [0], [1], [0, 0, 1, 1], [], []>} : vector<144x128xbf16>, vector<128x128xbf16>, vector<144x128xf32> -> vector<144x128xf32>
    %21 = arith.addf %14, %20 : vector<144x128xf32>
    %c2_21 = arith.constant 2 : index
    %c0_22 = arith.constant 0 : index
    %c0_23 = arith.constant 0 : index
    %c0_24 = arith.constant 0 : index
    %22 = vector.load %arg1[%c2_21, %c0_22, %c0_23, %c0_24] : memref<4x2x96x128xbf16, #tpu.memory_space<vmem>>, vector<1x2x72x128xbf16>
    %23 = vector.shape_cast %22 : vector<1x2x72x128xbf16> to vector<2x72x128xbf16>
    %24 = vector.shape_cast %23 : vector<2x72x128xbf16> to vector<144x128xbf16>
    %c3 = arith.constant 3 : index
    %c0_25 = arith.constant 0 : index
    %c0_26 = arith.constant 0 : index
    %25 = vector.load %arg2[%c3, %c0_25, %c0_26] : memref<9x128x128xbf16, #tpu.memory_space<vmem>>, vector<1x128x128xbf16>
    %26 = vector.shape_cast %25 : vector<1x128x128xbf16> to vector<128x128xbf16>
    %cst_27 = arith.constant dense<0.000000e+00> : vector<144x128xf32>
    %27 = tpu.matmul %24, %26, %cst_27 {dimension_numbers = #tpu.dot_dimension_numbers<[1], [0], [0], [1], [0, 0, 1, 1], [], []>} : vector<144x128xbf16>, vector<128x128xbf16>, vector<144x128xf32> -> vector<144x128xf32>
    %28 = arith.addf %21, %27 : vector<144x128xf32>
    %c3_28 = arith.constant 3 : index
    %c0_29 = arith.constant 0 : index
    %c0_30 = arith.constant 0 : index
    %c0_31 = arith.constant 0 : index
    %29 = vector.load %arg1[%c3_28, %c0_29, %c0_30, %c0_31] : memref<4x2x96x128xbf16, #tpu.memory_space<vmem>>, vector<1x2x72x128xbf16>
    %30 = vector.shape_cast %29 : vector<1x2x72x128xbf16> to vector<2x72x128xbf16>
    %31 = vector.shape_cast %30 : vector<2x72x128xbf16> to vector<144x128xbf16>
    %c4 = arith.constant 4 : index
    %c0_32 = arith.constant 0 : index
    %c0_33 = arith.constant 0 : index
    %32 = vector.load %arg2[%c4, %c0_32, %c0_33] : memref<9x128x128xbf16, #tpu.memory_space<vmem>>, vector<1x128x128xbf16>
    %33 = vector.shape_cast %32 : vector<1x128x128xbf16> to vector<128x128xbf16>
    %cst_34 = arith.constant dense<0.000000e+00> : vector<144x128xf32>
    %34 = tpu.matmul %31, %33, %cst_34 {dimension_numbers = #tpu.dot_dimension_numbers<[1], [0], [0], [1], [0, 0, 1, 1], [], []>} : vector<144x128xbf16>, vector<128x128xbf16>, vector<144x128xf32> -> vector<144x128xf32>
    %35 = arith.addf %28, %34 : vector<144x128xf32>
    %c2_35 = arith.constant 2 : index
    %c0_36 = arith.constant 0 : index
    %c1_37 = arith.constant 1 : index
    %c0_38 = arith.constant 0 : index
    %36 = vector.load %arg1[%c2_35, %c0_36, %c1_37, %c0_38] : memref<4x2x96x128xbf16, #tpu.memory_space<vmem>>, vector<1x2x72x128xbf16>
    %37 = vector.shape_cast %36 : vector<1x2x72x128xbf16> to vector<2x72x128xbf16>
    %38 = vector.shape_cast %37 : vector<2x72x128xbf16> to vector<144x128xbf16>
    %c5 = arith.constant 5 : index
    %c0_39 = arith.constant 0 : index
    %c0_40 = arith.constant 0 : index
    %39 = vector.load %arg2[%c5, %c0_39, %c0_40] : memref<9x128x128xbf16, #tpu.memory_space<vmem>>, vector<1x128x128xbf16>
    %40 = vector.shape_cast %39 : vector<1x128x128xbf16> to vector<128x128xbf16>
    %cst_41 = arith.constant dense<0.000000e+00> : vector<144x128xf32>
    %41 = tpu.matmul %38, %40, %cst_41 {dimension_numbers = #tpu.dot_dimension_numbers<[1], [0], [0], [1], [0, 0, 1, 1], [], []>} : vector<144x128xbf16>, vector<128x128xbf16>, vector<144x128xf32> -> vector<144x128xf32>
    %42 = arith.addf %35, %41 : vector<144x128xf32>
    %c0_42 = arith.constant 0 : index
    %c0_43 = arith.constant 0 : index
    %c9 = arith.constant 9 : index
    %c0_44 = arith.constant 0 : index
    %43 = vector.load %arg1[%c0_42, %c0_43, %c9, %c0_44] : memref<4x2x96x128xbf16, #tpu.memory_space<vmem>>, vector<1x2x72x128xbf16>
    %44 = vector.shape_cast %43 : vector<1x2x72x128xbf16> to vector<2x72x128xbf16>
    %45 = vector.shape_cast %44 : vector<2x72x128xbf16> to vector<144x128xbf16>
    %c6 = arith.constant 6 : index
    %c0_45 = arith.constant 0 : index
    %c0_46 = arith.constant 0 : index
    %46 = vector.load %arg2[%c6, %c0_45, %c0_46] : memref<9x128x128xbf16, #tpu.memory_space<vmem>>, vector<1x128x128xbf16>
    %47 = vector.shape_cast %46 : vector<1x128x128xbf16> to vector<128x128xbf16>
    %cst_47 = arith.constant dense<0.000000e+00> : vector<144x128xf32>
    %48 = tpu.matmul %45, %47, %cst_47 {dimension_numbers = #tpu.dot_dimension_numbers<[1], [0], [0], [1], [0, 0, 1, 1], [], []>} : vector<144x128xbf16>, vector<128x128xbf16>, vector<144x128xf32> -> vector<144x128xf32>
    %49 = arith.addf %42, %48 : vector<144x128xf32>
    %c1_48 = arith.constant 1 : index
    %c0_49 = arith.constant 0 : index
    %c9_50 = arith.constant 9 : index
    %c0_51 = arith.constant 0 : index
    %50 = vector.load %arg1[%c1_48, %c0_49, %c9_50, %c0_51] : memref<4x2x96x128xbf16, #tpu.memory_space<vmem>>, vector<1x2x72x128xbf16>
    %51 = vector.shape_cast %50 : vector<1x2x72x128xbf16> to vector<2x72x128xbf16>
    %52 = vector.shape_cast %51 : vector<2x72x128xbf16> to vector<144x128xbf16>
    %c7 = arith.constant 7 : index
    %c0_52 = arith.constant 0 : index
    %c0_53 = arith.constant 0 : index
    %53 = vector.load %arg2[%c7, %c0_52, %c0_53] : memref<9x128x128xbf16, #tpu.memory_space<vmem>>, vector<1x128x128xbf16>
    %54 = vector.shape_cast %53 : vector<1x128x128xbf16> to vector<128x128xbf16>
    %cst_54 = arith.constant dense<0.000000e+00> : vector<144x128xf32>
    %55 = tpu.matmul %52, %54, %cst_54 {dimension_numbers = #tpu.dot_dimension_numbers<[1], [0], [0], [1], [0, 0, 1, 1], [], []>} : vector<144x128xbf16>, vector<128x128xbf16>, vector<144x128xf32> -> vector<144x128xf32>
    %56 = arith.addf %49, %55 : vector<144x128xf32>
    %c0_55 = arith.constant 0 : index
    %c0_56 = arith.constant 0 : index
    %c10 = arith.constant 10 : index
    %c0_57 = arith.constant 0 : index
    %57 = vector.load %arg1[%c0_55, %c0_56, %c10, %c0_57] : memref<4x2x96x128xbf16, #tpu.memory_space<vmem>>, vector<1x2x72x128xbf16>
    %58 = vector.shape_cast %57 : vector<1x2x72x128xbf16> to vector<2x72x128xbf16>
    %59 = vector.shape_cast %58 : vector<2x72x128xbf16> to vector<144x128xbf16>
    %c8 = arith.constant 8 : index
    %c0_58 = arith.constant 0 : index
    %c0_59 = arith.constant 0 : index
    %60 = vector.load %arg2[%c8, %c0_58, %c0_59] : memref<9x128x128xbf16, #tpu.memory_space<vmem>>, vector<1x128x128xbf16>
    %61 = vector.shape_cast %60 : vector<1x128x128xbf16> to vector<128x128xbf16>
    %cst_60 = arith.constant dense<0.000000e+00> : vector<144x128xf32>
    %62 = tpu.matmul %59, %61, %cst_60 {dimension_numbers = #tpu.dot_dimension_numbers<[1], [0], [0], [1], [0, 0, 1, 1], [], []>} : vector<144x128xbf16>, vector<128x128xbf16>, vector<144x128xf32> -> vector<144x128xf32>
    %63 = arith.addf %56, %62 : vector<144x128xf32>
    %64 = vector.shape_cast %63 : vector<144x128xf32> to vector<2x8x9x128xf32>
    %65 = vector.extract_strided_slice %64 {offsets = [0, 0, 0, 0], sizes = [2, 8, 8, 128], strides = [1, 1, 1, 1]} : vector<2x8x9x128xf32> to vector<2x8x8x128xf32>
    %66 = vector.shape_cast %65 : vector<2x8x8x128xf32> to vector<128x128xf32>
    %67 = arith.truncf %66 : vector<128x128xf32> to vector<128x128xbf16>
    %c0_61 = arith.constant 0 : index
    %c0_62 = arith.constant 0 : index
    %68 = vector.load %arg5[%c0_61, %c0_62] : memref<128x128xbf16, #tpu.memory_space<vmem>>, vector<128x128xbf16>
    tpu.vector_store %arg5[%c0_61, %c0_62], %67 {strides = array<i32>} : memref<128x128xbf16, #tpu.memory_space<vmem>>, vector<128x128xbf16>,
    %cst_63 = arith.constant dense<0.000000e+00> : vector<128xf32>
    %69 = vector.multi_reduction <add>, %66, %cst_63 [0] : vector<128x128xf32> to vector<128xf32>
    %70 = vector.shape_cast %69 : vector<128xf32> to vector<1x128xf32>
    %c0_64 = arith.constant 0 : index
    %c0_65 = arith.constant 0 : index
    %71 = vector.load %arg6[%c0_64, %c0_65] : memref<1x128xf32, #tpu.memory_space<vmem>>, vector<1x128xf32>
    tpu.vector_store %arg6[%c0_64, %c0_65], %70 {strides = array<i32>} : memref<1x128xf32, #tpu.memory_space<vmem>>, vector<1x128xf32>,
    %72 = arith.mulf %66, %66 : vector<128x128xf32>
    %cst_66 = arith.constant dense<0.000000e+00> : vector<128xf32>
    %73 = vector.multi_reduction <add>, %72, %cst_66 [0] : vector<128x128xf32> to vector<128xf32>
    %74 = vector.shape_cast %73 : vector<128xf32> to vector<1x128xf32>
    %c0_67 = arith.constant 0 : index
    %c0_68 = arith.constant 0 : index
    %75 = vector.load %arg7[%c0_67, %c0_68] : memref<1x128xf32, #tpu.memory_space<vmem>>, vector<1x128xf32>
    tpu.vector_store %arg7[%c0_67, %c0_68], %74 {strides = array<i32>} : memref<1x128xf32, #tpu.memory_space<vmem>>, vector<1x128xf32>,
    %c0_69 = arith.constant 0 : index
    %c0_70 = arith.constant 0 : index
    %76 = vector.load %arg3[%c0_69, %c0_70] : memref<128x128xbf16, #tpu.memory_space<vmem>>, vector<128x128xbf16>
    %c0_71 = arith.constant 0 : index
    %c0_72 = arith.constant 0 : index
    %77 = vector.load %arg4[%c0_71, %c0_72] : memref<128x128xbf16, #tpu.memory_space<vmem>>, vector<128x128xbf16>
    %cst_73 = arith.constant dense<0.000000e+00> : vector<128x128xf32>
    %78 = tpu.matmul %76, %77, %cst_73 {dimension_numbers = #tpu.dot_dimension_numbers<[1], [0], [0], [1], [0, 0, 1, 1], [], []>} : vector<128x128xbf16>, vector<128x128xbf16>, vector<128x128xf32> -> vector<128x128xf32>
    %79 = arith.truncf %78 : vector<128x128xf32> to vector<128x128xbf16>
    %c0_74 = arith.constant 0 : index
    %c0_75 = arith.constant 0 : index
    %80 = vector.load %arg8[%c0_74, %c0_75] : memref<128x128xbf16, #tpu.memory_space<vmem>>, vector<128x128xbf16>
    tpu.vector_store %arg8[%c0_74, %c0_75], %79 {strides = array<i32>} : memref<128x128xbf16, #tpu.memory_space<vmem>>, vector<128x128xbf16>,
    %cst_76 = arith.constant dense<0.000000e+00> : vector<128xf32>
    %81 = vector.multi_reduction <add>, %78, %cst_76 [0] : vector<128x128xf32> to vector<128xf32>
    %82 = vector.shape_cast %81 : vector<128xf32> to vector<1x128xf32>
    %c0_77 = arith.constant 0 : index
    %c0_78 = arith.constant 0 : index
    %83 = vector.load %arg9[%c0_77, %c0_78] : memref<1x128xf32, #tpu.memory_space<vmem>>, vector<1x128xf32>
    tpu.vector_store %arg9[%c0_77, %c0_78], %82 {strides = array<i32>} : memref<1x128xf32, #tpu.memory_space<vmem>>, vector<1x128xf32>,
    %84 = arith.mulf %78, %78 : vector<128x128xf32>
    %cst_79 = arith.constant dense<0.000000e+00> : vector<128xf32>
    %85 = vector.multi_reduction <add>, %84, %cst_79 [0] : vector<128x128xf32> to vector<128xf32>
    %86 = vector.shape_cast %85 : vector<128xf32> to vector<1x128xf32>
    %c0_80 = arith.constant 0 : index
    %c0_81 = arith.constant 0 : index
    %87 = vector.load %arg10[%c0_80, %c0_81] : memref<1x128xf32, #tpu.memory_space<vmem>>, vector<1x128xf32>
    tpu.vector_store %arg10[%c0_80, %c0_81], %86 {strides = array<i32>} : memref<1x128xf32, #tpu.memory_space<vmem>>, vector<1x128xf32>,
    return
  }
  func.func @transform_0(%arg0: i32) -> (i32, i32, i32, i32) {
    %c0_i32 = arith.constant 0 : i32
    %c0_i32_0 = arith.constant 0 : i32
    %c0_i32_1 = arith.constant 0 : i32
    %c0_i32_2 = arith.constant 0 : i32
    return %c0_i32, %arg0, %c0_i32_0, %c0_i32_1 : i32, i32, i32, i32
  }
  func.func @transform_1(%arg0: i32) -> (i32, i32, i32) {
    %c0_i32 = arith.constant 0 : i32
    %c0_i32_0 = arith.constant 0 : i32
    %c0_i32_1 = arith.constant 0 : i32
    %c0_i32_2 = arith.constant 0 : i32
    return %c0_i32, %c0_i32_0, %c0_i32_1 : i32, i32, i32
  }
  func.func @transform_2(%arg0: i32) -> (i32, i32) {
    %c0_i32 = arith.constant 0 : i32
    %c0_i32_0 = arith.constant 0 : i32
    return %arg0, %c0_i32 : i32, i32
  }
  func.func @transform_3(%arg0: i32) -> (i32, i32) {
    %c0_i32 = arith.constant 0 : i32
    %c0_i32_0 = arith.constant 0 : i32
    %c0_i32_1 = arith.constant 0 : i32
    return %c0_i32, %c0_i32_0 : i32, i32
  }
  func.func @transform_4(%arg0: i32) -> (i32, i32) {
    %c0_i32 = arith.constant 0 : i32
    %c0_i32_0 = arith.constant 0 : i32
    return %arg0, %c0_i32 : i32, i32
  }
  func.func @transform_5(%arg0: i32) -> (i32, i32) {
    %c0_i32 = arith.constant 0 : i32
    %c0_i32_0 = arith.constant 0 : i32
    return %arg0, %c0_i32 : i32, i32
  }
  func.func @transform_6(%arg0: i32) -> (i32, i32) {
    %c0_i32 = arith.constant 0 : i32
    %c0_i32_0 = arith.constant 0 : i32
    return %arg0, %c0_i32 : i32, i32
  }
  func.func @transform_7(%arg0: i32) -> (i32, i32) {
    %c0_i32 = arith.constant 0 : i32
    %c0_i32_0 = arith.constant 0 : i32
    return %arg0, %c0_i32 : i32, i32
  }
  func.func @transform_8(%arg0: i32) -> (i32, i32) {
    %c0_i32 = arith.constant 0 : i32
    %c0_i32_0 = arith.constant 0 : i32
    return %arg0, %c0_i32 : i32, i32
  }
  func.func @transform_9(%arg0: i32) -> (i32, i32) {
    %c0_i32 = arith.constant 0 : i32
    %c0_i32_0 = arith.constant 0 : i32
    return %arg0, %c0_i32 : i32, i32
  }
}

module attributes {stable_mosaic.version = 11 : i64} {
  func.func @_conv2_fused_kernel(%arg0: i32, %arg1: memref<128x128xbf16, #tpu.memory_space<vmem>>, %arg2: memref<1x128xf32, #tpu.memory_space<vmem>>, %arg3: memref<1x128xf32, #tpu.memory_space<vmem>>, %arg4: memref<9x128x128xbf16, #tpu.memory_space<vmem>>, %arg5: memref<128x128xbf16, #tpu.memory_space<vmem>>, %arg6: memref<1x128xf32, #tpu.memory_space<vmem>>, %arg7: memref<1x128xf32, #tpu.memory_space<vmem>>, %arg8: memref<2x10x10x128xbf16, #tpu.memory_space<vmem>>) attributes {dimension_semantics = [#tpu.dimension_semantics<parallel>], iteration_bounds = array<i64: 1>, scalar_prefetch = 0 : i64, scratch_operands = 1 : i64, tpu.core_type = #tpu.core_type<tc>, window_params = [{transform_indices = @transform_0, window_bounds = array<i64: 128, 128>}, {pipeline_mode = #tpu.pipeline_mode<synchronous>, transform_indices = @transform_1, window_bounds = array<i64: 1, 128>}, {pipeline_mode = #tpu.pipeline_mode<synchronous>, transform_indices = @transform_2, window_bounds = array<i64: 1, 128>}, {pipeline_mode = #tpu.pipeline_mode<synchronous>, transform_indices = @transform_3, window_bounds = array<i64: 9, 128, 128>}, {transform_indices = @transform_4, window_bounds = array<i64: 128, 128>}, {transform_indices = @transform_5, window_bounds = array<i64: 1, 128>}, {transform_indices = @transform_6, window_bounds = array<i64: 1, 128>}]} {
    %c0 = arith.constant 0 : index
    %c0_0 = arith.constant 0 : index
    %0 = vector.load %arg1[%c0, %c0_0] : memref<128x128xbf16, #tpu.memory_space<vmem>>, vector<128x128xbf16>
    %1 = arith.extf %0 : vector<128x128xbf16> to vector<128x128xf32>
    %c0_1 = arith.constant 0 : index
    %c0_2 = arith.constant 0 : index
    %2 = vector.load %arg2[%c0_1, %c0_2] : memref<1x128xf32, #tpu.memory_space<vmem>>, vector<1x128xf32>
    %3 = vector.broadcast %2 : vector<1x128xf32> to vector<128x128xf32>
    %4 = arith.mulf %1, %3 : vector<128x128xf32>
    %c0_3 = arith.constant 0 : index
    %c0_4 = arith.constant 0 : index
    %5 = vector.load %arg3[%c0_3, %c0_4] : memref<1x128xf32, #tpu.memory_space<vmem>>, vector<1x128xf32>
    %6 = vector.broadcast %5 : vector<1x128xf32> to vector<128x128xf32>
    %7 = arith.addf %4, %6 : vector<128x128xf32>
    %cst = arith.constant 0.000000e+00 : f32
    %8 = vector.broadcast %cst : f32 to vector<128x128xf32>
    %9 = arith.maximumf %7, %8 : vector<128x128xf32>
    %cst_5 = arith.constant 0.000000e+00 : bf16
    %10 = vector.broadcast %cst_5 : bf16 to vector<2x10x10x128xbf16>
    %c0_6 = arith.constant 0 : index
    %c0_7 = arith.constant 0 : index
    %c0_8 = arith.constant 0 : index
    %c0_9 = arith.constant 0 : index
    %11 = vector.load %arg8[%c0_6, %c0_7, %c0_8, %c0_9] : memref<2x10x10x128xbf16, #tpu.memory_space<vmem>>, vector<2x10x10x128xbf16>
    tpu.vector_store %arg8[%c0_6, %c0_7, %c0_8, %c0_9], %10 {strides = array<i32>} : memref<2x10x10x128xbf16, #tpu.memory_space<vmem>>, vector<2x10x10x128xbf16>,
    %12 = vector.shape_cast %9 : vector<128x128xf32> to vector<2x8x8x128xf32>
    %13 = arith.truncf %12 : vector<2x8x8x128xf32> to vector<2x8x8x128xbf16>
    %c0_10 = arith.constant 0 : index
    %c1 = arith.constant 1 : index
    %c1_11 = arith.constant 1 : index
    %c0_12 = arith.constant 0 : index
    %14 = vector.load %arg8[%c0_10, %c1, %c1_11, %c0_12] : memref<2x10x10x128xbf16, #tpu.memory_space<vmem>>, vector<2x8x8x128xbf16>
    tpu.vector_store %arg8[%c0_10, %c1, %c1_11, %c0_12], %13 {strides = array<i32>} : memref<2x10x10x128xbf16, #tpu.memory_space<vmem>>, vector<2x8x8x128xbf16>,
    %cst_13 = arith.constant 0.000000e+00 : f32
    %15 = vector.broadcast %cst_13 : f32 to vector<128x128xf32>
    %c0_14 = arith.constant 0 : index
    %c0_15 = arith.constant 0 : index
    %c0_16 = arith.constant 0 : index
    %c0_17 = arith.constant 0 : index
    %16 = vector.load %arg8[%c0_14, %c0_15, %c0_16, %c0_17] : memref<2x10x10x128xbf16, #tpu.memory_space<vmem>>, vector<2x8x8x128xbf16>
    %17 = vector.shape_cast %16 : vector<2x8x8x128xbf16> to vector<128x128xbf16>
    %c0_18 = arith.constant 0 : index
    %c0_19 = arith.constant 0 : index
    %c0_20 = arith.constant 0 : index
    %18 = vector.load %arg4[%c0_18, %c0_19, %c0_20] : memref<9x128x128xbf16, #tpu.memory_space<vmem>>, vector<1x128x128xbf16>
    %19 = vector.shape_cast %18 : vector<1x128x128xbf16> to vector<128x128xbf16>
    %cst_21 = arith.constant dense<0.000000e+00> : vector<128x128xf32>
    %20 = tpu.matmul %17, %19, %cst_21 {dimension_numbers = #tpu.dot_dimension_numbers<[1], [0], [0], [1], [0, 0, 1, 1], [], []>} : vector<128x128xbf16>, vector<128x128xbf16>, vector<128x128xf32> -> vector<128x128xf32>
    %21 = arith.addf %15, %20 : vector<128x128xf32>
    %c0_22 = arith.constant 0 : index
    %c0_23 = arith.constant 0 : index
    %c1_24 = arith.constant 1 : index
    %c0_25 = arith.constant 0 : index
    %22 = vector.load %arg8[%c0_22, %c0_23, %c1_24, %c0_25] : memref<2x10x10x128xbf16, #tpu.memory_space<vmem>>, vector<2x8x8x128xbf16>
    %23 = vector.shape_cast %22 : vector<2x8x8x128xbf16> to vector<128x128xbf16>
    %c1_26 = arith.constant 1 : index
    %c0_27 = arith.constant 0 : index
    %c0_28 = arith.constant 0 : index
    %24 = vector.load %arg4[%c1_26, %c0_27, %c0_28] : memref<9x128x128xbf16, #tpu.memory_space<vmem>>, vector<1x128x128xbf16>
    %25 = vector.shape_cast %24 : vector<1x128x128xbf16> to vector<128x128xbf16>
    %cst_29 = arith.constant dense<0.000000e+00> : vector<128x128xf32>
    %26 = tpu.matmul %23, %25, %cst_29 {dimension_numbers = #tpu.dot_dimension_numbers<[1], [0], [0], [1], [0, 0, 1, 1], [], []>} : vector<128x128xbf16>, vector<128x128xbf16>, vector<128x128xf32> -> vector<128x128xf32>
    %27 = arith.addf %21, %26 : vector<128x128xf32>
    %c0_30 = arith.constant 0 : index
    %c0_31 = arith.constant 0 : index
    %c2 = arith.constant 2 : index
    %c0_32 = arith.constant 0 : index
    %28 = vector.load %arg8[%c0_30, %c0_31, %c2, %c0_32] : memref<2x10x10x128xbf16, #tpu.memory_space<vmem>>, vector<2x8x8x128xbf16>
    %29 = vector.shape_cast %28 : vector<2x8x8x128xbf16> to vector<128x128xbf16>
    %c2_33 = arith.constant 2 : index
    %c0_34 = arith.constant 0 : index
    %c0_35 = arith.constant 0 : index
    %30 = vector.load %arg4[%c2_33, %c0_34, %c0_35] : memref<9x128x128xbf16, #tpu.memory_space<vmem>>, vector<1x128x128xbf16>
    %31 = vector.shape_cast %30 : vector<1x128x128xbf16> to vector<128x128xbf16>
    %cst_36 = arith.constant dense<0.000000e+00> : vector<128x128xf32>
    %32 = tpu.matmul %29, %31, %cst_36 {dimension_numbers = #tpu.dot_dimension_numbers<[1], [0], [0], [1], [0, 0, 1, 1], [], []>} : vector<128x128xbf16>, vector<128x128xbf16>, vector<128x128xf32> -> vector<128x128xf32>
    %33 = arith.addf %27, %32 : vector<128x128xf32>
    %c0_37 = arith.constant 0 : index
    %c1_38 = arith.constant 1 : index
    %c0_39 = arith.constant 0 : index
    %c0_40 = arith.constant 0 : index
    %34 = vector.load %arg8[%c0_37, %c1_38, %c0_39, %c0_40] : memref<2x10x10x128xbf16, #tpu.memory_space<vmem>>, vector<2x8x8x128xbf16>
    %35 = vector.shape_cast %34 : vector<2x8x8x128xbf16> to vector<128x128xbf16>
    %c3 = arith.constant 3 : index
    %c0_41 = arith.constant 0 : index
    %c0_42 = arith.constant 0 : index
    %36 = vector.load %arg4[%c3, %c0_41, %c0_42] : memref<9x128x128xbf16, #tpu.memory_space<vmem>>, vector<1x128x128xbf16>
    %37 = vector.shape_cast %36 : vector<1x128x128xbf16> to vector<128x128xbf16>
    %cst_43 = arith.constant dense<0.000000e+00> : vector<128x128xf32>
    %38 = tpu.matmul %35, %37, %cst_43 {dimension_numbers = #tpu.dot_dimension_numbers<[1], [0], [0], [1], [0, 0, 1, 1], [], []>} : vector<128x128xbf16>, vector<128x128xbf16>, vector<128x128xf32> -> vector<128x128xf32>
    %39 = arith.addf %33, %38 : vector<128x128xf32>
    %c0_44 = arith.constant 0 : index
    %c1_45 = arith.constant 1 : index
    %c1_46 = arith.constant 1 : index
    %c0_47 = arith.constant 0 : index
    %40 = vector.load %arg8[%c0_44, %c1_45, %c1_46, %c0_47] : memref<2x10x10x128xbf16, #tpu.memory_space<vmem>>, vector<2x8x8x128xbf16>
    %41 = vector.shape_cast %40 : vector<2x8x8x128xbf16> to vector<128x128xbf16>
    %c4 = arith.constant 4 : index
    %c0_48 = arith.constant 0 : index
    %c0_49 = arith.constant 0 : index
    %42 = vector.load %arg4[%c4, %c0_48, %c0_49] : memref<9x128x128xbf16, #tpu.memory_space<vmem>>, vector<1x128x128xbf16>
    %43 = vector.shape_cast %42 : vector<1x128x128xbf16> to vector<128x128xbf16>
    %cst_50 = arith.constant dense<0.000000e+00> : vector<128x128xf32>
    %44 = tpu.matmul %41, %43, %cst_50 {dimension_numbers = #tpu.dot_dimension_numbers<[1], [0], [0], [1], [0, 0, 1, 1], [], []>} : vector<128x128xbf16>, vector<128x128xbf16>, vector<128x128xf32> -> vector<128x128xf32>
    %45 = arith.addf %39, %44 : vector<128x128xf32>
    %c0_51 = arith.constant 0 : index
    %c1_52 = arith.constant 1 : index
    %c2_53 = arith.constant 2 : index
    %c0_54 = arith.constant 0 : index
    %46 = vector.load %arg8[%c0_51, %c1_52, %c2_53, %c0_54] : memref<2x10x10x128xbf16, #tpu.memory_space<vmem>>, vector<2x8x8x128xbf16>
    %47 = vector.shape_cast %46 : vector<2x8x8x128xbf16> to vector<128x128xbf16>
    %c5 = arith.constant 5 : index
    %c0_55 = arith.constant 0 : index
    %c0_56 = arith.constant 0 : index
    %48 = vector.load %arg4[%c5, %c0_55, %c0_56] : memref<9x128x128xbf16, #tpu.memory_space<vmem>>, vector<1x128x128xbf16>
    %49 = vector.shape_cast %48 : vector<1x128x128xbf16> to vector<128x128xbf16>
    %cst_57 = arith.constant dense<0.000000e+00> : vector<128x128xf32>
    %50 = tpu.matmul %47, %49, %cst_57 {dimension_numbers = #tpu.dot_dimension_numbers<[1], [0], [0], [1], [0, 0, 1, 1], [], []>} : vector<128x128xbf16>, vector<128x128xbf16>, vector<128x128xf32> -> vector<128x128xf32>
    %51 = arith.addf %45, %50 : vector<128x128xf32>
    %c0_58 = arith.constant 0 : index
    %c2_59 = arith.constant 2 : index
    %c0_60 = arith.constant 0 : index
    %c0_61 = arith.constant 0 : index
    %52 = vector.load %arg8[%c0_58, %c2_59, %c0_60, %c0_61] : memref<2x10x10x128xbf16, #tpu.memory_space<vmem>>, vector<2x8x8x128xbf16>
    %53 = vector.shape_cast %52 : vector<2x8x8x128xbf16> to vector<128x128xbf16>
    %c6 = arith.constant 6 : index
    %c0_62 = arith.constant 0 : index
    %c0_63 = arith.constant 0 : index
    %54 = vector.load %arg4[%c6, %c0_62, %c0_63] : memref<9x128x128xbf16, #tpu.memory_space<vmem>>, vector<1x128x128xbf16>
    %55 = vector.shape_cast %54 : vector<1x128x128xbf16> to vector<128x128xbf16>
    %cst_64 = arith.constant dense<0.000000e+00> : vector<128x128xf32>
    %56 = tpu.matmul %53, %55, %cst_64 {dimension_numbers = #tpu.dot_dimension_numbers<[1], [0], [0], [1], [0, 0, 1, 1], [], []>} : vector<128x128xbf16>, vector<128x128xbf16>, vector<128x128xf32> -> vector<128x128xf32>
    %57 = arith.addf %51, %56 : vector<128x128xf32>
    %c0_65 = arith.constant 0 : index
    %c2_66 = arith.constant 2 : index
    %c1_67 = arith.constant 1 : index
    %c0_68 = arith.constant 0 : index
    %58 = vector.load %arg8[%c0_65, %c2_66, %c1_67, %c0_68] : memref<2x10x10x128xbf16, #tpu.memory_space<vmem>>, vector<2x8x8x128xbf16>
    %59 = vector.shape_cast %58 : vector<2x8x8x128xbf16> to vector<128x128xbf16>
    %c7 = arith.constant 7 : index
    %c0_69 = arith.constant 0 : index
    %c0_70 = arith.constant 0 : index
    %60 = vector.load %arg4[%c7, %c0_69, %c0_70] : memref<9x128x128xbf16, #tpu.memory_space<vmem>>, vector<1x128x128xbf16>
    %61 = vector.shape_cast %60 : vector<1x128x128xbf16> to vector<128x128xbf16>
    %cst_71 = arith.constant dense<0.000000e+00> : vector<128x128xf32>
    %62 = tpu.matmul %59, %61, %cst_71 {dimension_numbers = #tpu.dot_dimension_numbers<[1], [0], [0], [1], [0, 0, 1, 1], [], []>} : vector<128x128xbf16>, vector<128x128xbf16>, vector<128x128xf32> -> vector<128x128xf32>
    %63 = arith.addf %57, %62 : vector<128x128xf32>
    %c0_72 = arith.constant 0 : index
    %c2_73 = arith.constant 2 : index
    %c2_74 = arith.constant 2 : index
    %c0_75 = arith.constant 0 : index
    %64 = vector.load %arg8[%c0_72, %c2_73, %c2_74, %c0_75] : memref<2x10x10x128xbf16, #tpu.memory_space<vmem>>, vector<2x8x8x128xbf16>
    %65 = vector.shape_cast %64 : vector<2x8x8x128xbf16> to vector<128x128xbf16>
    %c8 = arith.constant 8 : index
    %c0_76 = arith.constant 0 : index
    %c0_77 = arith.constant 0 : index
    %66 = vector.load %arg4[%c8, %c0_76, %c0_77] : memref<9x128x128xbf16, #tpu.memory_space<vmem>>, vector<1x128x128xbf16>
    %67 = vector.shape_cast %66 : vector<1x128x128xbf16> to vector<128x128xbf16>
    %cst_78 = arith.constant dense<0.000000e+00> : vector<128x128xf32>
    %68 = tpu.matmul %65, %67, %cst_78 {dimension_numbers = #tpu.dot_dimension_numbers<[1], [0], [0], [1], [0, 0, 1, 1], [], []>} : vector<128x128xbf16>, vector<128x128xbf16>, vector<128x128xf32> -> vector<128x128xf32>
    %69 = arith.addf %63, %68 : vector<128x128xf32>
    %70 = arith.truncf %69 : vector<128x128xf32> to vector<128x128xbf16>
    %c0_79 = arith.constant 0 : index
    %c0_80 = arith.constant 0 : index
    %71 = vector.load %arg5[%c0_79, %c0_80] : memref<128x128xbf16, #tpu.memory_space<vmem>>, vector<128x128xbf16>
    tpu.vector_store %arg5[%c0_79, %c0_80], %70 {strides = array<i32>} : memref<128x128xbf16, #tpu.memory_space<vmem>>, vector<128x128xbf16>,
    %cst_81 = arith.constant dense<0.000000e+00> : vector<128xf32>
    %72 = vector.multi_reduction <add>, %69, %cst_81 [0] : vector<128x128xf32> to vector<128xf32>
    %73 = vector.shape_cast %72 : vector<128xf32> to vector<1x128xf32>
    %c0_82 = arith.constant 0 : index
    %c0_83 = arith.constant 0 : index
    %74 = vector.load %arg6[%c0_82, %c0_83] : memref<1x128xf32, #tpu.memory_space<vmem>>, vector<1x128xf32>
    tpu.vector_store %arg6[%c0_82, %c0_83], %73 {strides = array<i32>} : memref<1x128xf32, #tpu.memory_space<vmem>>, vector<1x128xf32>,
    %75 = arith.mulf %69, %69 : vector<128x128xf32>
    %cst_84 = arith.constant dense<0.000000e+00> : vector<128xf32>
    %76 = vector.multi_reduction <add>, %75, %cst_84 [0] : vector<128x128xf32> to vector<128xf32>
    %77 = vector.shape_cast %76 : vector<128xf32> to vector<1x128xf32>
    %c0_85 = arith.constant 0 : index
    %c0_86 = arith.constant 0 : index
    %78 = vector.load %arg7[%c0_85, %c0_86] : memref<1x128xf32, #tpu.memory_space<vmem>>, vector<1x128xf32>
    tpu.vector_store %arg7[%c0_85, %c0_86], %77 {strides = array<i32>} : memref<1x128xf32, #tpu.memory_space<vmem>>, vector<1x128xf32>,
    return
  }
  func.func @transform_0(%arg0: i32) -> (i32, i32) {
    %c0_i32 = arith.constant 0 : i32
    %c0_i32_0 = arith.constant 0 : i32
    return %arg0, %c0_i32 : i32, i32
  }
  func.func @transform_1(%arg0: i32) -> (i32, i32) {
    %c0_i32 = arith.constant 0 : i32
    %c0_i32_0 = arith.constant 0 : i32
    %c0_i32_1 = arith.constant 0 : i32
    return %c0_i32, %c0_i32_0 : i32, i32
  }
  func.func @transform_2(%arg0: i32) -> (i32, i32) {
    %c0_i32 = arith.constant 0 : i32
    %c0_i32_0 = arith.constant 0 : i32
    %c0_i32_1 = arith.constant 0 : i32
    return %c0_i32, %c0_i32_0 : i32, i32
  }
  func.func @transform_3(%arg0: i32) -> (i32, i32, i32) {
    %c0_i32 = arith.constant 0 : i32
    %c0_i32_0 = arith.constant 0 : i32
    %c0_i32_1 = arith.constant 0 : i32
    %c0_i32_2 = arith.constant 0 : i32
    return %c0_i32, %c0_i32_0, %c0_i32_1 : i32, i32, i32
  }
  func.func @transform_4(%arg0: i32) -> (i32, i32) {
    %c0_i32 = arith.constant 0 : i32
    %c0_i32_0 = arith.constant 0 : i32
    return %arg0, %c0_i32 : i32, i32
  }
  func.func @transform_5(%arg0: i32) -> (i32, i32) {
    %c0_i32 = arith.constant 0 : i32
    %c0_i32_0 = arith.constant 0 : i32
    return %arg0, %c0_i32 : i32, i32
  }
  func.func @transform_6(%arg0: i32) -> (i32, i32) {
    %c0_i32 = arith.constant 0 : i32
    %c0_i32_0 = arith.constant 0 : i32
    return %arg0, %c0_i32 : i32, i32
  }
}

module attributes {stable_mosaic.version = 11 : i64} {
  func.func @_residual_kernel(%arg0: i32, %arg1: memref<128x128xbf16, #tpu.memory_space<vmem>>, %arg2: memref<1x128xf32, #tpu.memory_space<vmem>>, %arg3: memref<1x128xf32, #tpu.memory_space<vmem>>, %arg4: memref<128x128xbf16, #tpu.memory_space<vmem>>, %arg5: memref<1x128xf32, #tpu.memory_space<vmem>>, %arg6: memref<1x128xf32, #tpu.memory_space<vmem>>, %arg7: memref<128x128xf32, #tpu.memory_space<vmem>>) attributes {dimension_semantics = [#tpu.dimension_semantics<parallel>], iteration_bounds = array<i64: 1>, scalar_prefetch = 0 : i64, scratch_operands = 0 : i64, tpu.core_type = #tpu.core_type<tc>, window_params = [{transform_indices = @transform_0, window_bounds = array<i64: 128, 128>}, {pipeline_mode = #tpu.pipeline_mode<synchronous>, transform_indices = @transform_1, window_bounds = array<i64: 1, 128>}, {pipeline_mode = #tpu.pipeline_mode<synchronous>, transform_indices = @transform_2, window_bounds = array<i64: 1, 128>}, {transform_indices = @transform_3, window_bounds = array<i64: 128, 128>}, {pipeline_mode = #tpu.pipeline_mode<synchronous>, transform_indices = @transform_4, window_bounds = array<i64: 1, 128>}, {pipeline_mode = #tpu.pipeline_mode<synchronous>, transform_indices = @transform_5, window_bounds = array<i64: 1, 128>}, {transform_indices = @transform_6, window_bounds = array<i64: 128, 128>}]} {
    %c0 = arith.constant 0 : index
    %c0_0 = arith.constant 0 : index
    %0 = vector.load %arg4[%c0, %c0_0] : memref<128x128xbf16, #tpu.memory_space<vmem>>, vector<128x128xbf16>
    %1 = arith.extf %0 : vector<128x128xbf16> to vector<128x128xf32>
    %c0_1 = arith.constant 0 : index
    %c0_2 = arith.constant 0 : index
    %2 = vector.load %arg5[%c0_1, %c0_2] : memref<1x128xf32, #tpu.memory_space<vmem>>, vector<1x128xf32>
    %3 = vector.broadcast %2 : vector<1x128xf32> to vector<128x128xf32>
    %4 = arith.mulf %1, %3 : vector<128x128xf32>
    %c0_3 = arith.constant 0 : index
    %c0_4 = arith.constant 0 : index
    %5 = vector.load %arg6[%c0_3, %c0_4] : memref<1x128xf32, #tpu.memory_space<vmem>>, vector<1x128xf32>
    %6 = vector.broadcast %5 : vector<1x128xf32> to vector<128x128xf32>
    %7 = arith.addf %4, %6 : vector<128x128xf32>
    %c0_5 = arith.constant 0 : index
    %c0_6 = arith.constant 0 : index
    %8 = vector.load %arg1[%c0_5, %c0_6] : memref<128x128xbf16, #tpu.memory_space<vmem>>, vector<128x128xbf16>
    %9 = arith.extf %8 : vector<128x128xbf16> to vector<128x128xf32>
    %c0_7 = arith.constant 0 : index
    %c0_8 = arith.constant 0 : index
    %10 = vector.load %arg2[%c0_7, %c0_8] : memref<1x128xf32, #tpu.memory_space<vmem>>, vector<1x128xf32>
    %11 = vector.broadcast %10 : vector<1x128xf32> to vector<128x128xf32>
    %12 = arith.mulf %9, %11 : vector<128x128xf32>
    %c0_9 = arith.constant 0 : index
    %c0_10 = arith.constant 0 : index
    %13 = vector.load %arg3[%c0_9, %c0_10] : memref<1x128xf32, #tpu.memory_space<vmem>>, vector<1x128xf32>
    %14 = vector.broadcast %13 : vector<1x128xf32> to vector<128x128xf32>
    %15 = arith.addf %12, %14 : vector<128x128xf32>
    %16 = arith.addf %15, %7 : vector<128x128xf32>
    %cst = arith.constant 0.000000e+00 : f32
    %17 = vector.broadcast %cst : f32 to vector<128x128xf32>
    %18 = arith.maximumf %16, %17 : vector<128x128xf32>
    %c0_11 = arith.constant 0 : index
    %c0_12 = arith.constant 0 : index
    %19 = vector.load %arg7[%c0_11, %c0_12] : memref<128x128xf32, #tpu.memory_space<vmem>>, vector<128x128xf32>
    tpu.vector_store %arg7[%c0_11, %c0_12], %18 {strides = array<i32>} : memref<128x128xf32, #tpu.memory_space<vmem>>, vector<128x128xf32>,
    return
  }
  func.func @transform_0(%arg0: i32) -> (i32, i32) {
    %c0_i32 = arith.constant 0 : i32
    %c0_i32_0 = arith.constant 0 : i32
    return %arg0, %c0_i32 : i32, i32
  }
  func.func @transform_1(%arg0: i32) -> (i32, i32) {
    %c0_i32 = arith.constant 0 : i32
    %c0_i32_0 = arith.constant 0 : i32
    %c0_i32_1 = arith.constant 0 : i32
    return %c0_i32, %c0_i32_0 : i32, i32
  }
  func.func @transform_2(%arg0: i32) -> (i32, i32) {
    %c0_i32 = arith.constant 0 : i32
    %c0_i32_0 = arith.constant 0 : i32
    %c0_i32_1 = arith.constant 0 : i32
    return %c0_i32, %c0_i32_0 : i32, i32
  }
  func.func @transform_3(%arg0: i32) -> (i32, i32) {
    %c0_i32 = arith.constant 0 : i32
    %c0_i32_0 = arith.constant 0 : i32
    return %arg0, %c0_i32 : i32, i32
  }
  func.func @transform_4(%arg0: i32) -> (i32, i32) {
    %c0_i32 = arith.constant 0 : i32
    %c0_i32_0 = arith.constant 0 : i32
    %c0_i32_1 = arith.constant 0 : i32
    return %c0_i32, %c0_i32_0 : i32, i32
  }
  func.func @transform_5(%arg0: i32) -> (i32, i32) {
    %c0_i32 = arith.constant 0 : i32
    %c0_i32_0 = arith.constant 0 : i32
    %c0_i32_1 = arith.constant 0 : i32
    return %c0_i32, %c0_i32_0 : i32, i32
  }
  func.func @transform_6(%arg0: i32) -> (i32, i32) {
    %c0_i32 = arith.constant 0 : i32
    %c0_i32_0 = arith.constant 0 : i32
    return %arg0, %c0_i32 : i32, i32
  }
}

</mosaic_0001>

<bundles_post_ra>
// kernel: resblock_forward.5
= control target key start
LH: loop header
LB: loop body
LE: loop exit
PB: predicated region body
PF: predicated region fallthrough
CT: control target
= control target key end

     0   :  { %s528_s0 = inlined_call_operand.vmem [shape: bf16[128,128], index: 0, kind: input, shape index: {}]   ;;  %s529_s1 = inlined_call_operand.vmem [shape: f32[1,128], index: 1, kind: input, shape index: {}]   ;;  %s530_s3 = inlined_call_operand.vmem [shape: bf16[128,128], index: 3, kind: input, shape index: {}]   ;;  %s531_s4 = inlined_call_operand.vmem [shape: f32[1,128], index: 4, kind: input, shape index: {}]   ;;  %s532_s5 = inlined_call_operand.vmem [shape: f32[1,128], index: 5, kind: input, shape index: {}]   ;;  %s533_s2 = inlined_call_operand.vmem [shape: f32[1,128], index: 2, kind: input, shape index: {}]   ;;  %s534_s6 = inlined_call_operand.vmem [shape: f32[128,128], index: 6, kind: output, shape index: {}]  }
   0x1   :  { %v236_v0 = vld [vmem:[%s530_s3] sm:$0xff]   ;;  %v299_v9 = vld [vmem:[%s530_s3 + $0x8] sm:$0xff]   ;;  %v300_v20 = vld [vmem:[%s530_s3 + $0x10] sm:$0xff]  }
   0x2   :  { %v354_v1 = vld [vmem:[%s531_s4] ss:$0 sm:$0xff]  ;;  %v237_v2 = vunpack.c.l.bf16 %v236_v0  ;;  %v238_v5 = vunpack.c.h.bf16 %v236_v0  ;;  %v306_v10 = vld [vmem:[%s528_s0 + $0x8] sm:$0xff]   ;;  %v241_v14 = vunpack.c.l.bf16 %v299_v9  ;;  %v242_v18 = vunpack.c.h.bf16 %v299_v9  ;;  %v307_v21 = vld [vmem:[%s528_s0 + $0x10] sm:$0xff]  }
   0x3   :  { %v268_v3 = vld [vmem:[%s528_s0] sm:$0xff]   ;;  %v273_v15 = vunpack.c.l.bf16 %v306_v10  ;;  %v274_v19 = vunpack.c.h.bf16 %v306_v10  ;;  %v245_v32 = vunpack.c.l.bf16 %v300_v20  ;;  %v277_v33 = vunpack.c.l.bf16 %v307_v21  ;;  %v301_v42 = vld [vmem:[%s530_s3 + $0x18] sm:$0xff]  }
   0x4   :  { %v362_v4 = vld [vmem:[%s529_s1] ss:$0 sm:$0xff]  ;;  %v269_v7 = vunpack.c.l.bf16 %v268_v3  ;;  %v270_v8 = vunpack.c.h.bf16 %v268_v3  ;;  %v62_v11 = vmul.f32 %v237_v2, %v354_v1  ;;  %v63_v13 = vmul.f32 %v238_v5, %v354_v1  ;;  %v308_v43 = vld [vmem:[%s528_s0 + $0x18] sm:$0xff]  }
   0x5   :  { %v367_v6 = vld [vmem:[%s532_s5] ss:$0 sm:$0xff]  ;;  %v64_v24 = vmul.f32 %v241_v14, %v354_v1  ;;  %v142_v25 = vmul.f32 %v273_v15, %v362_v4  ;;  %v65_v28 = vmul.f32 %v242_v18, %v354_v1  ;;  %v143_v29 = vmul.f32 %v274_v19, %v362_v4  ;;  %v303_v14 = vld [vmem:[%s530_s3 + $0x28] sm:$0xff]  }
   0x6   :  { %v379_v12 = vld [vmem:[%s533_s2] ss:$0 sm:$0xff]  ;;  %v140_v16 = vmul.f32 %v269_v7, %v362_v4  ;;  %v141_v17 = vmul.f32 %v270_v8, %v362_v4  ;;  %v85_v22 = vadd.f32 %v367_v6, %v62_v11  ;;  %v86_v23 = vadd.f32 %v367_v6, %v63_v13  ;;  %v310_v19 = vld [vmem:[%s528_s0 + $0x28] sm:$0xff]  }
   0x7   :  { %v87_v30 = vadd.f32 %v367_v6, %v64_v24  ;;  %v165_v31 = vadd.f32 %v379_v12, %v142_v25  ;;  %v88_v36 = vadd.f32 %v367_v6, %v65_v28  ;;  %v166_v37 = vadd.f32 %v379_v12, %v143_v29  ;;  %v302_v52 = vld [vmem:[%s530_s3 + $0x20] sm:$0xff]  }
   0x8   :  { %v163_v26 = vadd.f32 %v379_v12, %v140_v16  ;;  %v164_v27 = vadd.f32 %v379_v12, %v141_v17  ;;  %v66_v39 = vmul.f32 %v245_v32, %v354_v1  ;;  %v144_v40 = vmul.f32 %v277_v33, %v362_v4  ;;  %v309_v57 = vld [vmem:[%s528_s0 + $0x20] sm:$0xff]   ;;  %v304_v32 = vld [vmem:[%s530_s3 + $0x30] sm:$0xff]  }
   0x9   :  { %v181_v38 = vadd.f32 %v165_v31, %v87_v30  ;;  %v246_v41 = vunpack.c.h.bf16 %v300_v20  ;;  %v182_v46 = vadd.f32 %v166_v37, %v88_v36  ;;  %v278_v47 = vunpack.c.h.bf16 %v307_v21  ;;  %v311_v33 = vld [vmem:[%s528_s0 + $0x30] sm:$0xff]  }
   0xa   :  { %v179_v34 = vadd.f32 %v163_v26, %v85_v22  ;;  %v180_v35 = vadd.f32 %v164_v27, %v86_v23  ;;  %v89_v49 = vadd.f32 %v367_v6, %v66_v39  ;;  %v167_v50 = vadd.f32 %v379_v12, %v144_v40 }
   0xb   :  { %v197_v48 = vmax.f32 %v181_v38, 0.0  ;;  %v67_v51 = vmul.f32 %v246_v41, %v354_v1  ;;  %v198_v53 = vmax.f32 %v182_v46, 0.0  ;;  %v145_v54 = vmul.f32 %v278_v47, %v362_v4  ;;  %v305_v46 = vld [vmem:[%s530_s3 + $0x38] sm:$0xff]  }
   0xc   :  { %v195_v44 = vmax.f32 %v179_v34, 0.0  ;;  %v196_v45 = vmax.f32 %v180_v35, 0.0  ;;  %v249_v55 = vunpack.c.l.bf16 %v301_v42  ;;  %v281_v56 = vunpack.c.l.bf16 %v308_v43 }
   0xd   :  { %213 = vst [vmem:[%s534_s6 + $0x10] sm:$0xff] %v197_v48  ;;  %v183_v58 = vadd.f32 %v167_v50, %v89_v49  ;;  %v90_v59 = vadd.f32 %v367_v6, %v67_v51  ;;  %v250_v60 = vunpack.c.h.bf16 %v301_v42  ;;  %v282_v61 = vunpack.c.h.bf16 %v308_v43  ;;  %214 = vst [vmem:[%s534_s6 + $0x18] sm:$0xff] %v198_v53 }
   0xe   :  { %211 = vst [vmem:[%s534_s6] sm:$0xff] %v195_v44  ;;  %212 = vst [vmem:[%s534_s6 + $0x8] sm:$0xff] %v196_v45  ;;  %v168_v62 = vadd.f32 %v379_v12, %v145_v54  ;;  %v68_v63 = vmul.f32 %v249_v55, %v354_v1  ;;  %v146_v0 = vmul.f32 %v281_v56, %v362_v4  ;;  %v253_v2 = vunpack.c.l.bf16 %v302_v52  ;;  %v312_v55 = vld [vmem:[%s528_s0 + $0x38] sm:$0xff]  }
   0xf   :  { %v199_v3 = vmax.f32 %v183_v58, 0.0  ;;  %v69_v5 = vmul.f32 %v250_v60, %v354_v1  ;;  %v147_v7 = vmul.f32 %v282_v61, %v362_v4  ;;  %v285_v8 = vunpack.c.l.bf16 %v309_v57 }
  0x10   :  { %v184_v9 = vadd.f32 %v168_v62, %v90_v59  ;;  %v91_v10 = vadd.f32 %v367_v6, %v68_v63  ;;  %v169_v11 = vadd.f32 %v379_v12, %v146_v0  ;;  %v70_v13 = vmul.f32 %v253_v2, %v354_v1 }
  0x11   :  { %215 = vst [vmem:[%s534_s6 + $0x20] sm:$0xff] %v199_v3  ;;  %v92_v15 = vadd.f32 %v367_v6, %v69_v5  ;;  %v170_v16 = vadd.f32 %v379_v12, %v147_v7  ;;  %v148_v17 = vmul.f32 %v285_v8, %v362_v4  ;;  %v254_v18 = vunpack.c.h.bf16 %v302_v52 }
  0x12   :  { %v200_v20 = vmax.f32 %v184_v9, 0.0  ;;  %v185_v21 = vadd.f32 %v169_v11, %v91_v10  ;;  %v93_v22 = vadd.f32 %v367_v6, %v70_v13  ;;  %v286_v23 = vunpack.c.h.bf16 %v309_v57 }
  0x13   :  { %v186_v24 = vadd.f32 %v170_v16, %v92_v15  ;;  %v171_v25 = vadd.f32 %v379_v12, %v148_v17  ;;  %v71_v26 = vmul.f32 %v254_v18, %v354_v1  ;;  %v257_v27 = vunpack.c.l.bf16 %v303_v14 }
  0x14   :  { %216 = vst [vmem:[%s534_s6 + $0x28] sm:$0xff] %v200_v20  ;;  %v201_v28 = vmax.f32 %v185_v21, 0.0  ;;  %v149_v29 = vmul.f32 %v286_v23, %v362_v4  ;;  %v289_v30 = vunpack.c.l.bf16 %v310_v19  ;;  %v258_v31 = vunpack.c.h.bf16 %v303_v14 }
  0x15   :  { %v202_v34 = vmax.f32 %v186_v24, 0.0  ;;  %v187_v35 = vadd.f32 %v171_v25, %v93_v22  ;;  %v94_v36 = vadd.f32 %v367_v6, %v71_v26  ;;  %v72_v37 = vmul.f32 %v257_v27, %v354_v1 }
  0x16   :  { %217 = vst [vmem:[%s534_s6 + $0x30] sm:$0xff] %v201_v28  ;;  %v172_v38 = vadd.f32 %v379_v12, %v149_v29  ;;  %v150_v39 = vmul.f32 %v289_v30, %v362_v4  ;;  %v73_v40 = vmul.f32 %v258_v31, %v354_v1  ;;  %v290_v41 = vunpack.c.h.bf16 %v310_v19 }
  0x17   :  { %218 = vst [vmem:[%s534_s6 + $0x38] sm:$0xff] %v202_v34  ;;  %v203_v42 = vmax.f32 %v187_v35, 0.0  ;;  %v95_v43 = vadd.f32 %v367_v6, %v72_v37  ;;  %v261_v44 = vunpack.c.l.bf16 %v304_v32  ;;  %v293_v45 = vunpack.c.l.bf16 %v311_v33 }
  0x18   :  { %v188_v47 = vadd.f32 %v172_v38, %v94_v36  ;;  %v173_v48 = vadd.f32 %v379_v12, %v150_v39  ;;  %v96_v49 = vadd.f32 %v367_v6, %v73_v40  ;;  %v151_v50 = vmul.f32 %v290_v41, %v362_v4 }
  0x19   :  { %219 = vst [vmem:[%s534_s6 + $0x40] sm:$0xff] %v203_v42  ;;  %v74_v51 = vmul.f32 %v261_v44, %v354_v1  ;;  %v152_v52 = vmul.f32 %v293_v45, %v362_v4  ;;  %v262_v53 = vunpack.c.h.bf16 %v304_v32  ;;  %v294_v54 = vunpack.c.h.bf16 %v311_v33 }
  0x1a   :  { %v204_v56 = vmax.f32 %v188_v47, 0.0  ;;  %v189_v57 = vadd.f32 %v173_v48, %v95_v43  ;;  %v174_v58 = vadd.f32 %v379_v12, %v151_v50  ;;  %v265_v59 = vunpack.c.l.bf16 %v305_v46 }
  0x1b   :  { %v97_v60 = vadd.f32 %v367_v6, %v74_v51  ;;  %v175_v61 = vadd.f32 %v379_v12, %v152_v52  ;;  %v75_v62 = vmul.f32 %v262_v53, %v354_v1  ;;  %v153_v63 = vmul.f32 %v294_v54, %v362_v4 }
  0x1c   :  { %220 = vst [vmem:[%s534_s6 + $0x48] sm:$0xff] %v204_v56  ;;  %v205_v0 = vmax.f32 %v189_v57, 0.0  ;;  %v190_v2 = vadd.f32 %v174_v58, %v96_v49  ;;  %v76_v3 = vmul.f32 %v265_v59, %v354_v1  ;;  %v297_v5 = vunpack.c.l.bf16 %v312_v55 }
  0x1d   :  { %v191_v7 = vadd.f32 %v175_v61, %v97_v60  ;;  %v98_v8 = vadd.f32 %v367_v6, %v75_v62  ;;  %v176_v9 = vadd.f32 %v379_v12, %v153_v63  ;;  %v266_v10 = vunpack.c.h.bf16 %v305_v46 }
  0x1e   :  { %221 = vst [vmem:[%s534_s6 + $0x50] sm:$0xff] %v205_v0  ;;  %v206_v11 = vmax.f32 %v190_v2, 0.0  ;;  %v99_v13 = vadd.f32 %v367_v6, %v76_v3  ;;  %v154_v14 = vmul.f32 %v297_v5, %v362_v4  ;;  %v298_v15 = vunpack.c.h.bf16 %v312_v55 }
  0x1f   :  { %v207_v16 = vmax.f32 %v191_v7, 0.0  ;;  %v192_v17 = vadd.f32 %v176_v9, %v98_v8  ;;  %v77_v18 = vmul.f32 %v266_v10, %v354_v1 }
  0x20   :  { %222 = vst [vmem:[%s534_s6 + $0x58] sm:$0xff] %v206_v11  ;;  %v177_v19 = vadd.f32 %v379_v12, %v154_v14  ;;  %v155_v20 = vmul.f32 %v298_v15, %v362_v4 }
  0x21   :  { %223 = vst [vmem:[%s534_s6 + $0x60] sm:$0xff] %v207_v16  ;;  %v208_v21 = vmax.f32 %v192_v17, 0.0  ;;  %v100_v22 = vadd.f32 %v367_v6, %v77_v18 }
  0x22   :  { %v193_v23 = vadd.f32 %v177_v19, %v99_v13  ;;  %v178_v24 = vadd.f32 %v379_v12, %v155_v20 }
  0x23   :  { %224 = vst [vmem:[%s534_s6 + $0x68] sm:$0xff] %v208_v21 }
  0x24   :  { %v209_v1 = vmax.f32 %v193_v23, 0.0  ;;  %v194_v25 = vadd.f32 %v178_v24, %v100_v22 }
  0x26   :  { %225 = vst [vmem:[%s534_s6 + $0x70] sm:$0xff] %v209_v1  ;;  %v210_v4 = vmax.f32 %v194_v25, 0.0 }
  0x28   :  { %226 = vst [vmem:[%s534_s6 + $0x78] sm:$0xff] %v210_v4 }

// kernel: resblock_forward.4
= control target key start
LH: loop header
LB: loop body
LE: loop exit
PB: predicated region body
PF: predicated region fallthrough
CT: control target
= control target key end

     0   :  { %v4701_v1 = vmov 0   ;;  %vm380_vm0 = vcmask 1043456   ;;  %vm381_vm1 = vsmask.f32 7938  ;;  %vm387_vm2 = vsmask.f32 256  ;;  %s6055_s3 = inlined_call_operand.vmem [shape: bf16[9,128,128], index: 3, kind: input, shape index: {}]   ;;  %s6056_s0 = inlined_call_operand.vmem [shape: bf16[128,128], index: 0, kind: input, shape index: {}]   ;;  %s6057_s1 = inlined_call_operand.vmem [shape: f32[1,128], index: 1, kind: input, shape index: {}]   ;;  %s6058_s2 = inlined_call_operand.vmem [shape: f32[1,128], index: 2, kind: input, shape index: {}]   ;;  %s6059_s4 = inlined_call_operand.vmem [shape: bf16[128,128], index: 4, kind: output, shape index: {0}]   ;;  %s6060_s5 = inlined_call_operand.vmem [shape: f32[1,128], index: 5, kind: output, shape index: {1}]   ;;  %s6061_s6 = inlined_call_operand.vmem [shape: f32[1,128], index: 6, kind: output, shape index: {2}]  }
   0x1   :  { %v4603_v0 = vld [vmem:[%s6055_s3 + $0x38] sm:$0xff]   ;;  %115 = vst [vmem:[#allocation2] sm:$0xf] %v4701_v1  ;;  %117 = vst [vmem:[#allocation2 + $0x8] sm:$0xf] %v4701_v1  ;;  %v4605_v3 = vld [vmem:[%s6055_s3 + $0x30] sm:$0xff]  }
   0x2   :  { %116 = vst [vmem:[#allocation2 + $0x4] sm:$0x1] %v4701_v1  ;;  %118 = vst [vmem:[#allocation2 + $0xc] sm:$0x1] %v4701_v1  ;;  %v4604_v2 = vld [vmem:[%s6055_s3 + $0x78] sm:$0xff]   ;;  %4330 = vmatprep.subr.bf16.mxu1 %v4603_v0  ;;  %v4606_v4 = vld [vmem:[%s6055_s3 + $0x70] sm:$0xff]  }
   0x3   :  { %119 = vst [vmem:[#allocation2 + $0x10] sm:$0xf] %v4701_v1  ;;  %120 = vst [vmem:[#allocation2 + $0x14] sm:$0x1] %v4701_v1  ;;  %4331 = vmatpush3.bf16.msra.mxu1 %v4603_v0  ;;  %4298 = vmatprep.subr.bf16.mxu0 %v4604_v2  ;;  %v4607_v5 = vld [vmem:[%s6055_s3 + $0x28] sm:$0xff]   ;;  %v4609_v7 = vld [vmem:[%s6055_s3 + $0x20] sm:$0xff]  }
   0x4   :  { %121 = vst [vmem:[#allocation2 + $0x18] sm:$0xf] %v4701_v1  ;;  %122 = vst [vmem:[#allocation2 + $0x1c] sm:$0x1] %v4701_v1  ;;  %4299 = vmatpush3.bf16.msra.mxu0 %v4604_v2  ;;  %4332 = vmatprep.subr.bf16.mxu1 %v4605_v3  ;;  %v4608_v6 = vld [vmem:[%s6055_s3 + $0x68] sm:$0xff]   ;;  %v4610_v8 = vld [vmem:[%s6055_s3 + $0x60] sm:$0xff]  }
   0x5   :  { %123 = vst [vmem:[#allocation2 + $0x20] sm:$0xf] %v4701_v1  ;;  %124 = vst [vmem:[#allocation2 + $0x24] sm:$0x1] %v4701_v1  ;;  %4300 = vmatprep.subr.bf16.mxu0 %v4606_v4  ;;  %v4611_v9 = vld [vmem:[%s6055_s3 + $0x18] sm:$0xff]   ;;  %v4613_v11 = vld [vmem:[%s6055_s3 + $0x10] sm:$0xff]  }
   0x6   :  { %125 = vst [vmem:[#allocation2 + $0x28] sm:$0xf] %v4701_v1  ;;  %126 = vst [vmem:[#allocation2 + $0x2c] sm:$0x1] %v4701_v1  ;;  %v4612_v10 = vld [vmem:[%s6055_s3 + $0x58] sm:$0xff]   ;;  %v4069_v12 = vld [vmem:[%s6056_s0] sm:$0xff]  }
   0x7   :  { %127 = vst [vmem:[#allocation2 + $0x30] sm:$0xf] %v4701_v1  ;;  %128 = vst [vmem:[#allocation2 + $0x34] sm:$0x1] %v4701_v1  ;;  %4333 = vmatpush3.bf16.msra.mxu1 %v4605_v3  ;;  %v4776_v13 = vld [vmem:[%s6057_s1] ss:$0 sm:$0xff]  ;;  %v4070_v15 = vunpack.c.l.bf16 %v4069_v12  ;;  %v4071_v16 = vunpack.c.h.bf16 %v4069_v12 }
   0x8   :  { %129 = vst [vmem:[#allocation2 + $0x38] sm:$0xf] %v4701_v1  ;;  %130 = vst [vmem:[#allocation2 + $0x3c] sm:$0x1] %v4701_v1  ;;  %4301 = vmatpush3.bf16.msra.mxu0 %v4606_v4  ;;  %4334 = vmatprep.subr.bf16.mxu1 %v4607_v5  ;;  %v4614_v14 = vld [vmem:[%s6055_s3 + $0x50] sm:$0xff]   ;;  %v4140_v21 = vld [vmem:[%s6056_s0 + $0x8] sm:$0xff]  }
   0x9   :  { %131 = vst [vmem:[#allocation2 + $0x40] sm:$0xf] %v4701_v1  ;;  %132 = vst [vmem:[#allocation2 + $0x44] sm:$0x1] %v4701_v1  ;;  %4302 = vmatprep.subr.bf16.mxu0 %v4608_v6  ;;  %v4781_v17 = vld [vmem:[#allocation2] sm:$0xf]  ;;  %v60_v22 = vmul.f32 %v4070_v15, %v4776_v13  ;;  %v4074_v23 = vunpack.c.l.bf16 %v4140_v21  ;;  %v61_v24 = vmul.f32 %v4071_v16, %v4776_v13  ;;  %v4075_v25 = vunpack.c.h.bf16 %v4140_v21 }
   0xa   :  { %133 = vst [vmem:[#allocation2 + $0x48] sm:$0xf] %v4701_v1  ;;  %134 = vst [vmem:[#allocation2 + $0x4c] sm:$0x1] %v4701_v1  ;;  %v4786_v18 = vld [vmem:[%s6058_s2] ss:$0 sm:$0xff] }
   0xb   :  { %135 = vst [vmem:[#allocation2 + $0x50] sm:$0xf] %v4701_v1  ;;  %136 = vst [vmem:[#allocation2 + $0x54] sm:$0x1] %v4701_v1  ;;  %4335 = vmatpush3.bf16.msra.mxu1 %v4607_v5  ;;  %v534_v19 = vshrl.u32 %v4781_v17, 16  ;;  %v537_v20 = vshll.u32 %v4781_v17, 16  ;;  %v83_v31 = vadd.f32 %v4786_v18, %v60_v22  ;;  %v62_v32 = vmul.f32 %v4074_v23, %v4776_v13 }
   0xc   :  { %137 = vst [vmem:[#allocation2 + $0x58] sm:$0xf] %v4701_v1  ;;  %138 = vst [vmem:[#allocation2 + $0x5c] sm:$0x1] %v4701_v1  ;;  %4303 = vmatpush3.bf16.msra.mxu0 %v4608_v6  ;;  %4336 = vmatprep.subr.bf16.mxu1 %v4609_v7  ;;  %v4615_v26 = vld [vmem:[%s6055_s3 + $0x8] sm:$0xff]   ;;  %v84_v33 = vadd.f32 %v4786_v18, %v61_v24  ;;  %v4617_v36 = vld [vmem:[%s6055_s3] sm:$0xff]   ;;  %v63_v40 = vmul.f32 %v4075_v25, %v4776_v13 }
   0xd   :  { %139 = vst [vmem:[#allocation2 + $0x60] sm:$0xf] %v4701_v1  ;;  %140 = vst [vmem:[#allocation2 + $0x64] sm:$0x1] %v4701_v1  ;;  %4304 = vmatprep.subr.bf16.mxu0 %v4610_v8  ;;  %v536_v27 = vrot.slane %v534_v19, 4  ;;  %v539_v28 = vrot.slane %v537_v20, 5  ;;  %v85_v38 = vadd.f32 %v4786_v18, %v62_v32 }
   0xe   :  { %141 = vst [vmem:[#allocation2 + $0x68] sm:$0xf] %v4701_v1  ;;  %142 = vst [vmem:[#allocation2 + $0x6c] sm:$0x1] %v4701_v1  ;;  %v4798_v29 = vld [vmem:[#allocation2 + $0x4] sm:$0x1]  ;;  %v86_v45 = vadd.f32 %v4786_v18, %v63_v40 }
   0xf   :  { %143 = vst [vmem:[#allocation2 + $0x70] sm:$0xf] %v4701_v1  ;;  %144 = vst [vmem:[#allocation2 + $0x74] sm:$0x1] %v4701_v1  ;;  %4337 = vmatpush3.bf16.msra.mxu1 %v4609_v7  ;;  %v4616_v30 = vld [vmem:[%s6055_s3 + $0x48] sm:$0xff]   ;;  %v540_v34 = vor.u32 %v539_v28, %v536_v27  ;;  %v543_v35 = vshll.u32 %v4798_v29, 16 }
  0x10   :  { %145 = vst [vmem:[#allocation2 + $0x78] sm:$0xf] %v4701_v1  ;;  %146 = vst [vmem:[#allocation2 + $0x7c] sm:$0x1] %v4701_v1  ;;  %4305 = vmatpush3.bf16.msra.mxu0 %v4610_v8  ;;  %4338 = vmatprep.subr.bf16.mxu1 %v4611_v9  ;;  %v99_v37 = vmax.f32 %v83_v31, 0.0  ;;  %v100_v39 = vmax.f32 %v84_v33, 0.0 }
  0x11   :  { %147 = vst [vmem:[#allocation2 + $0x80] sm:$0xf] %v4701_v1  ;;  %148 = vst [vmem:[#allocation2 + $0x84] sm:$0x1] %v4701_v1  ;;  %4306 = vmatprep.subr.bf16.mxu0 %v4612_v10  ;;  %vm530_vm3 = vsmask.f32 3328 }
  0x12   :  { %149 = vst [vmem:[#allocation2 + $0x88] sm:$0xf] %v4701_v1  ;;  %150 = vst [vmem:[#allocation2 + $0x8c] sm:$0x1] %v4701_v1  ;;  %v4618_v41 = vld [vmem:[%s6055_s3 + $0x40] sm:$0xff]   ;;  %v4036_v42 = vpack.c.bf16 %v99_v37, %v99_v37  ;;  %v101_v43 = vmax.f32 %v85_v38, 0.0  ;;  %v4037_v44 = vpack.c.bf16 %v100_v39, %v100_v39 }
  0x13   :  { %151 = vst [vmem:[#allocation2 + $0x90] sm:$0xf] %v4701_v1  ;;  %152 = vst [vmem:[#allocation2 + $0x94] sm:$0x1] %v4701_v1  ;;  %4339 = vmatpush3.bf16.msra.mxu1 %v4611_v9  ;;  %vm386_vm4 = vcmask 1040384   ;;  %v4816_v46 = vrot.slane %v540_v34, 4 }
  0x14   :  { %153 = vst [vmem:[#allocation2 + $0x98] sm:$0xf] %v4701_v1  ;;  %154 = vst [vmem:[#allocation2 + $0x9c] sm:$0x1] %v4701_v1  ;;  %4307 = vmatpush3.bf16.msra.mxu0 %v4612_v10  ;;  %4340 = vmatprep.subr.bf16.mxu1 %v4613_v11  ;;  %vm531_vm5 = vsmask.f32 7440  ;;  %v4038_v51 = vpack.c.bf16 %v101_v43, %v101_v43 }
  0x15   :  { %4308 = vmatprep.subr.bf16.mxu0 %v4614_v14  ;;  %v4818_v47 = vrot.slane %v543_v35, 5  ;;  %v4141_v48 = vld [vmem:[%s6056_s0 + $0x10] sm:$0xff]   ;;  %v220_v49 = vshrl.u32 %v4036_v42, 16  ;;  %v223_v50 = vshll.u32 %v4036_v42, 16  ;;  %v228_v52 = vshrl.u32 %v4037_v44, 16  ;;  %v4826_v53 = vld [vmem:[%s6056_s0 + $0x18] sm:$0xff]   ;;  %vm4840_vm6 = vmand %vm380_vm0, %vm381_vm1 }
  0x16   :  { %v383_v54 = vld [vmem:[#allocation2 + $0x8] sm:$0xf]  ;;  %v231_v55 = vshll.u32 %v4037_v44, 16  ;;  %v392_v56 = vld [vmem:[#allocation2 + $0x10] sm:$0xf]  ;;  %v4831_v57 = vld [vmem:[%s6055_s3 + $0xf8] sm:$0xff]   ;;  %v4078_v59 = vunpack.c.l.bf16 %v4141_v48  ;;  %v4079_v61 = vunpack.c.h.bf16 %v4141_v48  ;;  %v4082_v8 = vunpack.c.l.bf16 %v4826_v53 }
  0x17   :  { %4341 = vmatpush3.bf16.msra.mxu1 %v4613_v11  ;;  %v4836_v58 = vld [vmem:[%s6055_s3 + $0xb8] sm:$0xff]   ;;  %v102_v60 = vmax.f32 %v86_v45, 0.0  ;;  %v222_v62 = vrot.slane %v220_v49, 7  ;;  %v230_v0 = vrot.slane %v228_v52, 7  ;;  %v236_v1 = vshrl.u32 %v4038_v51, 16  ;;  %vm4846_vm7 = vmand %vm386_vm4, %vm387_vm2  ;;  %v4880_v38 = vld [vmem:[%s6056_s0 + $0x20] sm:$0xff]  }
  0x18   :  { %4309 = vmatpush3.bf16.msra.mxu0 %v4614_v14  ;;  %4342 = vmatprep.subr.bf16.mxu1 %v4615_v26  ;;  %v239_v2 = vshll.u32 %v4038_v51, 16  ;;  %v389_v4 = vld [vmem:[#allocation2 + $0xc] sm:$0x1]  ;;  %v395_v5 = vld [vmem:[#allocation2 + $0x14] sm:$0x1]  ;;  %v64_v6 = vmul.f32 %v4078_v59, %v4776_v13  ;;  %v65_v9 = vmul.f32 %v4079_v61, %v4776_v13  ;;  %vm4856_vm8 = vmor %vm530_vm3, %vm531_vm5  ;;  %v1197_v34 = vrot.slane %v4798_v29, 5 }
  0x19   :  { %4310 = vmatprep.subr.bf16.mxu0 %v4616_v30  ;;  %v4039_v7 = vpack.c.bf16 %v102_v60, %v102_v60  ;;  %v225_v10 = vor.u32 %v223_v50, %v222_v62  ;;  %v226_v11 = vrot.slane %v222_v62, 4  ;;  %v233_v12 = vor.u32 %v231_v55, %v230_v0  ;;  %v398_v16 = vld [vmem:[#allocation2 + $0x18] sm:$0xf]  ;;  %v401_v27 = vld [vmem:[#allocation2 + $0x1c] sm:$0x1]  ;;  %v4899_v55 = vld [vmem:[%s6056_s0 + $0x28] sm:$0xff]  }
  0x1a   :  { %v234_v14 = vrot.slane %v230_v0, 4  ;;  %v238_v15 = vrot.slane %v236_v1, 7  ;;  %v87_v20 = vadd.f32 %v4786_v18, %v64_v6  ;;  %v546_v33 = vsel %vm4856_vm8, %v4816_v46, %v4818_v47  ;;  %v404_v35 = vld [vmem:[#allocation2 + $0x20] sm:$0xf]  ;;  %v407_v43 = vld [vmem:[#allocation2 + $0x24] sm:$0x1] }
  0x1b   :  { %4343 = vmatpush3.bf16.msra.mxu1 %v4615_v26  ;;  %v244_v21 = vshrl.u32 %v4039_v7, 16  ;;  %v247_v22 = vshll.u32 %v4039_v7, 16  ;;  %v384_v23 = vsel %vm4840_vm6, %v225_v10, %v383_v54  ;;  %v393_v24 = vsel %vm4840_vm6, %v233_v12, %v392_v56  ;;  %v4888_v44 = vld [vmem:[#allocation2 + $0x50] sm:$0xf]  ;;  %v5139_v29 = vld [vmem:[%s6055_s3 + $0x138] sm:$0xff]  }
  0x1c   :  { %4311 = vmatpush3.bf16.msra.mxu0 %v4616_v30  ;;  %4344 = vmatprep.subr.bf16.mxu1 %v4617_v36  ;;  %v390_v25 = vsel %vm4846_vm7, %v226_v11, %v389_v4  ;;  %v396_v26 = vsel %vm4846_vm7, %v234_v14, %v395_v5  ;;  %385 = vst [vmem:[#allocation2 + $0x8] sm:$0xf] %v384_v23  ;;  %v242_v30 = vrot.slane %v238_v15, 4  ;;  %394 = vst [vmem:[#allocation2 + $0x10] sm:$0xf] %v393_v24  ;;  %v4624_v46 = vld [vmem:[%s6055_s3 + $0xb0] sm:$0xff]  }
  0x1d   :  { %4312 = vmatprep.subr.bf16.mxu0 %v4618_v41  ;;  %v241_v28 = vor.u32 %v239_v2, %v238_v15  ;;  %391 = vst [vmem:[#allocation2 + $0xc] sm:$0x1] %v390_v25  ;;  %397 = vst [vmem:[#allocation2 + $0x14] sm:$0x1] %v396_v26  ;;  %v103_v31 = vmax.f32 %v87_v20, 0.0  ;;  %v246_v32 = vrot.slane %v244_v21, 7  ;;  %v88_v37 = vadd.f32 %v4786_v18, %v65_v9 }
  0x1e   :  { %v402_v40 = vsel %vm4846_vm7, %v242_v30, %v401_v27  ;;  %v4086_v50 = vunpack.c.l.bf16 %v4880_v38  ;;  %v646_v54 = vshrl.u32 %v4888_v44, 16  ;;  %v4083_v56 = vunpack.c.h.bf16 %v4826_v53  ;;  %v4657_v63 = vld [vmem:[%s6055_s3 + $0x158] sm:$0xff]  }
  0x1f   :  { %4345 = vmatpush3.bf16.msra.mxu1 %v4617_v36  ;;  %v66_v36 = vmul.f32 %v4082_v8, %v4776_v13  ;;  %v399_v39 = vsel %vm4840_vm6, %v241_v28, %v398_v16  ;;  %v249_v42 = vor.u32 %v247_v22, %v246_v32  ;;  %403 = vst [vmem:[#allocation2 + $0x1c] sm:$0x1] %v402_v40  ;;  %v250_v45 = vrot.slane %v246_v32, 4 }
  0x20   :  { %4313 = vmatpush3.bf16.msra.mxu0 %v4618_v41  ;;  %4394 = vmatprep.subr.bf16.mxu1 %v4831_v57  ;;  %v4886_v41 = vpack.c.bf16 %v103_v31, %v103_v31  ;;  %400 = vst [vmem:[#allocation2 + $0x18] sm:$0xf] %v399_v39  ;;  %v104_v49 = vmax.f32 %v88_v37, 0.0  ;;  %v68_v62 = vmul.f32 %v4086_v50, %v4776_v13  ;;  %v4910_v2 = vrot.slane %v646_v54, 4  ;;  %v4623_v37 = vld [vmem:[%s6055_s3 + $0xf0] sm:$0xff]  }
  0x21   :  { %4362 = vmatprep.subr.bf16.mxu0 %v4836_v58  ;;  %v89_v48 = vadd.f32 %v4786_v18, %v66_v36  ;;  %v405_v52 = vsel %vm4840_vm6, %v249_v42, %v404_v35  ;;  %v408_v61 = vsel %vm4846_vm7, %v250_v45, %v407_v43  ;;  %v649_v4 = vshll.u32 %v4888_v44, 16 }
  0x22   :  { %v252_v51 = vshrl.u32 %v4886_v41, 16  ;;  %v255_v59 = vshll.u32 %v4886_v41, 16  ;;  %406 = vst [vmem:[#allocation2 + $0x20] sm:$0xf] %v405_v52  ;;  %v4908_v1 = vpack.c.bf16 %v104_v49, %v104_v49  ;;  %409 = vst [vmem:[#allocation2 + $0x24] sm:$0x1] %v408_v61  ;;  %v4918_v9 = vadd.f32 %v4786_v18, %v68_v62 }
  0x23   :  { %v105_v60 = vmax.f32 %v89_v48, 0.0  ;;  %v483_v5 = vld [vmem:[#allocation2 + $0x8] sm:$0xf]  ;;  %v484_v6 = vld [vmem:[#allocation2 + $0x10] sm:$0xf]  ;;  %v4087_v10 = vunpack.c.h.bf16 %v4880_v38  ;;  %v4090_v11 = vunpack.c.l.bf16 %v4899_v55  ;;  %v4091_v24 = vunpack.c.h.bf16 %v4899_v55  ;;  %v4634_v55 = vld [vmem:[%s6055_s3 + $0x98] sm:$0xff]  }
  0x24   :  { %v4906_v0 = vrot.slane %v252_v51, 7  ;;  %v4913_v7 = vld [vmem:[#allocation2 + $0xc] sm:$0x1]  ;;  %v548_v12 = vshrl.u32 %v483_v5, 16  ;;  %v551_v14 = vshll.u32 %v483_v5, 16  ;;  %v3732_v15 = vcombine.low %v4781_v17, %v483_v5  ;;  %v5008_v38 = vld [vmem:[%s6056_s0 + $0x30] sm:$0xff]  }
  0x25   :  { %v4915_v8 = vpack.c.bf16 %v105_v60, %v105_v60  ;;  %v562_v16 = vshrl.u32 %v484_v6, 16  ;;  %v4923_v20 = vld [vmem:[#allocation2 + $0x14] sm:$0x1]  ;;  %v565_v21 = vshll.u32 %v484_v6, 16  ;;  %v557_v22 = vshll.u32 %v4913_v7, 16 }
  0x26   :  { %v571_v23 = vshll.u32 %v4923_v20, 16  ;;  %v550_v25 = vrot.slane %v548_v12, 4  ;;  %v553_v26 = vrot.slane %v551_v14, 5  ;;  %4346 = vmatprep.mubr.bf16.mxu1 %v3732_v15  ;;  %v1201_v30 = vrot.slane %v4913_v7, 5  ;;  %v4929_v36 = vld [vmem:[#allocation2 + $0x1c] sm:$0x1] }
  0x27   :  { %v485_v27 = vld [vmem:[#allocation2 + $0x18] sm:$0xf]  ;;  %v564_v28 = vrot.slane %v562_v16, 4  ;;  %v567_v31 = vrot.slane %v565_v21, 5  ;;  %v559_v40 = vrot.slane %v557_v22, 5  ;;  %v585_v41 = vshll.u32 %v4929_v36, 16 }
  0x28   :  { %v576_v32 = vshrl.u32 %v485_v27, 16  ;;  %v579_v17 = vshll.u32 %v485_v27, 16  ;;  %v3733_v35 = vcombine.low %v484_v6, %v485_v27  ;;  %v554_v39 = vor.u32 %v553_v26, %v550_v25  ;;  %v410_v51 = vld [vmem:[#allocation2 + $0x28] sm:$0xf]  ;;  %v413_v15 = vld [vmem:[#allocation2 + $0x2c] sm:$0x1] }
  0x29   :  { %v1205_v42 = vrot.slane %v4923_v20, 5  ;;  %v4936_v43 = vld [vmem:[#allocation2 + $0x20] sm:$0xf]  ;;  %v568_v49 = vor.u32 %v567_v31, %v564_v28  ;;  %v573_v50 = vrot.slane %v571_v23, 5  ;;  %v587_v54 = vrot.slane %v585_v41, 5  ;;  %v4627_v14 = vld [vmem:[%s6055_s3 + $0xe8] sm:$0xff]  }
  0x2a   :  { %v578_v45 = vrot.slane %v576_v32, 4  ;;  %v581_v48 = vrot.slane %v579_v17, 5  ;;  %4347 = vmatmul.mubr.bf16.vlgmr.msra.gmra.mxu1 %v3733_v35  ;;  %v555_v52 = vrot.slane %v554_v39, 4  ;;  %v257_v60 = vor.u32 %v255_v59, %v4906_v0  ;;  %v4952_v21 = vld [vmem:[#allocation2 + $0x24] sm:$0x1] }
  0x2b   :  { %4395 = vmatpush3.bf16.msra.mxu1 %v4831_v57  ;;  %v258_v61 = vrot.slane %v4906_v0, 4  ;;  %v569_v62 = vrot.slane %v568_v49, 4  ;;  %v590_v6 = vshrl.u32 %v4936_v43, 16  ;;  %v593_v12 = vshll.u32 %v4936_v43, 16  ;;  %v416_v27 = vld [vmem:[#allocation2 + $0x30] sm:$0xf] }
  0x2c   :  { %v582_v5 = vor.u32 %v581_v48, %v578_v45  ;;  %4396 = vmatprep.subr.bf16.mxu1 %v4623_v37  ;;  %v560_v57 = vsel %vm4856_vm8, %v555_v52, %v559_v40  ;;  %v411_v59 = vsel %vm4840_vm6, %v257_v60, %v410_v51  ;;  %v260_v0 = vshrl.u32 %v4908_v1, 16  ;;  %v419_v35 = vld [vmem:[#allocation2 + $0x34] sm:$0x1]  ;;  %v422_v48 = vld [vmem:[#allocation2 + $0x38] sm:$0xf] }
  0x2d   :  { %v263_v16 = vshll.u32 %v4908_v1, 16  ;;  %v3716_v22 = vcombine.low %v546_v33, %v560_v57  ;;  %v574_v23 = vsel %vm4856_vm8, %v569_v62, %v573_v50  ;;  %412 = vst [vmem:[#allocation2 + $0x28] sm:$0xf] %v411_v59  ;;  %v592_v26 = vrot.slane %v590_v6, 4  ;;  %v425_v49 = vld [vmem:[#allocation2 + $0x3c] sm:$0x1] }
  0x2e   :  { %v583_v25 = vrot.slane %v582_v5, 4  ;;  %v595_v28 = vrot.slane %v593_v12, 5  ;;  %v262_v31 = vrot.slane %v260_v0, 7  ;;  %v268_v1 = vshrl.u32 %v4915_v8, 16  ;;  %v4628_v62 = vld [vmem:[%s6055_s3 + $0xa8] sm:$0xff]   ;;  %v4633_v57 = vld [vmem:[%s6055_s3 + $0xd8] sm:$0xff]  }
  0x2f   :  { %4397 = vmatpush3.bf16.msra.mxu1 %v4623_v37  ;;  %v271_v32 = vshll.u32 %v4915_v8, 16  ;;  %4314 = vmatprep.mubr.bf16.mxu0 %v3716_v22  ;;  %v414_v47 = vsel %vm4846_vm7, %v258_v61, %v413_v15  ;;  %v599_v33 = vshll.u32 %v4952_v21, 16  ;;  %v4629_v37 = vld [vmem:[%s6055_s3 + $0xe0] sm:$0xff]   ;;  %v107_v8 = vmax.f32 %v4918_v9, 0.0  ;;  %v4986_v6 = vld [vmem:[#allocation2 + $0x54] sm:$0x1] }
  0x30   :  { %v588_v17 = vsel %vm4856_vm8, %v583_v25, %v587_v54  ;;  %4398 = vmatprep.subr.bf16.mxu1 %v4627_v14  ;;  %v265_v40 = vor.u32 %v263_v16, %v262_v31  ;;  %v266_v41 = vrot.slane %v262_v31, 4  ;;  %v270_v45 = vrot.slane %v268_v1, 7  ;;  %415 = vst [vmem:[#allocation2 + $0x2c] sm:$0x1] %v414_v47 }
  0x31   :  { %v3717_v39 = vcombine.low %v574_v23, %v588_v17  ;;  %v596_v50 = vor.u32 %v595_v28, %v592_v26  ;;  %v4975_v51 = vrot.slane %v599_v33, 5  ;;  %v4044_v52 = vpack.c.bf16 %v107_v8, %v107_v8  ;;  %v4635_v33 = vld [vmem:[%s6055_s3 + $0xd0] sm:$0xff]   ;;  %v4630_v8 = vld [vmem:[%s6055_s3 + $0xa0] sm:$0xff]  }
  0x32   :  { %v651_v54 = vrot.slane %v649_v4, 5  ;;  %v273_v60 = vor.u32 %v271_v32, %v270_v45  ;;  %v274_v61 = vrot.slane %v270_v45, 4  ;;  %v417_v9 = vsel %vm4840_vm6, %v265_v40, %v416_v27  ;;  %v434_v27 = vld [vmem:[#allocation2 + $0x58] sm:$0xf] }
  0x33   :  { %4315 = vmatmul.mubr.bf16.vlgmr.msra.gmra.mxu0 %v3717_v39  ;;  %4399 = vmatpush3.bf16.msra.mxu1 %v4627_v14  ;;  %v420_v5 = vsel %vm4846_vm7, %v266_v41, %v419_v35  ;;  %418 = vst [vmem:[#allocation2 + $0x30] sm:$0xf] %v417_v9  ;;  %v4989_v4 = vrot.slane %v596_v50, 4  ;;  %v284_v12 = vshrl.u32 %v4044_v52, 16  ;;  %v287_v15 = vshll.u32 %v4044_v52, 16 }
  0x34   :  { %4363 = vmatpush3.bf16.msra.mxu0 %v4836_v58  ;;  %421 = vst [vmem:[#allocation2 + $0x34] sm:$0x1] %v420_v5  ;;  %4400 = vmatprep.subr.bf16.mxu1 %v4629_v37  ;;  %v69_v14 = vmul.f32 %v4087_v10, %v4776_v13  ;;  %v487_v59 = vld [vmem:[#allocation2 + $0x28] sm:$0xf]  ;;  %v423_v58 = vsel %vm4840_vm6, %v273_v60, %v422_v48  ;;  %v655_v47 = vshll.u32 %v4986_v6, 16  ;;  %v4094_v35 = vunpack.c.l.bf16 %v5008_v38 }
  0x35   :  { %4364 = vmatprep.subr.bf16.mxu0 %v4624_v46  ;;  %v426_v0 = vsel %vm4846_vm7, %v274_v61, %v425_v49  ;;  %v70_v16 = vmul.f32 %v4090_v11, %v4776_v13  ;;  %v652_v22 = vor.u32 %v651_v54, %v4910_v2  ;;  %v604_v10 = vshrl.u32 %v487_v59, 16  ;;  %424 = vst [vmem:[#allocation2 + $0x38] sm:$0xf] %v423_v58  ;;  %v437_v11 = vld [vmem:[#allocation2 + $0x5c] sm:$0x1] }
  0x36   :  { %v607_v23 = vshll.u32 %v487_v59, 16  ;;  %v3734_v25 = vcombine.low %v4936_v43, %v487_v59  ;;  %v602_v26 = vsel %vm4856_vm8, %v4989_v4, %v4975_v51  ;;  %427 = vst [vmem:[#allocation2 + $0x3c] sm:$0x1] %v426_v0  ;;  %v286_v2 = vrot.slane %v284_v12, 7  ;;  %v443_v51 = vld [vmem:[#allocation2 + $0x64] sm:$0x1] }
  0x37   :  { %4401 = vmatpush3.bf16.msra.mxu1 %v4629_v37  ;;  %v92_v28 = vadd.f32 %v4786_v18, %v69_v14  ;;  %v93_v31 = vadd.f32 %v4786_v18, %v70_v16  ;;  %v5017_v1 = vrot.slane %v652_v22, 4  ;;  %v606_v32 = vrot.slane %v604_v10, 4  ;;  %v5019_v43 = vld [vmem:[#allocation2 + $0x2c] sm:$0x1] }
  0x38   :  { %v609_v17 = vrot.slane %v607_v23, 5  ;;  %4350 = vmatprep.mubr.bf16.mxu1 %v3734_v25  ;;  %4365 = vmatpush3.bf16.msra.mxu0 %v4624_v46  ;;  %v613_v37 = vshll.u32 %v5019_v43, 16  ;;  %v289_v39 = vor.u32 %v287_v15, %v286_v2  ;;  %v290_v40 = vrot.slane %v286_v2, 4  ;;  %v449_v4 = vld [vmem:[#allocation2 + $0x6c] sm:$0x1] }
  0x39   :  { %4366 = vmatprep.subr.bf16.mxu0 %v4628_v62  ;;  %v108_v46 = vmax.f32 %v92_v28, 0.0  ;;  %4402 = vmatprep.subr.bf16.mxu1 %v4633_v57  ;;  %v109_v45 = vmax.f32 %v93_v31, 0.0  ;;  %v5030_v48 = vrot.slane %v655_v47, 5  ;;  %v71_v49 = vmul.f32 %v4091_v24, %v4776_v13  ;;  %v4639_v24 = vld [vmem:[%s6055_s3 + $0xc8] sm:$0xff]   ;;  %v5060_v31 = vld [vmem:[%s6055_s3 + $0xc0] sm:$0xff]  }
  0x3a   :  { %v610_v41 = vor.u32 %v609_v17, %v606_v32  ;;  %v488_v50 = vld [vmem:[#allocation2 + $0x30] sm:$0xf]  ;;  %v615_v52 = vrot.slane %v613_v37, 5  ;;  %v435_v60 = vsel %vm4840_vm6, %v289_v39, %v434_v27  ;;  %v438_v9 = vsel %vm4846_vm7, %v290_v40, %v437_v11  ;;  %v440_v39 = vld [vmem:[#allocation2 + $0x60] sm:$0xf] }
  0x3b   :  { %v5035_v54 = vld [vmem:[#allocation2 + $0x34] sm:$0x1]  ;;  %v4045_v61 = vpack.c.bf16 %v108_v46, %v108_v46  ;;  %4403 = vmatpush3.bf16.msra.mxu1 %v4633_v57  ;;  %v618_v5 = vshrl.u32 %v488_v50, 16  ;;  %v621_v12 = vshll.u32 %v488_v50, 16  ;;  %436 = vst [vmem:[#allocation2 + $0x58] sm:$0xf] %v435_v60  ;;  %v4046_v58 = vpack.c.bf16 %v109_v45, %v109_v45 }
  0x3c   :  { %v611_v15 = vrot.slane %v610_v41, 4  ;;  %v627_v14 = vshll.u32 %v5035_v54, 16  ;;  %4367 = vmatpush3.bf16.msra.mxu0 %v4628_v62  ;;  %439 = vst [vmem:[#allocation2 + $0x5c] sm:$0x1] %v438_v9  ;;  %4404 = vmatprep.subr.bf16.mxu1 %v4635_v33  ;;  %v489_v57 = vld [vmem:[#allocation2 + $0x38] sm:$0xf]  ;;  %v658_v62 = vsel %vm4856_vm8, %v5017_v1, %v5030_v48 }
  0x3d   :  { %v5048_v59 = vld [vmem:[#allocation2 + $0x3c] sm:$0x1]  ;;  %4368 = vmatprep.subr.bf16.mxu0 %v4630_v8  ;;  %v292_v0 = vshrl.u32 %v4045_v61, 16  ;;  %v295_v16 = vshll.u32 %v4045_v61, 16  ;;  %vm1192_vm9 = vcmask 1042432   ;;  %vm1193_vm10 = vcmask 1046532  }
  0x3e   :  { %v620_v22 = vrot.slane %v618_v5, 4  ;;  %v623_v10 = vrot.slane %v621_v12, 5  ;;  %v632_v23 = vshrl.u32 %v489_v57, 16  ;;  %v635_v25 = vshll.u32 %v489_v57, 16  ;;  %v4636_v45 = vld [vmem:[%s6055_s3 + $0x90] sm:$0xff]   ;;  %vm5109_vm11 = vmor %vm1192_vm9, %vm1193_vm10 }
  0x3f   :  { %v3735_v27 = vcombine.low %v488_v50, %v489_v57  ;;  %v616_v11 = vsel %vm4856_vm8, %v611_v15, %v615_v52  ;;  %v629_v2 = vrot.slane %v627_v14, 5  ;;  %v641_v28 = vshll.u32 %v5048_v59, 16  ;;  %4405 = vmatpush3.bf16.msra.mxu1 %v4635_v33  ;;  %v446_v60 = vld [vmem:[#allocation2 + $0x68] sm:$0xf] }
  0x40   :  { %v634_v32 = vrot.slane %v632_v23, 4  ;;  %v637_v17 = vrot.slane %v635_v25, 5  ;;  %v3718_v47 = vcombine.low %v602_v26, %v616_v11  ;;  %v624_v37 = vor.u32 %v623_v10, %v620_v22  ;;  %4369 = vmatpush3.bf16.msra.mxu0 %v4630_v8  ;;  %4406 = vmatprep.subr.bf16.mxu1 %v4639_v24  ;;  %v1145_v23 = vld [vmem:[#allocation2 + $0x8] sm:$0xe]  ;;  %v1146_v25 = vld [vmem:[#allocation2 + $0x10] sm:$0xe] }
  0x41   :  { %4351 = vmatmul.mubr.bf16.gmra.mxu1 %v3735_v27  ;;  %v643_v40 = vrot.slane %v641_v28, 5  ;;  %v294_v33 = vrot.slane %v292_v0, 7  ;;  %v300_v46 = vshrl.u32 %v4046_v58, 16  ;;  %v303_v41 = vshll.u32 %v4046_v58, 16  ;;  %4370 = vmatprep.subr.bf16.mxu0 %v4634_v55  ;;  %v5097_v28 = vld [vmem:[%s6055_s3 + $0x178] sm:$0xff]  }
  0x42   :  { %4318 = vmatprep.mubr.bf16.mxu0 %v3718_v47  ;;  %v625_v50 = vrot.slane %v624_v37, 4  ;;  %v638_v52 = vor.u32 %v637_v17, %v634_v32  ;;  %v72_v26 = vmul.f32 %v4094_v35, %v4776_v13  ;;  %v94_v8 = vadd.f32 %v4786_v18, %v71_v49  ;;  %v491_v61 = vld [vmem:[#allocation2 + $0x58] sm:$0xf]  ;;  %v1144_v49 = vld [vmem:[#allocation2] sm:$0xe] }
  0x43   :  { %v297_v9 = vor.u32 %v295_v16, %v294_v33  ;;  %v298_v5 = vrot.slane %v294_v33, 4  ;;  %v302_v12 = vrot.slane %v300_v46, 7  ;;  %v5074_v15 = vld [vmem:[#allocation2 + $0x5c] sm:$0x1]  ;;  %v4095_v14 = vunpack.c.h.bf16 %v5008_v38  ;;  %4407 = vmatpush3.bf16.msra.mxu1 %v4639_v24 }
  0x44   :  { %v630_v57 = vsel %vm4856_vm8, %v625_v50, %v629_v2  ;;  %v639_v58 = vrot.slane %v638_v52, 4  ;;  %v660_v0 = vshrl.u32 %v491_v61, 16  ;;  %v663_v22 = vshll.u32 %v491_v61, 16  ;;  %4371 = vmatpush3.bf16.msra.mxu0 %v4634_v55  ;;  %v5082_v35 = vld [vmem:[%s6056_s0 + $0x38] sm:$0xff]   ;;  %4408 = vmatprep.subr.bf16.mxu1 %v5060_v31  ;;  %v4640_v55 = vld [vmem:[%s6055_s3 + $0x88] sm:$0xff]  }
  0x45   :  { %v3736_v16 = vcombine.low %v4888_v44, %v491_v61  ;;  %v305_v10 = vor.u32 %v303_v41, %v302_v12  ;;  %v306_v38 = vrot.slane %v302_v12, 4  ;;  %v441_v24 = vsel %vm4840_vm6, %v297_v9, %v440_v39  ;;  %4372 = vmatprep.subr.bf16.mxu0 %v4636_v45 }
  0x46   :  { %v644_v27 = vsel %vm4856_vm8, %v639_v58, %v643_v40  ;;  %v662_v11 = vrot.slane %v660_v0, 4  ;;  %v665_v2 = vrot.slane %v663_v22, 5  ;;  %442 = vst [vmem:[#allocation2 + $0x60] sm:$0xf] %v441_v24  ;;  %v669_v44 = vshll.u32 %v5074_v15, 16 }
  0x47   :  { %v3719_v32 = vcombine.low %v630_v57, %v644_v27  ;;  %4354 = vmatprep.mubr.bf16.mxu1 %v3736_v16  ;;  %v447_v17 = vsel %vm4840_vm6, %v305_v10, %v446_v60  ;;  %v444_v47 = vsel %vm4846_vm7, %v298_v5, %v443_v51  ;;  %v450_v37 = vsel %vm4846_vm7, %v306_v38, %v449_v4  ;;  %v4642_v60 = vld [vmem:[%s6055_s3 + $0x80] sm:$0xff]  }
  0x48   :  { %448 = vst [vmem:[#allocation2 + $0x68] sm:$0xf] %v447_v17  ;;  %v666_v39 = vor.u32 %v665_v2, %v662_v11  ;;  %v671_v40 = vrot.slane %v669_v44, 5  ;;  %445 = vst [vmem:[#allocation2 + $0x64] sm:$0x1] %v444_v47  ;;  %v95_v33 = vadd.f32 %v4786_v18, %v72_v26  ;;  %v110_v46 = vmax.f32 %v94_v8, 0.0  ;;  %4373 = vmatpush3.bf16.msra.mxu0 %v4636_v45 }
  0x49   :  { %451 = vst [vmem:[#allocation2 + $0x6c] sm:$0x1] %v450_v37  ;;  %4409 = vmatpush3.bf16.msra.mxu1 %v5060_v31  ;;  %4319 = vmatmul.mubr.bf16.gmra.mxu0 %v3719_v32  ;;  %v4098_v50 = vunpack.c.l.bf16 %v5082_v35  ;;  %v73_v52 = vmul.f32 %v4095_v14, %v4776_v13  ;;  %v3748_v51 = vrot.slane %v1144_v49, 9  ;;  %v3749_v45 = vrot.slane %v1145_v23, 9  ;;  %v452_v17 = vld [vmem:[#allocation2 + $0x70] sm:$0xf] }
  0x4a   :  { %4374 = vmatprep.subr.bf16.mxu0 %v4640_v55  ;;  %v667_v4 = vrot.slane %v666_v39, 4  ;;  %v111_v31 = vmax.f32 %v95_v33, 0.0  ;;  %v4047_v26 = vpack.c.bf16 %v110_v46, %v110_v46  ;;  %4458 = vmatprep.subr.bf16.mxu1 %v5097_v28  ;;  %v3750_v8 = vrot.slane %v1146_v25, 9  ;;  %v455_v39 = vld [vmem:[#allocation2 + $0x74] sm:$0x1] }
  0x4b   :  { %v74_v61 = vmul.f32 %v4098_v50, %v4776_v13  ;;  %v96_v9 = vadd.f32 %v4786_v18, %v73_v52  ;;  %v5125_v5 = vsel %vm5109_vm11, %v3748_v51, %v1197_v34  ;;  %v5131_v12 = vsel %vm5109_vm11, %v3749_v45, %v1201_v30  ;;  %v1147_v46 = vld [vmem:[#allocation2 + $0x18] sm:$0xe] }
  0x4c   :  { %v1209_v14 = vrot.slane %v4929_v36, 5  ;;  %v672_v57 = vsel %vm4856_vm8, %v667_v4, %v671_v40  ;;  %v4048_v58 = vpack.c.bf16 %v111_v31, %v111_v31  ;;  %v308_v0 = vshrl.u32 %v4047_v26, 16  ;;  %4375 = vmatpush3.bf16.msra.mxu0 %v4640_v55 }
  0x4d   :  { %v492_v34 = vld [vmem:[#allocation2 + $0x60] sm:$0xf]  ;;  %v3720_v7 = vcombine.low %v658_v62, %v672_v57  ;;  %v311_v30 = vshll.u32 %v4047_v26, 16  ;;  %v112_v22 = vmax.f32 %v96_v9, 0.0  ;;  %4376 = vmatprep.subr.bf16.mxu0 %v4642_v60  ;;  %v3780_v49 = vcombine.low %v5125_v5, %v5131_v12 }
  0x4e   :  { %v674_v16 = vshrl.u32 %v492_v34, 16  ;;  %v677_v10 = vshll.u32 %v492_v34, 16  ;;  %v310_v38 = vrot.slane %v308_v0, 7  ;;  %v316_v24 = vshrl.u32 %v4048_v58, 16 }
  0x4f   :  { %v493_v55 = vld [vmem:[#allocation2 + $0x68] sm:$0xf]  ;;  %4322 = vmatprep.mubr.bf16.mxu0 %v3720_v7  ;;  %v5148_v23 = vld [vmem:[#allocation2 + $0x64] sm:$0x1]  ;;  %v97_v27 = vadd.f32 %v4786_v18, %v74_v61  ;;  %v4049_v1 = vpack.c.bf16 %v112_v22, %v112_v22  ;;  %v5157_v48 = vsel %vm5109_vm11, %v3750_v8, %v1205_v42  ;;  %v67_v62 = vmul.f32 %v4083_v56, %v4776_v13  ;;  %v458_v13 = vld [vmem:[#allocation2 + $0x78] sm:$0xf] }
  0x50   :  { %v5150_v25 = vld [vmem:[#allocation2 + $0x6c] sm:$0x1]  ;;  %v676_v11 = vrot.slane %v674_v16, 4  ;;  %v679_v2 = vrot.slane %v677_v10, 5  ;;  %v688_v44 = vshrl.u32 %v493_v55, 16  ;;  %v691_v32 = vshll.u32 %v493_v55, 16  ;;  %4377 = vmatpush3.bf16.msra.mxu0 %v4642_v60 }
  0x51   :  { %v3737_v47 = vcombine.low %v492_v34, %v493_v55  ;;  %v683_v18 = vshll.u32 %v5148_v23, 16  ;;  %v697_v37 = vshll.u32 %v5150_v25, 16  ;;  %v313_v20 = vor.u32 %v311_v30, %v310_v38  ;;  %4426 = vmatprep.subr.bf16.mxu0 %v5139_v29  ;;  %v461_v56 = vld [vmem:[#allocation2 + $0x7c] sm:$0x1]  ;;  %v464_v16 = vld [vmem:[#allocation2 + $0x80] sm:$0xf] }
  0x52   :  { %v690_v42 = vrot.slane %v688_v44, 4  ;;  %v693_v40 = vrot.slane %v691_v32, 5  ;;  %v680_v33 = vor.u32 %v679_v2, %v676_v11  ;;  %v314_v53 = vrot.slane %v310_v38, 4  ;;  %v5180_v11 = vld [vmem:[%s6058_s2] ss:$0 sm:$0xff] }
  0x53   :  { %4355 = vmatmul.mubr.bf16.gmra.mxu1 %v3737_v47  ;;  %v685_v50 = vrot.slane %v683_v18, 5  ;;  %v699_v52 = vrot.slane %v697_v37, 5  ;;  %v318_v60 = vrot.slane %v316_v24, 7  ;;  %v319_v51 = vshll.u32 %v4048_v58, 16  ;;  %v5189_v18 = vld [vmem:[#allocation2 + $0x20] sm:$0xe] }
  0x54   :  { %v681_v45 = vrot.slane %v680_v33, 4  ;;  %v694_v4 = vor.u32 %v693_v40, %v690_v42  ;;  %v453_v31 = vsel %vm4840_vm6, %v313_v20, %v452_v17  ;;  %v113_v26 = vmax.f32 %v97_v27, 0.0  ;;  %v470_v20 = vld [vmem:[#allocation2 + $0x88] sm:$0xf]  ;;  %v473_v33 = vld [vmem:[#allocation2 + $0x8c] sm:$0x1] }
  0x55   :  { %v321_v8 = vor.u32 %v319_v51, %v318_v60  ;;  %v322_v61 = vrot.slane %v318_v60, 4  ;;  %454 = vst [vmem:[#allocation2 + $0x70] sm:$0xf] %v453_v31  ;;  %v324_v9 = vshrl.u32 %v4049_v1, 16  ;;  %v327_v57 = vshll.u32 %v4049_v1, 16 }
  0x56   :  { %v686_v0 = vsel %vm4856_vm8, %v681_v45, %v685_v50  ;;  %v695_v34 = vrot.slane %v694_v4, 4  ;;  %v4050_v7 = vpack.c.bf16 %v113_v26, %v113_v26  ;;  %v456_v30 = vsel %vm4846_vm7, %v314_v53, %v455_v39  ;;  %v467_v1 = vld [vmem:[#allocation2 + $0x84] sm:$0x1]  ;;  %v5193_v40 = vld [vmem:[#allocation2 + $0x28] sm:$0xe] }
  0x57   :  { %v459_v58 = vsel %vm4840_vm6, %v321_v8, %v458_v13  ;;  %v326_v22 = vrot.slane %v324_v9, 7  ;;  %457 = vst [vmem:[#allocation2 + $0x74] sm:$0x1] %v456_v30  ;;  %v462_v10 = vsel %vm4846_vm7, %v322_v61, %v461_v56  ;;  %v3751_v38 = vrot.slane %v1147_v46, 9 }
  0x58   :  { %v700_v24 = vsel %vm4856_vm8, %v695_v34, %v699_v52  ;;  %460 = vst [vmem:[#allocation2 + $0x78] sm:$0xf] %v459_v58  ;;  %v332_v55 = vshrl.u32 %v4050_v7, 16  ;;  %v335_v27 = vshll.u32 %v4050_v7, 16  ;;  %463 = vst [vmem:[#allocation2 + $0x7c] sm:$0x1] %v462_v10  ;;  %v90_v2 = vadd.f32 %v5180_v11, %v67_v62 }
  0x59   :  { %v3721_v44 = vcombine.low %v686_v0, %v700_v24  ;;  %v329_v32 = vor.u32 %v327_v57, %v326_v22  ;;  %v330_v17 = vrot.slane %v326_v22, 4  ;;  %v5187_v47 = vsel %vm5109_vm11, %v3751_v38, %v1209_v14  ;;  %v428_v22 = vld [vmem:[#allocation2 + $0x40] sm:$0xf]  ;;  %v5215_v24 = vld [vmem:[#allocation2 + $0x30] sm:$0xe] }
  0x5a   :  { %v334_v37 = vrot.slane %v332_v55, 7  ;;  %v3781_v39 = vcombine.low %v5157_v48, %v5187_v47  ;;  %v106_v42 = vmax.f32 %v90_v2, 0.0  ;;  %v4099_v14 = vunpack.c.h.bf16 %v5082_v35  ;;  %v4700_v55 = vld [vmem:[%s6057_s1] ss:$0 sm:$0xff] }
  0x5b   :  { %4323 = vmatmul.mubr.bf16.gmra.mxu0 %v3721_v44  ;;  %v465_v62 = vsel %vm4840_vm6, %v329_v32, %v464_v16  ;;  %v468_v36 = vsel %vm4846_vm7, %v330_v17, %v467_v1  ;;  %v3752_v50 = vrot.slane %v5189_v18, 9  ;;  %v1213_v51 = vrot.slane %v4952_v21, 5 }
  0x5c   :  { %v494_v53 = vld [vmem:[#allocation2 + $0x70] sm:$0xf]  ;;  %v337_v13 = vor.u32 %v335_v27, %v334_v37  ;;  %v338_v56 = vrot.slane %v334_v37, 4  ;;  %466 = vst [vmem:[#allocation2 + $0x80] sm:$0xf] %v465_v62  ;;  %v4043_v46 = vpack.c.bf16 %v106_v42, %v106_v42  ;;  %v3753_v45 = vrot.slane %v5193_v40, 9 }
  0x5d   :  { %469 = vst [vmem:[#allocation2 + $0x84] sm:$0x1] %v468_v36  ;;  %v702_v52 = vshrl.u32 %v494_v53, 16  ;;  %v705_v60 = vshll.u32 %v494_v53, 16  ;;  %v75_v27 = vmul.f32 %v4700_v55, %v4099_v14  ;;  %v1217_v32 = vrot.slane %v5019_v43, 5 }
  0x5e   :  { %v471_v4 = vsel %vm4840_vm6, %v337_v13, %v470_v20  ;;  %v5205_v31 = vld [vmem:[#allocation2 + $0x74] sm:$0x1]  ;;  %v474_v35 = vsel %vm4846_vm7, %v338_v56, %v473_v33  ;;  %v276_v26 = vshrl.u32 %v4043_v46, 16  ;;  %v279_v8 = vshll.u32 %v4043_v46, 16  ;;  %v4643_v56 = vld [vmem:[#allocation2 + $0x8] ss:$8 sps:$4 sm:$0xff]  }
  0x5f   :  { %v495_v61 = vld [vmem:[#allocation2 + $0x78] sm:$0xf]  ;;  %v704_v9 = vrot.slane %v702_v52, 4  ;;  %v707_v57 = vrot.slane %v705_v60, 5  ;;  %472 = vst [vmem:[#allocation2 + $0x88] sm:$0xf] %v471_v4  ;;  %v98_v4 = vadd.f32 %v5180_v11, %v75_v27  ;;  %v5260_v21 = vsel %vm5109_vm11, %v3753_v45, %v1217_v32 }
  0x60   :  { %v5209_v0 = vld [vmem:[#allocation2 + $0x7c] sm:$0x1]  ;;  %475 = vst [vmem:[#allocation2 + $0x8c] sm:$0x1] %v474_v35  ;;  %v716_v34 = vshrl.u32 %v495_v61, 16  ;;  %v719_v7 = vshll.u32 %v495_v61, 16  ;;  %v3738_v30 = vcombine.low %v494_v53, %v495_v61 }
  0x61   :  { %v711_v58 = vshll.u32 %v5205_v31, 16  ;;  %v708_v16 = vor.u32 %v707_v57, %v704_v9  ;;  %v725_v10 = vshll.u32 %v5209_v0, 16  ;;  %v5213_v38 = vrot.slane %v276_v26, 7  ;;  %v1151_v14 = vld [vmem:[#allocation2 + $0x38] sm:$0xe] }
  0x62   :  { %v718_v1 = vrot.slane %v716_v34, 4  ;;  %v721_v2 = vrot.slane %v719_v7, 5  ;;  %4358 = vmatprep.mubr.bf16.mxu1 %v3738_v30  ;;  %v3754_v52 = vrot.slane %v5215_v24, 9  ;;  %v1221_v43 = vrot.slane %v5035_v54, 5  ;;  %v1152_v60 = vld [vmem:[#allocation2 + $0x50] sm:$0xe] }
  0x63   :  { %v713_v44 = vrot.slane %v711_v58, 5  ;;  %v496_v17 = vld [vmem:[#allocation2 + $0x80] sm:$0xf]  ;;  %v709_v37 = vrot.slane %v708_v16, 4  ;;  %v727_v20 = vrot.slane %v725_v10, 5  ;;  %v281_v62 = vor.u32 %v279_v8, %v5213_v38 }
  0x64   :  { %v5221_v42 = vld [vmem:[#allocation2 + $0x84] sm:$0x1]  ;;  %v730_v36 = vshrl.u32 %v496_v17, 16  ;;  %v733_v33 = vshll.u32 %v496_v17, 16  ;;  %v722_v53 = vor.u32 %v721_v2, %v718_v1  ;;  %v1153_v57 = vld [vmem:[#allocation2 + $0x58] sm:$0xe]  ;;  %v5264_v18 = vsel %vm5109_vm11, %v3754_v52, %v1221_v43 }
  0x65   :  { %v739_v13 = vshll.u32 %v5221_v42, 16  ;;  %v429_v46 = vsel %vm4840_vm6, %v281_v62, %v428_v22  ;;  %v714_v61 = vsel %vm4856_vm8, %v709_v37, %v713_v44  ;;  %v282_v22 = vrot.slane %v5213_v38, 4  ;;  %v1154_v24 = vld [vmem:[#allocation2 + $0x60] sm:$0xe]  ;;  %v1155_v44 = vld [vmem:[#allocation2 + $0x68] sm:$0xe] }
  0x66   :  { %v497_v35 = vld [vmem:[#allocation2 + $0x88] sm:$0xf]  ;;  %v732_v26 = vrot.slane %v730_v36, 4  ;;  %v735_v8 = vrot.slane %v733_v33, 5  ;;  %v723_v9 = vrot.slane %v722_v53, 4  ;;  %v3755_v2 = vrot.slane %v1151_v14, 9 }
  0x67   :  { %430 = vst [vmem:[#allocation2 + $0x40] sm:$0xf] %v429_v46  ;;  %v744_v34 = vshrl.u32 %v497_v35, 16  ;;  %v747_v7 = vshll.u32 %v497_v35, 16  ;;  %v3739_v30 = vcombine.low %v496_v17, %v497_v35  ;;  %v5232_v58 = vld [vmem:[#allocation2 + $0x8c] sm:$0x1] }
  0x68   :  { %v728_v54 = vsel %vm4856_vm8, %v723_v9, %v727_v20  ;;  %v736_v11 = vor.u32 %v735_v8, %v732_v26  ;;  %v741_v16 = vrot.slane %v739_v13, 5  ;;  %v753_v10 = vshll.u32 %v5232_v58, 16  ;;  %v4644_v20 = vld [vmem:[#allocation2 + $0x18] ss:$8 sps:$4 sm:$0xff]  }
  0x69   :  { %v746_v55 = vrot.slane %v744_v34, 4  ;;  %v749_v27 = vrot.slane %v747_v7, 5  ;;  %4359 = vmatmul.mubr.bf16.gmra.mxu1 %v3739_v30  ;;  %v3722_v1 = vcombine.low %v714_v61, %v728_v54  ;;  %v1225_v62 = vrot.slane %v5048_v59, 5  ;;  %v5251_v59 = vld [vmem:[#allocation2 + $0x70] sm:$0xe]  ;;  %v4651_v34 = vld [vmem:[%s6055_s3 + $0x168] sm:$0xff]  }
  0x6a   :  { %v737_v37 = vrot.slane %v736_v11, 4  ;;  %v755_v17 = vrot.slane %v753_v10, 5  ;;  %4410 = vmatprep.mubr.bf16.mxu1 %v4643_v56  ;;  %v3756_v36 = vrot.slane %v1152_v60, 9  ;;  %v1229_v53 = vrot.slane %v4986_v6, 5  ;;  %v5253_v14 = vld [vmem:[#allocation2 + $0x78] sm:$0xe] }
  0x6b   :  { %4326 = vmatprep.mubr.bf16.mxu0 %v3722_v1  ;;  %v750_v33 = vor.u32 %v749_v27, %v746_v55  ;;  %v3757_v13 = vrot.slane %v1153_v57, 9  ;;  %v1233_v46 = vrot.slane %v5074_v15, 5  ;;  %v5249_v56 = vsel %vm5109_vm11, %v3752_v50, %v1213_v51  ;;  %v4649_v61 = vld [vmem:[#allocation2 + $0x28] ss:$8 sps:$4 sm:$0xff]   ;;  %v1158_v9 = vld [vmem:[#allocation2 + $0x80] sm:$0xe] }
  0x6c   :  { %v742_v35 = vsel %vm4856_vm8, %v737_v37, %v741_v16  ;;  %v3758_v6 = vrot.slane %v1154_v24, 9  ;;  %v1237_v26 = vrot.slane %v5148_v23, 5  ;;  %v3759_v15 = vrot.slane %v1155_v44, 9  ;;  %v4647_v23 = vld [vmem:[%s6055_s3 + $0x170] sm:$0xff]   ;;  %v1159_v57 = vld [vmem:[#allocation2 + $0x88] sm:$0xe] }
  0x6d   :  { %v751_v60 = vrot.slane %v750_v33, 4  ;;  %v1241_v50 = vrot.slane %v5150_v25, 5  ;;  %v114_v51 = vmax.f32 %v98_v4, 0.0  ;;  %v5274_v40 = vsel %vm5109_vm11, %v3755_v2, %v1225_v62  ;;  %v5301_v16 = vld [vmem:[#allocation2 + $0x14] sm:$0x1] }
  0x6e   :  { %v5278_v45 = vsel %vm5109_vm11, %v3756_v36, %v1229_v53  ;;  %v5282_v25 = vsel %vm5109_vm11, %v3757_v13, %v1233_v46  ;;  %v3760_v43 = vrot.slane %v5251_v59, 9  ;;  %v1245_v4 = vrot.slane %v5205_v31, 5  ;;  %v5299_v31 = vld [vmem:[#allocation2 + $0xc] sm:$0x1]  ;;  %v2177_v27 = vld [vmem:[#allocation2 + $0x8] sm:$0xe] }
  0x6f   :  { %v756_v8 = vsel %vm4856_vm8, %v751_v60, %v755_v17  ;;  %v4051_v52 = vpack.c.bf16 %v114_v51, %v114_v51  ;;  %v5291_v7 = vsel %vm5109_vm11, %v3758_v6, %v1237_v26  ;;  %v5295_v30 = vsel %vm5109_vm11, %v3759_v15, %v1241_v50  ;;  %v5306_v1 = vld [vmem:[#allocation2 + $0x10] sm:$0xe]  ;;  %v5316_v62 = vld [vmem:[#allocation2 + $0x1c] sm:$0x1]  ;;  %v5318_v36 = vld [vmem:[#allocation2 + $0x18] sm:$0xe] }
  0x70   :  { %v3723_v32 = vcombine.low %v742_v35, %v756_v8  ;;  %v3761_v54 = vrot.slane %v5253_v14, 9  ;;  %v1249_v11 = vrot.slane %v5209_v0, 5  ;;  %v3782_v10 = vcombine.low %v5249_v56, %v5260_v21  ;;  %v4650_v0 = vld [vmem:[#allocation2 + $0x38] ss:$8 sps:$4 sm:$0xff]   ;;  %v476_v44 = vld [vmem:[#allocation2 + $0x90] sm:$0xf] }
  0x71   :  { %4411 = vmatmul.mubr.bf16.vlgmr.msra.gmra.mxu1 %v4644_v20  ;;  %v340_v24 = vshrl.u32 %v4051_v52, 16  ;;  %v343_v55 = vshll.u32 %v4051_v52, 16  ;;  %v3783_v2 = vcombine.low %v5264_v18, %v5274_v40  ;;  %v3762_v37 = vrot.slane %v1158_v9, 9  ;;  %v5325_v20 = vld [vmem:[#allocation2 + $0x20] sm:$0xe]  ;;  %v4648_v56 = vld [vmem:[%s6055_s3 + $0x130] sm:$0xff]  }
  0x72   :  { %4327 = vmatmul.mubr.bf16.gmra.mxu0 %v3723_v32  ;;  %4459 = vmatpush3.bf16.msra.mxu1 %v5097_v28  ;;  %v3784_v28 = vcombine.low %v5278_v45, %v5282_v25  ;;  %v1253_v17 = vrot.slane %v5221_v42, 5  ;;  %v3785_v5 = vcombine.low %v5291_v7, %v5295_v30  ;;  %v1257_v33 = vrot.slane %v5232_v58, 5  ;;  %v5330_v35 = vld [vmem:[#allocation2 + $0x24] sm:$0x1]  ;;  %v1711_v26 = vld [vmem:[#allocation2 + $0x8] sm:$0xf] }
  0x73   :  { %4378 = vmatprep.mubr.bf16.mxu0 %v3780_v49  ;;  %4460 = vmatprep.subr.bf16.mxu1 %v4647_v23  ;;  %v5322_v12 = vrot.slane %v340_v24, 7  ;;  %v3763_v49 = vrot.slane %v1159_v57, 9  ;;  %v3860_v53 = vrot.slane %v2177_v27, 9  ;;  %v2227_v13 = vrot.slane %v5299_v31, 5  ;;  %v4653_v58 = vld [vmem:[%s6055_s3 + $0x160] sm:$0xff]   ;;  %v4664_v7 = vld [vmem:[%s6055_s3 + $0x108] sm:$0xff]  }
  0x74   :  { %4414 = vmatprep.mubr.bf16.mxu1 %v4649_v61  ;;  %v3861_v42 = vrot.slane %v5306_v1, 9  ;;  %v2231_v46 = vrot.slane %v5301_v16, 5  ;;  %v5341_v14 = vsel %vm5109_vm11, %v3760_v43, %v1245_v4  ;;  %v3862_v60 = vrot.slane %v5318_v36, 9  ;;  %v4655_v15 = vld [vmem:[#allocation2 + $0x58] ss:$8 sps:$4 sm:$0xff]  }
  0x75   :  { %v345_v59 = vor.u32 %v343_v55, %v5322_v12  ;;  %v2235_v6 = vrot.slane %v5316_v62, 5  ;;  %v5347_v21 = vsel %vm5109_vm11, %v3761_v54, %v1249_v11  ;;  %v5351_v50 = vsel %vm5109_vm11, %v3762_v37, %v1253_v17  ;;  %v1713_v8 = vld [vmem:[#allocation2 + $0x10] sm:$0xf]  ;;  %v1715_v4 = vld [vmem:[#allocation2 + $0x18] sm:$0xf]  ;;  %v4652_v37 = vld [vmem:[%s6055_s3 + $0x128] sm:$0xff]  }
  0x76   :  { %4461 = vmatpush3.bf16.msra.mxu1 %v4647_v23  ;;  %v3863_v51 = vrot.slane %v5325_v20, 9  ;;  %v1744_v23 = vshrl.u32 %v1711_v26, 16  ;;  %v5358_v32 = vsel %vm5109_vm11, %v3763_v49, %v1257_v33  ;;  %v1747_v52 = vshll.u32 %v1711_v26, 16  ;;  %v1717_v24 = vld [vmem:[#allocation2 + $0x20] sm:$0xf]  ;;  %v4659_v26 = vld [vmem:[%s6055_s3 + $0x150] sm:$0xff]  }
  0x77   :  { %4462 = vmatprep.subr.bf16.mxu1 %v4651_v34  ;;  %v477_v61 = vsel %vm4840_vm6, %v345_v59, %v476_v44  ;;  %v1753_v43 = vshll.u32 %v5299_v31, 16  ;;  %v346_v9 = vrot.slane %v5322_v12, 4  ;;  %v1758_v54 = vshrl.u32 %v1713_v8, 16  ;;  %v4656_v44 = vld [vmem:[#allocation2 + $0x68] ss:$8 sps:$4 sm:$0xff]   ;;  %v5384_v59 = vld [vmem:[%s6055_s3 + $0x120] sm:$0xff]  }
  0x78   :  { %478 = vst [vmem:[#allocation2 + $0x90] sm:$0xf] %v477_v61  ;;  %v1746_v57 = vrot.slane %v1744_v23, 4  ;;  %v1761_v11 = vshll.u32 %v1713_v8, 16  ;;  %v5370_v31 = vsel %vm5109_vm11, %v3860_v53, %v2227_v13  ;;  %v2239_v55 = vrot.slane %v5330_v35, 5 }
  0x79   :  { %4415 = vmatmul.mubr.bf16.gmra.mxu1 %v4650_v0  ;;  %v1749_v27 = vrot.slane %v1747_v52, 5  ;;  %v1767_v0 = vshll.u32 %v5301_v16, 16  ;;  %v1760_v48 = vrot.slane %v1758_v54, 4  ;;  %v5378_v49 = vrot.slane %v1753_v43, 5  ;;  %v5400_v54 = vld [vmem:[#allocation2 + $0x34] sm:$0x1] }
  0x7a   :  { %4379 = vmatmul.mubr.bf16.vlgmr.msra.gmra.mxu0 %v3781_v39  ;;  %4463 = vmatpush3.bf16.msra.mxu1 %v4651_v34  ;;  %v1763_v47 = vrot.slane %v1761_v11, 5  ;;  %v1772_v39 = vshrl.u32 %v1715_v4, 16  ;;  %v1775_v34 = vshll.u32 %v1715_v4, 16  ;;  %v1781_v33 = vshll.u32 %v5316_v62, 16  ;;  %v2181_v11 = vld [vmem:[#allocation2 + $0x28] sm:$0xe] }
  0x7b   :  { %4427 = vmatpush3.bf16.msra.mxu0 %v5139_v29  ;;  %4382 = vmatprep.mubr.bf16.mxu0 %v3782_v10  ;;  %v1750_v17 = vor.u32 %v1749_v27, %v1746_v57  ;;  %v1786_v20 = vshrl.u32 %v1717_v24, 16  ;;  %v1789_v13 = vshll.u32 %v1717_v24, 16  ;;  %v1769_v23 = vrot.slane %v1767_v0, 5  ;;  %v431_v24 = vld [vmem:[#allocation2 + $0x44] sm:$0x1] }
  0x7c   :  { %4428 = vmatprep.subr.bf16.mxu0 %v4648_v56  ;;  %4464 = vmatprep.subr.bf16.mxu1 %v4653_v58  ;;  %v1764_v29 = vor.u32 %v1763_v47, %v1760_v48  ;;  %v1774_v10 = vrot.slane %v1772_v39, 4  ;;  %v1777_v53 = vrot.slane %v1775_v34, 5  ;;  %v1795_v52 = vshll.u32 %v5330_v35, 16  ;;  %v4661_v35 = vld [vmem:[#allocation2 + $0x78] ss:$8 sps:$4 sm:$0xff]  }
  0x7d   :  { %4418 = vmatprep.mubr.bf16.mxu1 %v4655_v15  ;;  %v1751_v8 = vrot.slane %v1750_v17, 4  ;;  %v1788_v61 = vrot.slane %v1786_v20, 4  ;;  %v5390_v15 = vld [vmem:[#allocation2 + $0x2c] sm:$0x1]  ;;  %v1791_v57 = vrot.slane %v1789_v13, 5  ;;  %v5408_v16 = vsel %vm5109_vm11, %v3862_v60, %v2235_v6  ;;  %v4665_v20 = vld [vmem:[%s6055_s3 + $0x140] sm:$0xff]  }
  0x7e   :  { %4465 = vmatpush3.bf16.msra.mxu1 %v4653_v58  ;;  %v5398_v58 = vsel %vm5109_vm11, %v3861_v42, %v2231_v46  ;;  %v1765_v43 = vrot.slane %v1764_v29, 4  ;;  %v1778_v4 = vor.u32 %v1777_v53, %v1774_v10  ;;  %v5412_v1 = vsel %vm5109_vm11, %v3863_v51, %v2239_v55  ;;  %v2182_v6 = vld [vmem:[#allocation2 + $0x30] sm:$0xe]  ;;  %v4658_v55 = vld [vmem:[%s6055_s3 + $0x118] sm:$0xff]  }
  0x7f   :  { %4429 = vmatpush3.bf16.msra.mxu0 %v4648_v56  ;;  %4466 = vmatprep.subr.bf16.mxu1 %v4657_v63  ;;  %v5414_v42 = vrot.slane %v1781_v33, 5  ;;  %v3864_v46 = vrot.slane %v2181_v11, 9  ;;  %v5419_v56 = vld [vmem:[%s6055_s3 + $0x148] sm:$0xff]   ;;  %v1756_v62 = vsel %vm4856_vm8, %v1751_v8, %v5378_v49  ;;  %v1792_v60 = vor.u32 %v1791_v57, %v1788_v61  ;;  %v5440_v47 = vld [vmem:[#allocation2 + $0x3c] sm:$0x1] }
  0x80   :  { %4430 = vmatprep.subr.bf16.mxu0 %v4652_v37  ;;  %v5424_v36 = vrot.slane %v1778_v4, 4  ;;  %v2243_v51 = vrot.slane %v5390_v15, 5  ;;  %v1770_v27 = vsel %vm4856_vm8, %v1765_v43, %v1769_v23  ;;  %v3865_v0 = vrot.slane %v2182_v6, 9  ;;  %v5442_v18 = vld [vmem:[#allocation2 + $0x38] sm:$0xe] }
  0x81   :  { %4419 = vmatmul.mubr.bf16.gmra.mxu1 %v4656_v44  ;;  %v2247_v44 = vrot.slane %v5400_v54, 5  ;;  %v432_v48 = vsel %vm4846_vm7, %v282_v22, %v431_v24  ;;  %v4662_v40 = vld [vmem:[#allocation2 + $0x88] ss:$8 sps:$4 sm:$0xff]   ;;  %v5451_v38 = vrot.slane %v1792_v60, 4  ;;  %v5453_v39 = vrot.slane %v1795_v52, 5  ;;  %v4667_v24 = vld [vmem:[%s6055_s3 + $0x1f8] sm:$0xff]  }
  0x82   :  { %4383 = vmatmul.mubr.bf16.gmra.mxu0 %v3783_v2  ;;  %4467 = vmatpush3.bf16.msra.mxu1 %v4657_v63  ;;  %v3786_v2 = vcombine.low %v5341_v14, %v5347_v21  ;;  %v3787_v63 = vcombine.low %v5351_v50, %v5358_v32  ;;  %433 = vst [vmem:[#allocation2 + $0x44] sm:$0x1] %v432_v48  ;;  %v5455_v22 = vld [vmem:[#allocation2 + $0x40] sm:$0xe]  ;;  %v2251_v14 = vrot.slane %v5440_v47, 5  ;;  %v1809_v53 = vshll.u32 %v5390_v15, 16 }
  0x83   :  { %4431 = vmatpush3.bf16.msra.mxu0 %v4652_v37  ;;  %4386 = vmatprep.mubr.bf16.mxu0 %v3784_v28  ;;  %v3892_v45 = vcombine.low %v5370_v31, %v5398_v58  ;;  %v3893_v25 = vcombine.low %v5408_v16, %v5412_v1  ;;  %v3866_v28 = vrot.slane %v5442_v18, 9  ;;  %v1719_v21 = vld [vmem:[#allocation2 + $0x28] sm:$0xf]  ;;  %v5464_v34 = vcombine.low %v1756_v62, %v1770_v27  ;;  %v1721_v17 = vld [vmem:[#allocation2 + $0x30] sm:$0xf] }
  0x84   :  { %4432 = vmatprep.subr.bf16.mxu0 %v5384_v59  ;;  %4468 = vmatprep.subr.bf16.mxu1 %v4659_v26  ;;  %v1784_v37 = vsel %vm4856_vm8, %v5424_v36, %v5414_v42  ;;  %v1800_v49 = vshrl.u32 %v1719_v21, 16  ;;  %v1803_v33 = vshll.u32 %v1719_v21, 16  ;;  %v4660_v31 = vld [vmem:[%s6055_s3 + $0x110] sm:$0xff]   ;;  %v5478_v29 = vsel %vm5109_vm11, %v3864_v46, %v2243_v51  ;;  %v1725_v58 = vld [vmem:[#allocation2 + $0x40] sm:$0xf]  ;;  %v4671_v32 = vld [vmem:[%s6055_s3 + $0x1e8] sm:$0xff]  }
  0x85   :  { %4422 = vmatprep.mubr.bf16.mxu1 %v4661_v35  ;;  %v5482_v10 = vsel %vm5109_vm11, %v3865_v0, %v2247_v44  ;;  %v1814_v13 = vshrl.u32 %v1721_v17, 16  ;;  %v1817_v61 = vshll.u32 %v1721_v17, 16  ;;  %v1823_v52 = vshll.u32 %v5400_v54, 16  ;;  %v1730_v21 = vld [vmem:[#allocation2 + $0x64] sm:$0x1]  ;;  %v4669_v17 = vld [vmem:[%s6055_s3 + $0x1f0] sm:$0xff]  }
  0x86   :  { %4469 = vmatpush3.bf16.msra.mxu1 %v4659_v26  ;;  %v1723_v26 = vld [vmem:[#allocation2 + $0x38] sm:$0xf]  ;;  %v1802_v8 = vrot.slane %v1800_v49, 4  ;;  %v1805_v23 = vrot.slane %v1803_v33, 5  ;;  %v3867_v43 = vrot.slane %v5455_v22, 9  ;;  %v5489_v35 = vrot.slane %v1809_v53, 5 }
  0x87   :  { %4433 = vmatpush3.bf16.msra.mxu0 %v5384_v59  ;;  %4470 = vmatprep.subr.bf16.mxu1 %v5419_v56  ;;  %v1816_v4 = vrot.slane %v1814_v13, 4  ;;  %v1828_v57 = vshrl.u32 %v1723_v26, 16  ;;  %v1831_v11 = vshll.u32 %v1723_v26, 16  ;;  %v1819_v46 = vrot.slane %v1817_v61, 5  ;;  %v1728_v22 = vld [vmem:[#allocation2 + $0x5c] sm:$0x1] }
  0x88   :  { %4434 = vmatprep.subr.bf16.mxu0 %v4658_v55  ;;  %v1806_v15 = vor.u32 %v1805_v23, %v1802_v8  ;;  %v1837_v59 = vshll.u32 %v5440_v47, 16  ;;  %v1842_v6 = vshrl.u32 %v1725_v58, 16  ;;  %v1845_v51 = vshll.u32 %v1725_v58, 16  ;;  %v2185_v49 = vld [vmem:[#allocation2 + $0x58] sm:$0xe] }
  0x89   :  { %4423 = vmatmul.mubr.bf16.gmra.mxu1 %v4662_v40  ;;  %v1726_v54 = vld [vmem:[#allocation2 + $0x44] sm:$0x1]  ;;  %v1830_v62 = vrot.slane %v1828_v57, 4  ;;  %v1833_v60 = vrot.slane %v1831_v11, 5  ;;  %v1820_v44 = vor.u32 %v1819_v46, %v1816_v4  ;;  %v1825_v48 = vrot.slane %v1823_v52, 5 }
  0x8a   :  { %4387 = vmatmul.mubr.bf16.gmra.mxu0 %v3785_v5  ;;  %4471 = vmatpush3.bf16.msra.mxu1 %v5419_v56  ;;  %v2255_v27 = vrot.slane %v1726_v54, 5  ;;  %v1807_v0 = vrot.slane %v1806_v15, 4  ;;  %v1844_v5 = vrot.slane %v1842_v6, 4  ;;  %v1847_v56 = vrot.slane %v1845_v51, 5  ;;  %v2186_v33 = vld [vmem:[#allocation2 + $0x60] sm:$0xe] }
  0x8b   :  { %4435 = vmatpush3.bf16.msra.mxu0 %v4658_v55  ;;  %4390 = vmatprep.mubr.bf16.mxu0 %v3786_v2  ;;  %v1834_v30 = vor.u32 %v1833_v60, %v1830_v62  ;;  %v1851_v47 = vshll.u32 %v1726_v54, 16  ;;  %v1798_v55 = vsel %vm4856_vm8, %v5451_v38, %v5453_v39  ;;  %v3894_v18 = vcombine.low %v5478_v29, %v5482_v10  ;;  %v5528_v13 = vld [vmem:[#allocation2 + $0x6c] sm:$0x1]  ;;  %v2187_v52 = vld [vmem:[#allocation2 + $0x68] sm:$0xe] }
  0x8c   :  { %4436 = vmatprep.subr.bf16.mxu0 %v4660_v31  ;;  %4472 = vmatprep.subr.bf16.mxu1 %v4665_v20  ;;  %v5510_v40 = vsel %vm5109_vm11, %v3866_v28, %v2251_v14  ;;  %v1821_v2 = vrot.slane %v1820_v44, 4  ;;  %v5520_v38 = vsel %vm5109_vm11, %v3867_v43, %v2255_v27  ;;  %v5524_v28 = vrot.slane %v1837_v59, 5  ;;  %v2188_v43 = vld [vmem:[#allocation2 + $0x70] sm:$0xe]  ;;  %v1727_v36 = vld [vmem:[#allocation2 + $0x58] sm:$0xf] }
  0x8d   :  { %4474 = vmatprep.mubr.bf16.mxu1 %v3892_v45  ;;  %v4666_v45 = vld [vmem:[%s6055_s3 + $0x100] sm:$0xff]   ;;  %v5522_v39 = vrot.slane %v1834_v30, 4  ;;  %v1848_v14 = vor.u32 %v1847_v56, %v1844_v5  ;;  %v3868_v29 = vrot.slane %v2185_v49, 9  ;;  %v2259_v10 = vrot.slane %v1728_v22, 5  ;;  %v4670_v27 = vld [vmem:[%s6055_s3 + $0x1b0] sm:$0xff]  }
  0x8e   :  { %4473 = vmatpush3.bf16.msra.mxu1 %v4665_v20  ;;  %v5526_v20 = vrot.slane %v1851_v47, 5  ;;  %v3869_v53 = vrot.slane %v2186_v33, 9  ;;  %v1812_v26 = vsel %vm4856_vm8, %v1807_v0, %v5489_v35  ;;  %v1826_v8 = vsel %vm4856_vm8, %v1821_v2, %v1825_v48  ;;  %v1731_v30 = vld [vmem:[#allocation2 + $0x68] sm:$0xf]  ;;  %v1733_v5 = vld [vmem:[#allocation2 + $0x70] sm:$0xf] }
  0x8f   :  { %4437 = vmatpush3.bf16.msra.mxu0 %v4660_v31  ;;  %4522 = vmatprep.subr.bf16.mxu1 %v4667_v24  ;;  %v5535_v23 = vrot.slane %v1848_v14, 4  ;;  %v2263_v61 = vrot.slane %v1730_v21, 5  ;;  %v5537_v31 = vld [vmem:[#allocation2 + $0x74] sm:$0x1]  ;;  %v5544_v58 = vsel %vm5109_vm11, %v3868_v29, %v2259_v10  ;;  %v3870_v4 = vrot.slane %v2187_v52, 9  ;;  %v4672_v29 = vld [vmem:[%s6055_s3 + $0x1a8] sm:$0xff]  }
  0x90   :  { %4438 = vmatprep.subr.bf16.mxu0 %v4664_v7  ;;  %v2267_v57 = vrot.slane %v5528_v13, 5  ;;  %v2271_v11 = vrot.slane %v5537_v31, 5  ;;  %v3845_v16 = vcombine.low %v1784_v37, %v1798_v55  ;;  %v1865_v15 = vshll.u32 %v1728_v22, 16  ;;  %v1729_v37 = vld [vmem:[#allocation2 + $0x60] sm:$0xf] }
  0x91   :  { %4475 = vmatmul.mubr.bf16.vlgmr.msra.gmra.mxu1 %v3893_v25  ;;  %v5558_v1 = vsel %vm5109_vm11, %v3869_v53, %v2263_v61  ;;  %v3871_v25 = vrot.slane %v2188_v43, 9  ;;  %v3895_v50 = vcombine.low %v5510_v40, %v5520_v38  ;;  %v1840_v42 = vsel %vm4856_vm8, %v5522_v39, %v5524_v28  ;;  %v4673_v40 = vld [vmem:[%s6055_s3 + $0x1e0] sm:$0xff]   ;;  %v2192_v3 = vld [vmem:[#allocation2 + $0x90] sm:$0xe] }
  0x92   :  { %4391 = vmatmul.mubr.bf16.gmra.mxu0 %v3787_v63  ;;  %4523 = vmatpush3.bf16.msra.mxu1 %v4667_v24  ;;  %v3846_v63 = vcombine.low %v1812_v26, %v1826_v8  ;;  %v1879_v35 = vshll.u32 %v1730_v21, 16  ;;  %v1854_v46 = vsel %vm4856_vm8, %v5535_v23, %v5526_v20  ;;  %v3896_v59 = vcombine.low %v5544_v58, %v5558_v1  ;;  %v1738_v43 = vld [vmem:[#allocation2 + $0x84] sm:$0x1] }
  0x93   :  { %4439 = vmatpush3.bf16.msra.mxu0 %v4664_v7  ;;  %4442 = vmatprep.mubr.bf16.mxu0 %v5464_v34  ;;  %v4668_v34 = vld [vmem:[%s6055_s3 + $0x1b8] sm:$0xff]   ;;  %v1856_v54 = vshrl.u32 %v1727_v36, 16  ;;  %v1859_v62 = vshll.u32 %v1727_v36, 16  ;;  %v5579_v60 = vrot.slane %v1865_v15, 5  ;;  %v1870_v6 = vshrl.u32 %v1729_v37, 16  ;;  %v4674_v20 = vld [vmem:[%s6055_s3 + $0x1a0] sm:$0xff]  }
  0x94   :  { %4440 = vmatprep.subr.bf16.mxu0 %v4666_v45  ;;  %4524 = vmatprep.subr.bf16.mxu1 %v4669_v17  ;;  %v1873_v51 = vshll.u32 %v1729_v37, 16  ;;  %v5581_v24 = vrot.slane %v1879_v35, 5  ;;  %v5588_v0 = vsel %vm5109_vm11, %v3870_v4, %v2267_v57  ;;  %v5592_v44 = vsel %vm5109_vm11, %v3871_v25, %v2271_v11  ;;  %v2189_v11 = vld [vmem:[#allocation2 + $0x78] sm:$0xe]  ;;  %v479_v36 = vld [vmem:[#allocation2 + $0x94] sm:$0x1] }
  0x95   :  { %4478 = vmatprep.mubr.bf16.mxu1 %v3894_v18  ;;  %v1858_v48 = vrot.slane %v1856_v54, 4  ;;  %v1861_v7 = vrot.slane %v1859_v62, 5  ;;  %v1872_v56 = vrot.slane %v1870_v6, 4  ;;  %v1884_v55 = vshrl.u32 %v1731_v30, 16  ;;  %v2191_v54 = vld [vmem:[#allocation2 + $0x88] sm:$0xe] }
  0x96   :  { %4525 = vmatpush3.bf16.msra.mxu1 %v4669_v17  ;;  %v1875_v47 = vrot.slane %v1873_v51, 5  ;;  %v1887_v18 = vshll.u32 %v1731_v30, 16  ;;  %v1893_v22 = vshll.u32 %v5528_v13, 16  ;;  %v1898_v21 = vshrl.u32 %v1733_v5, 16  ;;  %v1735_v6 = vld [vmem:[#allocation2 + $0x78] sm:$0xf] }
  0x97   :  { %4441 = vmatpush3.bf16.msra.mxu0 %v4666_v45  ;;  %4526 = vmatprep.subr.bf16.mxu1 %v4671_v32  ;;  %v1862_v2 = vor.u32 %v1861_v7, %v1858_v48  ;;  %v1901_v17 = vshll.u32 %v1733_v5, 16  ;;  %v5601_v45 = vld [vmem:[%s6055_s3 + $0x1d8] sm:$0xff]   ;;  %v1886_v14 = vrot.slane %v1884_v55, 4  ;;  %v1907_v33 = vshll.u32 %v5537_v31, 16 }
  0x98   :  { %4490 = vmatprep.subr.bf16.mxu0 %v4668_v34  ;;  %v1876_v38 = vor.u32 %v1875_v47, %v1872_v56  ;;  %v1889_v49 = vrot.slane %v1887_v18, 5  ;;  %v5607_v53 = vrot.slane %v1893_v22, 5  ;;  %v1900_v13 = vrot.slane %v1898_v21, 4  ;;  %v1736_v31 = vld [vmem:[#allocation2 + $0x7c] sm:$0x1] }
  0x99   :  { %4479 = vmatmul.mubr.bf16.gmra.mxu1 %v3895_v50  ;;  %v1863_v10 = vrot.slane %v1862_v2, 4  ;;  %v1903_v26 = vrot.slane %v1901_v17, 5  ;;  %v3897_v8 = vcombine.low %v5588_v0, %v5592_v44  ;;  %v1909_v58 = vrot.slane %v1907_v33, 5  ;;  %v1737_v0 = vld [vmem:[#allocation2 + $0x80] sm:$0xf]  ;;  %v4676_v7 = vld [vmem:[%s6055_s3 + $0x198] sm:$0xff]  }
  0x9a   :  { %4443 = vmatmul.mubr.bf16.vlgmr.msra.gmra.mxu0 %v3845_v16  ;;  %4527 = vmatpush3.bf16.msra.mxu1 %v4671_v32  ;;  %v1877_v61 = vrot.slane %v1876_v38, 4  ;;  %v1890_v52 = vor.u32 %v1889_v49, %v1886_v14  ;;  %v2190_v16 = vld [vmem:[#allocation2 + $0x80] sm:$0xe]  ;;  %v2275_v1 = vrot.slane %v1736_v31, 5  ;;  %v2279_v25 = vrot.slane %v1738_v43, 5 }
  0x9b   :  { %4491 = vmatpush3.bf16.msra.mxu0 %v4668_v34  ;;  %4446 = vmatprep.mubr.bf16.mxu0 %v3846_v63  ;;  %v1868_v4 = vsel %vm4856_vm8, %v1863_v10, %v5579_v60  ;;  %v1904_v57 = vor.u32 %v1903_v26, %v1900_v13  ;;  %v3872_v32 = vrot.slane %v2189_v11, 9  ;;  %v3873_v63 = vrot.slane %v2190_v16, 9  ;;  %v1739_v2 = vld [vmem:[#allocation2 + $0x88] sm:$0xf] }
  0x9c   :  { %4492 = vmatprep.subr.bf16.mxu0 %v4670_v27  ;;  %4528 = vmatprep.subr.bf16.mxu1 %v4673_v40  ;;  %v1882_v15 = vsel %vm4856_vm8, %v1877_v61, %v5581_v24  ;;  %v1891_v50 = vrot.slane %v1890_v52, 4  ;;  %v3847_v37 = vcombine.low %v1840_v42, %v1854_v46  ;;  %v480_v34 = vsel %vm4846_vm7, %v346_v9, %v479_v36  ;;  %v4677_v42 = vld [vmem:[%s6055_s3 + $0x1d0] sm:$0xff]   ;;  %v2744_v36 = vld [vmem:[#allocation2 + $0x18] sm:$0xf] }
  0x9d   :  { %4482 = vmatprep.mubr.bf16.mxu1 %v3896_v59  ;;  %v1905_v35 = vrot.slane %v1904_v57, 4  ;;  %v5631_v59 = vld [vmem:[#allocation2 + $0x8c] sm:$0x1]  ;;  %v1921_v62 = vshll.u32 %v1736_v31, 16  ;;  %v3848_v39 = vcombine.low %v1868_v4, %v1882_v15  ;;  %v2276_v28 = vsel %vm5109_vm11, %v3872_v32, %v2275_v1  ;;  %481 = vst [vmem:[#allocation2 + $0x94] sm:$0x1] %v480_v34 }
  0x9e   :  { %4529 = vmatpush3.bf16.msra.mxu1 %v4673_v40  ;;  %v2280_v12 = vsel %vm5109_vm11, %v3873_v63, %v2279_v25  ;;  %v1896_v9 = vsel %vm4856_vm8, %v1891_v50, %v5607_v53  ;;  %v3874_v60 = vrot.slane %v2191_v54, 9  ;;  %v2283_v51 = vrot.slane %v5631_v59, 5  ;;  %v4678_v53 = vld [vmem:[%s6055_s3 + $0x190] sm:$0xff]   ;;  %v4680_v34 = vld [vmem:[%s6055_s3 + $0x188] sm:$0xff]  }
  0x9f   :  { %4493 = vmatpush3.bf16.msra.mxu0 %v4670_v27  ;;  %4530 = vmatprep.subr.bf16.mxu1 %v5601_v45  ;;  %v1910_v23 = vsel %vm4856_vm8, %v1905_v35, %v1909_v58  ;;  %v3898_v46 = vcombine.low %v2276_v28, %v2280_v12  ;;  %v3875_v24 = vrot.slane %v2192_v3, 9  ;;  %v4679_v27 = vld [vmem:[%s6055_s3 + $0x1c8] sm:$0xff]   ;;  %v1912_v44 = vshrl.u32 %v1735_v6, 16  ;;  %v2742_v32 = vld [vmem:[#allocation2 + $0x10] sm:$0xf] }
  0xa0   :  { %4494 = vmatprep.subr.bf16.mxu0 %v4672_v29  ;;  %v1915_v48 = vshll.u32 %v1735_v6, 16  ;;  %v1923_v30 = vrot.slane %v1921_v62, 5  ;;  %v1926_v5 = vshrl.u32 %v1737_v0, 16  ;;  %v1929_v56 = vshll.u32 %v1737_v0, 16  ;;  %v5670_v63 = vld [vmem:[#allocation2 + $0x14] sm:$0x1] }
  0xa1   :  { %4483 = vmatmul.mubr.bf16.gmra.mxu1 %v3897_v8  ;;  %v1935_v47 = vshll.u32 %v1738_v43, 16  ;;  %v3849_v55 = vcombine.low %v1896_v9, %v1910_v23  ;;  %v1914_v18 = vrot.slane %v1912_v44, 4  ;;  %v1940_v38 = vshrl.u32 %v1739_v2, 16  ;;  %v5677_v62 = vld [vmem:[#allocation2 + $0x1c] sm:$0x1] }
  0xa2   :  { %4447 = vmatmul.mubr.bf16.gmra.mxu0 %v3847_v37  ;;  %4531 = vmatpush3.bf16.msra.mxu1 %v5601_v45  ;;  %v1917_v40 = vrot.slane %v1915_v48, 5  ;;  %v1928_v22 = vrot.slane %v1926_v5, 4  ;;  %v1931_v21 = vrot.slane %v1929_v56, 5  ;;  %v1741_v45 = vld [vmem:[#allocation2 + $0x90] sm:$0xf]  ;;  %v1943_v49 = vshll.u32 %v1739_v2, 16 }
  0xa3   :  { %4495 = vmatpush3.bf16.msra.mxu0 %v4672_v29  ;;  %4450 = vmatprep.mubr.bf16.mxu0 %v3848_v39  ;;  %v1937_v17 = vrot.slane %v1935_v47, 5  ;;  %v1949_v33 = vshll.u32 %v5631_v59, 16  ;;  %v1954_v10 = vshrl.u32 %v1741_v45, 16  ;;  %v4681_v29 = vld [vmem:[%s6055_s3 + $0x1c0] sm:$0xff]   ;;  %v2284_v26 = vsel %vm5109_vm11, %v3874_v60, %v2283_v51  ;;  %v5684_v23 = vld [vmem:[%s6055_s3 + $0x238] sm:$0xff]  }
  0xa4   :  { %4496 = vmatprep.subr.bf16.mxu0 %v4674_v20  ;;  %4532 = vmatprep.subr.bf16.mxu1 %v4677_v42  ;;  %v1918_v14 = vor.u32 %v1917_v40, %v1914_v18  ;;  %v1742_v13 = vld [vmem:[#allocation2 + $0x94] sm:$0x1]  ;;  %v1932_v8 = vor.u32 %v1931_v21, %v1928_v22  ;;  %v1942_v61 = vrot.slane %v1940_v38, 4  ;;  %v1957_v52 = vshll.u32 %v1741_v45, 16  ;;  %v5679_v9 = vld [vmem:[#allocation2 + $0x24] sm:$0x1] }
  0xa5   :  { %4486 = vmatprep.mubr.bf16.mxu1 %v3898_v46  ;;  %v2287_v58 = vrot.slane %v1742_v13, 5  ;;  %v1945_v43 = vrot.slane %v1943_v49, 5  ;;  %v1951_v4 = vrot.slane %v1949_v33, 5  ;;  %v1956_v11 = vrot.slane %v1954_v10, 4  ;;  %v2748_v51 = vld [vmem:[#allocation2 + $0x28] sm:$0xf] }
  0xa6   :  { %4533 = vmatpush3.bf16.msra.mxu1 %v4677_v42  ;;  %v1919_v31 = vrot.slane %v1918_v14, 4  ;;  %v1933_v57 = vrot.slane %v1932_v8, 4  ;;  %v1959_v16 = vrot.slane %v1957_v52, 5  ;;  %v1963_v1 = vshll.u32 %v1742_v13, 16  ;;  %v5690_v48 = vld [vmem:[#allocation2 + $0x2c] sm:$0x1] }
  0xa7   :  { %4497 = vmatpush3.bf16.msra.mxu0 %v4674_v20  ;;  %4534 = vmatprep.subr.bf16.mxu1 %v4679_v27  ;;  %v2288_v25 = vsel %vm5109_vm11, %v3875_v24, %v2287_v58  ;;  %v1946_v50 = vor.u32 %v1945_v43, %v1942_v61  ;;  %v2746_v20 = vld [vmem:[#allocation2 + $0x20] sm:$0xf]  ;;  %v2775_v12 = vshrl.u32 %v2742_v32, 16  ;;  %v2778_v3 = vshll.u32 %v2742_v32, 16  ;;  %v4684_v10 = vld [vmem:[#allocation2 + $0x10] ss:$8 sps:$4 sm:$0xff]  }
  0xa8   :  { %4498 = vmatprep.subr.bf16.mxu0 %v4676_v7  ;;  %v1924_v15 = vsel %vm4856_vm8, %v1919_v31, %v1923_v30  ;;  %v3899_v37 = vcombine.low %v2284_v26, %v2288_v25  ;;  %v1938_v35 = vsel %vm4856_vm8, %v1933_v57, %v1937_v17  ;;  %v1960_v59 = vor.u32 %v1959_v16, %v1956_v11  ;;  %v4682_v2 = vld [vmem:[%s6055_s3 + $0x180] sm:$0xff]   ;;  %v5704_v16 = vld [vmem:[#allocation2 + $0x34] sm:$0x1]  ;;  %v5706_v25 = vld [vmem:[#allocation2 + $0x3c] sm:$0x1] }
  0xa9   :  { %v1965_v54 = vrot.slane %v1963_v1, 5  ;;  %v3850_v39 = vcombine.low %v1924_v15, %v1938_v35  ;;  %v1947_v28 = vrot.slane %v1946_v50, 4  ;;  %v2784_v46 = vshll.u32 %v5670_v63, 16  ;;  %v4685_v43 = vld [vmem:[#allocation2 + $0x20] ss:$8 sps:$4 sm:$0xff]  }
  0xaa   :  { %4451 = vmatmul.mubr.bf16.gmra.mxu0 %v3849_v55  ;;  %4535 = vmatpush3.bf16.msra.mxu1 %v4679_v27  ;;  %v1961_v42 = vrot.slane %v1960_v59, 4  ;;  %v2789_v60 = vshrl.u32 %v2744_v36, 16  ;;  %v2792_v6 = vshll.u32 %v2744_v36, 16  ;;  %v2777_v27 = vrot.slane %v2775_v12, 4  ;;  %v2752_v1 = vld [vmem:[#allocation2 + $0x38] sm:$0xf] }
  0xab   :  { %4499 = vmatpush3.bf16.msra.mxu0 %v4676_v7  ;;  %4536 = vmatprep.subr.bf16.mxu1 %v4681_v29  ;;  %v1952_v24 = vsel %vm4856_vm8, %v1947_v28, %v1951_v4  ;;  %v2780_v0 = vrot.slane %v2778_v3, 5  ;;  %v2798_v44 = vshll.u32 %v5677_v62, 16  ;;  %v2786_v30 = vrot.slane %v2784_v46, 5  ;;  %v2750_v4 = vld [vmem:[#allocation2 + $0x30] sm:$0xf] }
  0xac   :  { %4500 = vmatprep.subr.bf16.mxu0 %v4678_v53  ;;  %4487 = vmatmul.mubr.bf16.gmra.mxu1 %v3899_v37  ;;  %v1966_v7 = vsel %vm4856_vm8, %v1961_v42, %v1965_v54  ;;  %v2791_v5 = vrot.slane %v2789_v60, 4  ;;  %v2794_v56 = vrot.slane %v2792_v6, 5  ;;  %v2803_v40 = vshrl.u32 %v2746_v20, 16  ;;  %v2754_v37 = vld [vmem:[#allocation2 + $0x40] sm:$0xf]  ;;  %v4686_v60 = vld [vmem:[%s6055_s3 + $0x230] sm:$0xff]  }
  0xad   :  { %4454 = vmatprep.mubr.bf16.mxu0 %v3850_v39  ;;  %v3851_v47 = vcombine.low %v1952_v24, %v1966_v7  ;;  %v2781_v55 = vor.u32 %v2780_v0, %v2777_v27  ;;  %v2800_v18 = vrot.slane %v2798_v44, 5  ;;  %v2806_v21 = vshll.u32 %v2746_v20, 16  ;;  %v5710_v20 = vld [vmem:[#allocation2 + $0x44] sm:$0x1]  ;;  %v2756_v42 = vld [vmem:[#allocation2 + $0x48] sm:$0xf] }
  0xae   :  { %4537 = vmatpush3.bf16.msra.mxu1 %v4681_v29  ;;  %v2795_v22 = vor.u32 %v2794_v56, %v2791_v5  ;;  %v2812_v17 = vshll.u32 %v5679_v9, 16  ;;  %v2817_v45 = vshrl.u32 %v2748_v51, 16  ;;  %v2805_v14 = vrot.slane %v2803_v40, 4  ;;  %v5720_v27 = vld [vmem:[#allocation2 + $0x4c] sm:$0x1] }
  0xaf   :  { %4501 = vmatpush3.bf16.msra.mxu0 %v4678_v53  ;;  %4586 = vmatprep.subr.bf16.mxu1 %v5684_v23  ;;  %v2782_v38 = vrot.slane %v2781_v55, 4  ;;  %v2820_v49 = vshll.u32 %v2748_v51, 16  ;;  %v2826_v33 = vshll.u32 %v5690_v48, 16  ;;  %v2808_v53 = vrot.slane %v2806_v21, 5  ;;  %v4687_v21 = vld [vmem:[%s6055_s3 + $0x228] sm:$0xff]  }
  0xb0   :  { %4502 = vmatprep.subr.bf16.mxu0 %v4680_v34  ;;  %v2796_v29 = vrot.slane %v2795_v22, 4  ;;  %v2819_v13 = vrot.slane %v2817_v45, 4  ;;  %v2814_v8 = vrot.slane %v2812_v17, 5  ;;  %v2831_v50 = vshrl.u32 %v2750_v4, 16 }
  0xb1   :  { %v2787_v26 = vsel %vm4856_vm8, %v2782_v38, %v2786_v30  ;;  %v2822_v61 = vrot.slane %v2820_v49, 5  ;;  %v2828_v52 = vrot.slane %v2826_v33, 5  ;;  %v2809_v31 = vor.u32 %v2808_v53, %v2805_v14  ;;  %v4688_v49 = vld [vmem:[#allocation2 + $0x30] ss:$8 sps:$4 sm:$0xff]  }
  0xb2   :  { %4455 = vmatmul.mubr.bf16.gmra.mxu0 %v3851_v47  ;;  %v2801_v58 = vsel %vm4856_vm8, %v2796_v29, %v2800_v18  ;;  %v2834_v32 = vshll.u32 %v2750_v4, 16  ;;  %v2840_v36 = vshll.u32 %v5704_v16, 16  ;;  %v2848_v59 = vshll.u32 %v2752_v1, 16  ;;  %v2760_v4 = vld [vmem:[#allocation2 + $0x68] sm:$0xf] }
  0xb3   :  { %4503 = vmatpush3.bf16.msra.mxu0 %v4680_v34  ;;  %4506 = vmatprep.mubr.bf16.mxu0 %v4684_v10  ;;  %v3956_v57 = vcombine.low %v2787_v26, %v2801_v58  ;;  %v2823_v11 = vor.u32 %v2822_v61, %v2819_v13  ;;  %v2810_v15 = vrot.slane %v2809_v31, 4  ;;  %v2845_v34 = vshrl.u32 %v2752_v1, 16  ;;  %v5734_v58 = vld [vmem:[#allocation2 + $0x64] sm:$0x1] }
  0xb4   :  { %4504 = vmatprep.subr.bf16.mxu0 %v4682_v2  ;;  %v2854_v54 = vshll.u32 %v5706_v25, 16  ;;  %v2833_v28 = vrot.slane %v2831_v50, 4  ;;  %v2836_v12 = vrot.slane %v2834_v32, 5  ;;  %v2842_v3 = vrot.slane %v2840_v36, 5 }
  0xb5   :  { %4538 = vmatprep.mubr.bf16.mxu1 %v3956_v57  ;;  %v2824_v35 = vrot.slane %v2823_v11, 4  ;;  %v2815_v39 = vsel %vm4856_vm8, %v2810_v15, %v2814_v8  ;;  %v2847_v6 = vrot.slane %v2845_v34, 4  ;;  %v2850_v51 = vrot.slane %v2848_v59, 5  ;;  %v5737_v57 = vld [vmem:[#allocation2 + $0x6c] sm:$0x1]  ;;  %v4690_v15 = vld [vmem:[%s6055_s3 + $0x220] sm:$0xff]  }
  0xb6   :  { %v2856_v24 = vrot.slane %v2854_v54, 5  ;;  %v2837_v44 = vor.u32 %v2836_v12, %v2833_v28  ;;  %v2859_v7 = vshrl.u32 %v2754_v37, 16  ;;  %v2862_v30 = vshll.u32 %v2754_v37, 16  ;;  %v2762_v37 = vld [vmem:[#allocation2 + $0x70] sm:$0xf] }
  0xb7   :  { %4505 = vmatpush3.bf16.msra.mxu0 %v4682_v2  ;;  %v2829_v46 = vsel %vm4856_vm8, %v2824_v35, %v2828_v52  ;;  %v2851_v5 = vor.u32 %v2850_v51, %v2847_v6  ;;  %v2868_v56 = vshll.u32 %v5710_v20, 16  ;;  %v2873_v47 = vshrl.u32 %v2756_v42, 16  ;;  %v2758_v52 = vld [vmem:[#allocation2 + $0x60] sm:$0xf]  ;;  %v5750_v51 = vld [vmem:[#allocation2 + $0x7c] sm:$0x1] }
  0xb8   :  { %4554 = vmatprep.subr.bf16.mxu0 %v5684_v23  ;;  %v3957_v0 = vcombine.low %v2815_v39, %v2829_v46  ;;  %v2876_v55 = vshll.u32 %v2756_v42, 16  ;;  %v2838_v18 = vrot.slane %v2837_v44, 4  ;;  %v2861_v40 = vrot.slane %v2859_v7, 4  ;;  %v5748_v39 = vld [vmem:[#allocation2 + $0x74] sm:$0x1] }
  0xb9   :  { %v2864_v2 = vrot.slane %v2862_v30, 5  ;;  %v2882_v22 = vshll.u32 %v5720_v27, 16  ;;  %v2852_v17 = vrot.slane %v2851_v5, 4  ;;  %v2870_v45 = vrot.slane %v2868_v56, 5  ;;  %v2764_v46 = vld [vmem:[#allocation2 + $0x78] sm:$0xf] }
  0xba   :  { %4507 = vmatmul.mubr.bf16.vlgmr.msra.gmra.mxu0 %v4685_v43  ;;  %4539 = vmatmul.mubr.bf16.vlgmr.msra.gmra.mxu1 %v3957_v0  ;;  %v2875_v38 = vrot.slane %v2873_v47, 4  ;;  %v2878_v14 = vrot.slane %v2876_v55, 5  ;;  %v2843_v33 = vsel %vm4856_vm8, %v2838_v18, %v2842_v3  ;;  %v3258_v53 = vrot.slane %v5670_v63, 5  ;;  %v4691_v56 = vld [vmem:[%s6055_s3 + $0x218] sm:$0xff]  }
  0xbb   :  { %4555 = vmatpush3.bf16.msra.mxu0 %v5684_v23  ;;  %4594 = vmatpush3.bf16.msra.mxu1 %v5684_v23  ;;  %v2865_v10 = vor.u32 %v2864_v2, %v2861_v40  ;;  %v2884_v29 = vrot.slane %v2882_v22, 5  ;;  %v2857_v13 = vsel %vm4856_vm8, %v2852_v17, %v2856_v24  ;;  %v4689_v23 = vld [vmem:[#allocation2 + $0x40] ss:$8 sps:$4 sm:$0xff]   ;;  %v3262_v31 = vrot.slane %v5677_v62, 5 }
  0xbc   :  { %4556 = vmatprep.subr.bf16.mxu0 %v4686_v60  ;;  %4587 = vmatprep.subr.bf16.mxu1 %v4686_v60  ;;  %v2879_v26 = vor.u32 %v2878_v14, %v2875_v38  ;;  %v3958_v8 = vcombine.low %v2843_v33, %v2857_v13  ;;  %v2887_v11 = vshrl.u32 %v2758_v52, 16  ;;  %v2890_v50 = vshll.u32 %v2758_v52, 16  ;;  %v4694_v33 = vld [vmem:[%s6055_s3 + $0x210] sm:$0xff]  }
  0xbd   :  { %4510 = vmatprep.mubr.bf16.mxu0 %v4688_v49  ;;  %v2866_v61 = vrot.slane %v2865_v10, 4  ;;  %v2896_v32 = vshll.u32 %v5734_v58, 16  ;;  %v2901_v36 = vshrl.u32 %v2760_v4, 16  ;;  %v2904_v59 = vshll.u32 %v2760_v4, 16  ;;  %v4693_v52 = vld [vmem:[#allocation2 + $0x70] ss:$8 sps:$4 sm:$0xff]  }
  0xbe   :  { %v2880_v43 = vrot.slane %v2879_v26, 4  ;;  %4542 = vmatprep.mubr.bf16.mxu1 %v3958_v8  ;;  %v2889_v34 = vrot.slane %v2887_v11, 4  ;;  %v2910_v54 = vshll.u32 %v5737_v57, 16  ;;  %v2892_v12 = vrot.slane %v2890_v50, 5  ;;  %v4692_v26 = vld [vmem:[#allocation2 + $0x60] ss:$8 sps:$4 sm:$0xff]  }
  0xbf   :  { %4557 = vmatpush3.bf16.msra.mxu0 %v4686_v60  ;;  %4595 = vmatpush3.bf16.msra.mxu1 %v4686_v60  ;;  %v2871_v1 = vsel %vm4856_vm8, %v2866_v61, %v2870_v45  ;;  %v2898_v3 = vrot.slane %v2896_v32, 5  ;;  %v2903_v42 = vrot.slane %v2901_v36, 4  ;;  %v2906_v60 = vrot.slane %v2904_v59, 5  ;;  %v2766_v50 = vld [vmem:[#allocation2 + $0x80] sm:$0xf] }
  0xc0   :  { %4558 = vmatprep.subr.bf16.mxu0 %v4687_v21  ;;  %4588 = vmatprep.subr.bf16.mxu1 %v4687_v21  ;;  %v2885_v35 = vsel %vm4856_vm8, %v2880_v43, %v2884_v29  ;;  %v2912_v6 = vrot.slane %v2910_v54, 5  ;;  %v2915_v24 = vshrl.u32 %v2762_v37, 16  ;;  %v2918_v0 = vshll.u32 %v2762_v37, 16  ;;  %v5771_v32 = vld [vmem:[#allocation2 + $0x84] sm:$0x1] }
  0xc1   :  { %v3959_v28 = vcombine.low %v2871_v1, %v2885_v35  ;;  %v2893_v44 = vor.u32 %v2892_v12, %v2889_v34  ;;  %v2924_v7 = vshll.u32 %v5748_v39, 16  ;;  %v2929_v30 = vshrl.u32 %v2764_v46, 16  ;;  %v2768_v36 = vld [vmem:[#allocation2 + $0x88] sm:$0xf]  ;;  %v5775_v35 = vld [vmem:[#allocation2 + $0x8c] sm:$0x1] }
  0xc2   :  { %4511 = vmatmul.mubr.bf16.gmra.mxu0 %v4689_v23  ;;  %v2932_v5 = vshll.u32 %v2764_v46, 16  ;;  %v2907_v47 = vor.u32 %v2906_v60, %v2903_v42  ;;  %v2917_v55 = vrot.slane %v2915_v24, 4  ;;  %v2920_v18 = vrot.slane %v2918_v0, 5  ;;  %v2770_v46 = vld [vmem:[#allocation2 + $0x90] sm:$0xf]  ;;  %v4695_v60 = vld [vmem:[%s6055_s3 + $0x208] sm:$0xff]  }
  0xc3   :  { %4559 = vmatpush3.bf16.msra.mxu0 %v4687_v21  ;;  %4596 = vmatpush3.bf16.msra.mxu1 %v4687_v21  ;;  %v2938_v40 = vshll.u32 %v5750_v51, 16  ;;  %v2894_v2 = vrot.slane %v2893_v44, 4  ;;  %v2926_v22 = vrot.slane %v2924_v7, 5  ;;  %v2931_v21 = vrot.slane %v2929_v30, 4  ;;  %v5782_v44 = vld [vmem:[#allocation2 + $0x94] sm:$0x1] }
  0xc4   :  { %4560 = vmatprep.subr.bf16.mxu0 %v4690_v15  ;;  %4543 = vmatmul.mubr.bf16.gmra.mxu1 %v3959_v28  ;;  %v2934_v17 = vrot.slane %v2932_v5, 5  ;;  %v2908_v45 = vrot.slane %v2907_v47, 4  ;;  %v2921_v38 = vor.u32 %v2920_v18, %v2917_v55  ;;  %v3298_v49 = vrot.slane %v5748_v39, 5  ;;  %v2772_v47 = vld [vmem:[#allocation2 + $0x98] sm:$0xf] }
  0xc5   :  { %4589 = vmatprep.subr.bf16.mxu1 %v4690_v15  ;;  %v2940_v14 = vrot.slane %v2938_v40, 5  ;;  %v2899_v10 = vsel %vm4856_vm8, %v2894_v2, %v2898_v3  ;;  %v3302_v13 = vrot.slane %v5750_v51, 5  ;;  %v3290_v23 = vrot.slane %v5734_v58, 5  ;;  %4514 = vmatprep.mubr.bf16.mxu0 %v4692_v26  ;;  %v5784_v40 = vld [vmem:[#allocation2 + $0x9c] sm:$0x1] }
  0xc6   :  { %v2935_v29 = vor.u32 %v2934_v17, %v2931_v21  ;;  %v2913_v8 = vsel %vm4856_vm8, %v2908_v45, %v2912_v6  ;;  %v2922_v61 = vrot.slane %v2921_v38, 4  ;;  %v3294_v43 = vrot.slane %v5737_v57, 5  ;;  %v3211_v58 = vld [vmem:[#allocation2 + $0x28] sm:$0xe] }
  0xc7   :  { %4561 = vmatpush3.bf16.msra.mxu0 %v4690_v15  ;;  %4597 = vmatpush3.bf16.msra.mxu1 %v4690_v15  ;;  %v3960_v4 = vcombine.low %v2899_v10, %v2913_v8  ;;  %v3266_v1 = vrot.slane %v5679_v9, 5  ;;  %v2943_v34 = vshrl.u32 %v2766_v50, 16  ;;  %v2946_v59 = vshll.u32 %v2766_v50, 16  ;;  %v4698_v10 = vld [vmem:[%s6055_s3 + $0x200] sm:$0xff]  }
  0xc8   :  { %4562 = vmatprep.subr.bf16.mxu0 %v4691_v56  ;;  %4590 = vmatprep.subr.bf16.mxu1 %v4691_v56  ;;  %v2936_v11 = vrot.slane %v2935_v29, 4  ;;  %v2927_v15 = vsel %vm4856_vm8, %v2922_v61, %v2926_v22  ;;  %v2952_v54 = vshll.u32 %v5771_v32, 16  ;;  %v2957_v12 = vshrl.u32 %v2768_v36, 16  ;;  %v4696_v50 = vld [vmem:[#allocation2 + $0x80] ss:$8 sps:$4 sm:$0xff]  }
  0xc9   :  { %4546 = vmatprep.mubr.bf16.mxu1 %v3960_v4  ;;  %v2960_v3 = vshll.u32 %v2768_v36, 16  ;;  %v2966_v42 = vshll.u32 %v5775_v35, 16  ;;  %v2945_v6 = vrot.slane %v2943_v34, 4  ;;  %v2948_v24 = vrot.slane %v2946_v59, 5  ;;  %v4697_v59 = vld [vmem:[#allocation2 + $0x90] ss:$8 sps:$4 sm:$0xff]  }
  0xca   :  { %4515 = vmatmul.mubr.bf16.gmra.mxu0 %v4693_v52  ;;  %v2941_v37 = vsel %vm4856_vm8, %v2936_v11, %v2940_v14  ;;  %v2954_v0 = vrot.slane %v2952_v54, 5  ;;  %v2971_v7 = vshrl.u32 %v2770_v46, 16  ;;  %v2959_v30 = vrot.slane %v2957_v12, 4 }
  0xcb   :  { %4563 = vmatpush3.bf16.msra.mxu0 %v4691_v56  ;;  %4598 = vmatpush3.bf16.msra.mxu1 %v4691_v56  ;;  %v3961_v28 = vcombine.low %v2927_v15, %v2941_v37  ;;  %v2962_v5 = vrot.slane %v2960_v3, 5  ;;  %v2968_v56 = vrot.slane %v2966_v42, 5  ;;  %v2974_v55 = vshll.u32 %v2770_v46, 16  ;;  %v3217_v42 = vld [vmem:[#allocation2 + $0x68] sm:$0xe] }
  0xcc   :  { %4591 = vmatprep.subr.bf16.mxu1 %v4694_v33  ;;  %4564 = vmatprep.subr.bf16.mxu0 %v4694_v33  ;;  %v2949_v18 = vor.u32 %v2948_v24, %v2945_v6  ;;  %v2973_v2 = vrot.slane %v2971_v7, 4  ;;  %v2980_v22 = vshll.u32 %v5782_v44, 16  ;;  %v2985_v21 = vshrl.u32 %v2772_v47, 16  ;;  %v3219_v24 = vld [vmem:[#allocation2 + $0x78] sm:$0xe] }
  0xcd   :  { %4547 = vmatmul.mubr.bf16.gmra.mxu1 %v3961_v28  ;;  %v2963_v17 = vor.u32 %v2962_v5, %v2959_v30  ;;  %v2976_v45 = vrot.slane %v2974_v55, 5  ;;  %v2988_v38 = vshll.u32 %v2772_v47, 16  ;;  %v2994_v14 = vshll.u32 %v5784_v40, 16  ;;  %4518 = vmatprep.mubr.bf16.mxu0 %v4696_v50  ;;  %v3216_v28 = vld [vmem:[#allocation2 + $0x60] sm:$0xe] }
  0xce   :  { %v2950_v29 = vrot.slane %v2949_v18, 4  ;;  %v2982_v26 = vrot.slane %v2980_v22, 5  ;;  %v3270_v8 = vrot.slane %v5690_v48, 5  ;;  %v3306_v54 = vrot.slane %v5771_v32, 5  ;;  %v3208_v7 = vld [vmem:[#allocation2 + $0x10] sm:$0xe] }
  0xcf   :  { %4565 = vmatpush3.bf16.msra.mxu0 %v4694_v33  ;;  %4599 = vmatpush3.bf16.msra.mxu1 %v4694_v33  ;;  %v2987_v33 = vrot.slane %v2985_v21, 4  ;;  %v2964_v61 = vrot.slane %v2963_v17, 4  ;;  %v2977_v52 = vor.u32 %v2976_v45, %v2973_v2  ;;  %v2990_v4 = vrot.slane %v2988_v38, 5  ;;  %v3210_v55 = vld [vmem:[#allocation2 + $0x20] sm:$0xe] }
  0xd0   :  { %4566 = vmatprep.subr.bf16.mxu0 %v4695_v60  ;;  %4592 = vmatprep.subr.bf16.mxu1 %v4695_v60  ;;  %v2996_v11 = vrot.slane %v2994_v14, 5  ;;  %v2955_v15 = vsel %vm4856_vm8, %v2950_v29, %v2954_v0  ;;  %v3980_v46 = vrot.slane %v3216_v28, 9  ;;  %v3981_v6 = vrot.slane %v3217_v42, 9  ;;  %v3220_v21 = vld [vmem:[#allocation2 + $0x80] sm:$0xe] }
  0xd1   :  { %v2969_v36 = vsel %vm4856_vm8, %v2964_v61, %v2968_v56  ;;  %v2978_v37 = vrot.slane %v2977_v52, 4  ;;  %v2991_v34 = vor.u32 %v2990_v4, %v2987_v33  ;;  %v3983_v5 = vrot.slane %v3219_v24, 9  ;;  %v3209_v56 = vld [vmem:[#allocation2 + $0x18] sm:$0xe]  ;;  %v3221_v45 = vld [vmem:[#allocation2 + $0x88] sm:$0xe] }
  0xd2   :  { %v3962_v48 = vcombine.low %v2955_v15, %v2969_v36  ;;  %4519 = vmatmul.mubr.bf16.gmra.mxu0 %v4697_v59  ;;  %v3291_v30 = vsel %vm5109_vm11, %v3980_v46, %v3290_v23  ;;  %v3972_v47 = vrot.slane %v3208_v7, 9  ;;  %v3295_v2 = vsel %vm5109_vm11, %v3981_v6, %v3294_v43  ;;  %v3222_v14 = vld [vmem:[#allocation2 + $0x90] sm:$0xe]  ;;  %v3213_v33 = vld [vmem:[#allocation2 + $0x38] sm:$0xe] }
  0xd3   :  { %4567 = vmatpush3.bf16.msra.mxu0 %v4695_v60  ;;  %4600 = vmatpush3.bf16.msra.mxu1 %v4695_v60  ;;  %v2983_v12 = vsel %vm4856_vm8, %v2978_v37, %v2982_v26  ;;  %v2992_v3 = vrot.slane %v2991_v34, 4  ;;  %v3218_v60 = vld [vmem:[#allocation2 + $0x70] sm:$0xe]  ;;  %v3973_v22 = vrot.slane %v3209_v56, 9  ;;  %v4008_v17 = vcombine.low %v3291_v30, %v3295_v2  ;;  %v3214_v61 = vld [vmem:[#allocation2 + $0x40] sm:$0xe] }
  0xd4   :  { %4568 = vmatprep.subr.bf16.mxu0 %v4698_v10  ;;  %4593 = vmatprep.subr.bf16.mxu1 %v4698_v10  ;;  %v3982_v0 = vrot.slane %v3218_v60, 9  ;;  %v3303_v23 = vsel %vm5109_vm11, %v3983_v5, %v3302_v13  ;;  %v3259_v57 = vsel %vm5109_vm11, %v3972_v47, %v3258_v53  ;;  %v3974_v43 = vrot.slane %v3210_v55, 9  ;;  %v3212_v29 = vld [vmem:[#allocation2 + $0x30] sm:$0xe] }
  0xd5   :  { %4550 = vmatprep.mubr.bf16.mxu1 %v3962_v48  ;;  %v2997_v32 = vsel %vm4856_vm8, %v2992_v3, %v2996_v11  ;;  %v3263_v39 = vsel %vm5109_vm11, %v3973_v22, %v3262_v31  ;;  %v3984_v38 = vrot.slane %v3220_v21, 9  ;;  %v3985_v13 = vrot.slane %v3221_v45, 9 }
  0xd6   :  { %v3963_v18 = vcombine.low %v2983_v12, %v2997_v32  ;;  %v3299_v19 = vsel %vm5109_vm11, %v3982_v0, %v3298_v49  ;;  %v3975_v49 = vrot.slane %v3211_v58, 9  ;;  %v4004_v51 = vcombine.low %v3259_v57, %v3263_v39 }
  0xd7   :  { %4569 = vmatpush3.bf16.msra.mxu0 %v4698_v10  ;;  %4601 = vmatpush3.bf16.msra.mxu1 %v4698_v10  ;;  %v3267_v63 = vsel %vm5109_vm11, %v3974_v43, %v3266_v1  ;;  %v3310_v53 = vrot.slane %v5775_v35, 5  ;;  %v3223_v10 = vld [vmem:[#allocation2 + $0x98] sm:$0xe]  ;;  %v4009_v26 = vcombine.low %v3299_v19, %v3303_v23  ;;  %v3307_v31 = vsel %vm5109_vm11, %v3984_v38, %v3306_v54  ;;  %v3215_v35 = vld [vmem:[#allocation2 + $0x48] sm:$0xe] }
  0xd8   :  { %4551 = vmatmul.mubr.bf16.gmra.mxu1 %v3963_v18  ;;  %v3271_v62 = vsel %vm5109_vm11, %v3975_v49, %v3270_v8  ;;  %4570 = vmatprep.mubr.bf16.mxu0 %v4004_v51  ;;  %v3986_v1 = vrot.slane %v3222_v14, 9  ;;  %v3314_v4 = vrot.slane %v5782_v44, 5  ;;  %v3987_v11 = vrot.slane %v3223_v10, 9 }
  0xd9   :  { %4578 = vmatprep.mubr.bf16.mxu1 %v4008_v17  ;;  %v4005_v52 = vcombine.low %v3267_v63, %v3271_v62  ;;  %v3311_v9 = vsel %vm5109_vm11, %v3985_v13, %v3310_v53  ;;  %v3318_v15 = vrot.slane %v5784_v40, 5  ;;  %v3976_v50 = vrot.slane %v3212_v29, 9 }
  0xda   :  { %v3274_v8 = vrot.slane %v5704_v16, 5  ;;  %v4010_v36 = vcombine.low %v3307_v31, %v3311_v9  ;;  %v3977_v37 = vrot.slane %v3213_v33, 9  ;;  %v3278_v34 = vrot.slane %v5706_v25, 5 }
  0xdb   :  { %4571 = vmatmul.mubr.bf16.vlgmr.msra.gmra.mxu0 %v4005_v52  ;;  %v3978_v59 = vrot.slane %v3214_v61, 9  ;;  %v3282_v48 = vrot.slane %v5710_v20, 5  ;;  %v3979_v28 = vrot.slane %v3215_v35, 9  ;;  %v3286_v40 = vrot.slane %v5720_v27, 5 }
  0xdc   :  { %v3275_v54 = vsel %vm5109_vm11, %v3976_v50, %v3274_v8  ;;  %v3279_v44 = vsel %vm5109_vm11, %v3977_v37, %v3278_v34  ;;  %v3315_v25 = vsel %vm5109_vm11, %v3986_v1, %v3314_v4  ;;  %v3319_v3 = vsel %vm5109_vm11, %v3987_v11, %v3318_v15 }
  0xdd   :  { %v4006_v12 = vcombine.low %v3275_v54, %v3279_v44  ;;  %v3283_v16 = vsel %vm5109_vm11, %v3978_v59, %v3282_v48  ;;  %v3287_v20 = vsel %vm5109_vm11, %v3979_v28, %v3286_v40  ;;  %v4011_v46 = vcombine.low %v3315_v25, %v3319_v3 }
  0xde   :  { %v4007_v42 = vcombine.low %v3283_v16, %v3287_v20 }
  0xdf   :  { %4574 = vmatprep.mubr.bf16.mxu0 %v4006_v12 }
  0xe0   :  { %4579 = vmatmul.mubr.bf16.vlgmr.msra.gmra.mxu1 %v4009_v26 }
  0xe1   :  { %4582 = vmatprep.mubr.bf16.mxu1 %v4010_v36 }
  0xe3   :  { %4575 = vmatmul.mubr.bf16.gmra.mxu0 %v4007_v42 }
  0xe8   :  { %4583 = vmatmul.mubr.bf16.gmra.mxu1 %v4011_v46 }
  0xea   :  { %v4348_v27 = vpop.f32.mrf.mxu1 }
  0xec   :  { %v1081_v60 = vpop.f32.mrf.mxu1 }
  0xee   :  { %v4349_v0 = vpop.f32.mrf.mxu1 }
  0xf0   :  { %v1084_v56 = vpop.f32.mrf.mxu1 }
  0xf3   :  { %v4316_v6 = vpop.f32.mrf.mxu0 }
  0xf4   :  { %v1090_v24 = vadd.f32 %v4348_v27, %v4316_v6 }
  0xf5   :  { %v888_v7 = vpop.f32.mrf.mxu0 }
  0xf6   :  { %v1082_v32 = vadd.f32 %v1081_v60, %v888_v7 }
  0xf7   :  { %v4317_v30 = vpop.f32.mrf.mxu0 }
  0xf8   :  { %v1093_v5 = vadd.f32 %v4349_v0, %v4317_v30 }
  0xf9   :  { %v891_v47 = vpop.f32.mrf.mxu0 }
  0xfa   :  { %v1085_v55 = vadd.f32 %v1084_v56, %v891_v47 }
 0x101   :  { %v4352_v18 = vpop.f32.mrf.mxu1 }
 0x103   :  { %v1097_v41 = vpop.f32.mrf.mxu1 }
 0x105   :  { %v4353_v22 = vpop.f32.mrf.mxu1 }
 0x107   :  { %v1100_v57 = vpop.f32.mrf.mxu1 }
 0x109   :  { %v4320_v2 = vpop.f32.mrf.mxu0 }
 0x10a   :  { %v1106_v19 = vadd.f32 %v4352_v18, %v4320_v2 }
 0x10b   :  { %v904_v58 = vpop.f32.mrf.mxu0 }
 0x10c   :  { %v1098_v21 = vadd.f32 %v1097_v41, %v904_v58 }
 0x10d   :  { %v4321_v17 = vpop.f32.mrf.mxu0 }
 0x10e   :  { %v1109_v23 = vadd.f32 %v4353_v22, %v4321_v17 }
 0x10f   :  { %v907_v43 = vpop.f32.mrf.mxu0 }
 0x110   :  { %v1101_v45 = vadd.f32 %v1100_v57, %v907_v43 }
 0x113   :  { %v4356_v39 = vpop.f32.mrf.mxu1 }
 0x115   :  { %v1113_v49 = vpop.f32.mrf.mxu1 }
 0x117   :  { %v4357_v51 = vpop.f32.mrf.mxu1 }
 0x119   :  { %v1116_v29 = vpop.f32.mrf.mxu1 }
 0x11b   :  { %v4324_v38 = vpop.f32.mrf.mxu0 }
 0x11c   :  { %v1122_v14 = vadd.f32 %v4356_v39, %v4324_v38 }
 0x11d   :  { %v920_v63 = vpop.f32.mrf.mxu0 }
 0x11e   :  { %v1114_v13 = vadd.f32 %v1113_v49, %v920_v63 }
 0x11f   :  { %v4325_v53 = vpop.f32.mrf.mxu0 }
 0x120   :  { %v1125_v10 = vadd.f32 %v4357_v51, %v4325_v53 }
 0x121   :  { %v923_v26 = vpop.f32.mrf.mxu0 }
 0x122   :  { %v1117_v62 = vadd.f32 %v1116_v29, %v923_v26 }
 0x129   :  { %v4360_v31 = vpop.f32.mrf.mxu1 }
 0x12b   :  { %v1129_v33 = vpop.f32.mrf.mxu1 }
 0x12d   :  { %v4361_v61 = vpop.f32.mrf.mxu1 }
 0x12f   :  { %v1132_v52 = vpop.f32.mrf.mxu1 }
 0x131   :  { %v4412_v9 = vpop.f32.mrf.mxu1 }
 0x132   :  { %v4328_v1 = vpop.f32.mrf.mxu0 }
 0x133   :  { %v1138_v4 = vadd.f32 %v4360_v31, %v4328_v1  ;;  %v1632_v35 = vpop.f32.mrf.mxu1 }
 0x134   :  { %v936_v11 = vpop.f32.mrf.mxu0 }
 0x135   :  { %v1130_v15 = vadd.f32 %v1129_v33, %v936_v11  ;;  %v4413_v50 = vpop.f32.mrf.mxu1 }
 0x136   :  { %v4329_v8 = vpop.f32.mrf.mxu0 }
 0x137   :  { %v1141_v36 = vadd.f32 %v4361_v61, %v4329_v8  ;;  %v1635_v37 = vpop.f32.mrf.mxu1 }
 0x138   :  { %v939_v34 = vpop.f32.mrf.mxu0 }
 0x139   :  { %v1133_v59 = vadd.f32 %v1132_v52, %v939_v34  ;;  %v4416_v54 = vpop.f32.mrf.mxu1 }
 0x13a   :  { %v4380_v48 = vpop.f32.mrf.mxu0 }
 0x13b   :  { %v1455_v28 = vadd.f32 %v4380_v48, %v1090_v24  ;;  %v1648_v44 = vpop.f32.mrf.mxu1 }
 0x13c   :  { %v1390_v40 = vpop.f32.mrf.mxu0 }
 0x13d   :  { %v1453_v12 = vadd.f32 %v1390_v40, %v1082_v32  ;;  %v4417_v16 = vpop.f32.mrf.mxu1  ;;  %v5854_v25 = vadd.f32 %v4412_v9, %v1455_v28 }
 0x13e   :  { %v4381_v3 = vpop.f32.mrf.mxu0 }
 0x13f   :  { %v1456_v20 = vadd.f32 %v4381_v3, %v1093_v5  ;;  %v1651_v42 = vpop.f32.mrf.mxu1  ;;  %v5856_v46 = vadd.f32 %v1632_v35, %v1453_v12 }
 0x140   :  { %v1393_v27 = vpop.f32.mrf.mxu0 }
 0x141   :  { %v1454_v60 = vadd.f32 %v1393_v27, %v1085_v55  ;;  %v4420_v6 = vpop.f32.mrf.mxu1  ;;  %v5858_v0 = vadd.f32 %v4413_v50, %v1456_v20 }
 0x142   :  { %v4384_v7 = vpop.f32.mrf.mxu0 }
 0x143   :  { %v1459_v30 = vadd.f32 %v4384_v7, %v1106_v19  ;;  %v1664_v56 = vpop.f32.mrf.mxu1  ;;  %v5860_v24 = vadd.f32 %v1635_v37, %v1454_v60 }
 0x144   :  { %v1406_v47 = vpop.f32.mrf.mxu0 }
 0x145   :  { %v1457_v32 = vadd.f32 %v1406_v47, %v1098_v21  ;;  %v4421_v18 = vpop.f32.mrf.mxu1  ;;  %v5862_v41 = vadd.f32 %v4416_v54, %v1459_v30 }
 0x146   :  { %v4385_v2 = vpop.f32.mrf.mxu0 }
 0x147   :  { %v1460_v5 = vadd.f32 %v4385_v2, %v1109_v23  ;;  %v1667_v22 = vpop.f32.mrf.mxu1  ;;  %v5864_v58 = vadd.f32 %v1648_v44, %v1457_v32 }
 0x148   :  { %v1409_v17 = vpop.f32.mrf.mxu0 }
 0x149   :  { %v1458_v55 = vadd.f32 %v1409_v17, %v1101_v45  ;;  %v4424_v57 = vpop.f32.mrf.mxu1  ;;  %v5866_v43 = vadd.f32 %v4417_v16, %v1460_v5 }
 0x14a   :  { %v4388_v39 = vpop.f32.mrf.mxu0 }
 0x14b   :  { %v1463_v19 = vadd.f32 %v4388_v39, %v1122_v14  ;;  %v1680_v49 = vpop.f32.mrf.mxu1  ;;  %v5868_v38 = vadd.f32 %v1651_v42, %v1458_v55 }
 0x14c   :  { %v1422_v51 = vpop.f32.mrf.mxu0 }
 0x14d   :  { %v1461_v21 = vadd.f32 %v1422_v51, %v1114_v13  ;;  %v4425_v63 = vpop.f32.mrf.mxu1  ;;  %v5870_v53 = vadd.f32 %v4420_v6, %v1463_v19 }
 0x14e   :  { %v4389_v29 = vpop.f32.mrf.mxu0 }
 0x14f   :  { %v1464_v23 = vadd.f32 %v4389_v29, %v1125_v10  ;;  %v1683_v26 = vpop.f32.mrf.mxu1  ;;  %v5872_v31 = vadd.f32 %v1664_v56, %v1461_v21 }
 0x150   :  { %v1425_v33 = vpop.f32.mrf.mxu0 }
 0x151   :  { %v1462_v45 = vadd.f32 %v1425_v33, %v1117_v62  ;;  %v5874_v61 = vpop.f32.mrf.mxu1  ;;  %v5876_v52 = vadd.f32 %v4421_v18, %v1464_v23 }
 0x152   :  { %v4392_v14 = vpop.f32.mrf.mxu0 }
 0x153   :  { %v1467_v9 = vadd.f32 %v4392_v14, %v1138_v4  ;;  %v5878_v1 = vpop.f32.mrf.mxu1  ;;  %v5880_v35 = vadd.f32 %v1667_v22, %v1462_v45 }
 0x154   :  { %v1438_v13 = vpop.f32.mrf.mxu0 }
 0x155   :  { %v1465_v11 = vadd.f32 %v1438_v13, %v1130_v15  ;;  %v5882_v50 = vpop.f32.mrf.mxu1  ;;  %v5884_v10 = vadd.f32 %v4424_v57, %v1467_v9 }
 0x156   :  { %v4393_v8 = vpop.f32.mrf.mxu0 }
 0x157   :  { %v1468_v37 = vadd.f32 %v4393_v8, %v1141_v36  ;;  %v5886_v34 = vpop.f32.mrf.mxu1  ;;  %v5888_v62 = vadd.f32 %v1680_v49, %v1465_v11 }
 0x158   :  { %v1441_v54 = vpop.f32.mrf.mxu0 }
 0x159   :  { %v1466_v48 = vadd.f32 %v1441_v54, %v1133_v59  ;;  %v5890_v28 = vpop.f32.mrf.mxu1  ;;  %v5892_v4 = vadd.f32 %v4425_v63, %v1468_v37 }
 0x15a   :  { %v4444_v44 = vpop.f32.mrf.mxu0 }
 0x15b   :  { %v5894_v40 = vpop.f32.mrf.mxu1  ;;  %v5896_v15 = vadd.f32 %v1683_v26, %v1466_v48 }
 0x15c   :  { %v2098_v12 = vpop.f32.mrf.mxu0 }
 0x15d   :  { %v5898_v16 = vpop.f32.mrf.mxu1 }
 0x15e   :  { %v4445_v3 = vpop.f32.mrf.mxu0 }
 0x15f   :  { %v5900_v36 = vpop.f32.mrf.mxu1 }
 0x160   :  { %v2101_v20 = vpop.f32.mrf.mxu0 }
 0x161   :  { %v5902_v42 = vpop.f32.mrf.mxu1 }
 0x162   :  { %v4448_v27 = vpop.f32.mrf.mxu0 }
 0x163   :  { %v5904_v59 = vpop.f32.mrf.mxu1 }
 0x164   :  { %v2114_v60 = vpop.f32.mrf.mxu0 }
 0x165   :  { %v5906_v6 = vpop.f32.mrf.mxu1 }
 0x166   :  { %v4449_v7 = vpop.f32.mrf.mxu0 }
 0x167   :  { %v5908_v56 = vpop.f32.mrf.mxu1 }
 0x168   :  { %v2117_v30 = vpop.f32.mrf.mxu0  ;;  %6070 = vst [vmem:[#allocation3_spill] sm:$0xff] %v5908_v56 }
 0x16a   :  { %v4452_v47 = vpop.f32.mrf.mxu0 }
 0x16c   :  { %v2130_v32 = vpop.f32.mrf.mxu0  ;;  %v5910_v18 = vpop.f32.mrf.mxu1 }
 0x16d   :  { %6071 = vst [vmem:[#allocation4_spill] sm:$0xff] %v5910_v18 }
 0x16e   :  { %v4453_v2 = vpop.f32.mrf.mxu0  ;;  %v5912_v22 = vpop.f32.mrf.mxu1 }
 0x16f   :  { %6072 = vst [vmem:[#allocation5_spill] sm:$0xff] %v5912_v22 }
 0x170   :  { %v2133_v5 = vpop.f32.mrf.mxu0  ;;  %v5914_v55 = vpop.f32.mrf.mxu1 }
 0x171   :  { %6073 = vst [vmem:[#allocation6_spill] sm:$0xff] %v5914_v55 }
 0x172   :  { %v4456_v17 = vpop.f32.mrf.mxu0  ;;  %v5916_v19 = vpop.f32.mrf.mxu1 }
 0x173   :  { %6074 = vst [vmem:[#allocation7_spill] sm:$0xff] %v5916_v19 }
 0x174   :  { %v2146_v57 = vpop.f32.mrf.mxu0 }
 0x176   :  { %v4457_v39 = vpop.f32.mrf.mxu0 }
 0x178   :  { %v2149_v49 = vpop.f32.mrf.mxu0 }
 0x17a   :  { %v4508_v51 = vpop.f32.mrf.mxu0  ;;  %v5918_v21 = vpop.f32.mrf.mxu1 }
 0x17b   :  { %6075 = vst [vmem:[#allocation8_spill] sm:$0xff] %v5918_v21 }
 0x17c   :  { %v2663_v63 = vpop.f32.mrf.mxu0  ;;  %v5920_v29 = vpop.f32.mrf.mxu1 }
 0x17d   :  { %6076 = vst [vmem:[#allocation9_spill] sm:$0xff] %v5920_v29 }
 0x17e   :  { %v4509_v23 = vpop.f32.mrf.mxu0  ;;  %v5922_v26 = vpop.f32.mrf.mxu1 }
 0x17f   :  { %6077 = vst [vmem:[#allocation10_spill] sm:$0xff] %v5922_v26 }
 0x180   :  { %v2666_v33 = vpop.f32.mrf.mxu0  ;;  %v5924_v45 = vpop.f32.mrf.mxu1 }
 0x181   :  { %6078 = vst [vmem:[#allocation11_spill] sm:$0xff] %v5924_v45 }
 0x182   :  { %v4512_v14 = vpop.f32.mrf.mxu0 }
 0x184   :  { %v2679_v9 = vpop.f32.mrf.mxu0  ;;  %v5926_v13 = vpop.f32.mrf.mxu1 }
 0x185   :  { %6079 = vst [vmem:[#allocation12_spill] sm:$0xff] %v5926_v13 }
 0x186   :  { %v4513_v11 = vpop.f32.mrf.mxu0  ;;  %v5928_v8 = vpop.f32.mrf.mxu1 }
 0x187   :  { %6080 = vst [vmem:[#allocation13_spill] sm:$0xff] %v5928_v8  ;;  %v2163_v8 = vadd.f32 %v4444_v44, %v5854_v25  ;;  %v2171_v25 = vadd.f32 %v4452_v47, %v5870_v53  ;;  %v2170_v53 = vadd.f32 %v2133_v5, %v5880_v35  ;;  %v6089_v5 = vld [vmem:[#allocation4_spill] sm:$0xff] }
 0x188   :  { %v5930_v37 = vpop.f32.mrf.mxu0  ;;  %v5932_v54 = vpop.f32.mrf.mxu1 }
 0x189   :  { %6081 = vst [vmem:[#allocation14_spill] sm:$0xff] %v5930_v37  ;;  %6082 = vst [vmem:[#allocation15_spill] sm:$0xff] %v5932_v54  ;;  %v2161_v54 = vadd.f32 %v2098_v12, %v5856_v46  ;;  %v2162_v37 = vadd.f32 %v2101_v20, %v5860_v24  ;;  %v2169_v46 = vadd.f32 %v2130_v32, %v5872_v31 }
 0x18a   :  { %v5934_v48 = vpop.f32.mrf.mxu1  ;;  %v4516_v19 = vpop.f32.mrf.mxu0  ;;  %v2485_v24 = vadd.f32 %v5874_v61, %v2163_v8  ;;  %v2175_v31 = vadd.f32 %v4456_v17, %v5884_v10  ;;  %v6095_v8 = vld [vmem:[#allocation7_spill] sm:$0xff] }
 0x18b   :  { %6083 = vst [vmem:[#allocation16_spill] sm:$0xff] %v5934_v48  ;;  %v2164_v48 = vadd.f32 %v4445_v3, %v5858_v0  ;;  %v2172_v0 = vadd.f32 %v4453_v2, %v5876_v52  ;;  %v2173_v52 = vadd.f32 %v2146_v57, %v5888_v62  ;;  %v2176_v62 = vadd.f32 %v4457_v39, %v5892_v4  ;;  %v6088_v2 = vld [vmem:[#allocation3_spill] sm:$0xff] }
 0x18c   :  { %v2695_v55 = vpop.f32.mrf.mxu0 }
 0x18d   :  { %v5936_v29 = vpop.f32.mrf.mxu1  ;;  %v2494_v35 = vadd.f32 %v5906_v6, %v2172_v0 }
 0x18e   :  { %6084 = vst [vmem:[#allocation17_spill] sm:$0xff] %v5936_v29  ;;  %v4517_v26 = vpop.f32.mrf.mxu0  ;;  %v2167_v29 = vadd.f32 %v4448_v27, %v5862_v41  ;;  %v2483_v41 = vadd.f32 %v5878_v1, %v2161_v54  ;;  %v2728_v27 = vadd.f32 %v4508_v51, %v2485_v24 }
 0x18f   :  { %v5938_v21 = vpop.f32.mrf.mxu1  ;;  %v2737_v51 = vadd.f32 %v4517_v26, %v2494_v35 }
 0x190   :  { %6085 = vst [vmem:[#allocation18_spill] sm:$0xff] %v5938_v21  ;;  %v2698_v45 = vpop.f32.mrf.mxu0  ;;  %v2165_v21 = vadd.f32 %v2114_v60, %v5864_v58  ;;  %v2486_v58 = vadd.f32 %v5882_v50, %v2164_v48  ;;  %v6096_v48 = vld [vmem:[#allocation11_spill] sm:$0xff] }
 0x191   :  { %v5940_v22 = vpop.f32.mrf.mxu1 }
 0x192   :  { %6086 = vst [vmem:[#allocation19_spill] sm:$0xff] %v5940_v22  ;;  %v5942_v13 = vpop.f32.mrf.mxu0  ;;  %v2168_v22 = vadd.f32 %v4449_v7, %v5866_v43  ;;  %v2484_v43 = vadd.f32 %v5886_v34, %v2162_v37  ;;  %v2487_v61 = vadd.f32 %v5894_v40, %v2165_v21  ;;  %v2493_v34 = vadd.f32 %v5902_v42, %v2171_v25  ;;  %v6091_v21 = vld [vmem:[#allocation8_spill] sm:$0xff] }
 0x193   :  { %6087 = vst [vmem:[#allocation20_spill] sm:$0xff] %v5942_v13  ;;  %v5945_v18 = vpop.f32.mrf.mxu1  ;;  %v2166_v13 = vadd.f32 %v2117_v30, %v5868_v38  ;;  %v2489_v38 = vadd.f32 %v5890_v28, %v2167_v29  ;;  %v2726_v28 = vadd.f32 %v2663_v63, %v2483_v41  ;;  %v2729_v60 = vadd.f32 %v4509_v23, %v2486_v58  ;;  %v6092_v29 = vld [vmem:[#allocation9_spill] sm:$0xff]  ;;  %v6099_v41 = vld [vmem:[#allocation14_spill] sm:$0xff] }
 0x194   :  { %v5951_v56 = vpop.f32.mrf.mxu0  ;;  %v2490_v1 = vadd.f32 %v5898_v16, %v2168_v22  ;;  %v2491_v7 = vadd.f32 %v5904_v59, %v2169_v46  ;;  %v2174_v40 = vadd.f32 %v2149_v49, %v5896_v15  ;;  %v2727_v30 = vadd.f32 %v2666_v33, %v2484_v43  ;;  %v6090_v22 = vld [vmem:[#allocation5_spill] sm:$0xff]  ;;  %v6093_v33 = vld [vmem:[#allocation10_spill] sm:$0xff] }
 0x195   :  { %v2488_v50 = vadd.f32 %v5900_v36, %v2166_v13  ;;  %v2732_v47 = vadd.f32 %v4512_v14, %v2489_v38  ;;  %v2730_v16 = vadd.f32 %v2679_v9, %v2487_v61  ;;  %v2492_v36 = vadd.f32 %v6088_v2, %v2170_v53  ;;  %v6094_v9 = vld [vmem:[#allocation6_spill] sm:$0xff]  ;;  %v6100_v43 = vld [vmem:[#allocation17_spill] sm:$0xff]  ;;  %v6102_v61 = vld [vmem:[#allocation15_spill] sm:$0xff] }
 0x196   :  { %v5957_v44 = vpop.f32.mrf.mxu0  ;;  %v2497_v42 = vadd.f32 %v6089_v5, %v2175_v31  ;;  %v2495_v17 = vadd.f32 %v6090_v22, %v2173_v52  ;;  %v2733_v59 = vadd.f32 %v4513_v11, %v2490_v1  ;;  %v2736_v6 = vadd.f32 %v4516_v19, %v2493_v34  ;;  %v6097_v11 = vld [vmem:[#allocation12_spill] sm:$0xff] }
 0x197   :  { %v3194_v63 = vadd.f32 %v6091_v21, %v2728_v27  ;;  %v2734_v39 = vadd.f32 %v2695_v55, %v2491_v7  ;;  %v2735_v15 = vadd.f32 %v2698_v45, %v2492_v36  ;;  %v3192_v23 = vadd.f32 %v6092_v29, %v2726_v28  ;;  %v6098_v55 = vld [vmem:[#allocation13_spill] sm:$0xff]  ;;  %v6103_v1 = vld [vmem:[#allocation18_spill] sm:$0xff] }
 0x198   :  { %v5962_v12 = vpop.f32.mrf.mxu1  ;;  %v5968_v3 = vpop.f32.mrf.mxu0  ;;  %v3195_v14 = vadd.f32 %v6093_v33, %v2729_v60  ;;  %v2498_v13 = vadd.f32 %v6094_v9, %v2176_v62  ;;  %v2496_v37 = vadd.f32 %v6095_v8, %v2174_v40  ;;  %v3193_v25 = vadd.f32 %v6096_v48, %v2727_v30 }
 0x199   :  { %v3198_v19 = vadd.f32 %v6097_v11, %v2732_v47  ;;  %v3196_v45 = vadd.f32 %v6098_v55, %v2730_v16  ;;  %v2731_v58 = vadd.f32 %v6099_v41, %v2488_v50  ;;  %v3202_v38 = vadd.f32 %v6100_v43, %v2736_v6  ;;  %v6101_v53 = vld [vmem:[#allocation19_spill] sm:$0xff] }
 0x19a   :  { %v5974_v20 = vpop.f32.mrf.mxu1  ;;  %v3203_v31 = vadd.f32 %v6101_v53, %v2737_v51  ;;  %v3199_v27 = vadd.f32 %v6102_v61, %v2733_v59  ;;  %v3200_v34 = vadd.f32 %v6103_v1, %v2734_v39  ;;  %v3201_v60 = vadd.f32 %v5945_v18, %v2735_v15  ;;  %v6104_v62 = vld [vmem:[#allocation20_spill] sm:$0xff] }
 0x19b   :  { %v4572_v32 = vpop.f32.mrf.mxu0  ;;  %v2740_v40 = vadd.f32 %v6104_v62, %v2497_v42  ;;  %v2738_v30 = vadd.f32 %v5951_v56, %v2495_v17  ;;  %v2741_v22 = vadd.f32 %v5957_v44, %v2498_v13  ;;  %v2739_v39 = vadd.f32 %v5968_v3, %v2496_v37  ;;  %v6105_v37 = vld [vmem:[#allocation16_spill] sm:$0xff] }
 0x19c   :  { %v5981_v10 = vpop.f32.mrf.mxu1  ;;  %v3516_v46 = vadd.f32 %v4572_v32, %v3194_v63 }
 0x19d   :  { %v3451_v4 = vpop.f32.mrf.mxu0  ;;  %v3206_v13 = vadd.f32 %v5962_v12, %v2740_v40  ;;  %v3204_v3 = vadd.f32 %v5974_v20, %v2738_v30  ;;  %v3207_v8 = vadd.f32 %v5981_v10, %v2741_v22 }
 0x19e   :  { %v5988_v57 = vpop.f32.mrf.mxu1  ;;  %v3514_v0 = vadd.f32 %v3451_v4, %v3192_v23  ;;  %v3634_v6 = vmul.f32 %v3516_v46, %v3516_v46 }
 0x19f   :  { %v4573_v54 = vpop.f32.mrf.mxu0  ;;  %v3205_v55 = vadd.f32 %v5988_v57, %v2739_v39 }
 0x1a0   :  { %v4580_v49 = vpop.f32.mrf.mxu1  ;;  %v3517_v24 = vadd.f32 %v4573_v54, %v3195_v14  ;;  %v3632_v16 = vmul.f32 %v3514_v0, %v3514_v0  ;;  %v3197_v54 = vadd.f32 %v6105_v37, %v2731_v58 }
 0x1a1   :  { %v3454_v52 = vpop.f32.mrf.mxu0  ;;  %v6006_v47 = vadd.f32 %v4580_v49, %v3202_v38 }
 0x1a2   :  { %v3483_v26 = vpop.f32.mrf.mxu1  ;;  %v4108_v7 = vpack.c.bf16 %v3517_v24, %v3516_v46  ;;  %v3515_v35 = vadd.f32 %v3454_v52, %v3193_v25  ;;  %v3635_v15 = vmul.f32 %v3517_v24, %v3517_v24 }
 0x1a3   :  { %v4576_v32 = vpop.f32.mrf.mxu0  ;;  %v3522_v59 = vadd.f32 %v3483_v26, %v3200_v34  ;;  %v3642_v30 = vmul.f32 %v6006_v47, %v6006_v47 }
 0x1a4   :  { %v4581_v28 = vpop.f32.mrf.mxu1  ;;  %4147 = vst [vmem:[%s6059_s4 + $0x8] sm:$0xff] %v4108_v7   ;;  %v4103_v36 = vpack.c.bf16 %v3515_v35, %v3514_v0  ;;  %v3610_v5 = vadd.f32 %v3515_v35, %v3514_v0  ;;  %v3633_v18 = vmul.f32 %v3515_v35, %v3515_v35  ;;  %v3520_v33 = vadd.f32 %v4576_v32, %v3198_v19 }
 0x1a5   :  { %v6008_v50 = vadd.f32 %v4581_v28, %v3203_v31  ;;  %v3467_v17 = vpop.f32.mrf.mxu0  ;;  %v3640_v28 = vmul.f32 %v3522_v59, %v3522_v59 }
 0x1a6   :  { %v3486_v2 = vpop.f32.mrf.mxu1  ;;  %4104 = vst [vmem:[%s6059_s4] sm:$0xff] %v4103_v36   ;;  %v3611_v21 = vadd.f32 %v3610_v5, %v3516_v46  ;;  %v3648_v63 = vadd.f32 %v3633_v18, %v3632_v16  ;;  %v3518_v4 = vadd.f32 %v3467_v17, %v3196_v45  ;;  %v3638_v57 = vmul.f32 %v3520_v33, %v3520_v33 }
 0x1a7   :  { %v4128_v56 = vpack.c.bf16 %v6008_v50, %v6006_v47  ;;  %v3523_v42 = vadd.f32 %v3486_v2, %v3201_v60  ;;  %v4577_v49 = vpop.f32.mrf.mxu0  ;;  %v3643_v2 = vmul.f32 %v6008_v50, %v6008_v50 }
 0x1a8   :  { %v4584_v51 = vpop.f32.mrf.mxu1  ;;  %v3649_v29 = vadd.f32 %v3648_v63, %v3634_v6  ;;  %v3612_v14 = vadd.f32 %v3611_v21, %v3517_v24  ;;  %v3521_v9 = vadd.f32 %v4577_v49, %v3199_v27  ;;  %v3636_v26 = vmul.f32 %v3518_v4, %v3518_v4 }
 0x1a9   :  { %4151 = vst [vmem:[%s6059_s4 + $0x28] sm:$0xff] %v4128_v56   ;;  %v4123_v44 = vpack.c.bf16 %v3523_v42, %v3522_v59  ;;  %v3470_v48 = vpop.f32.mrf.mxu0  ;;  %v3528_v0 = vadd.f32 %v4584_v51, %v3206_v13  ;;  %v3641_v35 = vmul.f32 %v3523_v42, %v3523_v42 }
 0x1aa   :  { %v3499_v23 = vpop.f32.mrf.mxu1  ;;  %v3613_v11 = vadd.f32 %v3612_v14, %v3518_v4  ;;  %v3650_v46 = vadd.f32 %v3649_v29, %v3635_v15  ;;  %v4118_v19 = vpack.c.bf16 %v3521_v9, %v3520_v33  ;;  %v3519_v45 = vadd.f32 %v3470_v48, %v3197_v54 }
 0x1ab   :  { %4150 = vst [vmem:[%s6059_s4 + $0x20] sm:$0xff] %v4123_v44   ;;  %v3526_v12 = vadd.f32 %v3499_v23, %v3204_v3  ;;  %v3639_v27 = vmul.f32 %v3521_v9, %v3521_v9 }
 0x1ac   :  { %v4585_v25 = vpop.f32.mrf.mxu1  ;;  %v3651_v41 = vadd.f32 %v3650_v46, %v3636_v26  ;;  %4149 = vst [vmem:[%s6059_s4 + $0x18] sm:$0xff] %v4118_v19   ;;  %v4113_v58 = vpack.c.bf16 %v3519_v45, %v3518_v4  ;;  %v3614_v38 = vadd.f32 %v3613_v11, %v3519_v45  ;;  %v3637_v53 = vmul.f32 %v3519_v45, %v3519_v45 }
 0x1ad   :  { %v3529_v24 = vadd.f32 %v4585_v25, %v3207_v8  ;;  %v3644_v18 = vmul.f32 %v3526_v12, %v3526_v12 }
 0x1ae   :  { %v3502_v43 = vpop.f32.mrf.mxu1  ;;  %4148 = vst [vmem:[%s6059_s4 + $0x10] sm:$0xff] %v4113_v58   ;;  %v3615_v52 = vadd.f32 %v3614_v38, %v3520_v33  ;;  %v3652_v61 = vadd.f32 %v3651_v41, %v3637_v53 }
 0x1af   :  { %v4138_v20 = vpack.c.bf16 %v3529_v24, %v3528_v0  ;;  %v3527_v10 = vadd.f32 %v3502_v43, %v3205_v55  ;;  %v3647_v63 = vmul.f32 %v3529_v24, %v3529_v24 }
 0x1b0   :  { %v3616_v1 = vadd.f32 %v3615_v52, %v3521_v9  ;;  %v3653_v34 = vadd.f32 %v3652_v61, %v3638_v57 }
 0x1b1   :  { %4153 = vst [vmem:[%s6059_s4 + $0x38] sm:$0xff] %v4138_v20   ;;  %v4133_v31 = vpack.c.bf16 %v3527_v10, %v3526_v12 }
 0x1b2   :  { %v3617_v60 = vadd.f32 %v3616_v1, %v3522_v59  ;;  %v3654_v7 = vadd.f32 %v3653_v34, %v3639_v27  ;;  %v3645_v59 = vmul.f32 %v3527_v10, %v3527_v10 }
 0x1b3   :  { %4152 = vst [vmem:[%s6059_s4 + $0x30] sm:$0xff] %v4133_v31  }
 0x1b4   :  { %v3618_v62 = vadd.f32 %v3617_v60, %v3523_v42  ;;  %v3655_v40 = vadd.f32 %v3654_v7, %v3640_v28  ;;  %v3646_v42 = vmul.f32 %v3528_v0, %v3528_v0 }
 0x1b6   :  { %v3619_v32 = vadd.f32 %v3618_v62, %v6006_v47  ;;  %v3656_v16 = vadd.f32 %v3655_v40, %v3641_v35 }
 0x1b8   :  { %v3620_v36 = vadd.f32 %v3619_v32, %v6008_v50  ;;  %v3657_v5 = vadd.f32 %v3656_v16, %v3642_v30 }
 0x1ba   :  { %v3621_v22 = vadd.f32 %v3620_v36, %v3526_v12  ;;  %v3658_v56 = vadd.f32 %v3657_v5, %v3643_v2 }
 0x1bc   :  { %v3622_v17 = vadd.f32 %v3621_v22, %v3527_v10  ;;  %v3659_v6 = vadd.f32 %v3658_v56, %v3644_v18 }
 0x1be   :  { %v3623_v51 = vadd.f32 %v3622_v17, %v3528_v0  ;;  %v3660_v21 = vadd.f32 %v3659_v6, %v3645_v59 }
 0x1c0   :  { %v3624_v4 = vadd.f32 %v3623_v51, %v3529_v24  ;;  %v3661_v39 = vadd.f32 %v3660_v21, %v3646_v42 }
 0x1c2   :  { %v3625_v47 = vrot.slane %v3624_v4, 4  ;;  %v3662_v44 = vadd.f32 %v3661_v39, %v3647_v63 }
 0x1c4   :  { %v3626_v15 = vadd.f32 %v3625_v47, %v3624_v4  ;;  %v3663_v49 = vrot.slane %v3662_v44, 4 }
 0x1c6   :  { %v3627_v29 = vrot.slane %v3626_v15, 2  ;;  %v3664_v23 = vadd.f32 %v3663_v49, %v3662_v44 }
 0x1c8   :  { %v3628_v50 = vadd.f32 %v3627_v29, %v3626_v15  ;;  %v3665_v33 = vrot.slane %v3664_v23, 2 }
 0x1ca   :  { %v3629_v14 = vrot.slane %v3628_v50, 1  ;;  %v3666_v9 = vadd.f32 %v3665_v33, %v3664_v23 }
 0x1cc   :  { %v3630_v13 = vadd.f32 %v3629_v14, %v3628_v50  ;;  %v3667_v3 = vrot.slane %v3666_v9, 1 }
 0x1ce   :  { %3631 = vst [vmem:[%s6060_s5] sm:$0x1] %v3630_v13  ;;  %v3668_v8 = vadd.f32 %v3667_v3, %v3666_v9 }
 0x1d0   :  { %3669 = vst [vmem:[%s6061_s6] sm:$0x1] %v3668_v8 }

// kernel: resblock_forward.3
= control target key start
LH: loop header
LB: loop body
LE: loop exit
PB: predicated region body
PF: predicated region fallthrough
CT: control target
= control target key end

     0   :  { %v10204_v0 = vmov 0.0   ;;  %vm7819_vm0 = vmmov 0   ;;  %vm528_vm1 = vsmask.f32 3328  ;;  %vm529_vm2 = vsmask.f32 7440  ;;  %s10194_s1 = inlined_call_operand.vmem [shape: bf16[9,128,128], index: 1, kind: input, shape index: {}]   ;;  %s10195_s0 = inlined_call_operand.vmem [shape: bf16[4,2,96,128], index: 0, kind: input, shape index: {}]   ;;  %s10196_s3 = inlined_call_operand.vmem [shape: bf16[128,128], index: 3, kind: input, shape index: {}]   ;;  %s10197_s2 = inlined_call_operand.vmem [shape: bf16[128,128], index: 2, kind: input, shape index: {}]   ;;  %s10198_s7 = inlined_call_operand.vmem [shape: bf16[128,128], index: 7, kind: output, shape index: {3}]   ;;  %s10199_s4 = inlined_call_operand.vmem [shape: bf16[128,128], index: 4, kind: output, shape index: {0}]   ;;  %s10200_s8 = inlined_call_operand.vmem [shape: f32[1,128], index: 8, kind: output, shape index: {4}]   ;;  %s10201_s9 = inlined_call_operand.vmem [shape: f32[1,128], index: 9, kind: output, shape index: {5}]   ;;  %s10202_s5 = inlined_call_operand.vmem [shape: f32[1,128], index: 5, kind: output, shape index: {1}]   ;;  %s10203_s6 = inlined_call_operand.vmem [shape: f32[1,128], index: 6, kind: output, shape index: {2}]  }
   0x1   :  { %7191 = vmatprep.subr.bf16.mxu0 %v10204_v0  ;;  %7243 = vmatprep.subr.bf16.mxu1 %v10204_v0  ;;  %v7694_v1 = vld [vmem:[%s10194_s1 + $0x78] sm:$0xff]   ;;  %v7696_v3 = vld [vmem:[%s10194_s1 + $0x70] sm:$0xff]   ;;  %v7698_v5 = vld [vmem:[%s10194_s1 + $0x68] sm:$0xff]   ;;  %vm2783_vm4 = vcmask 1042432   ;;  %vm2784_vm5 = vcmask 1046532  }
   0x2   :  { %v7695_v2 = vld [vmem:[%s10194_s1 + $0x38] sm:$0xff]   ;;  %7207 = vmatprep.mubr.msk.bf16.mxu0 %vm7819_vm0, %v10204_v0  ;;  %7259 = vmatprep.mubr.msk.bf16.mxu1 %vm7819_vm0, %v10204_v0  ;;  %v7697_v4 = vld [vmem:[%s10194_s1 + $0x30] sm:$0xff]   ;;  %v7699_v6 = vld [vmem:[%s10194_s1 + $0x28] sm:$0xff]  }
   0x3   :  { %7192 = vmatpush3.bf16.msra.mxu0 %v7694_v1  ;;  %7244 = vmatpush3.bf16.msra.mxu1 %v7695_v2  ;;  %v7700_v7 = vld [vmem:[%s10194_s1 + $0x60] sm:$0xff]   ;;  %v7702_v9 = vld [vmem:[%s10194_s1 + $0x58] sm:$0xff]   ;;  %v7704_v11 = vld [vmem:[%s10194_s1 + $0x50] sm:$0xff]  }
   0x4   :  { %7193 = vmatprep.subr.bf16.mxu0 %v10204_v0  ;;  %7245 = vmatprep.subr.bf16.mxu1 %v10204_v0  ;;  %v7701_v8 = vld [vmem:[%s10194_s1 + $0x20] sm:$0xff]   ;;  %v7703_v10 = vld [vmem:[%s10194_s1 + $0x18] sm:$0xff]   ;;  %v7705_v12 = vld [vmem:[%s10194_s1 + $0x10] sm:$0xff]  }
   0x5   :  { %v7706_v13 = vld [vmem:[%s10194_s1 + $0x48] sm:$0xff]   ;;  %v7708_v15 = vld [vmem:[%s10194_s1 + $0x40] sm:$0xff]   ;;  %v7712_v19 = vld [vmem:[%s10194_s1 + $0xb8] sm:$0xff]  }
   0x6   :  { %v7707_v14 = vld [vmem:[%s10194_s1 + $0x8] sm:$0xff]   ;;  %v7709_v16 = vld [vmem:[%s10194_s1] sm:$0xff]   ;;  %v7727_v20 = vld [vmem:[%s10194_s1 + $0xf8] sm:$0xff]  }
   0x7   :  { %7194 = vmatpush3.bf16.msra.mxu0 %v7696_v3  ;;  %7246 = vmatpush3.bf16.msra.mxu1 %v7697_v4  ;;  %v7710_v17 = vld [vmem:[%s10195_s0 + $0x60] sm:$0xff]   ;;  %v7715_v21 = vld [vmem:[%s10194_s1 + $0xb0] sm:$0xff]   ;;  %v7713_v23 = vld [vmem:[%s10195_s0 + $0x68] sm:$0xff]  }
   0x8   :  { %7195 = vmatprep.subr.bf16.mxu0 %v10204_v0  ;;  %7247 = vmatprep.subr.bf16.mxu1 %v10204_v0  ;;  %v7711_v18 = vld [vmem:[%s10195_s0] sm:$0xff]   ;;  %v7729_v22 = vld [vmem:[%s10194_s1 + $0xf0] sm:$0xff]   ;;  %v7714_v24 = vld [vmem:[%s10195_s0 + $0x8] sm:$0xff]  }
   0x9   :  { %v7718_v25 = vld [vmem:[%s10194_s1 + $0xa8] sm:$0xff]   ;;  %v7721_v27 = vld [vmem:[%s10194_s1 + $0xa0] sm:$0xff]   ;;  %v7716_v29 = vld [vmem:[%s10195_s0 + $0x70] sm:$0xff]  }
   0xa   :  { %v7732_v26 = vld [vmem:[%s10194_s1 + $0xe8] sm:$0xff]   ;;  %v7734_v28 = vld [vmem:[%s10194_s1 + $0xe0] sm:$0xff]   ;;  %v7717_v30 = vld [vmem:[%s10195_s0 + $0x10] sm:$0xff]  }
   0xb   :  { %7196 = vmatpush3.bf16.msra.mxu0 %v7698_v5  ;;  %7248 = vmatpush3.bf16.msra.mxu1 %v7699_v6  ;;  %v7724_v31 = vld [vmem:[%s10194_s1 + $0x98] sm:$0xff]   ;;  %v7728_v33 = vld [vmem:[%s10194_s1 + $0x90] sm:$0xff]   ;;  %v7733_v37 = vld [vmem:[%s10194_s1 + $0x88] sm:$0xff]  }
   0xc   :  { %7197 = vmatprep.subr.bf16.mxu0 %v10204_v0  ;;  %7249 = vmatprep.subr.bf16.mxu1 %v10204_v0  ;;  %v7737_v32 = vld [vmem:[%s10194_s1 + $0xd8] sm:$0xff]   ;;  %v7738_v34 = vld [vmem:[%s10194_s1 + $0xd0] sm:$0xff]   ;;  %v7742_v38 = vld [vmem:[%s10194_s1 + $0xc8] sm:$0xff]  }
   0xd   :  { %v7719_v35 = vld [vmem:[%s10195_s0 + $0x78] sm:$0xff]   ;;  %v7741_v39 = vld [vmem:[%s10194_s1 + $0x80] sm:$0xff]   ;;  %v510_v55 = vld [vmem:[%s10195_s0 + $0x8] sm:$0xf] }
   0xe   :  { %v7720_v36 = vld [vmem:[%s10195_s0 + $0x18] sm:$0xff]   ;;  %v7743_v40 = vld [vmem:[%s10194_s1 + $0xc0] sm:$0xff]   ;;  %v511_v60 = vld [vmem:[%s10195_s0 + $0xc] sm:$0xf]  ;;  %v551_v62 = vshll.u32 %v510_v55, 16  ;;  %v555_v1 = vshrl.u32 %v510_v55, 16 }
   0xf   :  { %7198 = vmatpush3.bf16.msra.mxu0 %v7700_v7  ;;  %7250 = vmatpush3.bf16.msra.mxu1 %v7701_v8  ;;  %v7722_v41 = vld [vmem:[%s10195_s0 + $0x80] ss:$16 sps:$4 sm:$0xff]   ;;  %v7725_v43 = vld [vmem:[%s10195_s0 + $0x94] sm:$0xff]   ;;  %v509_v47 = vld [vmem:[%s10195_s0 + $0x4] sm:$0xf]  ;;  %v561_v2 = vshll.u32 %v511_v60, 16 }
  0x10   :  { %7199 = vmatprep.subr.bf16.mxu0 %v10204_v0  ;;  %7251 = vmatprep.subr.bf16.mxu1 %v10204_v0  ;;  %v7723_v42 = vld [vmem:[%s10195_s0 + $0x20] ss:$16 sps:$4 sm:$0xff]   ;;  %v7726_v44 = vld [vmem:[%s10195_s0 + $0x34] sm:$0xff]   ;;  %v541_v51 = vshll.u32 %v509_v47, 16  ;;  %v545_v52 = vshrl.u32 %v509_v47, 16  ;;  %v7735_v58 = vld [vmem:[%s10195_s0 + $0xa4] sm:$0xff]  }
  0x11   :  { %v508_v45 = vld [vmem:[%s10195_s0] sm:$0xf]  ;;  %v7736_v59 = vld [vmem:[%s10195_s0 + $0x44] sm:$0xff]   ;;  %v565_v3 = vshrl.u32 %v511_v60, 16  ;;  %v7739_v4 = vld [vmem:[%s10195_s0 + $0xac] sm:$0xff]   ;;  %v553_v6 = vrot.slane %v551_v62, 5 }
  0x12   :  { %v7730_v46 = vld [vmem:[%s10195_s0 + $0x9c] sm:$0xff]   ;;  %v532_v49 = vshrl.u32 %v508_v45, 16  ;;  %v535_v50 = vshll.u32 %v508_v45, 16  ;;  %v543_v56 = vrot.slane %v541_v51, 5  ;;  %v547_v57 = vrot.slane %v545_v52, 4  ;;  %v7740_v8 = vld [vmem:[%s10195_s0 + $0x4c] sm:$0xff]   ;;  %vm8110_vm3 = vmor %vm528_vm1, %vm529_vm2 }
  0x13   :  { %7200 = vmatpush3.bf16.msra.mxu0 %v7702_v9  ;;  %7252 = vmatpush3.bf16.msra.mxu1 %v7703_v10  ;;  %v7731_v48 = vld [vmem:[%s10195_s0 + $0x3c] sm:$0xff]   ;;  %v512_v7 = vld [vmem:[%s10195_s0 + $0x10] sm:$0xf]  ;;  %v557_v10 = vrot.slane %v555_v1, 4  ;;  %vm8606_vm6 = vmor %vm2783_vm4, %vm2784_vm5 }
  0x14   :  { %7201 = vmatprep.subr.bf16.mxu0 %v10204_v0  ;;  %7253 = vmatprep.subr.bf16.mxu1 %v10204_v0  ;;  %v534_v53 = vrot.slane %v532_v49, 4  ;;  %v537_v54 = vrot.slane %v535_v50, 5  ;;  %v548_v63 = vor.u32 %v547_v57, %v543_v56  ;;  %v7757_v47 = vld [vmem:[%s10194_s1 + $0x170] sm:$0xff]  }
  0x16   :  { %v538_v61 = vor.u32 %v537_v54, %v534_v53  ;;  %v549_v9 = vrot.slane %v548_v63, 4  ;;  %v516_v53 = vld [vmem:[%s10195_s0 + $0x20] sm:$0xf]  ;;  %v7749_v54 = vld [vmem:[%s10194_s1 + $0x128] sm:$0xff]  }
  0x17   :  { %7202 = vmatpush3.bf16.msra.mxu0 %v7704_v11  ;;  %7254 = vmatpush3.bf16.msra.mxu1 %v7705_v12  ;;  %v563_v11 = vrot.slane %v561_v2, 5  ;;  %v567_v12 = vrot.slane %v565_v3, 4  ;;  %v615_v55 = vshrl.u32 %v516_v53, 16  ;;  %v611_v60 = vshll.u32 %v516_v53, 16  ;;  %v7751_v2 = vld [vmem:[%s10194_s1 + $0x120] sm:$0xff]  }
  0x18   :  { %7203 = vmatprep.subr.bf16.mxu0 %v10204_v0  ;;  %7255 = vmatprep.subr.bf16.mxu1 %v10204_v0  ;;  %v539_v5 = vrot.slane %v538_v61, 4  ;;  %v7752_v53 = vld [vmem:[%s10195_s0 + $0xe0] ss:$16 sps:$4 sm:$0xff]  }
  0x19   :  { %v617_v3 = vrot.slane %v615_v55, 4  ;;  %v523_v55 = vld [vmem:[%s10195_s0 + $0x44] sm:$0xf] }
  0x1b   :  { %7204 = vmatpush3.bf16.msra.mxu0 %v7706_v13  ;;  %7256 = vmatpush3.bf16.msra.mxu1 %v7707_v14  ;;  %v513_v13 = vld [vmem:[%s10195_s0 + $0x14] sm:$0xf] }
  0x1c   :  { %7205 = vmatprep.subr.bf16.mxu0 %v10204_v0  ;;  %7257 = vmatprep.subr.bf16.mxu1 %v10204_v0 }
  0x1f   :  { %7206 = vmatpush3.bf16.msra.mxu0 %v7708_v15  ;;  %7258 = vmatpush3.bf16.msra.mxu1 %v7709_v16  ;;  %v571_v15 = vshll.u32 %v512_v7, 16  ;;  %v575_v16 = vshrl.u32 %v512_v7, 16  ;;  %v519_v7 = vld [vmem:[%s10195_s0 + $0x34] sm:$0xf] }
  0x20   :  { %7295 = vmatprep.subr.bf16.mxu0 %v10204_v0  ;;  %7347 = vmatprep.subr.bf16.mxu1 %v10204_v0 }
  0x22   :  { %7208 = vmatmul.mubr.bf16.vlgmr.msra.gmra.mxu0 %v7710_v17  ;;  %7260 = vmatmul.mubr.bf16.vlgmr.msra.gmra.mxu1 %v7711_v18  ;;  %v558_v17 = vor.u32 %v557_v10, %v553_v6  ;;  %v581_v18 = vshll.u32 %v513_v13, 16 }
  0x23   :  { %7296 = vmatpush3.bf16.msra.mxu0 %v7712_v19  ;;  %7211 = vmatprep.mubr.msk.bf16.mxu0 %vm7819_vm0, %v10204_v0  ;;  %v544_v19 = vsel %vm8110_vm3, %v539_v5, %v543_v56  ;;  %v518_v56 = vld [vmem:[%s10195_s0 + $0x30] sm:$0xf] }
  0x24   :  { %7263 = vmatprep.mubr.msk.bf16.mxu1 %vm7819_vm0, %v10204_v0  ;;  %7297 = vmatprep.subr.bf16.mxu0 %v10204_v0  ;;  %v626_v63 = vshrl.u32 %v518_v56, 16  ;;  %v629_v1 = vshll.u32 %v518_v56, 16 }
  0x25   :  { %7348 = vmatpush3.bf16.msra.mxu1 %v7727_v20  ;;  %v554_v20 = vsel %vm8110_vm3, %v549_v9, %v553_v6  ;;  %v517_v6 = vld [vmem:[%s10195_s0 + $0x24] sm:$0x1] }
  0x26   :  { %7349 = vmatprep.subr.bf16.mxu1 %v10204_v0 }
  0x27   :  { %7298 = vmatpush3.bf16.msra.mxu0 %v7715_v21  ;;  %v568_v21 = vor.u32 %v567_v12, %v563_v11  ;;  %v628_v12 = vrot.slane %v626_v63, 4 }
  0x28   :  { %7299 = vmatprep.subr.bf16.mxu0 %v10204_v0 }
  0x29   :  { %7350 = vmatpush3.bf16.msra.mxu1 %v7729_v22  ;;  %v585_v22 = vshrl.u32 %v513_v13, 16  ;;  %v631_v13 = vrot.slane %v629_v1, 5  ;;  %v675_v1 = vshll.u32 %v523_v55, 16 }
  0x2a   :  { %7212 = vmatmul.mubr.bf16.gmra.mxu0 %v7713_v23  ;;  %7351 = vmatprep.subr.bf16.mxu1 %v10204_v0  ;;  %v7744_v23 = vld [vmem:[%s10194_s1 + $0x138] sm:$0xff]  }
  0x2b   :  { %7264 = vmatmul.mubr.bf16.gmra.mxu1 %v7714_v24  ;;  %7215 = vmatprep.mubr.msk.bf16.mxu0 %vm7819_vm0, %v10204_v0  ;;  %v7745_v24 = vld [vmem:[%s10195_s0 + $0xc0] sm:$0xff]  }
  0x2c   :  { %7267 = vmatprep.mubr.msk.bf16.mxu1 %vm7819_vm0, %v10204_v0  ;;  %7300 = vmatpush3.bf16.msra.mxu0 %v7718_v25  ;;  %v573_v25 = vrot.slane %v571_v15, 5  ;;  %v520_v15 = vld [vmem:[%s10195_s0 + $0x38] sm:$0xf] }
  0x2d   :  { %7301 = vmatprep.subr.bf16.mxu0 %v10204_v0  ;;  %7352 = vmatpush3.bf16.msra.mxu1 %v7732_v26  ;;  %v577_v26 = vrot.slane %v575_v16, 4 }
  0x2e   :  { %7353 = vmatprep.subr.bf16.mxu1 %v10204_v0 }
  0x30   :  { %7302 = vmatpush3.bf16.msra.mxu0 %v7721_v27  ;;  %v6539_v27 = vcombine.low %v544_v19, %v554_v20  ;;  %v635_v19 = vshll.u32 %v519_v7, 16  ;;  %v7763_v20 = vld [vmem:[%s10194_s1 + $0x158] sm:$0xff]  }
  0x31   :  { %7303 = vmatprep.subr.bf16.mxu0 %v10204_v0  ;;  %7354 = vmatpush3.bf16.msra.mxu1 %v7734_v28  ;;  %v559_v28 = vrot.slane %v558_v17, 4  ;;  %v621_v17 = vshll.u32 %v517_v6, 16 }
  0x32   :  { %7216 = vmatmul.mubr.bf16.gmra.mxu0 %v7716_v29  ;;  %7355 = vmatprep.subr.bf16.mxu1 %v10204_v0  ;;  %v8128_v29 = vrot.slane %v581_v18, 5  ;;  %v7753_v18 = vld [vmem:[%s10194_s1 + $0x118] sm:$0xff]  }
  0x33   :  { %7268 = vmatmul.mubr.bf16.gmra.mxu1 %v7717_v30  ;;  %7219 = vmatprep.mubr.msk.bf16.mxu0 %vm7819_vm0, %v10204_v0  ;;  %v569_v30 = vrot.slane %v568_v21, 4  ;;  %v639_v21 = vshrl.u32 %v519_v7, 16 }
  0x34   :  { %7271 = vmatprep.mubr.msk.bf16.mxu1 %vm7819_vm0, %v10204_v0  ;;  %7304 = vmatpush3.bf16.msra.mxu0 %v7724_v31  ;;  %v587_v31 = vrot.slane %v585_v22, 4  ;;  %v645_v22 = vshll.u32 %v520_v15, 16 }
  0x35   :  { %7305 = vmatprep.subr.bf16.mxu0 %v10204_v0  ;;  %7356 = vmatpush3.bf16.msra.mxu1 %v7737_v32  ;;  %v515_v32 = vld [vmem:[%s10195_s0 + $0x1c] sm:$0xf] }
  0x36   :  { %7357 = vmatprep.subr.bf16.mxu1 %v10204_v0 }
  0x38   :  { %7306 = vmatpush3.bf16.msra.mxu0 %v7728_v33  ;;  %v514_v33 = vld [vmem:[%s10195_s0 + $0x18] sm:$0xf] }
  0x39   :  { %7307 = vmatprep.subr.bf16.mxu0 %v10204_v0  ;;  %7358 = vmatpush3.bf16.msra.mxu1 %v7738_v34  ;;  %v578_v34 = vor.u32 %v577_v26, %v573_v25  ;;  %v649_v26 = vshrl.u32 %v520_v15, 16 }
  0x3a   :  { %7220 = vmatmul.mubr.bf16.gmra.mxu0 %v7719_v35  ;;  %7359 = vmatprep.subr.bf16.mxu1 %v10204_v0  ;;  %v595_v35 = vshrl.u32 %v514_v33, 16 }
  0x3b   :  { %7272 = vmatmul.mubr.bf16.gmra.mxu1 %v7720_v36  ;;  %7223 = vmatprep.mubr.msk.bf16.mxu0 %vm7819_vm0, %v10204_v0  ;;  %v7755_v36 = vld [vmem:[%s10194_s1 + $0x178] sm:$0xff]   ;;  %v579_v45 = vrot.slane %v578_v34, 4 }
  0x3c   :  { %7275 = vmatprep.mubr.msk.bf16.mxu1 %vm7819_vm0, %v10204_v0  ;;  %7308 = vmatpush3.bf16.msra.mxu0 %v7733_v37  ;;  %v601_v37 = vshll.u32 %v515_v32, 16  ;;  %v521_v34 = vld [vmem:[%s10195_s0 + $0x3c] sm:$0xf] }
  0x3d   :  { %7309 = vmatprep.subr.bf16.mxu0 %v10204_v0  ;;  %7360 = vmatpush3.bf16.msra.mxu1 %v7742_v38  ;;  %v605_v38 = vshrl.u32 %v515_v32, 16  ;;  %v584_v61 = vsel %vm8110_vm3, %v579_v45, %v8128_v29  ;;  %v7764_v32 = vld [vmem:[%s10194_s1 + $0x150] sm:$0xff]   ;;  %v659_v45 = vshrl.u32 %v521_v34, 16 }
  0x3e   :  { %7361 = vmatprep.subr.bf16.mxu1 %v10204_v0  ;;  %v8158_v49 = vrot.slane %v601_v37, 5 }
  0x3f   :  { %v607_v50 = vrot.slane %v605_v38, 4  ;;  %v651_v38 = vrot.slane %v649_v26, 4  ;;  %v661_v56 = vrot.slane %v659_v45, 4  ;;  %v7758_v26 = vld [vmem:[%s10195_s0 + $0xfc] sm:$0xff]  }
  0x40   :  { %7310 = vmatpush3.bf16.msra.mxu0 %v7741_v39  ;;  %v564_v39 = vsel %vm8110_vm3, %v559_v28, %v563_v11  ;;  %v613_v11 = vrot.slane %v611_v60, 5  ;;  %v623_v28 = vrot.slane %v621_v17, 5  ;;  %v526_v17 = vld [vmem:[%s10195_s0 + $0x50] sm:$0xf] }
  0x41   :  { %7362 = vmatpush3.bf16.msra.mxu1 %v7743_v40  ;;  %7399 = vmatprep.subr.bf16.mxu0 %v10204_v0  ;;  %v574_v40 = vsel %vm8110_vm3, %v569_v30, %v573_v25  ;;  %v632_v25 = vor.u32 %v631_v13, %v628_v12  ;;  %v7750_v30 = vld [vmem:[%s10195_s0 + $0xd8] sm:$0xff]   ;;  %v677_v12 = vrot.slane %v675_v1, 5  ;;  %v525_v13 = vld [vmem:[%s10195_s0 + $0x4c] sm:$0xf] }
  0x42   :  { %7224 = vmatmul.mubr.bf16.gmra.mxu0 %v7722_v41  ;;  %7451 = vmatprep.subr.bf16.mxu1 %v10204_v0  ;;  %v7747_v41 = vld [vmem:[%s10194_s1 + $0x130] sm:$0xff]   ;;  %v618_v16 = vor.u32 %v617_v3, %v613_v11 }
  0x43   :  { %7276 = vmatmul.mubr.bf16.gmra.mxu1 %v7723_v42  ;;  %7227 = vmatprep.mubr.msk.bf16.mxu0 %vm7819_vm0, %v10204_v0  ;;  %v588_v42 = vor.u32 %v587_v31, %v8128_v29  ;;  %v7756_v29 = vld [vmem:[%s10194_s1 + $0x110] sm:$0xff]   ;;  %v637_v31 = vrot.slane %v635_v19, 5  ;;  %v633_v37 = vrot.slane %v632_v25, 4  ;;  %v709_v25 = vshrl.u32 %v526_v17, 16 }
  0x44   :  { %7279 = vmatprep.mubr.msk.bf16.mxu1 %vm7819_vm0, %v10204_v0 }
  0x45   :  { %v589_v51 = vrot.slane %v588_v42, 4 }
  0x4a   :  { %7228 = vmatmul.mubr.bf16.gmra.mxu0 %v7725_v43  ;;  %v591_v43 = vshll.u32 %v514_v33, 16 }
  0x4b   :  { %7280 = vmatmul.mubr.bf16.gmra.mxu1 %v7726_v44  ;;  %7231 = vmatprep.mubr.msk.bf16.mxu0 %vm7819_vm0, %v10204_v0  ;;  %v7746_v44 = vld [vmem:[%s10195_s0 + $0xc8] sm:$0xff]  }
  0x4c   :  { %7283 = vmatprep.mubr.msk.bf16.mxu1 %vm7819_vm0, %v10204_v0  ;;  %v593_v52 = vrot.slane %v591_v43, 5 }
  0x4e   :  { %v594_v62 = vsel %vm8110_vm3, %v589_v51, %v593_v52  ;;  %v7768_v51 = vld [vmem:[%s10194_s1 + $0x140] sm:$0xff]  }
  0x4f   :  { %v6541_v9 = vcombine.low %v584_v61, %v594_v62  ;;  %v524_v61 = vld [vmem:[%s10195_s0 + $0x48] sm:$0xf] }
  0x50   :  { %v689_v6 = vshrl.u32 %v524_v61, 16 }
  0x52   :  { %7232 = vmatmul.mubr.bf16.gmra.mxu0 %v7730_v46  ;;  %v597_v46 = vrot.slane %v595_v35, 4  ;;  %v641_v35 = vrot.slane %v639_v21, 4  ;;  %v699_v21 = vshrl.u32 %v525_v13, 16 }
  0x53   :  { %7284 = vmatmul.mubr.bf16.gmra.mxu1 %v7731_v48  ;;  %7235 = vmatprep.mubr.msk.bf16.mxu0 %vm7819_vm0, %v10204_v0  ;;  %v6540_v48 = vcombine.low %v564_v39, %v574_v40  ;;  %v522_v39 = vld [vmem:[%s10195_s0 + $0x40] sm:$0xf]  ;;  %v7760_v40 = vld [vmem:[%s10194_s1 + $0x108] sm:$0xff]  }
  0x54   :  { %7287 = vmatprep.mubr.msk.bf16.mxu1 %vm7819_vm0, %v10204_v0  ;;  %v598_v57 = vor.u32 %v597_v46, %v593_v52  ;;  %v642_v43 = vor.u32 %v641_v35, %v637_v31  ;;  %v638_v46 = vsel %vm8110_vm3, %v633_v37, %v637_v31  ;;  %v6658_v35 = vld [vmem:[%s10195_s0 + $0xc0] sm:$0xf] }
  0x56   :  { %v599_v5 = vrot.slane %v598_v57, 4 }
  0x5a   :  { %7236 = vmatmul.mubr.bf16.gmra.mxu0 %v7735_v58  ;;  %v7759_v58 = vld [vmem:[%s10194_s1 + $0x168] sm:$0xff]  }
  0x5b   :  { %7288 = vmatmul.mubr.bf16.gmra.mxu1 %v7736_v59  ;;  %7239 = vmatprep.mubr.msk.bf16.mxu0 %vm7819_vm0, %v10204_v0  ;;  %v608_v59 = vor.u32 %v607_v50, %v8158_v49  ;;  %v7765_v50 = vld [vmem:[%s10194_s1 + $0x100] sm:$0xff]  }
  0x5c   :  { %7291 = vmatprep.mubr.msk.bf16.mxu1 %vm7819_vm0, %v10204_v0 }
  0x5d   :  { %v609_v10 = vrot.slane %v608_v59, 4 }
  0x62   :  { %7240 = vmatmul.mubr.bf16.gmra.mxu0 %v7739_v4  ;;  %v7748_v4 = vld [vmem:[%s10195_s0 + $0xd0] sm:$0xff]  }
  0x63   :  { %7292 = vmatmul.mubr.bf16.gmra.mxu1 %v7740_v8  ;;  %7311 = vmatprep.mubr.msk.bf16.mxu0 %vm7819_vm0, %v10204_v0  ;;  %v7761_v8 = vld [vmem:[%s10194_s1 + $0x160] sm:$0xff]  }
  0x64   :  { %7363 = vmatprep.mubr.msk.bf16.mxu1 %vm7819_vm0, %v10204_v0 }
  0x6a   :  { %7312 = vmatmul.mubr.bf16.vlgmr.msra.gmra.mxu0 %v6539_v27  ;;  %v619_v27 = vrot.slane %v618_v16, 4  ;;  %v691_v16 = vrot.slane %v689_v6, 4  ;;  %v6663_v6 = vld [vmem:[%s10195_s0 + $0xd4] sm:$0xf] }
  0x6b   :  { %7400 = vmatpush3.bf16.msra.mxu0 %v7744_v23  ;;  %7364 = vmatmul.mubr.bf16.vlgmr.msra.gmra.mxu1 %v7745_v24  ;;  %v604_v23 = vsel %vm8110_vm3, %v599_v5, %v8158_v49  ;;  %v614_v24 = vsel %vm8110_vm3, %v609_v10, %v613_v11  ;;  %v669_v49 = vshrl.u32 %v522_v39, 16  ;;  %v685_v5 = vshll.u32 %v524_v61, 16 }
  0x6c   :  { %7315 = vmatprep.mubr.msk.bf16.mxu0 %vm7819_vm0, %v10204_v0  ;;  %7367 = vmatprep.mubr.msk.bf16.mxu1 %vm7819_vm0, %v10204_v0  ;;  %v6542_v33 = vcombine.low %v604_v23, %v614_v24  ;;  %v624_v42 = vsel %vm8110_vm3, %v619_v27, %v623_v28  ;;  %v705_v24 = vshll.u32 %v526_v17, 16 }
  0x6d   :  { %7401 = vmatprep.subr.bf16.mxu0 %v10204_v0  ;;  %7452 = vmatpush3.bf16.msra.mxu1 %v7755_v36  ;;  %v647_v36 = vrot.slane %v645_v22, 5  ;;  %v6543_v52 = vcombine.low %v624_v42, %v638_v46  ;;  %v671_v60 = vrot.slane %v669_v49, 4  ;;  %v687_v15 = vrot.slane %v685_v5, 5 }
  0x6e   :  { %7453 = vmatprep.subr.bf16.mxu1 %v10204_v0  ;;  %v1486_v42 = vshrl.u32 %v6658_v35, 16 }
  0x6f   :  { %7402 = vmatpush3.bf16.msra.mxu0 %v7747_v41  ;;  %v7767_v41 = vld [vmem:[%s10194_s1 + $0x148] sm:$0xff]   ;;  %v692_v23 = vor.u32 %v691_v16, %v687_v15 }
  0x70   :  { %7403 = vmatprep.subr.bf16.mxu0 %v10204_v0 }
  0x71   :  { %7454 = vmatpush3.bf16.msra.mxu1 %v7757_v47  ;;  %v652_v47 = vor.u32 %v651_v38, %v647_v36  ;;  %v693_v31 = vrot.slane %v692_v23, 4  ;;  %v6665_v23 = vld [vmem:[%s10195_s0 + $0xdc] sm:$0xf] }
  0x72   :  { %7316 = vmatmul.mubr.bf16.gmra.mxu0 %v6540_v48  ;;  %7455 = vmatprep.subr.bf16.mxu1 %v10204_v0  ;;  %v665_v48 = vshll.u32 %v522_v39, 16 }
  0x73   :  { %7368 = vmatmul.mubr.bf16.gmra.mxu1 %v7746_v44  ;;  %7319 = vmatprep.mubr.msk.bf16.mxu0 %vm7819_vm0, %v10204_v0  ;;  %v655_v44 = vshll.u32 %v521_v34, 16  ;;  %v653_v57 = vrot.slane %v652_v47, 4  ;;  %v711_v34 = vrot.slane %v709_v25, 4  ;;  %v7762_v47 = vld [vmem:[%s10195_s0 + $0x104] sm:$0xff]  }
  0x74   :  { %7371 = vmatprep.mubr.msk.bf16.mxu1 %vm7819_vm0, %v10204_v0  ;;  %7404 = vmatpush3.bf16.msra.mxu0 %v7749_v54  ;;  %v643_v54 = vrot.slane %v642_v43, 4  ;;  %v667_v59 = vrot.slane %v665_v48, 5  ;;  %v1489_v43 = vshll.u32 %v6658_v35, 16  ;;  %v1559_v35 = vshrl.u32 %v6665_v23, 16 }
  0x75   :  { %7405 = vmatprep.subr.bf16.mxu0 %v10204_v0  ;;  %7456 = vmatpush3.bf16.msra.mxu1 %v7759_v58  ;;  %v657_v58 = vrot.slane %v655_v44, 5 }
  0x76   :  { %7457 = vmatprep.subr.bf16.mxu1 %v10204_v0  ;;  %v648_v62 = vsel %vm8110_vm3, %v643_v54, %v647_v36  ;;  %v6659_v36 = vld [vmem:[%s10195_s0 + $0xc4] sm:$0xf] }
  0x77   :  { %v662_v63 = vor.u32 %v661_v56, %v657_v58  ;;  %v658_v3 = vsel %vm8110_vm3, %v653_v57, %v657_v58  ;;  %v1495_v44 = vshll.u32 %v6659_v36, 16  ;;  %v1499_v45 = vshrl.u32 %v6659_v36, 16  ;;  %v6661_v56 = vld [vmem:[%s10195_s0 + $0xcc] sm:$0xf]  ;;  %v6666_v36 = vld [vmem:[%s10195_s0 + $0xe0] sm:$0xf] }
  0x78   :  { %7406 = vmatpush3.bf16.msra.mxu0 %v7751_v2  ;;  %v679_v2 = vshrl.u32 %v523_v55, 16  ;;  %v6544_v7 = vcombine.low %v648_v62, %v658_v3  ;;  %v1519_v1 = vshrl.u32 %v6661_v56, 16  ;;  %v7766_v3 = vld [vmem:[%s10195_s0 + $0x10c] sm:$0xff]  }
  0x79   :  { %7407 = vmatprep.subr.bf16.mxu0 %v10204_v0  ;;  %7458 = vmatpush3.bf16.msra.mxu1 %v7761_v8  ;;  %v7754_v8 = vld [vmem:[%s10195_s0 + $0xf4] sm:$0xff]   ;;  %v1497_v54 = vrot.slane %v1495_v44, 5  ;;  %v1501_v55 = vrot.slane %v1499_v45, 4 }
  0x7a   :  { %7320 = vmatmul.mubr.bf16.gmra.mxu0 %v6541_v9  ;;  %7459 = vmatprep.subr.bf16.mxu1 %v10204_v0  ;;  %v663_v9 = vrot.slane %v662_v63, 4  ;;  %v681_v10 = vrot.slane %v679_v2, 4  ;;  %v1515_v63 = vshll.u32 %v6661_v56, 16  ;;  %v6667_v56 = vld [vmem:[%s10195_s0 + $0xe4] sm:$0x1] }
  0x7b   :  { %7372 = vmatmul.mubr.bf16.gmra.mxu1 %v7748_v4  ;;  %7323 = vmatprep.mubr.msk.bf16.mxu0 %vm7819_vm0, %v10204_v0  ;;  %v672_v4 = vor.u32 %v671_v60, %v667_v59  ;;  %v1502_v62 = vor.u32 %v1501_v55, %v1497_v54 }
  0x7c   :  { %7375 = vmatprep.mubr.msk.bf16.mxu1 %vm7819_vm0, %v10204_v0  ;;  %7408 = vmatpush3.bf16.msra.mxu0 %v7753_v18  ;;  %v668_v18 = vsel %vm8110_vm3, %v663_v9, %v667_v59  ;;  %v682_v19 = vor.u32 %v681_v10, %v677_v12  ;;  %v1517_v9 = vrot.slane %v1515_v63, 5  ;;  %v1521_v10 = vrot.slane %v1519_v1, 4 }
  0x7d   :  { %7409 = vmatprep.subr.bf16.mxu0 %v10204_v0  ;;  %7460 = vmatpush3.bf16.msra.mxu1 %v7763_v20  ;;  %v673_v11 = vrot.slane %v672_v4, 4  ;;  %v695_v20 = vshll.u32 %v525_v13, 16  ;;  %v1535_v13 = vshll.u32 %v6663_v6, 16 }
  0x7e   :  { %7461 = vmatprep.subr.bf16.mxu1 %v10204_v0  ;;  %v683_v28 = vrot.slane %v682_v19, 4  ;;  %v1522_v19 = vor.u32 %v1521_v10, %v1517_v9 }
  0x7f   :  { %v678_v22 = vsel %vm8110_vm3, %v673_v11, %v677_v12  ;;  %v6662_v11 = vld [vmem:[%s10195_s0 + $0xd0] sm:$0xf]  ;;  %v8362_v25 = vrot.slane %v1535_v13, 5 }
  0x80   :  { %7410 = vmatpush3.bf16.msra.mxu0 %v7756_v29  ;;  %v6545_v27 = vcombine.low %v668_v18, %v678_v22  ;;  %v697_v29 = vrot.slane %v695_v20, 5  ;;  %v688_v37 = vsel %vm8110_vm3, %v683_v28, %v687_v15  ;;  %v1529_v12 = vshrl.u32 %v6662_v11, 16  ;;  %v7769_v22 = vld [vmem:[%s10195_s0 + $0x120] sm:$0xff]   ;;  %v7770_v28 = vld [vmem:[%s10194_s1 + $0x1b8] sm:$0xff]  }
  0x81   :  { %7411 = vmatprep.subr.bf16.mxu0 %v10204_v0  ;;  %7462 = vmatpush3.bf16.msra.mxu1 %v7764_v32  ;;  %v701_v32 = vrot.slane %v699_v21, 4  ;;  %v1539_v15 = vshrl.u32 %v6663_v6, 16  ;;  %v1525_v20 = vshll.u32 %v6662_v11, 16  ;;  %v6664_v21 = vld [vmem:[%s10195_s0 + $0xd8] sm:$0xf]  ;;  %v1575_v6 = vshll.u32 %v6667_v56, 16 }
  0x82   :  { %7324 = vmatmul.mubr.bf16.gmra.mxu0 %v6542_v33  ;;  %7463 = vmatprep.subr.bf16.mxu1 %v10204_v0  ;;  %v707_v33 = vrot.slane %v705_v24, 5  ;;  %v698_v39 = vsel %vm8110_vm3, %v693_v31, %v697_v29  ;;  %v1531_v24 = vrot.slane %v1529_v12, 4  ;;  %v1545_v31 = vshll.u32 %v6664_v21, 16 }
  0x83   :  { %7376 = vmatmul.mubr.bf16.gmra.mxu1 %v7750_v30  ;;  %7327 = vmatprep.mubr.msk.bf16.mxu0 %vm7819_vm0, %v10204_v0  ;;  %v527_v30 = vld [vmem:[%s10195_s0 + $0x54] sm:$0x1]  ;;  %v6546_v46 = vcombine.low %v688_v37, %v698_v39  ;;  %v7780_v37 = vld [vmem:[%s10194_s1 + $0x1f8] sm:$0xff]  }
  0x84   :  { %7379 = vmatprep.mubr.msk.bf16.mxu1 %vm7819_vm0, %v10204_v0  ;;  %7412 = vmatpush3.bf16.msra.mxu0 %v7760_v40  ;;  %v715_v38 = vshll.u32 %v527_v30, 16  ;;  %v702_v40 = vor.u32 %v701_v32, %v697_v29  ;;  %v1523_v32 = vrot.slane %v1522_v19, 4 }
  0x85   :  { %7413 = vmatprep.subr.bf16.mxu0 %v10204_v0  ;;  %7464 = vmatpush3.bf16.msra.mxu1 %v7767_v41  ;;  %v712_v41 = vor.u32 %v711_v34, %v707_v33  ;;  %v1555_v34 = vshll.u32 %v6665_v23, 16 }
  0x86   :  { %7465 = vmatprep.subr.bf16.mxu1 %v10204_v0  ;;  %v717_v48 = vrot.slane %v715_v38, 5  ;;  %v703_v49 = vrot.slane %v702_v40, 4 }
  0x87   :  { %v8385_v45 = vrot.slane %v1555_v34, 5  ;;  %v7788_v34 = vld [vmem:[%s10194_s1 + $0x1d8] sm:$0xff]  }
  0x88   :  { %7414 = vmatpush3.bf16.msra.mxu0 %v7765_v50  ;;  %v713_v50 = vrot.slane %v712_v41, 4  ;;  %v708_v57 = vsel %vm8110_vm3, %v703_v49, %v707_v33  ;;  %v1527_v33 = vrot.slane %v1525_v20, 5  ;;  %v6668_v49 = vld [vmem:[%s10195_s0 + $0xf0] sm:$0xf] }
  0x89   :  { %7466 = vmatpush3.bf16.msra.mxu1 %v7768_v51  ;;  %7503 = vmatprep.subr.bf16.mxu0 %v10204_v0  ;;  %v6660_v51 = vld [vmem:[%s10195_s0 + $0xc8] sm:$0xf]  ;;  %v1583_v1 = vshll.u32 %v6668_v49, 16 }
  0x8a   :  { %7328 = vmatmul.mubr.bf16.gmra.mxu0 %v6543_v52  ;;  %7555 = vmatprep.subr.bf16.mxu1 %v10204_v0  ;;  %v1488_v52 = vrot.slane %v1486_v42, 4  ;;  %v718_v58 = vsel %vm8110_vm3, %v713_v50, %v717_v48  ;;  %v1505_v59 = vshll.u32 %v6660_v51, 16  ;;  %v1509_v60 = vshrl.u32 %v6660_v51, 16  ;;  %v7772_v42 = vld [vmem:[%s10194_s1 + $0x1b0] sm:$0xff]   ;;  %v7771_v51 = vld [vmem:[%s10195_s0 + $0x128] sm:$0xff]  }
  0x8b   :  { %7380 = vmatmul.mubr.bf16.gmra.mxu1 %v7752_v53  ;;  %7331 = vmatprep.mubr.msk.bf16.mxu0 %vm7819_vm0, %v10204_v0  ;;  %v1491_v53 = vrot.slane %v1489_v43, 5  ;;  %v6547_v2 = vcombine.low %v708_v57, %v718_v58  ;;  %v1532_v38 = vor.u32 %v1531_v24, %v1527_v33  ;;  %v1547_v43 = vrot.slane %v1545_v31, 5  ;;  %v7782_v50 = vld [vmem:[%s10194_s1 + $0x1f0] sm:$0xff]  }
  0x8c   :  { %7383 = vmatprep.mubr.msk.bf16.mxu1 %vm7819_vm0, %v10204_v0  ;;  %v1507_v4 = vrot.slane %v1505_v59, 5  ;;  %v1511_v5 = vrot.slane %v1509_v60, 4  ;;  %v1528_v44 = vsel %vm8110_vm3, %v1523_v32, %v1527_v33  ;;  %v1569_v48 = vshrl.u32 %v6666_v36, 16  ;;  %v6669_v58 = vld [vmem:[%s10195_s0 + $0xf4] sm:$0xf] }
  0x8d   :  { %v1492_v61 = vor.u32 %v1491_v53, %v1488_v52  ;;  %v1533_v52 = vrot.slane %v1532_v38, 4  ;;  %v6674_v33 = vld [vmem:[%s10195_s0 + $0x108] sm:$0xf] }
  0x8e   :  { %v1512_v16 = vor.u32 %v1511_v5, %v1507_v4  ;;  %v1571_v63 = vrot.slane %v1569_v48, 4  ;;  %v7776_v5 = vld [vmem:[%s10194_s1 + $0x1a0] sm:$0xff]   ;;  %v1643_v48 = vshrl.u32 %v6674_v33, 16 }
  0x8f   :  { %v1538_v10 = vsel %vm8110_vm3, %v1533_v52, %v8362_v25  ;;  %v7775_v52 = vld [vmem:[%s10195_s0 + $0x138] sm:$0xff]  }
  0x90   :  { %v1513_v30 = vrot.slane %v1512_v16, 4  ;;  %v7773_v16 = vld [vmem:[%s10195_s0 + $0x130] sm:$0xff]  }
  0x92   :  { %7332 = vmatmul.mubr.bf16.gmra.mxu0 %v6544_v7  ;;  %v1493_v7 = vrot.slane %v1492_v61, 4  ;;  %v1518_v41 = vsel %vm8110_vm3, %v1513_v30, %v1517_v9  ;;  %v1580_v61 = vshrl.u32 %v6668_v49, 16  ;;  %v6672_v9 = vld [vmem:[%s10195_s0 + $0x100] sm:$0xf]  ;;  %v8452_v30 = vrot.slane %v1575_v6, 5 }
  0x93   :  { %7384 = vmatmul.mubr.bf16.gmra.mxu1 %v7754_v8  ;;  %7335 = vmatprep.mubr.msk.bf16.mxu0 %vm7819_vm0, %v10204_v0  ;;  %v1503_v8 = vrot.slane %v1502_v62, 4  ;;  %v6695_v57 = vcombine.low %v1518_v41, %v1528_v44  ;;  %v6670_v62 = vld [vmem:[%s10195_s0 + $0xf8] sm:$0xf]  ;;  %v1623_v23 = vshrl.u32 %v6672_v9, 16 }
  0x94   :  { %7387 = vmatprep.mubr.msk.bf16.mxu1 %vm7819_vm0, %v10204_v0  ;;  %v1498_v17 = vsel %vm8110_vm3, %v1493_v7, %v1497_v54  ;;  %v7774_v54 = vld [vmem:[%s10194_s1 + $0x1a8] sm:$0xff]   ;;  %v1599_v7 = vshll.u32 %v6670_v62, 16  ;;  %v1582_v13 = vrot.slane %v1580_v61, 4 }
  0x95   :  { %v1508_v18 = vsel %vm8110_vm3, %v1503_v8, %v1507_v4  ;;  %v1603_v8 = vshrl.u32 %v6670_v62, 16  ;;  %v7785_v62 = vld [vmem:[%s10194_s1 + $0x188] sm:$0xff]  }
  0x96   :  { %v6694_v29 = vcombine.low %v1498_v17, %v1508_v18  ;;  %v1585_v17 = vrot.slane %v1583_v1, 5  ;;  %v1589_v18 = vshll.u32 %v6669_v58, 16  ;;  %v1645_v1 = vrot.slane %v1643_v48, 4 }
  0x98   :  { %v1586_v31 = vor.u32 %v1585_v17, %v1582_v13  ;;  %v8454_v32 = vrot.slane %v1589_v18, 5 }
  0x9a   :  { %7336 = vmatmul.mubr.bf16.gmra.mxu0 %v6545_v27  ;;  %v1549_v27 = vshrl.u32 %v6664_v21, 16  ;;  %v7786_v21 = vld [vmem:[%s10194_s1 + $0x1e0] sm:$0xff]   ;;  %v1587_v49 = vrot.slane %v1586_v31, 4  ;;  %v8577_v31 = vld [vmem:[%s10195_s0 + $0xc] sm:$0xf] }
  0x9b   :  { %7388 = vmatmul.mubr.bf16.gmra.mxu1 %v7758_v26  ;;  %7339 = vmatprep.mubr.msk.bf16.mxu0 %vm7819_vm0, %v10204_v0  ;;  %v1541_v26 = vrot.slane %v1539_v15, 4  ;;  %v6671_v15 = vld [vmem:[%s10195_s0 + $0xfc] sm:$0xf] }
  0x9c   :  { %7391 = vmatprep.mubr.msk.bf16.mxu1 %vm7819_vm0, %v10204_v0  ;;  %v1551_v40 = vrot.slane %v1549_v27, 4  ;;  %v1613_v20 = vshrl.u32 %v6671_v15, 16 }
  0x9d   :  { %v1542_v39 = vor.u32 %v1541_v26, %v8362_v25  ;;  %v8446_v25 = vrot.slane %v1599_v7, 5  ;;  %v1605_v26 = vrot.slane %v1603_v8, 4  ;;  %v7792_v7 = vld [vmem:[%s10194_s1 + $0x1c8] sm:$0xff]  }
  0x9e   :  { %v1552_v55 = vor.u32 %v1551_v40, %v1547_v43 }
  0x9f   :  { %v1543_v53 = vrot.slane %v1542_v39, 4  ;;  %v1625_v39 = vrot.slane %v1623_v23, 4 }
  0xa0   :  { %v8417_v4 = vrot.slane %v1552_v55, 4  ;;  %v6676_v55 = vld [vmem:[%s10195_s0 + $0x110] sm:$0xf] }
  0xa1   :  { %v1548_v11 = vsel %vm8110_vm3, %v1543_v53, %v1547_v43  ;;  %v1663_v6 = vshrl.u32 %v6676_v55, 16 }
  0xa2   :  { %7340 = vmatmul.mubr.bf16.gmra.mxu0 %v6546_v46  ;;  %v1561_v46 = vrot.slane %v1559_v35, 4  ;;  %v6696_v24 = vcombine.low %v1538_v10, %v1548_v11  ;;  %v1558_v35 = vsel %vm8110_vm3, %v8417_v4, %v8385_v45  ;;  %v1897_v10 = vld [vmem:[%s10195_s0 + $0x4] sm:$0xf] }
  0xa3   :  { %7392 = vmatmul.mubr.bf16.gmra.mxu1 %v7762_v47  ;;  %7343 = vmatprep.mubr.msk.bf16.mxu0 %vm7819_vm0, %v10204_v0  ;;  %v1565_v47 = vshll.u32 %v6666_v36, 16  ;;  %v6673_v36 = vld [vmem:[%s10195_s0 + $0x104] sm:$0xf] }
  0xa4   :  { %7395 = vmatprep.mubr.msk.bf16.mxu1 %vm7819_vm0, %v10204_v0  ;;  %v1562_v59 = vor.u32 %v1561_v46, %v8385_v45  ;;  %v1633_v43 = vshrl.u32 %v6673_v36, 16  ;;  %v7781_v46 = vld [vmem:[%s10194_s1 + $0x190] sm:$0xff]  }
  0xa5   :  { %v8409_v60 = vrot.slane %v1565_v47, 5  ;;  %v1639_v47 = vshll.u32 %v6674_v33, 16  ;;  %v2761_v33 = vld [vmem:[%s10195_s0 + $0x4] sm:$0xe] }
  0xa6   :  { %v1563_v12 = vrot.slane %v1562_v59, 4  ;;  %v6675_v59 = vld [vmem:[%s10195_s0 + $0x10c] sm:$0xf] }
  0xa7   :  { %v1572_v27 = vor.u32 %v1571_v63, %v8409_v60  ;;  %v8506_v63 = vrot.slane %v1639_v47, 5 }
  0xa8   :  { %v1568_v40 = vsel %vm8110_vm3, %v1563_v12, %v8409_v60  ;;  %v1635_v60 = vrot.slane %v1633_v43, 4 }
  0xa9   :  { %v1573_v44 = vrot.slane %v1572_v27, 4  ;;  %v6697_v56 = vcombine.low %v1558_v35, %v1568_v40  ;;  %v1646_v18 = vor.u32 %v1645_v1, %v8506_v63 }
  0xaa   :  { %7344 = vmatmul.mubr.bf16.gmra.mxu0 %v6547_v2  ;;  %v1593_v2 = vshrl.u32 %v6669_v58, 16 }
  0xab   :  { %7396 = vmatmul.mubr.bf16.gmra.mxu1 %v7766_v3  ;;  %7415 = vmatprep.mubr.msk.bf16.mxu0 %vm7819_vm0, %v10204_v0  ;;  %v7784_v3 = vld [vmem:[%s10194_s1 + $0x1e8] sm:$0xff]   ;;  %v1578_v61 = vsel %vm8110_vm3, %v1573_v44, %v8452_v30  ;;  %v8603_v44 = vld [vmem:[%s10195_s0 + $0x10] sm:$0xf] }
  0xac   :  { %7467 = vmatprep.mubr.msk.bf16.mxu1 %vm7819_vm0, %v10204_v0  ;;  %v1595_v19 = vrot.slane %v1593_v2, 4  ;;  %v1653_v2 = vshrl.u32 %v6675_v59, 16 }
  0xae   :  { %v1596_v41 = vor.u32 %v1595_v19, %v8454_v32  ;;  %v7791_v19 = vld [vmem:[%s10194_s1 + $0x180] sm:$0xff]  }
  0xb2   :  { %7416 = vmatmul.mubr.bf16.vlgmr.msra.gmra.mxu0 %v7769_v22  ;;  %v1619_v22 = vshll.u32 %v6672_v9, 16 }
  0xb3   :  { %7504 = vmatpush3.bf16.msra.mxu0 %v7770_v28  ;;  %7468 = vmatmul.mubr.bf16.vlgmr.msra.gmra.mxu1 %v6694_v29  ;;  %v7778_v28 = vld [vmem:[%s10194_s1 + $0x198] sm:$0xff]   ;;  %v1609_v29 = vshll.u32 %v6671_v15, 16  ;;  %v1649_v15 = vshll.u32 %v6675_v59, 16 }
  0xb4   :  { %7419 = vmatprep.mubr.msk.bf16.mxu0 %vm7819_vm0, %v10204_v0  ;;  %7471 = vmatprep.mubr.msk.bf16.mxu1 %vm7819_vm0, %v10204_v0  ;;  %v8470_v38 = vrot.slane %v1619_v22, 5  ;;  %v8552_v22 = vld [vmem:[%s10195_s0 + $0x8] sm:$0xf] }
  0xb5   :  { %7505 = vmatprep.subr.bf16.mxu0 %v10204_v0  ;;  %7556 = vmatpush3.bf16.msra.mxu1 %v7780_v37  ;;  %v1615_v37 = vrot.slane %v1613_v20, 4  ;;  %v1611_v45 = vrot.slane %v1609_v29, 5  ;;  %v8545_v20 = vld [vmem:[%s10195_s0 + $0x114] sm:$0x1]  ;;  %v2788_v27 = vrot.slane %v8552_v22, 5  ;;  %v8589_v35 = vrot.slane %v1649_v15, 5 }
  0xb6   :  { %7557 = vmatprep.subr.bf16.mxu1 %v10204_v0  ;;  %v1669_v40 = vshll.u32 %v8545_v20, 16  ;;  %v1931_v43 = vshrl.u32 %v8552_v22, 16 }
  0xb7   :  { %7506 = vmatpush3.bf16.msra.mxu0 %v7772_v42  ;;  %v1606_v42 = vor.u32 %v1605_v26, %v8446_v25  ;;  %v1616_v53 = vor.u32 %v1615_v37, %v1611_v45  ;;  %v1918_v26 = vshrl.u32 %v1897_v10, 16  ;;  %v2791_v37 = vrot.slane %v8577_v31, 5 }
  0xb8   :  { %7507 = vmatprep.subr.bf16.mxu0 %v10204_v0  ;;  %v2790_v47 = vrot.slane %v2788_v27, 4 }
  0xb9   :  { %7558 = vmatpush3.bf16.msra.mxu1 %v7782_v50  ;;  %v1629_v50 = vshll.u32 %v6673_v36, 16  ;;  %v1607_v58 = vrot.slane %v1606_v42, 4  ;;  %v8517_v8 = vrot.slane %v1616_v53, 4  ;;  %v1921_v36 = vshll.u32 %v1897_v10, 16 }
  0xba   :  { %7420 = vmatmul.mubr.bf16.gmra.mxu0 %v7771_v51  ;;  %7559 = vmatprep.subr.bf16.mxu1 %v10204_v0  ;;  %v7789_v51 = vld [vmem:[%s10194_s1 + $0x1d0] sm:$0xff]   ;;  %v8596_v42 = vrot.slane %v1918_v26, 4  ;;  %v2794_v53 = vrot.slane %v8603_v44, 5 }
  0xbb   :  { %7472 = vmatmul.mubr.bf16.gmra.mxu1 %v6695_v57  ;;  %7423 = vmatprep.mubr.msk.bf16.mxu0 %vm7819_vm0, %v10204_v0  ;;  %v1597_v57 = vrot.slane %v1596_v41, 4  ;;  %v8511_v4 = vrot.slane %v1629_v50, 5  ;;  %v1612_v12 = vsel %vm8110_vm3, %v1607_v58, %v1611_v45  ;;  %v1622_v29 = vsel %vm8110_vm3, %v8517_v8, %v8470_v38  ;;  %v6744_v50 = vld [vmem:[%s10195_s0 + $0x64] sm:$0xf] }
  0xbc   :  { %7475 = vmatprep.mubr.msk.bf16.mxu1 %vm7819_vm0, %v10204_v0  ;;  %7508 = vmatpush3.bf16.msra.mxu0 %v7774_v54  ;;  %v1626_v54 = vor.u32 %v1625_v39, %v8470_v38  ;;  %v8592_v39 = vrot.slane %v1646_v18, 4  ;;  %v1927_v41 = vshll.u32 %v8552_v22, 16  ;;  %v8642_v58 = vsel %vm8606_vm6, %v2790_v47, %v2791_v37  ;;  %v7783_v38 = vld [vmem:[%s10195_s0 + $0x15c] sm:$0xff]  }
  0xbd   :  { %7509 = vmatprep.subr.bf16.mxu0 %v10204_v0  ;;  %7560 = vmatpush3.bf16.msra.mxu1 %v7784_v3  ;;  %v1592_v3 = vsel %vm8110_vm3, %v1587_v49, %v8454_v32  ;;  %v1602_v11 = vsel %vm8110_vm3, %v1597_v57, %v8446_v25  ;;  %v1636_v13 = vor.u32 %v1635_v60, %v8511_v4  ;;  %v7793_v25 = vld [vmem:[%s10194_s1 + $0x1c0] sm:$0xff]   ;;  %v8582_v32 = vld [vmem:[%s10196_s3 + $0x38] sm:$0xff]  }
  0xbe   :  { %7561 = vmatprep.subr.bf16.mxu1 %v10204_v0  ;;  %v8519_v9 = vrot.slane %v1626_v54, 4  ;;  %v6698_v17 = vcombine.low %v1578_v61, %v1592_v3  ;;  %v8626_v54 = vrot.slane %v1921_v36, 5  ;;  %v8650_v60 = vld [vmem:[%s10195_s0 + $0x1c] sm:$0xf]  ;;  %v8655_v61 = vld [vmem:[%s10195_s0 + $0x20] sm:$0xf] }
  0xbf   :  { %v2803_v10 = vrot.slane %v8650_v60, 5  ;;  %v8694_v36 = vld [vmem:[%s10195_s0 + $0x6c] sm:$0xf]  ;;  %v7805_v45 = vld [vmem:[%s10196_s3 + $0x20] sm:$0xff]  }
  0xc0   :  { %7510 = vmatpush3.bf16.msra.mxu0 %v7776_v5  ;;  %v1659_v5 = vshll.u32 %v6676_v55, 16  ;;  %v1632_v30 = vsel %vm8110_vm3, %v8519_v9, %v8511_v4  ;;  %v6745_v55 = vld [vmem:[%s10195_s0 + $0x68] sm:$0xf]  ;;  %v1937_v4 = vshll.u32 %v8577_v31, 16  ;;  %v2369_v20 = vshll.u32 %v8694_v36, 16 }
  0xc1   :  { %7511 = vmatprep.subr.bf16.mxu0 %v10204_v0  ;;  %7562 = vmatpush3.bf16.msra.mxu1 %v7786_v21  ;;  %v8547_v21 = vrot.slane %v1653_v2, 4  ;;  %v2796_v2 = vrot.slane %v2794_v53, 4  ;;  %v2363_v26 = vshrl.u32 %v6745_v55, 16 }
  0xc2   :  { %7424 = vmatmul.mubr.bf16.gmra.mxu0 %v7773_v16  ;;  %7563 = vmatprep.subr.bf16.mxu1 %v10204_v0  ;;  %v7777_v16 = vld [vmem:[%s10195_s0 + $0x140] ss:$16 sps:$4 sm:$0xff]   ;;  %v8555_v23 = vrot.slane %v1659_v5, 5  ;;  %v2350_v5 = vshrl.u32 %v6744_v50, 16 }
  0xc3   :  { %7476 = vmatmul.mubr.bf16.gmra.mxu1 %v6696_v24  ;;  %7427 = vmatprep.mubr.msk.bf16.mxu0 %vm7819_vm0, %v10204_v0  ;;  %v8557_v24 = vrot.slane %v1663_v6, 4  ;;  %v1656_v48 = vor.u32 %v8547_v21, %v8589_v35  ;;  %v8667_v6 = vld [vmem:[%s10195_s0 + $0x24] sm:$0xf]  ;;  %v2805_v21 = vrot.slane %v2803_v10, 4 }
  0xc4   :  { %7479 = vmatprep.mubr.msk.bf16.mxu1 %vm7819_vm0, %v10204_v0  ;;  %7512 = vmatpush3.bf16.msra.mxu0 %v7778_v28  ;;  %v8563_v28 = vcombine.low %v1602_v11, %v1612_v12  ;;  %v2806_v11 = vrot.slane %v8655_v61, 5  ;;  %v7779_v12 = vld [vmem:[%s10195_s0 + $0x154] sm:$0xff]   ;;  %v2352_v9 = vrot.slane %v2350_v5, 4  ;;  %v1947_v5 = vshll.u32 %v8603_v44, 16 }
  0xc5   :  { %7513 = vmatprep.subr.bf16.mxu0 %v10204_v0  ;;  %7564 = vmatpush3.bf16.msra.mxu1 %v7788_v34  ;;  %v8587_v34 = vrot.slane %v1636_v13, 4  ;;  %v1666_v49 = vor.u32 %v8557_v24, %v8555_v23  ;;  %v2353_v13 = vshll.u32 %v6744_v50, 16  ;;  %v8685_v24 = vrot.slane %v1927_v41, 5 }
  0xc6   :  { %7565 = vmatprep.subr.bf16.mxu1 %v10204_v0  ;;  %v2808_v22 = vrot.slane %v2806_v11, 4  ;;  %v8716_v47 = vrot.slane %v1656_v48, 4  ;;  %v1924_v48 = vor.u32 %v8626_v54, %v8596_v42 }
  0xc7   :  { %v8733_v8 = vrot.slane %v1666_v49, 4 }
  0xc8   :  { %7514 = vmatpush3.bf16.msra.mxu0 %v7781_v46  ;;  %v6797_v46 = vrot.slane %v2761_v33, 9  ;;  %v1933_v33 = vrot.slane %v1931_v43, 4  ;;  %v6700_v43 = vcombine.low %v1622_v29, %v1632_v30  ;;  %v2365_v29 = vrot.slane %v2363_v26, 4 }
  0xc9   :  { %7515 = vmatprep.subr.bf16.mxu0 %v10204_v0  ;;  %7566 = vmatpush3.bf16.msra.mxu1 %v7789_v51  ;;  %v8620_v51 = vld [vmem:[%s10195_s0 + $0x14] sm:$0xf]  ;;  %v1642_v30 = vsel %vm8110_vm3, %v8587_v34, %v8506_v63  ;;  %v6747_v34 = vld [vmem:[%s10195_s0 + $0x70] sm:$0xf]  ;;  %v8787_v26 = vrot.slane %v1937_v4, 5 }
  0xca   :  { %7428 = vmatmul.mubr.bf16.gmra.mxu0 %v7775_v52  ;;  %7567 = vmatprep.subr.bf16.mxu1 %v10204_v0  ;;  %v2793_v52 = vrot.slane %v2791_v37, 4  ;;  %v8638_v57 = vsel %vm8606_vm6, %v6797_v46, %v2788_v27  ;;  %v2797_v59 = vrot.slane %v8620_v51, 5  ;;  %v8700_v46 = vsel %vm8606_vm6, %v2805_v21, %v2806_v11  ;;  %v2762_v63 = vld [vmem:[%s10195_s0 + $0x34] sm:$0xe]  ;;  %v8805_v4 = vld [vmem:[%s10195_s0 + $0x3c] sm:$0xf] }
  0xcb   :  { %7480 = vmatmul.mubr.bf16.gmra.mxu1 %v6697_v56  ;;  %7431 = vmatprep.mubr.msk.bf16.mxu0 %vm7819_vm0, %v10204_v0  ;;  %v8634_v56 = vld [vmem:[%s10195_s0 + $0x18] sm:$0xf]  ;;  %v1934_v49 = vor.u32 %v1933_v33, %v8685_v24  ;;  %v6798_v42 = vrot.slane %v2762_v63, 9  ;;  %v1957_v11 = vshll.u32 %v8620_v51, 16  ;;  %v8789_v33 = vrot.slane %v2369_v20, 5 }
  0xcc   :  { %7483 = vmatprep.mubr.msk.bf16.mxu1 %vm7819_vm0, %v10204_v0  ;;  %7516 = vmatpush3.bf16.msra.mxu0 %v7785_v62  ;;  %v8661_v1 = vsel %vm8606_vm6, %v2793_v52, %v2794_v53  ;;  %v2800_v3 = vrot.slane %v8634_v56, 5  ;;  %v8676_v15 = vsel %vm8606_vm6, %v2796_v2, %v2797_v59  ;;  %v8725_v52 = vrot.slane %v1669_v40, 5 }
  0xcd   :  { %7517 = vmatprep.subr.bf16.mxu0 %v10204_v0  ;;  %7568 = vmatpush3.bf16.msra.mxu1 %v7792_v7  ;;  %v2799_v7 = vrot.slane %v2797_v59, 4  ;;  %v2355_v53 = vrot.slane %v2353_v13, 5  ;;  %v1652_v40 = vsel %vm8110_vm3, %v8592_v39, %v8589_v35  ;;  %v8757_v59 = vld [vmem:[%s10195_s0 + $0x38] sm:$0xf] }
  0xce   :  { %7569 = vmatprep.subr.bf16.mxu1 %v10204_v0  ;;  %v2816_v54 = vrot.slane %v8757_v59, 5 }
  0xcf   :  { %v2356_v2 = vor.u32 %v2355_v53, %v2352_v9  ;;  %v8794_v9 = vld [vmem:[%s10195_s0 + $0x74] sm:$0xf] }
  0xd0   :  { %7518 = vmatpush3.bf16.msra.mxu0 %v7791_v19  ;;  %v8683_v19 = vsel %vm8606_vm6, %v2799_v7, %v2800_v3  ;;  %v1951_v7 = vshrl.u32 %v8603_v44, 16  ;;  %v8778_v13 = vsel %vm8606_vm6, %v6798_v42, %v2816_v54 }
  0xd1   :  { %7570 = vmatpush3.bf16.msra.mxu1 %v7793_v25  ;;  %7607 = vmatprep.subr.bf16.mxu0 %v10204_v0  ;;  %v2359_v25 = vshll.u32 %v6745_v55, 16  ;;  %v8752_v55 = vld [vmem:[%s10195_s0 + $0x28] sm:$0x1]  ;;  %10221 = vst [vmem:[#allocation3_spill] sm:$0xff] %v8778_v13  ;;  %v8798_v53 = vrot.slane %v2356_v2, 4 }
  0xd2   :  { %7432 = vmatmul.mubr.bf16.gmra.mxu0 %v7777_v16  ;;  %7659 = vmatprep.subr.bf16.mxu1 %v8582_v32  ;;  %v2802_v16 = vrot.slane %v2800_v3, 4  ;;  %v2812_v39 = vrot.slane %v8752_v55, 5  ;;  %v1941_v3 = vshrl.u32 %v8577_v31, 16  ;;  %v2383_v31 = vshrl.u32 %v6747_v34, 16 }
  0xd3   :  { %7484 = vmatmul.mubr.bf16.gmra.mxu1 %v6698_v17  ;;  %7435 = vmatprep.mubr.msk.bf16.mxu0 %vm7819_vm0, %v10204_v0  ;;  %v2809_v17 = vrot.slane %v8667_v6, 5 }
  0xd4   :  { %7487 = vmatprep.mubr.msk.bf16.mxu1 %vm7819_vm0, %v10204_v0  ;;  %v8689_v27 = vsel %vm8606_vm6, %v2802_v16, %v2803_v10  ;;  %v2373_v16 = vshrl.u32 %v8694_v36, 16 }
  0xd5   :  { %v8704_v41 = vsel %vm8606_vm6, %v2808_v22, %v2809_v17  ;;  %v2811_v35 = vrot.slane %v2809_v17, 4  ;;  %v2379_v17 = vshll.u32 %v6747_v34, 16  ;;  %v8783_v22 = vrot.slane %v1924_v48, 4 }
  0xd6   :  { %v1953_v48 = vrot.slane %v1951_v7, 4  ;;  %v8816_v34 = vrot.slane %v1957_v11, 5  ;;  %v2375_v42 = vrot.slane %v2373_v16, 4  ;;  %v8825_v7 = vld [vmem:[%s10195_s0 + $0x40] sm:$0xf]  ;;  %v1672_v11 = vsel %vm8110_vm3, %v8733_v8, %v8725_v52 }
  0xd7   :  { %v8819_v2 = vrot.slane %v2379_v17, 5  ;;  %v2393_v16 = vshrl.u32 %v8794_v9, 16  ;;  %v2818_v17 = vrot.slane %v2816_v54, 4  ;;  %v2822_v52 = vrot.slane %v8825_v7, 5 }
  0xda   :  { %7436 = vmatmul.mubr.bf16.gmra.mxu0 %v7779_v12  ;;  %v8774_v12 = vsel %vm8606_vm6, %v2811_v35, %v2812_v39  ;;  %v2819_v35 = vrot.slane %v8805_v4, 5 }
  0xdb   :  { %7488 = vmatmul.mubr.bf16.gmra.mxu1 %v8563_v28  ;;  %7439 = vmatprep.mubr.msk.bf16.mxu0 %vm7819_vm0, %v10204_v0  ;;  %v8735_v28 = vrot.slane %v2359_v25, 5  ;;  %10220 = vst [vmem:[#allocation2_spill] sm:$0xff] %v8774_v12  ;;  %v8785_v25 = vrot.slane %v1934_v49, 4 }
  0xdc   :  { %7491 = vmatprep.mubr.msk.bf16.mxu1 %vm7819_vm0, %v10204_v0  ;;  %v2821_v21 = vrot.slane %v2819_v35, 4 }
  0xdd   :  { %v2366_v10 = vor.u32 %v2365_v29, %v8735_v28  ;;  %v8800_v29 = vrot.slane %v1947_v5, 5  ;;  %v2389_v5 = vshll.u32 %v8794_v9, 16  ;;  %v1940_v9 = vsel %vm8110_vm3, %v8785_v25, %v8787_v26 }
  0xdf   :  { %v8814_v63 = vrot.slane %v2366_v10, 4  ;;  %v1662_v10 = vsel %vm8110_vm3, %v8716_v47, %v8555_v23  ;;  %v1967_v23 = vshll.u32 %v8634_v56, 16  ;;  %v8843_v47 = vsel %vm8606_vm6, %v2818_v17, %v2819_v35  ;;  %v8896_v17 = vld [vmem:[%s10195_s0 + $0x48] sm:$0xf] }
  0xe0   :  { %10222 = vst [vmem:[#allocation4_spill] sm:$0xff] %v8843_v47  ;;  %v6702_v54 = vcombine.low %v1662_v10, %v1672_v11 }
  0xe2   :  { %v230_v44 = vpop.f32.mrf.mxu0  ;;  %7440 = vmatmul.mubr.bf16.gmra.mxu0 %v7783_v38  ;;  %v437_v36 = vpop.f32.mrf.mxu1  ;;  %v1943_v38 = vrot.slane %v1941_v3, 4  ;;  %v2385_v3 = vrot.slane %v2383_v31, 4 }
  0xe3   :  { %7492 = vmatmul.mubr.bf16.gmra.mxu1 %v6700_v43  ;;  %7443 = vmatprep.mubr.msk.bf16.mxu0 %vm7819_vm0, %v10204_v0  ;;  %v8807_v20 = vadd.f32 %v437_v36, %v230_v44  ;;  %v7787_v43 = vld [vmem:[%s10195_s0 + $0x164] sm:$0xff]   ;;  %v6701_v36 = vcombine.low %v1642_v30, %v1652_v40  ;;  %v1930_v30 = vsel %vm8110_vm3, %v8783_v22, %v8685_v24  ;;  %v6749_v22 = vld [vmem:[%s10195_s0 + $0x78] sm:$0xf] }
  0xe4   :  { %v7209_v49 = vpop.f32.mrf.mxu0  ;;  %7495 = vmatprep.mubr.msk.bf16.mxu1 %vm7819_vm0, %v10204_v0  ;;  %v7261_v39 = vpop.f32.mrf.mxu1  ;;  %v2376_v24 = vor.u32 %v2375_v42, %v8789_v33  ;;  %v2386_v25 = vor.u32 %v2385_v3, %v8819_v2  ;;  %v1971_v42 = vshrl.u32 %v8634_v56, 16  ;;  %v2395_v3 = vrot.slane %v2393_v16, 4 }
  0xe5   :  { %v1944_v49 = vor.u32 %v1943_v38, %v8787_v26  ;;  %v1961_v39 = vshrl.u32 %v8620_v51, 16  ;;  %v1954_v51 = vor.u32 %v1953_v48, %v8800_v29  ;;  %v2362_v38 = vsel %vm8110_vm3, %v8798_v53, %v8735_v28 }
  0xe6   :  { %v233_v44 = vpop.f32.mrf.mxu0  ;;  %v440_v31 = vpop.f32.mrf.mxu1  ;;  %v8870_v48 = vsel %vm8606_vm6, %v2821_v21, %v2822_v52  ;;  %v2372_v28 = vsel %vm8110_vm3, %v8814_v63, %v8789_v33  ;;  %v8891_v33 = vrot.slane %v2389_v5, 5  ;;  %v8901_v56 = vrot.slane %v2376_v24, 4 }
  0xe7   :  { %v8838_v50 = vadd.f32 %v440_v31, %v233_v44  ;;  %10223 = vst [vmem:[#allocation5_spill] sm:$0xff] %v8870_v48  ;;  %v8885_v21 = vrot.slane %v1944_v49, 4  ;;  %v8889_v11 = vrot.slane %v1954_v51, 4  ;;  %v1963_v63 = vrot.slane %v1961_v39, 4 }
  0xe8   :  { %v7210_v37 = vpop.f32.mrf.mxu0  ;;  %v7262_v8 = vpop.f32.mrf.mxu1  ;;  %v2824_v49 = vrot.slane %v2822_v52, 4  ;;  %v2828_v51 = vrot.slane %v8896_v17, 5  ;;  %v8906_v16 = vrot.slane %v1967_v23, 5  ;;  %v2399_v39 = vshll.u32 %v6749_v22, 16 }
  0xe9   :  { %v8854_v37 = vld [vmem:[%s10195_s0 + $0x44] sm:$0xf]  ;;  %v1973_v26 = vrot.slane %v1971_v42, 4  ;;  %v1977_v23 = vshll.u32 %v8650_v60, 16  ;;  %v2396_v62 = vor.u32 %v2395_v3, %v8891_v33  ;;  %v6727_v42 = vcombine.low %v1930_v30, %v1940_v9  ;;  %v6750_v9 = vld [vmem:[%s10195_s0 + $0x7c] sm:$0xf] }
  0xea   :  { %v238_v40 = vpop.f32.mrf.mxu0  ;;  %7444 = vmatmul.mubr.bf16.gmra.mxu0 %v7787_v43  ;;  %v2825_v44 = vrot.slane %v8854_v37, 5  ;;  %v2382_v30 = vsel %vm8110_vm3, %v8901_v56, %v8819_v2 }
  0xeb   :  { %v445_v43 = vpop.f32.mrf.mxu1  ;;  %7496 = vmatmul.mubr.bf16.gmra.mxu1 %v6701_v36  ;;  %7447 = vmatprep.mubr.msk.bf16.mxu0 %vm7819_vm0, %v10204_v0  ;;  %v7790_v36 = vld [vmem:[%s10195_s0 + $0x16c] sm:$0xff]   ;;  %v8959_v56 = vrot.slane %v1977_v23, 5 }
  0xec   :  { %v8881_v53 = vadd.f32 %v445_v43, %v238_v40  ;;  %v7213_v35 = vpop.f32.mrf.mxu0  ;;  %7499 = vmatprep.mubr.msk.bf16.mxu1 %vm7819_vm0, %v10204_v0  ;;  %v2827_v8 = vrot.slane %v2825_v44, 4  ;;  %v8904_v40 = vrot.slane %v2386_v25, 4  ;;  %v2403_v43 = vshrl.u32 %v6749_v22, 16 }
  0xed   :  { %v7265_v10 = vpop.f32.mrf.mxu1  ;;  %v8912_v18 = vsel %vm8606_vm6, %v2824_v49, %v2825_v44  ;;  %v1964_v25 = vor.u32 %v1963_v63, %v8816_v34  ;;  %v1950_v44 = vsel %vm8110_vm3, %v8885_v21, %v8800_v29  ;;  %v1960_v63 = vsel %vm8110_vm3, %v8889_v11, %v8816_v34 }
  0xee   :  { %v241_v31 = vpop.f32.mrf.mxu0  ;;  %10224 = vst [vmem:[#allocation6_spill] sm:$0xff] %v8912_v18  ;;  %v8916_v52 = vsel %vm8606_vm6, %v2827_v8, %v2828_v51  ;;  %v8940_v29 = vrot.slane %v2399_v39, 5  ;;  %v2392_v2 = vsel %vm8110_vm3, %v8904_v40, %v8891_v33  ;;  %v1974_v21 = vor.u32 %v1973_v26, %v8906_v16  ;;  %v6751_v26 = vld [vmem:[%s10195_s0 + $0x80] sm:$0xf] }
  0xef   :  { %v448_v5 = vpop.f32.mrf.mxu1  ;;  %10225 = vst [vmem:[#allocation7_spill] sm:$0xff] %v8916_v52  ;;  %v8961_v8 = vrot.slane %v2396_v62, 4  ;;  %v1981_v39 = vshrl.u32 %v8650_v60, 16  ;;  %v2409_v33 = vshll.u32 %v6750_v9, 16  ;;  %v2830_v40 = vrot.slane %v2828_v51, 4  ;;  %v7794_v60 = vld [vmem:[%s10194_s1 + $0x238] sm:$0xff]  }
  0xf0   :  { %v8908_v35 = vadd.f32 %v448_v5, %v241_v31  ;;  %v7214_v10 = vpop.f32.mrf.mxu0  ;;  %v6780_v5 = vcombine.low %v2362_v38, %v2372_v28  ;;  %v8945_v38 = vld [vmem:[%s10195_s0 + $0x4c] sm:$0xf]  ;;  %v2423_v48 = vshrl.u32 %v6751_v26, 16 }
  0xf1   :  { %v7266_v24 = vpop.f32.mrf.mxu1  ;;  %v2831_v11 = vrot.slane %v8945_v38, 5 }
  0xf2   :  { %v246_v31 = vpop.f32.mrf.mxu0  ;;  %7448 = vmatmul.mubr.bf16.gmra.mxu0 %v7790_v36  ;;  %v8957_v36 = vrot.slane %v1964_v25, 4 }
  0xf3   :  { %v453_v49 = vpop.f32.mrf.mxu1  ;;  %7500 = vmatmul.mubr.bf16.gmra.mxu1 %v6702_v54  ;;  %7519 = vmatprep.mubr.msk.bf16.mxu0 %vm7819_vm0, %v10204_v0  ;;  %v2405_v54 = vrot.slane %v2403_v43, 4  ;;  %v8967_v43 = vld [vmem:[%s10195_s0 + $0x50] sm:$0xf]  ;;  %v2833_v24 = vrot.slane %v2831_v11, 4  ;;  %v8985_v51 = vsel %vm8606_vm6, %v2830_v40, %v2831_v11  ;;  %v9000_v40 = vrot.slane %v2409_v33, 5 }
  0xf4   :  { %v8947_v28 = vadd.f32 %v453_v49, %v246_v31  ;;  %v7217_v34 = vpop.f32.mrf.mxu0  ;;  %7571 = vmatprep.mubr.msk.bf16.mxu1 %vm7819_vm0, %v10204_v0  ;;  %v2834_v25 = vrot.slane %v8967_v43, 5  ;;  %v2413_v31 = vshrl.u32 %v6750_v9, 16  ;;  %v1987_v49 = vshll.u32 %v8655_v61, 16  ;;  %10226 = vst [vmem:[#allocation8_spill] sm:$0xff] %v8985_v51  ;;  %v7795_v11 = vld [vmem:[%s10194_s1 + $0x230] sm:$0xff]  }
  0xf5   :  { %v7269_v3 = vpop.f32.mrf.mxu1  ;;  %v2406_v62 = vor.u32 %v2405_v54, %v8940_v29  ;;  %v1991_v34 = vshrl.u32 %v8655_v61, 16  ;;  %v8981_v0 = vrot.slane %v1974_v21, 4  ;;  %v8991_v54 = vrot.slane %v1981_v39, 4 }
  0xf6   :  { %v249_v10 = vpop.f32.mrf.mxu0  ;;  %v8989_v52 = vsel %vm8606_vm6, %v2833_v24, %v2834_v25  ;;  %v2419_v9 = vshll.u32 %v6751_v26, 16  ;;  %v8995_v21 = vcombine.low %v2382_v30, %v2392_v2  ;;  %v9005_v24 = vrot.slane %v1987_v49, 5 }
  0xf7   :  { %v456_v23 = vpop.f32.mrf.mxu1  ;;  %10227 = vst [vmem:[#allocation9_spill] sm:$0xff] %v8989_v52  ;;  %v2407_v26 = vrot.slane %v2406_v62, 4  ;;  %v10228_v33 = vmov 0.0  }
  0xf8   :  { %v8979_v3 = vadd.f32 %v456_v23, %v249_v10  ;;  %v7218_v22 = vpop.f32.mrf.mxu0  ;;  %v2402_v23 = vsel %vm8110_vm3, %v8961_v8, %v8940_v29  ;;  %v9043_v49 = vrot.slane %v2419_v9, 5  ;;  %v2425_v29 = vrot.slane %v2423_v48, 4  ;;  %v1907_v8 = vld [vmem:[%s10195_s0 + $0x34] sm:$0xf] }
  0xf9   :  { %v7270_v18 = vpop.f32.mrf.mxu1  ;;  %v6728_v22 = vcombine.low %v1950_v44, %v1960_v63  ;;  %v9009_v44 = vrot.slane %v2413_v31, 4  ;;  %v9014_v63 = vld [vmem:[%s10195_s0 + $0x54] sm:$0xf]  ;;  %v2836_v48 = vrot.slane %v2834_v25, 4 }
  0xfa   :  { %v254_v10 = vpop.f32.mrf.mxu0  ;;  %7520 = vmatmul.mubr.bf16.vlgmr.msra.gmra.mxu0 %v6727_v42  ;;  %v7802_v18 = vld [vmem:[%s10196_s3 + $0x30] sm:$0xff]   ;;  %v9007_v42 = vrot.slane %v1991_v34, 4  ;;  %v2837_v62 = vrot.slane %v9014_v63, 5  ;;  %v9052_v34 = vld [vmem:[%s10195_s0 + $0x58] sm:$0x1] }
  0xfb   :  { %v461_v39 = vpop.f32.mrf.mxu1  ;;  %7608 = vmatpush3.bf16.msra.mxu0 %v7794_v60  ;;  %7572 = vmatmul.mubr.bf16.vlgmr.msra.gmra.mxu1 %v6780_v5  ;;  %v1970_v5 = vsel %vm8110_vm3, %v8957_v36, %v8906_v16  ;;  %v9033_v60 = vld [vmem:[%s10195_s0 + $0x84] sm:$0xf]  ;;  %v1980_v16 = vsel %vm8110_vm3, %v8981_v0, %v8959_v56  ;;  %v1984_v36 = vor.u32 %v8991_v54, %v8959_v56  ;;  %v2001_v0 = vshrl.u32 %v8667_v6, 16  ;;  %v7804_v56 = vld [vmem:[%s10196_s3 + $0x28] sm:$0xff]   ;;  %v6754_v25 = vld [vmem:[%s10195_s0 + $0x94] sm:$0xf] }
  0xfc   :  { %v9016_v30 = vadd.f32 %v461_v39, %v254_v10  ;;  %v7221_v2 = vpop.f32.mrf.mxu0  ;;  %7523 = vmatprep.mubr.msk.bf16.mxu0 %vm7819_vm0, %v10228_v33  ;;  %7575 = vmatprep.mubr.msk.bf16.mxu1 %vm7819_vm0, %v10228_v33  ;;  %v2839_v54 = vrot.slane %v2837_v62, 4  ;;  %v2840_v9 = vrot.slane %v9052_v34, 5  ;;  %v2416_v61 = vor.u32 %v9009_v44, %v9000_v40 }
  0xfd   :  { %v7273_v31 = vpop.f32.mrf.mxu1  ;;  %7609 = vmatprep.subr.bf16.mxu0 %v10228_v33  ;;  %7660 = vmatpush3.bf16.msra.mxu1 %v8582_v32  ;;  %v2412_v32 = vsel %vm8110_vm3, %v2407_v26, %v9000_v40  ;;  %v1994_v2 = vor.u32 %v9007_v42, %v9005_v24  ;;  %v2429_v26 = vshll.u32 %v9033_v60, 16  ;;  %v2426_v44 = vor.u32 %v2425_v29, %v9043_v49 }
  0xfe   :  { %v257_v10 = vpop.f32.mrf.mxu0  ;;  %7661 = vmatprep.subr.bf16.mxu1 %v7802_v18  ;;  %v1997_v31 = vshll.u32 %v8667_v6, 16  ;;  %v9079_v6 = vsel %vm8606_vm6, %v2836_v48, %v2837_v62  ;;  %v9083_v40 = vsel %vm8606_vm6, %v2839_v54, %v2840_v9  ;;  %v9088_v13 = vrot.slane %v1984_v36, 4 }
  0xff   :  { %v464_v39 = vpop.f32.mrf.mxu1  ;;  %7610 = vmatpush3.bf16.msra.mxu0 %v7795_v11  ;;  %v7796_v11 = vld [vmem:[%s10194_s1 + $0x228] sm:$0xff]   ;;  %10229 = vst [vmem:[#allocation10_spill] sm:$0xff] %v9079_v6  ;;  %10230 = vst [vmem:[#allocation11_spill] sm:$0xff] %v9083_v40  ;;  %v2433_v62 = vshrl.u32 %v9033_v60, 16  ;;  %v2003_v48 = vrot.slane %v2001_v0, 4  ;;  %v2444_v12 = vshrl.u32 %v6754_v25, 16 }
 0x100   :  { %v9070_v52 = vadd.f32 %v464_v39, %v257_v10  ;;  %v7222_v51 = vpop.f32.mrf.mxu0  ;;  %7611 = vmatprep.subr.bf16.mxu0 %v10228_v33  ;;  %v2015_v10 = vshll.u32 %v1907_v8, 16  ;;  %v2447_v36 = vshll.u32 %v6754_v25, 16  ;;  %v1995_v0 = vrot.slane %v1994_v2, 4  ;;  %v6761_v39 = vld [vmem:[%s10195_s0 + $0xb0] sm:$0xf] }
 0x101   :  { %v7274_v42 = vpop.f32.mrf.mxu1  ;;  %v2012_v51 = vshrl.u32 %v1907_v8, 16  ;;  %7662 = vmatpush3.bf16.msra.mxu1 %v7802_v18  ;;  %v6729_v18 = vcombine.low %v1970_v5, %v1980_v16  ;;  %v6782_v8 = vcombine.low %v2402_v23, %v2412_v32  ;;  %v9103_v9 = vrot.slane %v2416_v61, 4 }
 0x102   :  { %v262_v47 = vpop.f32.mrf.mxu0  ;;  %7524 = vmatmul.mubr.bf16.gmra.mxu0 %v6728_v22  ;;  %7663 = vmatprep.subr.bf16.mxu1 %v7804_v56  ;;  %v9097_v22 = vrot.slane %v1997_v31, 5  ;;  %v2007_v5 = vshll.u32 %v8752_v55, 16  ;;  %v2427_v16 = vrot.slane %v2426_v44, 4  ;;  %v9109_v32 = vrot.slane %v2429_v26, 5  ;;  %v6753_v55 = vld [vmem:[%s10195_s0 + $0x88] sm:$0x1] }
 0x103   :  { %v469_v29 = vpop.f32.mrf.mxu1  ;;  %7576 = vmatmul.mubr.bf16.gmra.mxu1 %v8995_v21  ;;  %7527 = vmatprep.mubr.msk.bf16.mxu0 %vm7819_vm0, %v10228_v33  ;;  %v7797_v21 = vld [vmem:[%s10194_s1 + $0x220] sm:$0xff]   ;;  %v2017_v31 = vrot.slane %v2015_v10, 5  ;;  %v1990_v61 = vsel %vm8110_vm3, %v9088_v13, %v9005_v24  ;;  %v2446_v26 = vrot.slane %v2444_v12, 4  ;;  %v7806_v42 = vld [vmem:[%s10196_s3 + $0x18] sm:$0xff]   ;;  %v2025_v13 = vshrl.u32 %v8757_v59, 16 }
 0x104   :  { %v9099_v54 = vadd.f32 %v469_v29, %v262_v47  ;;  %v7225_v60 = vpop.f32.mrf.mxu0  ;;  %7579 = vmatprep.mubr.msk.bf16.mxu1 %vm7819_vm0, %v10228_v33  ;;  %7612 = vmatpush3.bf16.msra.mxu0 %v7796_v11  ;;  %v2014_v47 = vrot.slane %v2012_v51, 4  ;;  %v2004_v2 = vor.u32 %v2003_v48, %v9097_v22  ;;  %v2435_v11 = vrot.slane %v2433_v62, 4  ;;  %v6755_v44 = vld [vmem:[%s10195_s0 + $0x98] sm:$0xf] }
 0x105   :  { %v7277_v23 = vpop.f32.mrf.mxu1  ;;  %7613 = vmatprep.subr.bf16.mxu0 %v10228_v33  ;;  %7664 = vmatpush3.bf16.msra.mxu1 %v7804_v56  ;;  %v2449_v51 = vrot.slane %v2447_v36, 5  ;;  %v2031_v24 = vshll.u32 %v8805_v4, 16  ;;  %v2035_v10 = vshrl.u32 %v8805_v4, 16  ;;  %v2000_v62 = vsel %vm8110_vm3, %v1995_v0, %v9097_v22  ;;  %v7798_v60 = vld [vmem:[%s10194_s1 + $0x218] sm:$0xff]  }
 0x106   :  { %v265_v25 = vpop.f32.mrf.mxu0  ;;  %7665 = vmatprep.subr.bf16.mxu1 %v7805_v45  ;;  %v2422_v29 = vsel %vm8110_vm3, %v9103_v9, %v9043_v49  ;;  %v9138_v36 = vrot.slane %v2007_v5, 5  ;;  %v2432_v23 = vsel %vm8110_vm3, %v2427_v16, %v9109_v32  ;;  %v2021_v22 = vshll.u32 %v8757_v59, 16  ;;  %v6756_v49 = vld [vmem:[%s10195_s0 + $0x9c] sm:$0xf]  ;;  %v7807_v59 = vld [vmem:[%s10196_s3 + $0x10] sm:$0xff]  }
 0x107   :  { %v472_v56 = vpop.f32.mrf.mxu1  ;;  %v2439_v0 = vshll.u32 %v6753_v55, 16  ;;  %v2436_v5 = vor.u32 %v2435_v11, %v9109_v32  ;;  %v6730_v55 = vcombine.low %v1990_v61, %v2000_v62  ;;  %v2463_v11 = vshll.u32 %v6756_v49, 16 }
 0x108   :  { %v9129_v48 = vadd.f32 %v472_v56, %v265_v25  ;;  %v7226_v12 = vpop.f32.mrf.mxu0  ;;  %7614 = vmatpush3.bf16.msra.mxu0 %v7797_v21  ;;  %v2018_v25 = vor.u32 %v2017_v31, %v2014_v47  ;;  %v9151_v21 = vrot.slane %v2004_v2, 4  ;;  %v2453_v56 = vshll.u32 %v6755_v44, 16 }
 0x109   :  { %v7278_v4 = vpop.f32.mrf.mxu1  ;;  %7615 = vmatprep.subr.bf16.mxu0 %v10228_v33  ;;  %7666 = vmatpush3.bf16.msra.mxu1 %v7805_v45  ;;  %v2457_v12 = vshrl.u32 %v6755_v44, 16  ;;  %v2450_v47 = vor.u32 %v2449_v51, %v2446_v26  ;;  %v2027_v45 = vrot.slane %v2025_v13, 4  ;;  %v9159_v31 = vrot.slane %v2031_v24, 5 }
 0x10a   :  { %v270_v9 = vpop.f32.mrf.mxu0  ;;  %7528 = vmatmul.mubr.bf16.gmra.mxu0 %v6729_v18  ;;  %7667 = vmatprep.subr.bf16.mxu1 %v7806_v42  ;;  %v2037_v18 = vrot.slane %v2035_v10, 4  ;;  %v2467_v44 = vshrl.u32 %v6756_v49, 16  ;;  %v6783_v26 = vcombine.low %v2422_v29, %v2432_v23  ;;  %v9168_v51 = vrot.slane %v2018_v25, 4  ;;  %v7808_v23 = vld [vmem:[%s10196_s3 + $0x8] sm:$0xff]  }
 0x10b   :  { %v477_v16 = vpop.f32.mrf.mxu1  ;;  %7580 = vmatmul.mubr.bf16.gmra.mxu1 %v6782_v8  ;;  %7531 = vmatprep.mubr.msk.bf16.mxu0 %vm7819_vm0, %v10228_v33  ;;  %v7799_v8 = vld [vmem:[%s10194_s1 + $0x210] sm:$0xff]   ;;  %v9170_v13 = vrot.slane %v2021_v22, 5  ;;  %v9172_v24 = vrot.slane %v2439_v0, 5  ;;  %v2010_v10 = vsel %vm8110_vm3, %v9151_v21, %v9138_v36  ;;  %v9179_v62 = vrot.slane %v2436_v5, 4  ;;  %v6757_v36 = vld [vmem:[%s10195_s0 + $0xa0] sm:$0xf] }
 0x10c   :  { %v9161_v2 = vadd.f32 %v477_v16, %v270_v9  ;;  %v7229_v32 = vpop.f32.mrf.mxu0  ;;  %7583 = vmatprep.mubr.msk.bf16.mxu1 %vm7819_vm0, %v10228_v33  ;;  %7616 = vmatpush3.bf16.msra.mxu0 %v7798_v60  ;;  %v9181_v60 = vrot.slane %v2453_v56, 5  ;;  %v2041_v29 = vshll.u32 %v8825_v7, 16  ;;  %v2451_v22 = vrot.slane %v2450_v47, 4  ;;  %v6758_v9 = vld [vmem:[%s10195_s0 + $0xa4] sm:$0xf] }
 0x10d   :  { %v7281_v4 = vpop.f32.mrf.mxu1  ;;  %7617 = vmatprep.subr.bf16.mxu0 %v10228_v33  ;;  %7668 = vmatpush3.bf16.msra.mxu1 %v7806_v42  ;;  %v2028_v42 = vor.u32 %v2027_v45, %v9170_v13  ;;  %v2038_v0 = vor.u32 %v2037_v18, %v9159_v31  ;;  %v2459_v49 = vrot.slane %v2457_v12, 4  ;;  %v9197_v56 = vrot.slane %v2463_v11, 5  ;;  %v7801_v45 = vld [vmem:[%s10194_s1 + $0x208] sm:$0xff]  }
 0x10e   :  { %v273_v61 = vpop.f32.mrf.mxu0  ;;  %7669 = vmatprep.subr.bf16.mxu1 %v7807_v59  ;;  %v2469_v16 = vrot.slane %v2467_v44, 4  ;;  %v2045_v47 = vshrl.u32 %v8825_v7, 16  ;;  %v2024_v12 = vsel %vm8110_vm3, %v9168_v51, %v9170_v13  ;;  %v2477_v32 = vshrl.u32 %v6757_v36, 16  ;;  %v7809_v51 = vld [vmem:[%s10196_s3] sm:$0xff]  }
 0x10f   :  { %v480_v25 = vpop.f32.mrf.mxu1  ;;  %v2051_v4 = vshll.u32 %v8854_v37, 16  ;;  %v2055_v11 = vshrl.u32 %v8854_v37, 16  ;;  %v2442_v7 = vsel %vm8110_vm3, %v9179_v62, %v9172_v24  ;;  %v2029_v37 = vrot.slane %v2028_v42, 4 }
 0x110   :  { %v9195_v21 = vadd.f32 %v480_v25, %v273_v61  ;;  %v7230_v5 = vpop.f32.mrf.mxu0  ;;  %7618 = vmatpush3.bf16.msra.mxu0 %v7799_v8  ;;  %v2473_v8 = vshll.u32 %v6757_v36, 16  ;;  %v2483_v61 = vshll.u32 %v6758_v9, 16  ;;  %v2487_v25 = vshrl.u32 %v6758_v9, 16 }
 0x111   :  { %v7282_v18 = vpop.f32.mrf.mxu1  ;;  %7619 = vmatprep.subr.bf16.mxu0 %v10228_v33  ;;  %7670 = vmatpush3.bf16.msra.mxu1 %v7807_v59  ;;  %v2039_v59 = vrot.slane %v2038_v0, 4  ;;  %v2460_v5 = vor.u32 %v2459_v49, %v9181_v60  ;;  %v2456_v62 = vsel %vm8110_vm3, %v2451_v22, %v9181_v60  ;;  %v2047_v36 = vrot.slane %v2045_v47, 4  ;;  %v6759_v60 = vld [vmem:[%s10195_s0 + $0xa8] sm:$0xf] }
 0x112   :  { %v278_v44 = vpop.f32.mrf.mxu0  ;;  %7532 = vmatmul.mubr.bf16.gmra.mxu0 %v6730_v55  ;;  %7671 = vmatprep.subr.bf16.mxu1 %v7808_v23  ;;  %v2043_v55 = vrot.slane %v2041_v29, 5  ;;  %v7803_v29 = vld [vmem:[%s10194_s1 + $0x200] sm:$0xff]   ;;  %v9231_v0 = vrot.slane %v2051_v4, 5  ;;  %v2057_v49 = vrot.slane %v2055_v11, 4  ;;  %v2479_v9 = vrot.slane %v2477_v32, 4 }
 0x113   :  { %v485_v13 = vpop.f32.mrf.mxu1  ;;  %7584 = vmatmul.mubr.bf16.gmra.mxu1 %v6783_v26  ;;  %7535 = vmatprep.mubr.msk.bf16.mxu0 %vm7819_vm0, %v10228_v33  ;;  %v2470_v26 = vor.u32 %v2469_v16, %v9197_v56  ;;  %v9237_v22 = vrot.slane %v2483_v61, 5  ;;  %v2489_v16 = vrot.slane %v2487_v25, 4  ;;  %v2034_v32 = vsel %vm8110_vm3, %v2029_v37, %v9159_v31  ;;  %v6760_v25 = vld [vmem:[%s10195_s0 + $0xac] sm:$0xf] }
 0x114   :  { %v9220_v18 = vadd.f32 %v485_v13, %v278_v44  ;;  %v7233_v24 = vpop.f32.mrf.mxu0  ;;  %7587 = vmatprep.mubr.msk.bf16.mxu1 %vm7819_vm0, %v10228_v33  ;;  %7620 = vmatpush3.bf16.msra.mxu0 %v7801_v45  ;;  %v6731_v13 = vcombine.low %v2010_v10, %v2024_v12  ;;  %v6784_v45 = vcombine.low %v2442_v7, %v2456_v62  ;;  %v2461_v4 = vrot.slane %v2460_v5, 4 }
 0x115   :  { %v7285_v42 = vpop.f32.mrf.mxu1  ;;  %7621 = vmatprep.subr.bf16.mxu0 %v10228_v33  ;;  %7672 = vmatpush3.bf16.msra.mxu1 %v7808_v23  ;;  %v2475_v24 = vrot.slane %v2473_v8, 5  ;;  %v2044_v23 = vsel %vm8110_vm3, %v2039_v59, %v2043_v55  ;;  %v2471_v11 = vrot.slane %v2470_v26, 4  ;;  %v2048_v8 = vor.u32 %v2047_v36, %v2043_v55 }
 0x116   :  { %v281_v44 = vpop.f32.mrf.mxu0  ;;  %7673 = vmatprep.subr.bf16.mxu1 %v7809_v51  ;;  %v2061_v61 = vshll.u32 %v8896_v17, 16  ;;  %v2058_v62 = vor.u32 %v2057_v49, %v9231_v0  ;;  %v2493_v37 = vshll.u32 %v6759_v60, 16  ;;  %v2065_v59 = vshrl.u32 %v8896_v17, 16 }
 0x117   :  { %v488_v47 = vpop.f32.mrf.mxu1  ;;  %v2480_v31 = vor.u32 %v2479_v9, %v2475_v24  ;;  %v2490_v26 = vor.u32 %v2489_v16, %v9237_v22  ;;  %v2497_v55 = vshrl.u32 %v6759_v60, 16  ;;  %v2071_v36 = vshll.u32 %v8945_v38, 16 }
 0x118   :  { %v9244_v10 = vadd.f32 %v488_v47, %v281_v44  ;;  %v7234_v12 = vpop.f32.mrf.mxu0  ;;  %7622 = vmatpush3.bf16.msra.mxu0 %v7803_v29  ;;  %v2075_v42 = vshrl.u32 %v8945_v38, 16  ;;  %v6732_v29 = vcombine.low %v2034_v32, %v2044_v23  ;;  %v2466_v17 = vsel %vm8110_vm3, %v2461_v4, %v9197_v56 }
 0x119   :  { %v7286_v7 = vpop.f32.mrf.mxu1  ;;  %7674 = vmatpush3.bf16.msra.mxu1 %v7809_v51  ;;  %v2503_v51 = vshll.u32 %v6760_v25, 16  ;;  %v2507_v49 = vshrl.u32 %v6760_v25, 16  ;;  %v2476_v38 = vsel %vm8110_vm3, %v2471_v11, %v2475_v24  ;;  %v2049_v60 = vrot.slane %v2048_v8, 4 }
 0x11a   :  { %v286_v5 = vpop.f32.mrf.mxu0  ;;  %7536 = vmatmul.mubr.bf16.gmra.mxu0 %v6731_v13  ;;  %v2063_v16 = vrot.slane %v2061_v61, 5  ;;  %v2481_v32 = vrot.slane %v2480_v31, 4  ;;  %v2495_v23 = vrot.slane %v2493_v37, 5  ;;  %v2067_v12 = vrot.slane %v2065_v59, 4 }
 0x11b   :  { %v493_v44 = vpop.f32.mrf.mxu1  ;;  %7588 = vmatmul.mubr.bf16.gmra.mxu1 %v6784_v45  ;;  %7539 = vmatprep.mubr.msk.bf16.mxu0 %vm7819_vm0, %v10228_v33  ;;  %v2059_v45 = vrot.slane %v2058_v62, 4  ;;  %v2491_v56 = vrot.slane %v2490_v26, 4  ;;  %v9266_v4 = vrot.slane %v2071_v36, 5  ;;  %v2077_v25 = vrot.slane %v2075_v42, 4  ;;  %v6762_v36 = vld [vmem:[%s10195_s0 + $0xb4] sm:$0xf] }
 0x11c   :  { %v9260_v9 = vadd.f32 %v493_v44, %v286_v5  ;;  %v7237_v13 = vpop.f32.mrf.mxu0  ;;  %7591 = vmatprep.mubr.msk.bf16.mxu1 %vm7819_vm0, %v10228_v33  ;;  %v2499_v5 = vrot.slane %v2497_v55, 4  ;;  %v9271_v24 = vrot.slane %v2503_v51, 5  ;;  %v2509_v11 = vrot.slane %v2507_v49, 4 }
 0x11d   :  { %v7289_v47 = vpop.f32.mrf.mxu1  ;;  %v6785_v13 = vcombine.low %v2466_v17, %v2476_v38  ;;  %v2054_v62 = vsel %vm8110_vm3, %v2049_v60, %v9231_v0  ;;  %v2064_v37 = vsel %vm8110_vm3, %v2059_v45, %v2063_v16  ;;  %v2486_v59 = vsel %vm8110_vm3, %v2481_v32, %v9237_v22 }
 0x11e   :  { %v289_v7 = vpop.f32.mrf.mxu0  ;;  %v2068_v26 = vor.u32 %v2067_v12, %v2063_v16  ;;  %v2081_v55 = vshll.u32 %v8967_v43, 16  ;;  %v2496_v0 = vsel %vm8110_vm3, %v2491_v56, %v2495_v23  ;;  %v2078_v17 = vor.u32 %v2077_v25, %v9266_v4 }
 0x11f   :  { %v496_v44 = vpop.f32.mrf.mxu1  ;;  %v2500_v51 = vor.u32 %v2499_v5, %v2495_v23  ;;  %v2513_v49 = vshll.u32 %v6761_v39, 16  ;;  %v2510_v22 = vor.u32 %v2509_v11, %v9271_v24  ;;  %v2085_v60 = vshrl.u32 %v8967_v43, 16 }
 0x120   :  { %v9273_v8 = vadd.f32 %v496_v44, %v289_v7  ;;  %v7238_v61 = vpop.f32.mrf.mxu0  ;;  %v2091_v16 = vshll.u32 %v9014_v63, 16  ;;  %v2517_v32 = vshrl.u32 %v6761_v39, 16  ;;  %v2523_v23 = vshll.u32 %v6762_v36, 16 }
 0x121   :  { %v7290_v31 = vpop.f32.mrf.mxu1  ;;  %v2527_v12 = vshrl.u32 %v6762_v36, 16  ;;  %v6733_v56 = vcombine.low %v2054_v62, %v2064_v37  ;;  %v6786_v25 = vcombine.low %v2486_v59, %v2496_v0  ;;  %v2083_v5 = vrot.slane %v2081_v55, 5  ;;  %v6763_v62 = vld [vmem:[%s10195_s0 + $0xb8] sm:$0x1] }
 0x122   :  { %v294_v42 = vpop.f32.mrf.mxu0  ;;  %7540 = vmatmul.mubr.bf16.gmra.mxu0 %v6732_v29  ;;  %v2095_v29 = vshrl.u32 %v9014_v63, 16  ;;  %v2079_v43 = vrot.slane %v2078_v17, 4  ;;  %v2501_v11 = vrot.slane %v2500_v51, 4  ;;  %v2515_v61 = vrot.slane %v2513_v49, 5 }
 0x123   :  { %v501_v38 = vpop.f32.mrf.mxu1  ;;  %7592 = vmatmul.mubr.bf16.gmra.mxu1 %v6785_v13  ;;  %7543 = vmatprep.mubr.msk.bf16.mxu0 %vm7819_vm0, %v10228_v33  ;;  %v2069_v13 = vrot.slane %v2068_v26, 4  ;;  %v2511_v63 = vrot.slane %v2510_v22, 4  ;;  %v2519_v39 = vrot.slane %v2517_v32, 4  ;;  %v2529_v36 = vrot.slane %v2527_v12, 4 }
 0x124   :  { %v9296_v47 = vadd.f32 %v501_v38, %v294_v42  ;;  %v7241_v45 = vpop.f32.mrf.mxu0  ;;  %7595 = vmatprep.mubr.msk.bf16.mxu1 %vm7819_vm0, %v10228_v33  ;;  %v2087_v42 = vrot.slane %v2085_v60, 4  ;;  %v2093_v38 = vrot.slane %v2091_v16, 5  ;;  %v2084_v26 = vsel %vm8110_vm3, %v2079_v43, %v2083_v5 }
 0x125   :  { %v7293_v7 = vpop.f32.mrf.mxu1  ;;  %v2097_v45 = vrot.slane %v2095_v29, 4  ;;  %v2074_v59 = vsel %vm8110_vm3, %v2069_v13, %v9266_v4  ;;  %v2101_v55 = vshll.u32 %v9052_v34, 16  ;;  %v2516_v4 = vsel %vm8110_vm3, %v2511_v63, %v2515_v61 }
 0x126   :  { %10231 = vst [vmem:[#allocation12_spill] sm:$0xff] %v9296_v47  ;;  %v297_v44 = vpop.f32.mrf.mxu0  ;;  %v2525_v47 = vrot.slane %v2523_v23, 5  ;;  %v2088_v51 = vor.u32 %v2087_v42, %v2083_v5  ;;  %v2520_v60 = vor.u32 %v2519_v39, %v2515_v61  ;;  %v2533_v16 = vshll.u32 %v6763_v62, 16 }
 0x127   :  { %v504_v31 = vpop.f32.mrf.mxu1  ;;  %v2098_v49 = vor.u32 %v2097_v45, %v2093_v38  ;;  %v6734_v32 = vcombine.low %v2074_v59, %v2084_v26  ;;  %v2103_v23 = vrot.slane %v2101_v55, 5 }
 0x128   :  { %v9300_v40 = vadd.f32 %v504_v31, %v297_v44  ;;  %v7242_v6 = vpop.f32.mrf.mxu0  ;;  %v2089_v5 = vrot.slane %v2088_v51, 4  ;;  %v2521_v43 = vrot.slane %v2520_v60, 4  ;;  %v2535_v31 = vrot.slane %v2533_v16, 5  ;;  %v7810_v51 = vld [vmem:[%s10197_s2] sm:$0xff]  }
 0x129   :  { %v7294_v7 = vpop.f32.mrf.mxu1  ;;  %v2506_v6 = vsel %vm8110_vm3, %v2501_v11, %v9271_v24  ;;  %v2530_v24 = vor.u32 %v2529_v36, %v2525_v47  ;;  %v2099_v44 = vrot.slane %v2098_v49, 4 }
 0x12a   :  { %v854_v37 = vpop.f32.mrf.mxu0  ;;  %7544 = vmatmul.mubr.bf16.gmra.mxu0 %v6733_v56  ;;  %v2526_v62 = vsel %vm8110_vm3, %v2521_v43, %v2525_v47 }
 0x12b   :  { %v925_v0 = vadd.f32 %v854_v37, %v8807_v20  ;;  %v1115_v17 = vpop.f32.mrf.mxu1  ;;  %7596 = vmatmul.mubr.bf16.gmra.mxu1 %v6786_v25  ;;  %7547 = vmatprep.mubr.msk.bf16.mxu0 %vm7819_vm0, %v10228_v33  ;;  %v6787_v25 = vcombine.low %v2506_v6, %v2516_v4  ;;  %v2531_v11 = vrot.slane %v2530_v24, 4  ;;  %v2104_v36 = vsel %vm8110_vm3, %v2099_v44, %v2103_v23 }
 0x12c   :  { %v7313_v22 = vpop.f32.mrf.mxu0  ;;  %7599 = vmatprep.mubr.msk.bf16.mxu1 %vm7819_vm0, %v10228_v33 }
 0x12d   :  { %v9321_v34 = vadd.f32 %v1115_v17, %v925_v0  ;;  %v7365_v20 = vpop.f32.mrf.mxu1 }
 0x12e   :  { %v857_v29 = vpop.f32.mrf.mxu0 }
 0x12f   :  { %v926_v12 = vadd.f32 %v857_v29, %v8838_v50  ;;  %v1118_v56 = vpop.f32.mrf.mxu1  ;;  %v2094_v50 = vsel %vm8110_vm3, %v2089_v5, %v2093_v38  ;;  %v10232_v5 = vcombine.low %v8638_v57, %v8642_v58  ;;  %v7813_v57 = vld [vmem:[%s10197_s2 + $0x18] sm:$0xff]  }
 0x130   :  { %v7314_v13 = vpop.f32.mrf.mxu0  ;;  %v6735_v6 = vcombine.low %v2094_v50, %v2104_v36  ;;  %v10233_v36 = vcombine.low %v8661_v1, %v8676_v15  ;;  %v7815_v1 = vld [vmem:[%s10197_s2 + $0x28] sm:$0xff]  }
 0x131   :  { %v9324_v63 = vadd.f32 %v1118_v56, %v926_v12  ;;  %v7366_v61 = vpop.f32.mrf.mxu1 }
 0x132   :  { %v862_v42 = vpop.f32.mrf.mxu0  ;;  %7548 = vmatmul.mubr.bf16.gmra.mxu0 %v6734_v32  ;;  %v7811_v32 = vld [vmem:[%s10197_s2 + $0x8] sm:$0xff]  }
 0x133   :  { %v927_v45 = vadd.f32 %v862_v42, %v8881_v53  ;;  %v1123_v39 = vpop.f32.mrf.mxu1  ;;  %7600 = vmatmul.mubr.bf16.gmra.mxu1 %v6787_v25  ;;  %7551 = vmatprep.mubr.msk.bf16.mxu0 %vm7819_vm0, %v10228_v33  ;;  %v2536_v53 = vsel %vm8110_vm3, %v2531_v11, %v2535_v31 }
 0x134   :  { %v7317_v7 = vpop.f32.mrf.mxu0  ;;  %7603 = vmatprep.mubr.msk.bf16.mxu1 %vm7819_vm0, %v10228_v33  ;;  %v6788_v0 = vcombine.low %v2526_v62, %v2536_v53 }
 0x135   :  { %v9339_v37 = vadd.f32 %v1123_v39, %v927_v45  ;;  %v7369_v59 = vpop.f32.mrf.mxu1 }
 0x136   :  { %v865_v26 = vpop.f32.mrf.mxu0 }
 0x137   :  { %v928_v38 = vadd.f32 %v865_v26, %v8908_v35  ;;  %v1126_v55 = vpop.f32.mrf.mxu1 }
 0x138   :  { %v7318_v17 = vpop.f32.mrf.mxu0 }
 0x139   :  { %v9345_v49 = vadd.f32 %v1126_v55, %v928_v38  ;;  %v7370_v47 = vpop.f32.mrf.mxu1 }
 0x13a   :  { %v870_v22 = vpop.f32.mrf.mxu0  ;;  %7552 = vmatmul.mubr.bf16.gmra.mxu0 %v6735_v6 }
 0x13b   :  { %v929_v14 = vadd.f32 %v870_v22, %v8947_v28  ;;  %v1131_v4 = vpop.f32.mrf.mxu1  ;;  %7604 = vmatmul.mubr.bf16.gmra.mxu1 %v6788_v0  ;;  %7623 = vmatprep.mubr.msk.bf16.mxu0 %vm7819_vm0, %v10228_v33  ;;  %v7812_v28 = vld [vmem:[%s10197_s2 + $0x10] sm:$0xff]  }
 0x13c   :  { %v7321_v35 = vpop.f32.mrf.mxu0  ;;  %7675 = vmatprep.mubr.bf16.mxu1 %v7810_v51  ;;  %v10234_v51 = vcombine.low %v8683_v19, %v8689_v27  ;;  %v7817_v19 = vld [vmem:[%s10197_s2 + $0x38] sm:$0xff]  }
 0x13d   :  { %v9350_v60 = vadd.f32 %v1131_v4, %v929_v14  ;;  %v7373_v24 = vpop.f32.mrf.mxu1 }
 0x13e   :  { %v873_v16 = vpop.f32.mrf.mxu0 }
 0x13f   :  { %v930_v20 = vadd.f32 %v873_v16, %v8979_v3  ;;  %v1134_v29 = vpop.f32.mrf.mxu1 }
 0x140   :  { %v7322_v23 = vpop.f32.mrf.mxu0 }
 0x141   :  { %v9359_v12 = vadd.f32 %v1134_v29, %v930_v20  ;;  %v7374_v56 = vpop.f32.mrf.mxu1 }
 0x142   :  { %v878_v25 = vpop.f32.mrf.mxu0  ;;  %7624 = vmatmul.mubr.bf16.vlgmr.msra.gmra.mxu0 %v10232_v5 }
 0x143   :  { %v931_v3 = vadd.f32 %v878_v25, %v9016_v30  ;;  %v1139_v44 = vpop.f32.mrf.mxu1  ;;  %7627 = vmatprep.mubr.msk.bf16.mxu0 %vm7819_vm0, %v10228_v33  ;;  %7676 = vmatmul.mubr.bf16.vlgmr.msra.gmra.mxu1 %v7811_v32  ;;  %v7814_v30 = vld [vmem:[%s10197_s2 + $0x20] sm:$0xff]   ;;  %v10235_v32 = vcombine.low %v8700_v46, %v8704_v41 }
 0x144   :  { %v7325_v13 = vpop.f32.mrf.mxu0  ;;  %7679 = vmatprep.mubr.bf16.mxu1 %v7812_v28 }
 0x145   :  { %v9367_v43 = vadd.f32 %v1139_v44, %v931_v3  ;;  %v7377_v11 = vpop.f32.mrf.mxu1 }
 0x146   :  { %v881_v31 = vpop.f32.mrf.mxu0 }
 0x147   :  { %v932_v61 = vadd.f32 %v881_v31, %v9070_v52  ;;  %v1142_v42 = vpop.f32.mrf.mxu1  ;;  %v10236_v31 = vld [vmem:[#allocation2_spill] sm:$0xff] }
 0x148   :  { %v7326_v58 = vpop.f32.mrf.mxu0 }
 0x149   :  { %v9376_v45 = vadd.f32 %v1142_v42, %v932_v61  ;;  %v7378_v39 = vpop.f32.mrf.mxu1 }
 0x14a   :  { %v886_v50 = vpop.f32.mrf.mxu0  ;;  %7628 = vmatmul.mubr.bf16.gmra.mxu0 %v10233_v36 }
 0x14b   :  { %v933_v52 = vadd.f32 %v886_v50, %v9099_v54  ;;  %v1147_v7 = vpop.f32.mrf.mxu1  ;;  %7631 = vmatprep.mubr.msk.bf16.mxu0 %vm7819_vm0, %v10228_v33  ;;  %7680 = vmatmul.mubr.bf16.gmra.mxu1 %v7813_v57  ;;  %v7816_v54 = vld [vmem:[%s10197_s2 + $0x30] sm:$0xff]  }
 0x14c   :  { %v7329_v62 = vpop.f32.mrf.mxu0  ;;  %7683 = vmatprep.mubr.bf16.mxu1 %v7814_v30 }
 0x14d   :  { %v9384_v53 = vadd.f32 %v1147_v7, %v933_v52  ;;  %v7381_v59 = vpop.f32.mrf.mxu1 }
 0x14e   :  { %v889_v26 = vpop.f32.mrf.mxu0 }
 0x14f   :  { %v934_v6 = vadd.f32 %v889_v26, %v9129_v48  ;;  %v1150_v38 = vpop.f32.mrf.mxu1  ;;  %v10239_v26 = vld [vmem:[#allocation4_spill] sm:$0xff] }
 0x150   :  { %v7330_v15 = vpop.f32.mrf.mxu0 }
 0x151   :  { %v9393_v55 = vadd.f32 %v1150_v38, %v934_v6  ;;  %v7382_v0 = vpop.f32.mrf.mxu1  ;;  %v10240_v6 = vld [vmem:[#allocation5_spill] sm:$0xff]  ;;  %v10242_v38 = vld [vmem:[#allocation12_spill] sm:$0xff] }
 0x152   :  { %v894_v17 = vpop.f32.mrf.mxu0  ;;  %7632 = vmatmul.mubr.bf16.gmra.mxu0 %v10234_v51 }
 0x153   :  { %v935_v48 = vadd.f32 %v894_v17, %v9161_v2  ;;  %v1155_v47 = vpop.f32.mrf.mxu1  ;;  %7635 = vmatprep.mubr.msk.bf16.mxu0 %vm7819_vm0, %v10228_v33  ;;  %7684 = vmatmul.mubr.bf16.gmra.mxu1 %v7815_v1 }
 0x154   :  { %v7333_v22 = vpop.f32.mrf.mxu0  ;;  %7687 = vmatprep.mubr.bf16.mxu1 %v7816_v54 }
 0x155   :  { %v9401_v14 = vadd.f32 %v1155_v47, %v935_v48  ;;  %v7385_v4 = vpop.f32.mrf.mxu1 }
 0x156   :  { %v897_v35 = vpop.f32.mrf.mxu0 }
 0x157   :  { %v936_v24 = vadd.f32 %v897_v35, %v9195_v21  ;;  %v1158_v16 = vpop.f32.mrf.mxu1 }
 0x158   :  { %v7334_v27 = vpop.f32.mrf.mxu0 }
 0x159   :  { %v9407_v2 = vadd.f32 %v1158_v16, %v936_v24  ;;  %v7386_v20 = vpop.f32.mrf.mxu1  ;;  %v10243_v24 = vld [vmem:[#allocation6_spill] sm:$0xff]  ;;  %v10244_v16 = vld [vmem:[#allocation7_spill] sm:$0xff] }
 0x15a   :  { %v902_v29 = vpop.f32.mrf.mxu0  ;;  %7636 = vmatmul.mubr.bf16.gmra.mxu0 %v10235_v32 }
 0x15b   :  { %v937_v23 = vadd.f32 %v902_v29, %v9220_v18  ;;  %v1163_v28 = vpop.f32.mrf.mxu1  ;;  %7639 = vmatprep.mubr.msk.bf16.mxu0 %vm7819_vm0, %v10228_v33  ;;  %7688 = vmatmul.mubr.bf16.gmra.mxu1 %v7817_v19  ;;  %v10237_v18 = vld [vmem:[#allocation3_spill] sm:$0xff]  ;;  %v10245_v19 = vcombine.low %v10243_v24, %v10244_v16 }
 0x15c   :  { %v7337_v21 = vpop.f32.mrf.mxu0  ;;  %v10238_v61 = vcombine.low %v10236_v31, %v10237_v18 }
 0x15d   :  { %v9415_v56 = vadd.f32 %v1163_v28, %v937_v23  ;;  %v7389_v25 = vpop.f32.mrf.mxu1 }
 0x15e   :  { %v905_v5 = vpop.f32.mrf.mxu0 }
 0x15f   :  { %v938_v3 = vadd.f32 %v905_v5, %v9244_v10  ;;  %v1166_v44 = vpop.f32.mrf.mxu1 }
 0x160   :  { %v7338_v13 = vpop.f32.mrf.mxu0 }
 0x161   :  { %v9418_v11 = vadd.f32 %v1166_v44, %v938_v3  ;;  %v7390_v46 = vpop.f32.mrf.mxu1  ;;  %v10246_v13 = vld [vmem:[#allocation8_spill] sm:$0xff] }
 0x162   :  { %v910_v41 = vpop.f32.mrf.mxu0  ;;  %7640 = vmatmul.mubr.bf16.gmra.mxu0 %v10238_v61  ;;  %v10247_v46 = vld [vmem:[#allocation9_spill] sm:$0xff] }
 0x163   :  { %v939_v42 = vadd.f32 %v910_v41, %v9260_v9  ;;  %v1171_v57 = vpop.f32.mrf.mxu1  ;;  %7643 = vmatprep.mubr.msk.bf16.mxu0 %vm7819_vm0, %v10228_v33  ;;  %v10241_v9 = vcombine.low %v10239_v26, %v10240_v6 }
 0x164   :  { %v7341_v58 = vpop.f32.mrf.mxu0 }
 0x165   :  { %v9426_v30 = vadd.f32 %v1171_v57, %v939_v42  ;;  %v7393_v10 = vpop.f32.mrf.mxu1 }
 0x166   :  { %v913_v39 = vpop.f32.mrf.mxu0 }
 0x167   :  { %v940_v50 = vadd.f32 %v913_v39, %v9273_v8  ;;  %v1174_v36 = vpop.f32.mrf.mxu1 }
 0x168   :  { %v7342_v52 = vpop.f32.mrf.mxu0 }
 0x169   :  { %v9429_v7 = vadd.f32 %v1174_v36, %v940_v50  ;;  %v7394_v62 = vpop.f32.mrf.mxu1  ;;  %v10249_v52 = vld [vmem:[#allocation10_spill] sm:$0xff] }
 0x16a   :  { %v918_v59 = vpop.f32.mrf.mxu0  ;;  %7644 = vmatmul.mubr.bf16.gmra.mxu0 %v10241_v9  ;;  %v10250_v62 = vld [vmem:[#allocation11_spill] sm:$0xff] }
 0x16b   :  { %v941_v1 = vadd.f32 %v918_v59, %v10242_v38  ;;  %v1179_v15 = vpop.f32.mrf.mxu1  ;;  %7647 = vmatprep.mubr.msk.bf16.mxu0 %vm7819_vm0, %v10228_v33 }
 0x16c   :  { %v7345_v54 = vpop.f32.mrf.mxu0 }
 0x16d   :  { %v9437_v0 = vadd.f32 %v1179_v15, %v941_v1  ;;  %v7397_v8 = vpop.f32.mrf.mxu1 }
 0x16e   :  { %v921_v17 = vpop.f32.mrf.mxu0 }
 0x16f   :  { %v942_v51 = vadd.f32 %v921_v17, %v9300_v40  ;;  %v1182_v48 = vpop.f32.mrf.mxu1 }
 0x170   :  { %v7346_v47 = vpop.f32.mrf.mxu0 }
 0x171   :  { %v9440_v22 = vadd.f32 %v1182_v48, %v942_v51  ;;  %v7398_v4 = vpop.f32.mrf.mxu1 }
 0x172   :  { %v1376_v35 = vpop.f32.mrf.mxu0  ;;  %7648 = vmatmul.mubr.bf16.gmra.mxu0 %v10245_v19 }
 0x173   :  { %v1447_v27 = vadd.f32 %v1376_v35, %v9321_v34  ;;  %v1808_v20 = vpop.f32.mrf.mxu1  ;;  %7651 = vmatprep.mubr.msk.bf16.mxu0 %vm7819_vm0, %v10228_v33  ;;  %v10248_v34 = vcombine.low %v10246_v13, %v10247_v46 }
 0x174   :  { %v7417_v29 = vpop.f32.mrf.mxu0 }
 0x175   :  { %v9448_v32 = vadd.f32 %v1808_v20, %v1447_v27  ;;  %v7469_v40 = vpop.f32.mrf.mxu1 }
 0x176   :  { %v1379_v23 = vpop.f32.mrf.mxu0 }
 0x177   :  { %v1448_v28 = vadd.f32 %v1379_v23, %v9324_v63  ;;  %v1811_v21 = vpop.f32.mrf.mxu1 }
 0x178   :  { %v7418_v25 = vpop.f32.mrf.mxu0 }
 0x179   :  { %v9451_v5 = vadd.f32 %v1811_v21, %v1448_v28  ;;  %v7470_v3 = vpop.f32.mrf.mxu1 }
 0x17a   :  { %v1384_v44 = vpop.f32.mrf.mxu0  ;;  %7652 = vmatmul.mubr.bf16.gmra.mxu0 %v10248_v34 }
 0x17b   :  { %v1449_v41 = vadd.f32 %v1384_v44, %v9339_v37  ;;  %v1816_v31 = vpop.f32.mrf.mxu1  ;;  %7655 = vmatprep.mubr.msk.bf16.mxu0 %vm7819_vm0, %v10228_v33  ;;  %v10251_v37 = vcombine.low %v10249_v52, %v10250_v62 }
 0x17c   :  { %v7421_v18 = vpop.f32.mrf.mxu0 }
 0x17d   :  { %v9459_v61 = vadd.f32 %v1816_v31, %v1449_v41  ;;  %v7473_v63 = vpop.f32.mrf.mxu1 }
 0x17e   :  { %v1387_v42 = vpop.f32.mrf.mxu0 }
 0x17f   :  { %v1450_v57 = vadd.f32 %v1387_v42, %v9345_v49  ;;  %v1819_v58 = vpop.f32.mrf.mxu1 }
 0x180   :  { %v7422_v10 = vpop.f32.mrf.mxu0 }
 0x181   :  { %v9462_v39 = vadd.f32 %v1819_v58, %v1450_v57  ;;  %v7474_v50 = vpop.f32.mrf.mxu1 }
 0x182   :  { %v1392_v36 = vpop.f32.mrf.mxu0  ;;  %7656 = vmatmul.mubr.bf16.gmra.mxu0 %v10251_v37 }
 0x183   :  { %v1451_v59 = vadd.f32 %v1392_v36, %v9350_v60  ;;  %v1824_v33 = vpop.f32.mrf.mxu1 }
 0x184   :  { %v7425_v26 = vpop.f32.mrf.mxu0 }
 0x185   :  { %v9468_v6 = vadd.f32 %v1824_v33, %v1451_v59  ;;  %v7477_v9 = vpop.f32.mrf.mxu1 }
 0x186   :  { %v1395_v38 = vpop.f32.mrf.mxu0 }
 0x187   :  { %v1452_v49 = vadd.f32 %v1395_v38, %v9359_v12  ;;  %v1827_v1 = vpop.f32.mrf.mxu1 }
 0x188   :  { %v7426_v15 = vpop.f32.mrf.mxu0 }
 0x189   :  { %v9471_v54 = vadd.f32 %v1827_v1, %v1452_v49  ;;  %v7478_v8 = vpop.f32.mrf.mxu1 }
 0x18a   :  { %v1400_v17 = vpop.f32.mrf.mxu0 }
 0x18b   :  { %v1453_v51 = vadd.f32 %v1400_v17, %v9367_v43  ;;  %v1832_v48 = vpop.f32.mrf.mxu1 }
 0x18c   :  { %v7429_v47 = vpop.f32.mrf.mxu0 }
 0x18d   :  { %v9474_v4 = vadd.f32 %v1832_v48, %v1453_v51  ;;  %v7481_v60 = vpop.f32.mrf.mxu1 }
 0x18e   :  { %v1403_v35 = vpop.f32.mrf.mxu0 }
 0x18f   :  { %v1454_v24 = vadd.f32 %v1403_v35, %v9376_v45  ;;  %v1835_v16 = vpop.f32.mrf.mxu1 }
 0x190   :  { %v7430_v19 = vpop.f32.mrf.mxu0 }
 0x191   :  { %v9477_v27 = vadd.f32 %v1835_v16, %v1454_v24  ;;  %v7482_v12 = vpop.f32.mrf.mxu1 }
 0x192   :  { %v1408_v20 = vpop.f32.mrf.mxu0 }
 0x193   :  { %v1455_v29 = vadd.f32 %v1408_v20, %v9384_v53  ;;  %v1840_v40 = vpop.f32.mrf.mxu1 }
 0x194   :  { %v7433_v23 = vpop.f32.mrf.mxu0 }
 0x195   :  { %v9480_v28 = vadd.f32 %v1840_v40, %v1455_v29  ;;  %v7485_v43 = vpop.f32.mrf.mxu1 }
 0x196   :  { %v1411_v21 = vpop.f32.mrf.mxu0 }
 0x197   :  { %v1456_v25 = vadd.f32 %v1411_v21, %v9393_v55  ;;  %v1843_v3 = vpop.f32.mrf.mxu1 }
 0x198   :  { %v7434_v44 = vpop.f32.mrf.mxu0 }
 0x199   :  { %v9483_v13 = vadd.f32 %v1843_v3, %v1456_v25  ;;  %v7486_v45 = vpop.f32.mrf.mxu1 }
 0x19a   :  { %v1416_v46 = vpop.f32.mrf.mxu0 }
 0x19b   :  { %v1457_v34 = vadd.f32 %v1416_v46, %v9401_v14  ;;  %v1848_v41 = vpop.f32.mrf.mxu1 }
 0x19c   :  { %v7437_v31 = vpop.f32.mrf.mxu0 }
 0x19d   :  { %v9486_v18 = vadd.f32 %v1848_v41, %v1457_v34  ;;  %v7489_v53 = vpop.f32.mrf.mxu1 }
 0x19e   :  { %v1419_v63 = vpop.f32.mrf.mxu0 }
 0x19f   :  { %v1458_v42 = vadd.f32 %v1419_v63, %v9407_v2  ;;  %v1851_v57 = vpop.f32.mrf.mxu1 }
 0x1a0   :  { %v7438_v58 = vpop.f32.mrf.mxu0 }
 0x1a1   :  { %v9489_v10 = vadd.f32 %v1851_v57, %v1458_v42  ;;  %v7490_v55 = vpop.f32.mrf.mxu1 }
 0x1a2   :  { %v1424_v50 = vpop.f32.mrf.mxu0 }
 0x1a3   :  { %v1459_v36 = vadd.f32 %v1424_v50, %v9415_v56  ;;  %v1856_v52 = vpop.f32.mrf.mxu1 }
 0x1a4   :  { %v7441_v62 = vpop.f32.mrf.mxu0 }
 0x1a5   :  { %v9492_v37 = vadd.f32 %v1856_v52, %v1459_v36  ;;  %v7493_v14 = vpop.f32.mrf.mxu1 }
 0x1a6   :  { %v1427_v59 = vpop.f32.mrf.mxu0 }
 0x1a7   :  { %v1460_v33 = vadd.f32 %v1427_v59, %v9418_v11  ;;  %v1859_v26 = vpop.f32.mrf.mxu1 }
 0x1a8   :  { %v7442_v9 = vpop.f32.mrf.mxu0 }
 0x1a9   :  { %v9495_v38 = vadd.f32 %v1859_v26, %v1460_v33  ;;  %v7494_v2 = vpop.f32.mrf.mxu1 }
 0x1aa   :  { %v1432_v49 = vpop.f32.mrf.mxu0 }
 0x1ab   :  { %v1461_v1 = vadd.f32 %v1432_v49, %v9426_v30  ;;  %v1864_v15 = vpop.f32.mrf.mxu1 }
 0x1ac   :  { %v7445_v8 = vpop.f32.mrf.mxu0 }
 0x1ad   :  { %v9498_v17 = vadd.f32 %v1864_v15, %v1461_v1  ;;  %v7497_v56 = vpop.f32.mrf.mxu1 }
 0x1ae   :  { %v1435_v51 = vpop.f32.mrf.mxu0 }
 0x1af   :  { %v1462_v48 = vadd.f32 %v1435_v51, %v9429_v7  ;;  %v1867_v47 = vpop.f32.mrf.mxu1 }
 0x1b0   :  { %v7446_v60 = vpop.f32.mrf.mxu0 }
 0x1b1   :  { %v9501_v35 = vadd.f32 %v1867_v47, %v1462_v48  ;;  %v7498_v11 = vpop.f32.mrf.mxu1 }
 0x1b2   :  { %v1440_v24 = vpop.f32.mrf.mxu0 }
 0x1b3   :  { %v1463_v16 = vadd.f32 %v1440_v24, %v9437_v0  ;;  %v1872_v19 = vpop.f32.mrf.mxu1 }
 0x1b4   :  { %v7449_v12 = vpop.f32.mrf.mxu0 }
 0x1b5   :  { %v9504_v20 = vadd.f32 %v1872_v19, %v1463_v16  ;;  %v7501_v30 = vpop.f32.mrf.mxu1 }
 0x1b6   :  { %v1443_v29 = vpop.f32.mrf.mxu0 }
 0x1b7   :  { %v1464_v40 = vadd.f32 %v1443_v29, %v9440_v22  ;;  %v1875_v23 = vpop.f32.mrf.mxu1 }
 0x1b8   :  { %v7450_v43 = vpop.f32.mrf.mxu0 }
 0x1b9   :  { %v9507_v21 = vadd.f32 %v1875_v23, %v1464_v40  ;;  %v7502_v7 = vpop.f32.mrf.mxu1 }
 0x1ba   :  { %v2240_v25 = vpop.f32.mrf.mxu0 }
 0x1bb   :  { %v2311_v3 = vadd.f32 %v2240_v25, %v9448_v32  ;;  %v2672_v44 = vpop.f32.mrf.mxu1 }
 0x1bc   :  { %v7521_v45 = vpop.f32.mrf.mxu0 }
 0x1bd   :  { %v9510_v46 = vadd.f32 %v2672_v44, %v2311_v3  ;;  %v7573_v0 = vpop.f32.mrf.mxu1 }
 0x1be   :  { %v2243_v34 = vpop.f32.mrf.mxu0 }
 0x1bf   :  { %v2312_v41 = vadd.f32 %v2243_v34, %v9451_v5  ;;  %v2675_v31 = vpop.f32.mrf.mxu1 }
 0x1c0   :  { %v7522_v53 = vpop.f32.mrf.mxu0 }
 0x1c1   :  { %v9513_v63 = vadd.f32 %v2675_v31, %v2312_v41  ;;  %v7574_v22 = vpop.f32.mrf.mxu1 }
 0x1c2   :  { %v2248_v42 = vpop.f32.mrf.mxu0 }
 0x1c3   :  { %v2313_v57 = vadd.f32 %v2248_v42, %v9459_v61  ;;  %v2680_v58 = vpop.f32.mrf.mxu1 }
 0x1c4   :  { %v7525_v55 = vpop.f32.mrf.mxu0 }
 0x1c5   :  { %v9516_v50 = vadd.f32 %v2680_v58, %v2313_v57  ;;  %v7577_v32 = vpop.f32.mrf.mxu1 }
 0x1c6   :  { %v2251_v36 = vpop.f32.mrf.mxu0 }
 0x1c7   :  { %v2314_v52 = vadd.f32 %v2251_v36, %v9462_v39  ;;  %v2683_v62 = vpop.f32.mrf.mxu1 }
 0x1c8   :  { %v7526_v14 = vpop.f32.mrf.mxu0 }
 0x1c9   :  { %v9519_v59 = vadd.f32 %v2683_v62, %v2314_v52  ;;  %v7578_v5 = vpop.f32.mrf.mxu1 }
 0x1ca   :  { %v2256_v33 = vpop.f32.mrf.mxu0 }
 0x1cb   :  { %v2315_v26 = vadd.f32 %v2256_v33, %v9468_v6  ;;  %v2688_v9 = vpop.f32.mrf.mxu1 }
 0x1cc   :  { %v7529_v2 = vpop.f32.mrf.mxu0 }
 0x1cd   :  { %v9522_v49 = vadd.f32 %v2688_v9, %v2315_v26  ;;  %v7581_v61 = vpop.f32.mrf.mxu1 }
 0x1ce   :  { %v2259_v1 = vpop.f32.mrf.mxu0 }
 0x1cf   :  { %v2316_v15 = vadd.f32 %v2259_v1, %v9471_v54  ;;  %v2691_v8 = vpop.f32.mrf.mxu1 }
 0x1d0   :  { %v7530_v56 = vpop.f32.mrf.mxu0 }
 0x1d1   :  { %v9525_v51 = vadd.f32 %v2691_v8, %v2316_v15  ;;  %v7582_v39 = vpop.f32.mrf.mxu1 }
 0x1d2   :  { %v2264_v48 = vpop.f32.mrf.mxu0 }
 0x1d3   :  { %v2317_v47 = vadd.f32 %v2264_v48, %v9474_v4  ;;  %v2696_v60 = vpop.f32.mrf.mxu1 }
 0x1d4   :  { %v7533_v11 = vpop.f32.mrf.mxu0 }
 0x1d5   :  { %v9528_v24 = vadd.f32 %v2696_v60, %v2317_v47  ;;  %v7585_v6 = vpop.f32.mrf.mxu1 }
 0x1d6   :  { %v2267_v16 = vpop.f32.mrf.mxu0 }
 0x1d7   :  { %v2318_v19 = vadd.f32 %v2267_v16, %v9477_v27  ;;  %v2699_v12 = vpop.f32.mrf.mxu1 }
 0x1d8   :  { %v7534_v30 = vpop.f32.mrf.mxu0 }
 0x1d9   :  { %v9531_v29 = vadd.f32 %v2699_v12, %v2318_v19  ;;  %v7586_v54 = vpop.f32.mrf.mxu1  ;;  %v7820_v19 = vmov 1966171168   ;;  %v3088_v30 = vlaneseq }
 0x1da   :  { %v2272_v40 = vpop.f32.mrf.mxu0  ;;  %v3086_v12 = vunpack.c.l.s4 %v7820_v19 }
 0x1db   :  { %v2319_v23 = vadd.f32 %v2272_v40, %v9480_v28  ;;  %v2704_v43 = vpop.f32.mrf.mxu1 }
 0x1dc   :  { %v7537_v7 = vpop.f32.mrf.mxu0 }
 0x1dd   :  { %v9534_v25 = vadd.f32 %v2704_v43, %v2319_v23  ;;  %v7589_v4 = vpop.f32.mrf.mxu1 }
 0x1de   :  { %v2275_v3 = vpop.f32.mrf.mxu0  ;;  %v3087_v4 = vunpack.c.0.s8 %v3086_v12 }
 0x1df   :  { %v2320_v44 = vadd.f32 %v2275_v3, %v9483_v13  ;;  %v2707_v45 = vpop.f32.mrf.mxu1  ;;  %v3089_v3 = vshrl.u32 %v3088_v30, 7 }
 0x1e0   :  { %v7538_v0 = vpop.f32.mrf.mxu0 }
 0x1e1   :  { %v9537_v34 = vadd.f32 %v2707_v45, %v2320_v44  ;;  %v7590_v27 = vpop.f32.mrf.mxu1 }
 0x1e2   :  { %v2280_v41 = vpop.f32.mrf.mxu0 }
 0x1e3   :  { %v2321_v31 = vadd.f32 %v2280_v41, %v9486_v18  ;;  %v2712_v53 = vpop.f32.mrf.mxu1  ;;  %v9563_v41 = vsub.s32 %v3087_v4, %v3089_v3 }
 0x1e4   :  { %v7541_v22 = vpop.f32.mrf.mxu0 }
 0x1e5   :  { %v9540_v42 = vadd.f32 %v2712_v53, %v2321_v31  ;;  %v7593_v28 = vpop.f32.mrf.mxu1 }
 0x1e6   :  { %v2283_v57 = vpop.f32.mrf.mxu0 }
 0x1e7   :  { %v2322_v58 = vadd.f32 %v2283_v57, %v9489_v10  ;;  %v2715_v55 = vpop.f32.mrf.mxu1 }
 0x1e8   :  { %v7542_v32 = vpop.f32.mrf.mxu0 }
 0x1e9   :  { %v9543_v36 = vadd.f32 %v2715_v55, %v2322_v58  ;;  %v7594_v13 = vpop.f32.mrf.mxu1 }
 0x1ea   :  { %v2288_v52 = vpop.f32.mrf.mxu0 }
 0x1eb   :  { %v2323_v62 = vadd.f32 %v2288_v52, %v9492_v37  ;;  %v2720_v14 = vpop.f32.mrf.mxu1 }
 0x1ec   :  { %v7545_v5 = vpop.f32.mrf.mxu0 }
 0x1ed   :  { %v9546_v33 = vadd.f32 %v2720_v14, %v2323_v62  ;;  %v7597_v18 = vpop.f32.mrf.mxu1 }
 0x1ee   :  { %v2291_v26 = vpop.f32.mrf.mxu0 }
 0x1ef   :  { %v2324_v9 = vadd.f32 %v2291_v26, %v9495_v38  ;;  %v2723_v2 = vpop.f32.mrf.mxu1 }
 0x1f0   :  { %v7546_v61 = vpop.f32.mrf.mxu0 }
 0x1f1   :  { %v9549_v1 = vadd.f32 %v2723_v2, %v2324_v9  ;;  %v7598_v10 = vpop.f32.mrf.mxu1 }
 0x1f2   :  { %v2296_v15 = vpop.f32.mrf.mxu0 }
 0x1f3   :  { %v2325_v8 = vadd.f32 %v2296_v15, %v9498_v17  ;;  %v2728_v56 = vpop.f32.mrf.mxu1 }
 0x1f4   :  { %v7549_v39 = vpop.f32.mrf.mxu0 }
 0x1f5   :  { %v9552_v48 = vadd.f32 %v2728_v56, %v2325_v8  ;;  %v7601_v37 = vpop.f32.mrf.mxu1 }
 0x1f6   :  { %v2299_v47 = vpop.f32.mrf.mxu0 }
 0x1f7   :  { %v2326_v60 = vadd.f32 %v2299_v47, %v9501_v35  ;;  %v2731_v11 = vpop.f32.mrf.mxu1 }
 0x1f8   :  { %v7550_v6 = vpop.f32.mrf.mxu0 }
 0x1f9   :  { %v9555_v16 = vadd.f32 %v2731_v11, %v2326_v60  ;;  %v7602_v38 = vpop.f32.mrf.mxu1 }
 0x1fa   :  { %v2304_v54 = vpop.f32.mrf.mxu0 }
 0x1fb   :  { %v2327_v40 = vadd.f32 %v2304_v54, %v9504_v20  ;;  %v2736_v17 = vpop.f32.mrf.mxu1 }
 0x1fc   :  { %v7553_v23 = vpop.f32.mrf.mxu0 }
 0x1fd   :  { %v9558_v43 = vadd.f32 %v2736_v17, %v2327_v40  ;;  %v7605_v7 = vpop.f32.mrf.mxu1 }
 0x1fe   :  { %v2307_v44 = vpop.f32.mrf.mxu0 }
 0x1ff   :  { %v2328_v35 = vadd.f32 %v2307_v44, %v9507_v21  ;;  %v2739_v45 = vpop.f32.mrf.mxu1 }
 0x200   :  { %v7554_v0 = vpop.f32.mrf.mxu0 }
 0x201   :  { %v9561_v27 = vadd.f32 %v2739_v45, %v2328_v35  ;;  %v7606_v31 = vpop.f32.mrf.mxu1 }
 0x202   :  { %v2977_v53 = vpop.f32.mrf.mxu0 }
 0x203   :  { %v3048_v20 = vadd.f32 %v2977_v53, %v9510_v46  ;;  %v9566_v22 = vpop.f32.mrf.mxu1 }
 0x204   :  { %v7625_v28 = vpop.f32.mrf.mxu0  ;;  %v9578_v46 = vmul.f32 %v9566_v22, %v9566_v22 }
 0x205   :  { %v3084_v57 = vcombine.high %v3048_v20, %v3048_v20  ;;  %v3091_v58 = vrot.slane %v3048_v20, %v9563_v41  ;;  %v9569_v55 = vpop.f32.mrf.mxu1 }
 0x206   :  { %v2980_v32 = vpop.f32.mrf.mxu0  ;;  %v9582_v18 = vmul.f32 %v9569_v55, %v9569_v55 }
 0x207   :  { %v3098_v21 = vrot.slane %v3084_v57, %v9563_v41  ;;  %v3099_v13 = vcombine.high %v3091_v58, %v3091_v58  ;;  %v3107_v52 = vrot.slane %v3091_v58, %v9563_v41  ;;  %v3049_v62 = vadd.f32 %v2980_v32, %v9513_v63  ;;  %v9574_v14 = vpop.f32.mrf.mxu1 }
 0x208   :  { %v7626_v5 = vpop.f32.mrf.mxu0  ;;  %v6976_v26 = vpack.c.bf16 %v9574_v14, %v9566_v22  ;;  %v9588_v9 = vmul.f32 %v9574_v14, %v9574_v14 }
 0x209   :  { %v3100_v2 = vcombine.high %v3098_v21, %v3098_v21  ;;  %v3114_v63 = vrot.slane %v3098_v21, %v9563_v41  ;;  %v3121_v61 = vrot.slane %v3099_v13, %v9563_v41  ;;  %v3129_v10 = vcombine.high %v3107_v52, %v3107_v52  ;;  %v9592_v15 = vpop.f32.mrf.mxu1 }
 0x20a   :  { %v4988_v8 = vmul.f32 %v3107_v52, %v3107_v52  ;;  %v3133_v56 = vcombine.high %v3049_v62, %v3049_v62  ;;  %v3140_v39 = vrot.slane %v3049_v62, %v9563_v41  ;;  %v2985_v37 = vpop.f32.mrf.mxu0  ;;  %7015 = vst [vmem:[%s10198_s7 + $0x8] sm:$0xff] %v6976_v26   ;;  %v9600_v47 = vadd.f32 %v9592_v15, %v9569_v55 }
 0x20b   :  { %v3128_v60 = vrot.slane %v3100_v2, %v9563_v41  ;;  %v3130_v11 = vcombine.high %v3114_v63, %v3114_v63  ;;  %v3131_v6 = vcombine.high %v3121_v61, %v3121_v61  ;;  %v4086_v38 = vcombine.low %v3107_v52, %v3121_v61 }
 0x20c   :  { %v6832_v19 = vcombine.high %v3107_v52, %v3121_v61  ;;  %v4989_v12 = vmul.f32 %v3121_v61, %v3121_v61  ;;  %v4990_v30 = vmul.f32 %v3129_v10, %v3129_v10  ;;  %v4992_v54 = vmul.f32 %v3114_v63, %v3114_v63  ;;  %v7629_v40 = vpop.f32.mrf.mxu0 }
 0x20d   :  { %v3132_v17 = vcombine.high %v3128_v60, %v3128_v60  ;;  %v4088_v23 = vcombine.low %v3114_v63, %v3128_v60  ;;  %v6833_v7 = vcombine.high %v3114_v63, %v3128_v60  ;;  %v4096_v4 = vrot.slane %v4086_v38, %v9563_v41 }
 0x20e   :  { %v4103_v3 = vrot.slane %v6832_v19, %v9563_v41  ;;  %v4991_v44 = vmul.f32 %v3131_v6, %v3131_v6  ;;  %v4993_v35 = vmul.f32 %v3128_v60, %v3128_v60  ;;  %v4994_v45 = vmul.f32 %v3130_v11, %v3130_v11  ;;  %v2988_v0 = vpop.f32.mrf.mxu0 }
 0x20f   :  { %v4110_v31 = vrot.slane %v4088_v23, %v9563_v41  ;;  %v4117_v53 = vrot.slane %v6833_v7, %v9563_v41  ;;  %v4995_v20 = vmul.f32 %v3132_v17, %v3132_v17  ;;  %v5244_v28 = vcombine.low %v4988_v8, %v4989_v12 }
 0x210   :  { %v4118_v57 = vcombine.low %v4096_v4, %v4103_v3  ;;  %v5245_v58 = vcombine.low %v4990_v30, %v4991_v44  ;;  %v5246_v32 = vcombine.low %v4992_v54, %v4993_v35  ;;  %v3147_v21 = vrot.slane %v3133_v56, %v9563_v41  ;;  %v7630_v13 = vpop.f32.mrf.mxu0 }
 0x211   :  { %v4119_v52 = vcombine.low %v4110_v31, %v4117_v53  ;;  %v5247_v62 = vcombine.low %v4994_v45, %v4995_v20  ;;  %v5254_v5 = vrot.slane %v5244_v28, %v9563_v41  ;;  %v3148_v26 = vcombine.high %v3140_v39, %v3140_v39 }
 0x212   :  { %v4126_v2 = vrot.slane %v4118_v57, %v9563_v41  ;;  %v5261_v63 = vrot.slane %v5245_v58, %v9563_v41  ;;  %v5268_v61 = vrot.slane %v5246_v32, %v9563_v41  ;;  %v3149_v10 = vcombine.high %v3147_v21, %v3147_v21  ;;  %v9612_v60 = vpop.f32.mrf.mxu0 }
 0x213   :  { %v4133_v8 = vrot.slane %v4119_v52, %v9563_v41  ;;  %v5275_v11 = vrot.slane %v5247_v62, %v9563_v41  ;;  %v3156_v56 = vrot.slane %v3140_v39, %v9563_v41  ;;  %v3163_v6 = vrot.slane %v3147_v21, %v9563_v41 }
 0x214   :  { %v5276_v38 = vcombine.low %v5254_v5, %v5261_v63  ;;  %v3170_v19 = vrot.slane %v3148_v26, %v9563_v41  ;;  %v3177_v12 = vrot.slane %v3149_v10, %v9563_v41  ;;  %v3050_v30 = vadd.f32 %v2985_v37, %v9516_v50  ;;  %v7633_v54 = vpop.f32.mrf.mxu0 }
 0x215   :  { %v5277_v40 = vcombine.low %v5268_v61, %v5275_v11  ;;  %v3178_v17 = vcombine.high %v3156_v56, %v3156_v56  ;;  %v3179_v23 = vcombine.high %v3163_v6, %v3163_v6  ;;  %v4999_v7 = vmul.f32 %v3163_v6, %v3163_v6 }
 0x216   :  { %v9622_v4 = vrot.slane %v5276_v38, %v9563_v41  ;;  %v3180_v3 = vcombine.high %v3170_v19, %v3170_v19  ;;  %v3181_v44 = vcombine.high %v3177_v12, %v3177_v12  ;;  %v4996_v39 = vmul.f32 %v3170_v19, %v3170_v19  ;;  %v9624_v35 = vpop.f32.mrf.mxu0 }
 0x217   :  { %v9627_v45 = vrot.slane %v5277_v40, %v9563_v41  ;;  %v4135_v31 = vcombine.low %v3170_v19, %v3178_v17  ;;  %v4137_v53 = vcombine.low %v3177_v12, %v3179_v23  ;;  %v4997_v20 = vmul.f32 %v3178_v17, %v3178_v17 }
 0x218   :  { %v4136_v50 = vcombine.low %v3180_v3, %v3163_v6  ;;  %v4998_v37 = vmul.f32 %v3180_v3, %v3180_v3  ;;  %v5000_v28 = vmul.f32 %v3177_v12, %v3177_v12  ;;  %v5001_v57 = vmul.f32 %v3179_v23, %v3179_v23  ;;  %v7634_v58 = vpop.f32.mrf.mxu0 }
 0x219   :  { %v4145_v32 = vrot.slane %v4135_v31, %v9563_v41  ;;  %v4159_v21 = vrot.slane %v4137_v53, %v9563_v41  ;;  %v5002_v13 = vmul.f32 %v3181_v44, %v3181_v44  ;;  %v5293_v52 = vcombine.low %v4996_v39, %v4997_v20 }
 0x21a   :  { %v4152_v62 = vrot.slane %v4136_v50, %v9563_v41  ;;  %v5294_v5 = vcombine.low %v4998_v37, %v4999_v7  ;;  %v5295_v26 = vcombine.low %v5000_v28, %v5001_v57  ;;  %v3182_v63 = vcombine.high %v3050_v30, %v3050_v30  ;;  %v9632_v61 = vpop.f32.mrf.mxu0 }
 0x21b   :  { %v5303_v10 = vrot.slane %v5293_v52, %v9563_v41  ;;  %v3189_v11 = vrot.slane %v3050_v30, %v9563_v41  ;;  %v3051_v56 = vadd.f32 %v2988_v0, %v9519_v59  ;;  %v9637_v6 = vcombine.low %v4126_v2, %v4133_v8 }
 0x21c   :  { %v4167_v38 = vcombine.low %v4145_v32, %v4152_v62  ;;  %v5310_v19 = vrot.slane %v5294_v5, %v9563_v41  ;;  %v5317_v12 = vrot.slane %v5295_v26, %v9563_v41  ;;  %v3196_v54 = vrot.slane %v3182_v63, %v9563_v41  ;;  %v7637_v40 = vpop.f32.mrf.mxu0 }
 0x21d   :  { %v3197_v17 = vcombine.high %v3189_v11, %v3189_v11  ;;  %v3205_v23 = vrot.slane %v3189_v11, %v9563_v41  ;;  %v3231_v7 = vcombine.high %v3051_v56, %v3051_v56  ;;  %v3238_v3 = vrot.slane %v3051_v56, %v9563_v41 }
 0x21e   :  { %v4175_v30 = vrot.slane %v4167_v38, %v9563_v41  ;;  %v5325_v39 = vcombine.low %v5303_v10, %v5310_v19  ;;  %v3198_v59 = vcombine.high %v3196_v54, %v3196_v54  ;;  %v3212_v0 = vrot.slane %v3196_v54, %v9563_v41  ;;  %v9646_v2 = vpop.f32.mrf.mxu0 }
 0x21f   :  { %v3219_v8 = vrot.slane %v3197_v17, %v9563_v41  ;;  %v3227_v31 = vcombine.high %v3205_v23, %v3205_v23  ;;  %v4138_v53 = vcombine.low %v3181_v44, %v3205_v23  ;;  %v5003_v20 = vmul.f32 %v3205_v23, %v3205_v23 }
 0x220   :  { %v9650_v50 = vrot.slane %v5325_v39, %v9563_v41  ;;  %v3226_v37 = vrot.slane %v3198_v59, %v9563_v41  ;;  %v3228_v28 = vcombine.high %v3212_v0, %v3212_v0  ;;  %v5006_v57 = vmul.f32 %v3212_v0, %v3212_v0  ;;  %v7638_v58 = vpop.f32.mrf.mxu0 }
 0x221   :  { %v3229_v32 = vcombine.high %v3219_v8, %v3219_v8  ;;  %v4166_v52 = vrot.slane %v4138_v53, %v9563_v41  ;;  %v6834_v62 = vcombine.high %v3205_v23, %v3219_v8  ;;  %v5004_v5 = vmul.f32 %v3227_v31, %v3227_v31 }
 0x222   :  { %v3230_v26 = vcombine.high %v3226_v37, %v3226_v37  ;;  %v4185_v63 = vcombine.low %v3212_v0, %v3226_v37  ;;  %v5007_v10 = vmul.f32 %v3226_v37, %v3226_v37  ;;  %v9654_v11 = vmul.f32 %v3228_v28, %v3228_v28  ;;  %v9656_v44 = vpop.f32.mrf.mxu0 }
 0x223   :  { %v4168_v56 = vcombine.low %v4159_v21, %v4166_v52  ;;  %v4194_v38 = vrot.slane %v6834_v62, %v9563_v41  ;;  %v5005_v19 = vmul.f32 %v3229_v32, %v3229_v32  ;;  %v5296_v54 = vcombine.low %v5002_v13, %v5003_v20 }
 0x224   :  { %v4201_v40 = vrot.slane %v4185_v63, %v9563_v41  ;;  %v5009_v17 = vmul.f32 %v3230_v26, %v3230_v26  ;;  %v5343_v39 = vcombine.low %v5006_v57, %v5007_v10  ;;  %v3245_v59 = vrot.slane %v3231_v7, %v9563_v41  ;;  %v7641_v23 = vpop.f32.mrf.mxu0 }
 0x225   :  { %v4182_v8 = vrot.slane %v4168_v56, %v9563_v41  ;;  %v5324_v31 = vrot.slane %v5296_v54, %v9563_v41  ;;  %v5342_v53 = vcombine.low %v5004_v5, %v5005_v19  ;;  %v3246_v28 = vcombine.high %v3238_v3, %v3238_v3 }
 0x226   :  { %v4216_v58 = vcombine.low %v4194_v38, %v4201_v40  ;;  %v5359_v21 = vrot.slane %v5343_v39, %v9563_v41  ;;  %v3247_v52 = vcombine.high %v3245_v59, %v3245_v59  ;;  %v3254_v32 = vrot.slane %v3238_v3, %v9563_v41  ;;  %v9665_v13 = vpop.f32.mrf.mxu0 }
 0x227   :  { %v5326_v20 = vcombine.low %v5317_v12, %v5324_v31  ;;  %v5352_v57 = vrot.slane %v5342_v53, %v9563_v41  ;;  %v3261_v7 = vrot.slane %v3245_v59, %v9563_v41  ;;  %v3268_v62 = vrot.slane %v3246_v28, %v9563_v41 }
 0x228   :  { %v4224_v26 = vrot.slane %v4216_v58, %v9563_v41  ;;  %v3275_v5 = vrot.slane %v3247_v52, %v9563_v41  ;;  %v4183_v63 = vcombine.low %v4175_v30, %v4182_v8  ;;  %v6835_v10 = vcombine.high %v3212_v0, %v3226_v37  ;;  %v7642_v56 = vpop.f32.mrf.mxu0 }
 0x229   :  { %v5340_v38 = vrot.slane %v5326_v20, %v9563_v41  ;;  %v5374_v19 = vcombine.low %v5352_v57, %v5359_v21  ;;  %v3276_v3 = vcombine.high %v3261_v7, %v3261_v7  ;;  %v3277_v54 = vcombine.high %v3268_v62, %v3268_v62 }
 0x22a   :  { %v4187_v40 = vcombine.low %v3254_v32, %v3268_v62  ;;  %v4208_v12 = vrot.slane %v6835_v10, %v9563_v41  ;;  %v6931_v39 = vpack.c.bf16 %v4183_v63, %v9637_v6  ;;  %v4966_v59 = vadd.f32 %v4183_v63, %v9637_v6  ;;  %v9676_v23 = vpop.f32.mrf.mxu0 }
 0x22b   :  { %v9679_v31 = vrot.slane %v5374_v19, %v9563_v41  ;;  %v4233_v30 = vcombine.low %v3277_v54, %v3261_v7  ;;  %v4234_v0 = vcombine.low %v3275_v5, %v3276_v3  ;;  %v5010_v37 = vmul.f32 %v3254_v32, %v3254_v32 }
 0x22c   :  { %v4215_v8 = vrot.slane %v4187_v40, %v9563_v41  ;;  %6932 = vst [vmem:[%s10199_s4] sm:$0xff] %v6931_v39   ;;  %v5011_v53 = vmul.f32 %v3268_v62, %v3268_v62  ;;  %v5012_v28 = vmul.f32 %v3277_v54, %v3277_v54  ;;  %v5013_v58 = vmul.f32 %v3261_v7, %v3261_v7  ;;  %v7645_v21 = vpop.f32.mrf.mxu0 }
 0x22d   :  { %v4243_v6 = vrot.slane %v4233_v30, %v9563_v41  ;;  %v4250_v52 = vrot.slane %v4234_v0, %v9563_v41  ;;  %v5014_v20 = vmul.f32 %v3275_v5, %v3275_v5  ;;  %v5015_v57 = vmul.f32 %v3276_v3, %v3276_v3 }
 0x22e   :  { %v4217_v63 = vcombine.low %v4208_v12, %v4215_v8  ;;  %v5292_v32 = vcombine.low %v9622_v4, %v9627_v45  ;;  %v5341_v10 = vcombine.low %v9650_v50, %v5340_v38  ;;  %v5344_v56 = vcombine.low %v9654_v11, %v5009_v17  ;;  %v9691_v19 = vpop.f32.mrf.mxu0 }
 0x22f   :  { %v4265_v62 = vcombine.low %v4243_v6, %v4250_v52  ;;  %v5345_v54 = vcombine.low %v5010_v37, %v5011_v53  ;;  %v5391_v7 = vcombine.low %v5012_v28, %v5013_v58  ;;  %v5392_v40 = vcombine.low %v5014_v20, %v5015_v57 }
 0x230   :  { %v4231_v39 = vrot.slane %v4217_v63, %v9563_v41  ;;  %v5366_v30 = vrot.slane %v5344_v56, %v9563_v41  ;;  %v6044_v0 = vadd.f32 %v5341_v10, %v5292_v32  ;;  %v3052_v3 = vadd.f32 %v9612_v60, %v9522_v49  ;;  %v7646_v12 = vpop.f32.mrf.mxu0 }
 0x231   :  { %v9698_v4 = vrot.slane %v4265_v62, %v9563_v41  ;;  %v5373_v45 = vrot.slane %v5345_v54, %v9563_v41  ;;  %v5401_v50 = vrot.slane %v5391_v7, %v9563_v41  ;;  %v5408_v11 = vrot.slane %v5392_v40, %v9563_v41 }
 0x232   :  { %v9703_v17 = vcombine.low %v4224_v26, %v4231_v39  ;;  %v3278_v38 = vcombine.high %v3275_v5, %v3275_v5  ;;  %v3279_v37 = vcombine.high %v3052_v3, %v3052_v3  ;;  %v3286_v8 = vrot.slane %v3052_v3, %v9563_v41  ;;  %v9706_v53 = vpop.f32.mrf.mxu0 }
 0x233   :  { %v5375_v28 = vcombine.low %v5366_v30, %v5373_v45  ;;  %v5423_v49 = vcombine.low %v5401_v50, %v5408_v11  ;;  %v3053_v60 = vadd.f32 %v9624_v35, %v9525_v51  ;;  %v9712_v58 = vadd.f32 %v9632_v61, %v9528_v24 }
 0x234   :  { %v9715_v21 = vadd.f32 %v4966_v59, %v9703_v17  ;;  %v3293_v26 = vrot.slane %v3279_v37, %v9563_v41  ;;  %v3294_v5 = vcombine.high %v3286_v8, %v3286_v8  ;;  %v3302_v6 = vrot.slane %v3286_v8, %v9563_v41  ;;  %v7649_v52 = vpop.f32.mrf.mxu0 }
 0x235   :  { %v5389_v20 = vrot.slane %v5375_v28, %v9563_v41  ;;  %v9721_v57 = vrot.slane %v5423_v49, %v9563_v41  ;;  %v5016_v63 = vmul.f32 %v3278_v38, %v3278_v38  ;;  %v3327_v51 = vcombine.high %v3053_v60, %v3053_v60 }
 0x236   :  { %v3295_v35 = vcombine.high %v3293_v26, %v3293_v26  ;;  %v3309_v24 = vrot.slane %v3293_v26, %v9563_v41  ;;  %v3316_v61 = vrot.slane %v3294_v5, %v9563_v41  ;;  %v3324_v59 = vcombine.high %v3302_v6, %v3302_v6  ;;  %v9725_v32 = vpop.f32.mrf.mxu0 }
 0x237   :  { %v5390_v10 = vcombine.low %v9679_v31, %v5389_v20  ;;  %v4235_v56 = vcombine.low %v3278_v38, %v3302_v6  ;;  %v5017_v62 = vmul.f32 %v3302_v6, %v3302_v6  ;;  %v3334_v54 = vrot.slane %v3053_v60, %v9563_v41 }
 0x238   :  { %v3323_v7 = vrot.slane %v3295_v35, %v9563_v41  ;;  %v3325_v40 = vcombine.high %v3309_v24, %v3309_v24  ;;  %v4236_v39 = vcombine.low %v3316_v61, %v3324_v59  ;;  %v5018_v30 = vmul.f32 %v3316_v61, %v3316_v61  ;;  %v7650_v3 = vpop.f32.mrf.mxu0 }
 0x239   :  { %v6045_v12 = vadd.f32 %v6044_v0, %v5390_v10  ;;  %v4257_v45 = vrot.slane %v4235_v56, %v9563_v41  ;;  %v5019_v50 = vmul.f32 %v3324_v59, %v3324_v59  ;;  %v5020_v11 = vmul.f32 %v3309_v24, %v3309_v24 }
 0x23a   :  { %v3326_v37 = vcombine.high %v3323_v7, %v3323_v7  ;;  %v4264_v8 = vrot.slane %v4236_v39, %v9563_v41  ;;  %v4282_v28 = vcombine.low %v3309_v24, %v3323_v7  ;;  %v6836_v31 = vcombine.high %v3309_v24, %v3323_v7  ;;  %v9732_v38 = vpop.f32.mrf.mxu0 }
 0x23b   :  { %v5021_v49 = vmul.f32 %v3323_v7, %v3323_v7  ;;  %v5022_v60 = vmul.f32 %v3325_v40, %v3325_v40  ;;  %v5393_v26 = vcombine.low %v5016_v63, %v5017_v62  ;;  %v5394_v5 = vcombine.low %v5018_v30, %v5019_v50 }
 0x23c   :  { %v4266_v6 = vcombine.low %v4257_v45, %v4264_v8  ;;  %v4292_v52 = vrot.slane %v4282_v28, %v9563_v41  ;;  %v4299_v0 = vrot.slane %v6836_v31, %v9563_v41  ;;  %v5023_v20 = vmul.f32 %v3326_v37, %v3326_v37  ;;  %v7653_v35 = vpop.f32.mrf.mxu0 }
 0x23d   :  { %v5415_v61 = vrot.slane %v5393_v26, %v9563_v41  ;;  %v5422_v59 = vrot.slane %v5394_v5, %v9563_v41  ;;  %v5440_v10 = vcombine.low %v5020_v11, %v5021_v49  ;;  %v3341_v24 = vrot.slane %v3327_v51, %v9563_v41 }
 0x23e   :  { %v4280_v56 = vrot.slane %v4266_v6, %v9563_v41  ;;  %v4314_v7 = vcombine.low %v4292_v52, %v4299_v0  ;;  %v5441_v40 = vcombine.low %v5022_v60, %v5023_v20  ;;  %v3342_v63 = vcombine.high %v3334_v54, %v3334_v54  ;;  %v9740_v62 = vpop.f32.mrf.mxu0 }
 0x23f   :  { %v5424_v39 = vcombine.low %v5415_v61, %v5422_v59  ;;  %v5450_v30 = vrot.slane %v5440_v10, %v9563_v41  ;;  %v3343_v3 = vcombine.high %v3341_v24, %v3341_v24  ;;  %v3350_v45 = vrot.slane %v3334_v54, %v9563_v41 }
 0x240   :  { %v4281_v50 = vcombine.low %v9698_v4, %v4280_v56  ;;  %v4322_v37 = vrot.slane %v4314_v7, %v9563_v41  ;;  %v5457_v11 = vrot.slane %v5441_v40, %v9563_v41  ;;  %v3357_v51 = vrot.slane %v3341_v24, %v9563_v41  ;;  %v7654_v8 = vpop.f32.mrf.mxu0 }
 0x241   :  { %v5438_v28 = vrot.slane %v5424_v39, %v9563_v41  ;;  %v3364_v31 = vrot.slane %v3342_v63, %v9563_v41  ;;  %v3371_v49 = vrot.slane %v3343_v3, %v9563_v41  ;;  %v3372_v60 = vcombine.high %v3350_v45, %v3350_v45 }
 0x242   :  { %v6936_v26 = vpack.c.bf16 %v4281_v50, %v9703_v17  ;;  %v4968_v54 = vadd.f32 %v9715_v21, %v4281_v50  ;;  %v5472_v5 = vcombine.low %v5450_v30, %v5457_v11  ;;  %v3373_v4 = vcombine.high %v3357_v51, %v3357_v51  ;;  %v9753_v6 = vpop.f32.mrf.mxu0 }
 0x243   :  { %v5439_v52 = vcombine.low %v9721_v57, %v5438_v28  ;;  %v3374_v0 = vcombine.high %v3364_v31, %v3364_v31  ;;  %v4284_v20 = vcombine.low %v3350_v45, %v3364_v31  ;;  %v6837_v35 = vcombine.high %v3350_v45, %v3364_v31 }
 0x244   :  { %7008 = vst [vmem:[%s10199_s4 + $0x8] sm:$0xff] %v6936_v26   ;;  %v9760_v61 = vrot.slane %v5472_v5, %v9563_v41  ;;  %v4331_v59 = vcombine.low %v3371_v49, %v3373_v4  ;;  %v5024_v17 = vmul.f32 %v3350_v45, %v3350_v45  ;;  %v5025_v10 = vmul.f32 %v3364_v31, %v3364_v31  ;;  %v7657_v21 = vpop.f32.mrf.mxu0 }
 0x245   :  { %v6046_v24 = vadd.f32 %v6045_v12, %v5439_v52  ;;  %v4306_v56 = vrot.slane %v4284_v20, %v9563_v41  ;;  %v4313_v7 = vrot.slane %v6837_v35, %v9563_v41  ;;  %v5026_v57 = vmul.f32 %v3372_v60, %v3372_v60 }
 0x246   :  { %v4341_v40 = vrot.slane %v4331_v59, %v9563_v41  ;;  %v5027_v63 = vmul.f32 %v3374_v0, %v3374_v0  ;;  %v5028_v39 = vmul.f32 %v3371_v49, %v3371_v49  ;;  %v5029_v30 = vmul.f32 %v3373_v4, %v3373_v4 }
 0x247   :  { %v4315_v3 = vcombine.low %v4306_v56, %v4313_v7  ;;  %v5442_v50 = vcombine.low %v5024_v17, %v5025_v10  ;;  %v3375_v11 = vcombine.high %v3371_v49, %v3371_v49  ;;  %v3376_v51 = vcombine.high %v9712_v58, %v9712_v58 }
 0x248   :  { %v5443_v45 = vcombine.low %v5026_v57, %v5027_v63  ;;  %v5489_v8 = vcombine.low %v5028_v39, %v5029_v30  ;;  %v3383_v12 = vrot.slane %v9712_v58, %v9563_v41  ;;  %v3055_v28 = vadd.f32 %v9646_v2, %v9531_v29  ;;  %v9783_v63 = vpop.f32.mrf.mxu0 }
 0x249   :  { %v4329_v31 = vrot.slane %v4315_v3, %v9563_v41  ;;  %v5464_v60 = vrot.slane %v5442_v50, %v9563_v41  ;;  %v3390_v26 = vrot.slane %v3376_v51, %v9563_v41  ;;  %v5030_v5 = vmul.f32 %v3375_v11, %v3375_v11 }
 0x24a   :  { %v5471_v49 = vrot.slane %v5443_v45, %v9563_v41  ;;  %v5499_v4 = vrot.slane %v5489_v8, %v9563_v41  ;;  %v3391_v52 = vcombine.high %v3383_v12, %v3383_v12  ;;  %v3399_v0 = vrot.slane %v3383_v12, %v9563_v41  ;;  %v7658_v12 = vpop.f32.mrf.mxu0 }
 0x24b   :  { %v9777_v20 = vcombine.low %v4322_v37, %v4329_v31  ;;  %v3392_v58 = vcombine.high %v3390_v26, %v3390_v26  ;;  %v3406_v35 = vrot.slane %v3390_v26, %v9563_v41  ;;  %v3425_v29 = vcombine.high %v3055_v28, %v3055_v28 }
 0x24c   :  { %v5473_v2 = vcombine.low %v5464_v60, %v5471_v49  ;;  %v3413_v59 = vrot.slane %v3391_v52, %v9563_v41  ;;  %v3421_v17 = vcombine.high %v3399_v0, %v3399_v0  ;;  %v4332_v10 = vcombine.low %v3375_v11, %v3399_v0 }
 0x24d   :  { %v3420_v21 = vrot.slane %v3392_v58, %v9563_v41  ;;  %v3422_v56 = vcombine.high %v3406_v35, %v3406_v35  ;;  %v4969_v7 = vadd.f32 %v4968_v54, %v9777_v20  ;;  %v5031_v57 = vmul.f32 %v3399_v0, %v3399_v0 }
 0x24e   :  { %v5487_v37 = vrot.slane %v5473_v2, %v9563_v41  ;;  %v3423_v39 = vcombine.high %v3413_v59, %v3413_v59  ;;  %v4333_v30 = vcombine.low %v3413_v59, %v3421_v17  ;;  %v4348_v3 = vrot.slane %v4332_v10, %v9563_v41 }
 0x24f   :  { %v3424_v50 = vcombine.high %v3420_v21, %v3420_v21  ;;  %v6838_v51 = vcombine.high %v3406_v35, %v3420_v21  ;;  %v5032_v45 = vmul.f32 %v3413_v59, %v3413_v59  ;;  %v5033_v8 = vmul.f32 %v3421_v17, %v3421_v17 }
 0x250   :  { %v5488_v11 = vcombine.low %v9760_v61, %v5487_v37  ;;  %v4334_v31 = vcombine.low %v3423_v39, %v3406_v35  ;;  %v4355_v60 = vrot.slane %v4333_v30, %v9563_v41  ;;  %v4363_v54 = vcombine.low %v4341_v40, %v4348_v3 }
 0x251   :  { %v4390_v26 = vrot.slane %v6838_v51, %v9563_v41  ;;  %v5034_v49 = vmul.f32 %v3423_v39, %v3423_v39  ;;  %v5035_v52 = vmul.f32 %v3406_v35, %v3406_v35  ;;  %v5036_v0 = vmul.f32 %v3422_v56, %v3422_v56 }
 0x252   :  { %v4362_v58 = vrot.slane %v4334_v31, %v9563_v41  ;;  %v4371_v2 = vrot.slane %v4363_v54, %v9563_v41  ;;  %v5037_v10 = vmul.f32 %v3424_v50, %v3424_v50  ;;  %v5490_v21 = vcombine.low %v5030_v5, %v5031_v57 }
 0x253   :  { %v5491_v59 = vcombine.low %v5032_v45, %v5033_v8  ;;  %v5492_v17 = vcombine.low %v5034_v49, %v5035_v52  ;;  %v6047_v12 = vadd.f32 %v6046_v24, %v5488_v11  ;;  %v3432_v61 = vrot.slane %v3055_v28, %v9563_v41 }
 0x254   :  { %v4364_v37 = vcombine.low %v4355_v60, %v4362_v58  ;;  %v5506_v30 = vrot.slane %v5490_v21, %v9563_v41  ;;  %v5538_v40 = vcombine.low %v5036_v0, %v5037_v10  ;;  %v3439_v3 = vrot.slane %v3425_v29, %v9563_v41 }
 0x255   :  { %v5513_v35 = vrot.slane %v5491_v59, %v9563_v41  ;;  %v5520_v56 = vrot.slane %v5492_v17, %v9563_v41  ;;  %v3440_v39 = vcombine.high %v3432_v61, %v3432_v61  ;;  %v3448_v51 = vrot.slane %v3432_v61, %v9563_v41 }
 0x256   :  { %v4378_v5 = vrot.slane %v4364_v37, %v9563_v41  ;;  %v5521_v57 = vcombine.low %v5499_v4, %v5506_v30  ;;  %v5548_v24 = vrot.slane %v5538_v40, %v9563_v41  ;;  %v3441_v50 = vcombine.high %v3439_v3, %v3439_v3 }
 0x257   :  { %v5522_v28 = vcombine.low %v5513_v35, %v5520_v56  ;;  %v3455_v45 = vrot.slane %v3439_v3, %v9563_v41  ;;  %v3462_v8 = vrot.slane %v3440_v39, %v9563_v41  ;;  %v3470_v11 = vcombine.high %v3448_v51, %v3448_v51 }
 0x258   :  { %v4379_v29 = vcombine.low %v4371_v2, %v4378_v5  ;;  %v5529_v31 = vrot.slane %v5521_v57, %v9563_v41  ;;  %v3469_v60 = vrot.slane %v3441_v50, %v9563_v41  ;;  %v5038_v54 = vmul.f32 %v3448_v51, %v3448_v51 }
 0x259   :  { %v5536_v49 = vrot.slane %v5522_v28, %v9563_v41  ;;  %v3471_v52 = vcombine.high %v3462_v8, %v3462_v8  ;;  %v4381_v0 = vcombine.low %v3448_v51, %v3462_v8  ;;  %v6839_v4 = vcombine.high %v3448_v51, %v3462_v8 }
 0x25a   :  { %v6941_v58 = vpack.c.bf16 %v4379_v29, %v9777_v20  ;;  %v4970_v10 = vadd.f32 %v4969_v7, %v4379_v29  ;;  %v4383_v21 = vcombine.low %v3455_v45, %v3469_v60  ;;  %v5039_v59 = vmul.f32 %v3462_v8, %v3462_v8 }
 0x25b   :  { %v5537_v17 = vcombine.low %v5529_v31, %v5536_v49  ;;  %v4397_v61 = vrot.slane %v4381_v0, %v9563_v41  ;;  %v4404_v2 = vrot.slane %v6839_v4, %v9563_v41  ;;  %v5040_v37 = vmul.f32 %v3470_v11, %v3470_v11 }
 0x25c   :  { %7009 = vst [vmem:[%s10199_s4 + $0x10] sm:$0xff] %v6941_v58   ;;  %v4411_v30 = vrot.slane %v4383_v21, %v9563_v41  ;;  %v5041_v40 = vmul.f32 %v3471_v52, %v3471_v52  ;;  %v5042_v3 = vmul.f32 %v3455_v45, %v3455_v45  ;;  %v5043_v35 = vmul.f32 %v3469_v60, %v3469_v60 }
 0x25d   :  { %v6048_v56 = vadd.f32 %v6047_v12, %v5537_v17  ;;  %v4412_v20 = vcombine.low %v4390_v26, %v4397_v61  ;;  %v5539_v7 = vcombine.low %v5038_v54, %v5039_v59  ;;  %v3056_v39 = vadd.f32 %v9656_v44, %v9534_v25 }
 0x25e   :  { %v4413_v51 = vcombine.low %v4404_v2, %v4411_v30  ;;  %v5540_v5 = vcombine.low %v5040_v37, %v5041_v40  ;;  %v5541_v57 = vcombine.low %v5042_v3, %v5043_v35  ;;  %v3472_v50 = vcombine.high %v3469_v60, %v3469_v60 }
 0x25f   :  { %v4420_v28 = vrot.slane %v4412_v20, %v9563_v41  ;;  %v5555_v8 = vrot.slane %v5539_v7, %v9563_v41  ;;  %v3473_v11 = vcombine.high %v3056_v39, %v3056_v39  ;;  %v3480_v29 = vrot.slane %v3056_v39, %v9563_v41 }
 0x260   :  { %v4427_v45 = vrot.slane %v4413_v51, %v9563_v41  ;;  %v5562_v12 = vrot.slane %v5540_v5, %v9563_v41  ;;  %v5569_v26 = vrot.slane %v5541_v57, %v9563_v41  ;;  %v5044_v31 = vmul.f32 %v3472_v50, %v3472_v50 }
 0x261   :  { %v5570_v54 = vcombine.low %v5548_v24, %v5555_v8  ;;  %v3487_v25 = vrot.slane %v3473_v11, %v9563_v41  ;;  %v3488_v44 = vcombine.high %v3480_v29, %v3480_v29  ;;  %v3496_v60 = vrot.slane %v3480_v29, %v9563_v41 }
 0x262   :  { %v9822_v49 = vcombine.low %v4420_v28, %v4427_v45  ;;  %v5571_v52 = vcombine.low %v5562_v12, %v5569_v26  ;;  %v3057_v0 = vadd.f32 %v9665_v13, %v9537_v34  ;;  %v9828_v4 = vadd.f32 %v9676_v23, %v9540_v42 }
 0x263   :  { %v5578_v58 = vrot.slane %v5570_v54, %v9563_v41  ;;  %v3489_v21 = vcombine.high %v3487_v25, %v3487_v25  ;;  %v3503_v24 = vrot.slane %v3487_v25, %v9563_v41  ;;  %v3510_v59 = vrot.slane %v3488_v44, %v9563_v41 }
 0x264   :  { %v4971_v17 = vadd.f32 %v4970_v10, %v9822_v49  ;;  %v5585_v61 = vrot.slane %v5571_v52, %v9563_v41  ;;  %v3518_v2 = vcombine.high %v3496_v60, %v3496_v60  ;;  %v4429_v37 = vcombine.low %v3472_v50, %v3496_v60 }
 0x265   :  { %v3517_v30 = vrot.slane %v3489_v21, %v9563_v41  ;;  %v3519_v34 = vcombine.high %v3503_v24, %v3503_v24  ;;  %v3520_v13 = vcombine.high %v3510_v59, %v3510_v59  ;;  %v5045_v40 = vmul.f32 %v3496_v60, %v3496_v60 }
 0x266   :  { %v5586_v42 = vcombine.low %v5578_v58, %v5585_v61  ;;  %v4430_v23 = vcombine.low %v3510_v59, %v3518_v2  ;;  %v4439_v3 = vrot.slane %v4429_v37, %v9563_v41  ;;  %v5046_v35 = vmul.f32 %v3510_v59, %v3510_v59 }
 0x267   :  { %v4431_v20 = vcombine.low %v3520_v13, %v3503_v24  ;;  %v4432_v7 = vcombine.low %v3517_v30, %v3519_v34  ;;  %v5047_v39 = vmul.f32 %v3518_v2, %v3518_v2  ;;  %v5048_v51 = vmul.f32 %v3520_v13, %v3520_v13 }
 0x268   :  { %v6049_v5 = vadd.f32 %v6048_v56, %v5586_v42  ;;  %v4446_v10 = vrot.slane %v4430_v23, %v9563_v41  ;;  %v5049_v57 = vmul.f32 %v3503_v24, %v3503_v24  ;;  %v5050_v28 = vmul.f32 %v3517_v30, %v3517_v30 }
 0x269   :  { %v4453_v50 = vrot.slane %v4431_v20, %v9563_v41  ;;  %v4460_v8 = vrot.slane %v4432_v7, %v9563_v41  ;;  %v5051_v11 = vmul.f32 %v3519_v34, %v3519_v34  ;;  %v5587_v29 = vcombine.low %v5044_v31, %v5045_v40 }
 0x26a   :  { %v4461_v45 = vcombine.low %v4439_v3, %v4446_v10  ;;  %v5588_v12 = vcombine.low %v5046_v35, %v5047_v39  ;;  %v5589_v26 = vcombine.low %v5048_v51, %v5049_v57  ;;  %v3521_v54 = vcombine.high %v3057_v0, %v3057_v0 }
 0x26b   :  { %v4462_v25 = vcombine.low %v4453_v50, %v4460_v8  ;;  %v5590_v44 = vcombine.low %v5050_v28, %v5051_v11  ;;  %v5597_v60 = vrot.slane %v5587_v29, %v9563_v41  ;;  %v3528_v56 = vrot.slane %v3057_v0, %v9563_v41 }
 0x26c   :  { %v4469_v52 = vrot.slane %v4461_v45, %v9563_v41  ;;  %v5604_v58 = vrot.slane %v5588_v12, %v9563_v41  ;;  %v5611_v21 = vrot.slane %v5589_v26, %v9563_v41  ;;  %v3535_v24 = vrot.slane %v3521_v54, %v9563_v41 }
 0x26d   :  { %v4476_v31 = vrot.slane %v4462_v25, %v9563_v41  ;;  %v5618_v59 = vrot.slane %v5590_v44, %v9563_v41  ;;  %v3536_v61 = vcombine.high %v3528_v56, %v3528_v56  ;;  %v3544_v2 = vrot.slane %v3528_v56, %v9563_v41 }
 0x26e   :  { %v5619_v37 = vcombine.low %v5597_v60, %v5604_v58  ;;  %v3537_v30 = vcombine.high %v3535_v24, %v3535_v24  ;;  %v3551_v34 = vrot.slane %v3535_v24, %v9563_v41  ;;  %v3570_v0 = vcombine.high %v9828_v4, %v9828_v4 }
 0x26f   :  { %v4477_v13 = vcombine.low %v4469_v52, %v4476_v31  ;;  %v5620_v40 = vcombine.low %v5611_v21, %v5618_v59  ;;  %v3558_v42 = vrot.slane %v3536_v61, %v9563_v41  ;;  %v3566_v23 = vcombine.high %v3544_v2, %v3544_v2 }
 0x270   :  { %v5627_v3 = vrot.slane %v5619_v37, %v9563_v41  ;;  %v3565_v35 = vrot.slane %v3537_v30, %v9563_v41  ;;  %v3567_v20 = vcombine.high %v3551_v34, %v3551_v34  ;;  %v5052_v7 = vmul.f32 %v3544_v2, %v3544_v2 }
 0x271   :  { %v6946_v39 = vpack.c.bf16 %v4477_v13, %v9822_v49  ;;  %v9856_v51 = vadd.f32 %v4971_v17, %v4477_v13  ;;  %v5634_v10 = vrot.slane %v5620_v40, %v9563_v41  ;;  %v3568_v57 = vcombine.high %v3558_v42, %v3558_v42 }
 0x272   :  { %v3569_v28 = vcombine.high %v3565_v35, %v3565_v35  ;;  %v4478_v50 = vcombine.low %v3544_v2, %v3558_v42  ;;  %v6840_v8 = vcombine.high %v3544_v2, %v3558_v42  ;;  %v4480_v11 = vcombine.low %v3551_v34, %v3565_v35 }
 0x273   :  { %7010 = vst [vmem:[%s10199_s4 + $0x18] sm:$0xff] %v6946_v39   ;;  %v5635_v29 = vcombine.low %v5627_v3, %v5634_v10  ;;  %v6841_v45 = vcombine.high %v3551_v34, %v3565_v35  ;;  %v5053_v12 = vmul.f32 %v3558_v42, %v3558_v42  ;;  %v5054_v26 = vmul.f32 %v3566_v23, %v3566_v23 }
 0x274   :  { %v4488_v54 = vrot.slane %v4478_v50, %v9563_v41  ;;  %v4495_v49 = vrot.slane %v6840_v8, %v9563_v41  ;;  %v4502_v17 = vrot.slane %v4480_v11, %v9563_v41  ;;  %v5055_v25 = vmul.f32 %v3568_v57, %v3568_v57 }
 0x275   :  { %v9865_v44 = vadd.f32 %v6049_v5, %v5635_v29  ;;  %v4509_v60 = vrot.slane %v6841_v45, %v9563_v41  ;;  %v5056_v56 = vmul.f32 %v3551_v34, %v3551_v34  ;;  %v5057_v52 = vmul.f32 %v3565_v35, %v3565_v35 }
 0x276   :  { %v4510_v58 = vcombine.low %v4488_v54, %v4495_v49  ;;  %v5058_v21 = vmul.f32 %v3567_v20, %v3567_v20  ;;  %v5059_v24 = vmul.f32 %v3569_v28, %v3569_v28  ;;  %v5636_v31 = vcombine.low %v5052_v7, %v5053_v12 }
 0x277   :  { %v4511_v59 = vcombine.low %v4502_v17, %v4509_v60  ;;  %v5637_v61 = vcombine.low %v5054_v26, %v5055_v25  ;;  %v5638_v2 = vcombine.low %v5056_v56, %v5057_v52  ;;  %v3577_v37 = vrot.slane %v9828_v4, %v9563_v41 }
 0x278   :  { %v4518_v30 = vrot.slane %v4510_v58, %v9563_v41  ;;  %v5639_v13 = vcombine.low %v5058_v21, %v5059_v24  ;;  %v5646_v5 = vrot.slane %v5636_v31, %v9563_v41  ;;  %v3584_v40 = vrot.slane %v3570_v0, %v9563_v41 }
 0x279   :  { %v4525_v34 = vrot.slane %v4511_v59, %v9563_v41  ;;  %v5653_v42 = vrot.slane %v5637_v61, %v9563_v41  ;;  %v5660_v23 = vrot.slane %v5638_v2, %v9563_v41  ;;  %v3585_v3 = vcombine.high %v3577_v37, %v3577_v37 }
 0x27a   :  { %v5667_v35 = vrot.slane %v5639_v13, %v9563_v41  ;;  %v3586_v20 = vcombine.high %v3584_v40, %v3584_v40  ;;  %v3593_v7 = vrot.slane %v3577_v37, %v9563_v41  ;;  %v3600_v4 = vrot.slane %v3584_v40, %v9563_v41 }
 0x27b   :  { %v9879_v39 = vcombine.low %v4518_v30, %v4525_v34  ;;  %v5668_v10 = vcombine.low %v5646_v5, %v5653_v42  ;;  %v3607_v57 = vrot.slane %v3585_v3, %v9563_v41  ;;  %v3059_v0 = vadd.f32 %v9691_v19, %v9543_v36 }
 0x27c   :  { %v5669_v28 = vcombine.low %v5660_v23, %v5667_v35  ;;  %v3614_v50 = vrot.slane %v3586_v20, %v9563_v41  ;;  %v3615_v8 = vcombine.high %v3593_v7, %v3593_v7  ;;  %v3616_v11 = vcombine.high %v3600_v4, %v3600_v4 }
 0x27d   :  { %v9886_v29 = vrot.slane %v5668_v10, %v9563_v41  ;;  %v3617_v45 = vcombine.high %v3607_v57, %v3607_v57  ;;  %v5060_v12 = vmul.f32 %v3607_v57, %v3607_v57  ;;  %v5063_v26 = vmul.f32 %v3600_v4, %v3600_v4 }
 0x27e   :  { %v9889_v54 = vrot.slane %v5669_v28, %v9563_v41  ;;  %v3618_v49 = vcombine.high %v3614_v50, %v3614_v50  ;;  %v4527_v17 = vcombine.low %v3607_v57, %v3615_v8  ;;  %v4529_v25 = vcombine.low %v3614_v50, %v3616_v11 }
 0x27f   :  { %v4528_v60 = vcombine.low %v3617_v45, %v3600_v4  ;;  %v5061_v56 = vmul.f32 %v3615_v8, %v3615_v8  ;;  %v5062_v36 = vmul.f32 %v3617_v45, %v3617_v45  ;;  %v5064_v19 = vmul.f32 %v3614_v50, %v3614_v50 }
 0x280   :  { %v5684_v52 = vcombine.low %v9886_v29, %v9889_v54  ;;  %v4537_v58 = vrot.slane %v4527_v17, %v9563_v41  ;;  %v4551_v21 = vrot.slane %v4529_v25, %v9563_v41  ;;  %v5065_v24 = vmul.f32 %v3616_v11, %v3616_v11 }
 0x281   :  { %v4544_v31 = vrot.slane %v4528_v60, %v9563_v41  ;;  %v5066_v59 = vmul.f32 %v3618_v49, %v3618_v49  ;;  %v5685_v61 = vcombine.low %v5060_v12, %v5061_v56  ;;  %v5686_v2 = vcombine.low %v5062_v36, %v5063_v26 }
 0x282   :  { %v5687_v37 = vcombine.low %v5064_v19, %v5065_v24  ;;  %v3619_v30 = vcombine.high %v3059_v0, %v3059_v0  ;;  %v3626_v13 = vrot.slane %v3059_v0, %v9563_v41  ;;  %v6971_v5 = vpack.c.bf16 %v9592_v15, %v9569_v55  ;;  %v9911_v55 = vpop.f32.mrf.mxu1 }
 0x283   :  { %v4559_v40 = vcombine.low %v4537_v58, %v4544_v31  ;;  %v5695_v34 = vrot.slane %v5685_v61, %v9563_v41  ;;  %v5702_v42 = vrot.slane %v5686_v2, %v9563_v41  ;;  %v9903_v23 = vadd.f32 %v9566_v22, %v9600_v47 }
 0x284   :  { %v5709_v3 = vrot.slane %v5687_v37, %v9563_v41  ;;  %v3633_v35 = vrot.slane %v3619_v30, %v9563_v41  ;;  %v3634_v20 = vcombine.high %v3626_v13, %v3626_v13  ;;  %v3642_v7 = vrot.slane %v3626_v13, %v9563_v41  ;;  %6972 = vst [vmem:[%s10198_s7] sm:$0xff] %v6971_v5  }
 0x285   :  { %v4567_v4 = vrot.slane %v4559_v40, %v9563_v41  ;;  %v5717_v10 = vcombine.low %v5695_v34, %v5702_v42  ;;  %v6394_v22 = vmul.f32 %v9592_v15, %v9592_v15  ;;  %v9918_v47 = vmul.f32 %v9911_v55, %v9911_v55 }
 0x286   :  { %v3635_v57 = vcombine.high %v3633_v35, %v3633_v35  ;;  %v3649_v0 = vrot.slane %v3633_v35, %v9563_v41  ;;  %v3656_v28 = vrot.slane %v3634_v20, %v9563_v41  ;;  %v3664_v50 = vcombine.high %v3642_v7, %v3642_v7 }
 0x287   :  { %v9923_v8 = vrot.slane %v5717_v10, %v9563_v41  ;;  %v4530_v11 = vcombine.low %v3618_v49, %v3642_v7  ;;  %v5067_v45 = vmul.f32 %v3642_v7, %v3642_v7  ;;  %v6409_v12 = vadd.f32 %v6394_v22, %v9582_v18 }
 0x288   :  { %v3663_v26 = vrot.slane %v3635_v57, %v9563_v41  ;;  %v3665_v15 = vcombine.high %v3649_v0, %v3649_v0  ;;  %v3666_v17 = vcombine.high %v3656_v28, %v3656_v28  ;;  %v6842_v25 = vcombine.high %v3642_v7, %v3656_v28 }
 0x289   :  { %v4558_v60 = vrot.slane %v4530_v11, %v9563_v41  ;;  %v5068_v56 = vmul.f32 %v3664_v50, %v3664_v50  ;;  %v5070_v36 = vmul.f32 %v3649_v0, %v3649_v0  ;;  %v5688_v19 = vcombine.low %v5066_v59, %v5067_v45 }
 0x28a   :  { %v3667_v58 = vcombine.high %v3663_v26, %v3663_v26  ;;  %v4577_v24 = vcombine.low %v3649_v0, %v3663_v26  ;;  %v4586_v31 = vrot.slane %v6842_v25, %v9563_v41  ;;  %v5069_v61 = vmul.f32 %v3666_v17, %v3666_v17  ;;  %v6244_v25 = vpop.f32.mrf.mxu1 }
 0x28b   :  { %v4560_v2 = vcombine.low %v4551_v21, %v4558_v60  ;;  %v5071_v49 = vmul.f32 %v3663_v26, %v3663_v26  ;;  %v5072_v37 = vmul.f32 %v3665_v15, %v3665_v15  ;;  %v5716_v18 = vrot.slane %v5688_v19, %v9563_v41 }
 0x28c   :  { %v4593_v30 = vrot.slane %v4577_v24, %v9563_v41  ;;  %v5073_v13 = vmul.f32 %v3667_v58, %v3667_v58  ;;  %v5734_v5 = vcombine.low %v5068_v56, %v5069_v61  ;;  %v6410_v40 = vadd.f32 %v6409_v12, %v9578_v46 }
 0x28d   :  { %v4574_v34 = vrot.slane %v4560_v2, %v9563_v41  ;;  %v5718_v42 = vcombine.low %v5709_v3, %v5716_v18  ;;  %v5735_v59 = vcombine.low %v5070_v36, %v5071_v49  ;;  %v3060_v35 = vadd.f32 %v9706_v53, %v9546_v33 }
 0x28e   :  { %v4608_v20 = vcombine.low %v4586_v31, %v4593_v30  ;;  %v5744_v21 = vrot.slane %v5734_v5, %v9563_v41  ;;  %v6843_v7 = vcombine.high %v3649_v0, %v3663_v26  ;;  %v4973_v10 = vadd.f32 %v9856_v51, %v9879_v39 }
 0x28f   :  { %v5732_v22 = vrot.slane %v5718_v42, %v9563_v41  ;;  %v5751_v57 = vrot.slane %v5735_v59, %v9563_v41  ;;  %v3668_v28 = vcombine.high %v3060_v35, %v3060_v35  ;;  %v3675_v46 = vrot.slane %v3060_v35, %v9563_v41 }
 0x290   :  { %v4616_v3 = vrot.slane %v4608_v20, %v9563_v41  ;;  %v4575_v50 = vcombine.low %v4567_v4, %v4574_v34  ;;  %v4600_v11 = vrot.slane %v6843_v7, %v9563_v41  ;;  %v5736_v33 = vcombine.low %v5072_v37, %v5073_v13  ;;  %v9963_v13 = vpop.f32.mrf.mxu1 }
 0x291   :  { %v5766_v53 = vcombine.low %v5744_v21, %v5751_v57  ;;  %v3682_v45 = vrot.slane %v3668_v28, %v9563_v41  ;;  %v3683_v0 = vcombine.high %v3675_v46, %v3675_v46  ;;  %v3691_v12 = vrot.slane %v3675_v46, %v9563_v41 }
 0x292   :  { %v6951_v51 = vpack.c.bf16 %v4575_v50, %v9879_v39  ;;  %v4974_v26 = vadd.f32 %v4973_v10, %v4575_v50  ;;  %v5733_v15 = vcombine.low %v9923_v8, %v5732_v22  ;;  %v5758_v17 = vrot.slane %v5736_v33, %v9563_v41  ;;  %v6247_v57 = vpop.f32.mrf.mxu1 }
 0x293   :  { %v9949_v60 = vrot.slane %v5766_v53, %v9563_v41  ;;  %v3684_v4 = vcombine.high %v3682_v45, %v3682_v45  ;;  %v3698_v56 = vrot.slane %v3682_v45, %v9563_v41  ;;  %v3705_v36 = vrot.slane %v3683_v0, %v9563_v41 }
 0x294   :  { %7011 = vst [vmem:[%s10199_s4 + $0x20] sm:$0xff] %v6951_v51   ;;  %v5074_v19 = vmul.f32 %v3691_v12, %v3691_v12  ;;  %v6051_v39 = vadd.f32 %v9865_v44, %v5684_v52  ;;  %v6373_v8 = vadd.f32 %v9574_v14, %v9903_v23  ;;  %v6397_v58 = vmul.f32 %v6244_v25, %v6244_v25 }
 0x295   :  { %v3712_v24 = vrot.slane %v3684_v4, %v9563_v41  ;;  %v3713_v31 = vcombine.high %v3698_v56, %v3698_v56  ;;  %v3714_v61 = vcombine.high %v3705_v36, %v3705_v36  ;;  %v4579_v2 = vcombine.low %v3691_v12, %v3705_v36 }
 0x296   :  { %v5075_v49 = vmul.f32 %v3705_v36, %v3705_v36  ;;  %v5077_v37 = vmul.f32 %v3698_v56, %v3698_v56  ;;  %v6052_v18 = vadd.f32 %v6051_v39, %v5733_v15  ;;  %v6374_v30 = vadd.f32 %v6373_v8, %v6244_v25 }
 0x297   :  { %v4607_v5 = vrot.slane %v4579_v2, %v9563_v41  ;;  %v4625_v29 = vcombine.low %v3714_v61, %v3698_v56  ;;  %v4626_v54 = vcombine.low %v3712_v24, %v3713_v31  ;;  %v5076_v44 = vmul.f32 %v3714_v61, %v3714_v61 }
 0x298   :  { %v5078_v52 = vmul.f32 %v3712_v24, %v3712_v24  ;;  %v5079_v34 = vmul.f32 %v3713_v31, %v3713_v31  ;;  %v5737_v14 = vcombine.low %v5074_v19, %v5075_v49  ;;  %v6411_v23 = vadd.f32 %v6410_v40, %v9588_v9 }
 0x299   :  { %v4609_v42 = vcombine.low %v4600_v11, %v4607_v5  ;;  %v4635_v59 = vrot.slane %v4625_v29, %v9563_v41  ;;  %v4642_v35 = vrot.slane %v4626_v54, %v9563_v41  ;;  %v5783_v20 = vcombine.low %v5076_v44, %v5077_v37 }
 0x29a   :  { %v5765_v21 = vrot.slane %v5737_v14, %v9563_v41  ;;  %v5784_v7 = vcombine.low %v5078_v52, %v5079_v34  ;;  %v6412_v10 = vadd.f32 %v6411_v23, %v6397_v58  ;;  %v6986_v22 = vpack.c.bf16 %v9963_v13, %v9911_v55  ;;  %v10003_v58 = vpop.f32.mrf.mxu1 }
 0x29b   :  { %v4623_v28 = vrot.slane %v4609_v42, %v9563_v41  ;;  %v4657_v46 = vcombine.low %v4635_v59, %v4642_v35  ;;  %v5793_v50 = vrot.slane %v5783_v20, %v9563_v41  ;;  %v9976_v9 = vmul.f32 %v9963_v13, %v9963_v13 }
 0x29c   :  { %v5767_v40 = vcombine.low %v5758_v17, %v5765_v21  ;;  %v5800_v11 = vrot.slane %v5784_v7, %v9563_v41  ;;  %7017 = vst [vmem:[%s10198_s7 + $0x18] sm:$0xff] %v6986_v22   ;;  %v3061_v33 = vadd.f32 %v9725_v32, %v9549_v1  ;;  %v3715_v53 = vcombine.high %v3712_v24, %v3712_v24 }
 0x29d   :  { %v9984_v45 = vcombine.low %v4616_v3, %v4623_v28  ;;  %v9987_v0 = vrot.slane %v4657_v46, %v9563_v41  ;;  %v6981_v12 = vpack.c.bf16 %v6247_v57, %v6244_v25  ;;  %v6375_v51 = vadd.f32 %v6374_v30, %v6247_v57 }
 0x29e   :  { %v5781_v15 = vrot.slane %v5767_v40, %v9563_v41  ;;  %v5815_v17 = vcombine.low %v5793_v50, %v5800_v11  ;;  %v3716_v4 = vcombine.high %v3061_v33, %v3061_v33  ;;  %v3723_v56 = vrot.slane %v3061_v33, %v9563_v41 }
 0x29f   :  { %v9992_v36 = vadd.f32 %v4974_v26, %v9984_v45  ;;  %v5080_v19 = vmul.f32 %v3715_v53, %v3715_v53  ;;  %7016 = vst [vmem:[%s10198_s7 + $0x10] sm:$0xff] %v6981_v12   ;;  %v6376_v1 = vadd.f32 %v9911_v55, %v6375_v51  ;;  %v6398_v32 = vmul.f32 %v6247_v57, %v6247_v57 }
 0x2a0   :  { %v5782_v3 = vcombine.low %v9949_v60, %v5781_v15  ;;  %v10000_v25 = vrot.slane %v5815_v17, %v9563_v41  ;;  %v3730_v39 = vrot.slane %v3716_v4, %v9563_v41  ;;  %v3731_v8 = vcombine.high %v3723_v56, %v3723_v56 }
 0x2a1   :  { %v3739_v26 = vrot.slane %v3723_v56, %v9563_v41  ;;  %v6413_v24 = vadd.f32 %v6412_v10, %v6398_v32  ;;  %v10008_v31 = vmul.f32 %v10003_v58, %v10003_v58  ;;  %v3062_v55 = vadd.f32 %v9732_v38, %v9552_v48 }
 0x2a2   :  { %v10012_v61 = vadd.f32 %v6052_v18, %v5782_v3  ;;  %v3732_v60 = vcombine.high %v3730_v39, %v3730_v39  ;;  %v3746_v2 = vrot.slane %v3730_v39, %v9563_v41  ;;  %v3753_v49 = vrot.slane %v3731_v8, %v9563_v41 }
 0x2a3   :  { %v3761_v37 = vcombine.high %v3739_v26, %v3739_v26  ;;  %v4627_v30 = vcombine.low %v3715_v53, %v3739_v26  ;;  %v5081_v5 = vmul.f32 %v3739_v26, %v3739_v26  ;;  %v10017_v29 = vadd.f32 %v6413_v24, %v9918_v47 }
 0x2a4   :  { %v3760_v54 = vrot.slane %v3732_v60, %v9563_v41  ;;  %v3762_v44 = vcombine.high %v3746_v2, %v3746_v2  ;;  %v5082_v52 = vmul.f32 %v3753_v49, %v3753_v49  ;;  %v5084_v34 = vmul.f32 %v3746_v2, %v3746_v2 }
 0x2a5   :  { %v4628_v14 = vcombine.low %v3753_v49, %v3761_v37  ;;  %v4649_v48 = vrot.slane %v4627_v30, %v9563_v41  ;;  %v5083_v38 = vmul.f32 %v3761_v37, %v3761_v37  ;;  %v5785_v18 = vcombine.low %v5080_v19, %v5081_v5  ;;  %v6260_v19 = vpop.f32.mrf.mxu1 }
 0x2a6   :  { %v3763_v23 = vcombine.high %v3760_v54, %v3760_v54  ;;  %v4674_v42 = vcombine.low %v3746_v2, %v3760_v54  ;;  %v6844_v59 = vcombine.high %v3746_v2, %v3760_v54  ;;  %v5085_v35 = vmul.f32 %v3760_v54, %v3760_v54 }
 0x2a7   :  { %v4656_v20 = vrot.slane %v4628_v14, %v9563_v41  ;;  %v5086_v21 = vmul.f32 %v3762_v44, %v3762_v44  ;;  %v5786_v7 = vcombine.low %v5082_v52, %v5083_v38  ;;  %v5807_v47 = vrot.slane %v5785_v18, %v9563_v41  ;;  %v7686_v14 = vpop.f32.mrf.mxu1 }
 0x2a8   :  { %v4684_v10 = vrot.slane %v4674_v42, %v9563_v41  ;;  %v4691_v22 = vrot.slane %v6844_v59, %v9563_v41  ;;  %v5087_v57 = vmul.f32 %v3763_v23, %v3763_v23  ;;  %v5832_v28 = vcombine.low %v5084_v34, %v5085_v35 }
 0x2a9   :  { %v4658_v46 = vcombine.low %v4649_v48, %v4656_v20  ;;  %v5814_v50 = vrot.slane %v5786_v7, %v9563_v41  ;;  %v3764_v40 = vcombine.high %v3062_v55, %v3062_v55  ;;  %v3771_v11 = vrot.slane %v3062_v55, %v9563_v41 }
 0x2aa   :  { %v4706_v33 = vcombine.low %v4684_v10, %v4691_v22  ;;  %v5833_v53 = vcombine.low %v5086_v21, %v5087_v57  ;;  %v5842_v12 = vrot.slane %v5832_v28, %v9563_v41  ;;  %v6377_v51 = vadd.f32 %v9963_v13, %v6376_v1  ;;  %v6263_v22 = vpop.f32.mrf.mxu1 }
 0x2ab   :  { %v4672_v15 = vrot.slane %v4658_v46, %v9563_v41  ;;  %v5816_v17 = vcombine.low %v5807_v47, %v5814_v50  ;;  %v3778_v4 = vrot.slane %v3764_v40, %v9563_v41  ;;  %v3779_v56 = vcombine.high %v3771_v11, %v3771_v11 }
 0x2ac   :  { %v4714_v32 = vrot.slane %v4706_v33, %v9563_v41  ;;  %v5849_v3 = vrot.slane %v5833_v53, %v9563_v41  ;;  %v3787_v39 = vrot.slane %v3771_v11, %v9563_v41  ;;  %v6378_v8 = vadd.f32 %v6377_v51, %v6260_v19 }
 0x2ad   :  { %v4673_v26 = vcombine.low %v9987_v0, %v4672_v15  ;;  %v5830_v24 = vrot.slane %v5816_v17, %v9563_v41  ;;  %v3780_v55 = vcombine.high %v3778_v4, %v3778_v4  ;;  %v3794_v13 = vrot.slane %v3778_v4, %v9563_v41 }
 0x2ae   :  { %v5864_v1 = vcombine.low %v5842_v12, %v5849_v3  ;;  %v3801_v60 = vrot.slane %v3779_v56, %v9563_v41  ;;  %v3809_v2 = vcombine.high %v3787_v39, %v3787_v39  ;;  %v5088_v49 = vmul.f32 %v3787_v39, %v3787_v39  ;;  %v10073_v3 = vpop.f32.mrf.mxu1 }
 0x2af   :  { %v6956_v37 = vpack.c.bf16 %v4673_v26, %v9984_v45  ;;  %v4976_v30 = vadd.f32 %v9992_v36, %v4673_v26  ;;  %v5831_v5 = vcombine.low %v10000_v25, %v5830_v24  ;;  %v3808_v54 = vrot.slane %v3780_v55, %v9563_v41 }
 0x2b0   :  { %v10043_v0 = vrot.slane %v5864_v1, %v9563_v41  ;;  %v3810_v44 = vcombine.high %v3794_v13, %v3794_v13  ;;  %v3811_v52 = vcombine.high %v3801_v60, %v3801_v60  ;;  %v4676_v34 = vcombine.low %v3787_v39, %v3801_v60 }
 0x2b1   :  { %7012 = vst [vmem:[%s10199_s4 + $0x28] sm:$0xff] %v6956_v37   ;;  %v10049_v48 = vadd.f32 %v10012_v61, %v5831_v5  ;;  %v6845_v45 = vcombine.high %v3787_v39, %v3801_v60  ;;  %v5089_v36 = vmul.f32 %v3801_v60, %v3801_v60  ;;  %v5090_v38 = vmul.f32 %v3809_v2, %v3809_v2 }
 0x2b2   :  { %v4698_v25 = vrot.slane %v4676_v34, %v9563_v41  ;;  %v4723_v18 = vcombine.low %v3808_v54, %v3810_v44  ;;  %v5091_v23 = vmul.f32 %v3811_v52, %v3811_v52  ;;  %v5092_v42 = vmul.f32 %v3808_v54, %v3808_v54 }
 0x2b3   :  { %v4705_v59 = vrot.slane %v6845_v45, %v9563_v41  ;;  %v5093_v35 = vmul.f32 %v3810_v44, %v3810_v44  ;;  %v5834_v20 = vcombine.low %v5088_v49, %v5089_v36  ;;  %v6401_v21 = vmul.f32 %v6260_v19, %v6260_v19 }
 0x2b4   :  { %v10054_v7 = vrot.slane %v4723_v18, %v9563_v41  ;;  %v5835_v47 = vcombine.low %v5090_v38, %v5091_v23  ;;  %v6415_v61 = vadd.f32 %v10017_v29, %v9976_v9  ;;  %v6996_v10 = vpack.c.bf16 %v7686_v14, %v10003_v58 }
 0x2b5   :  { %v4707_v57 = vcombine.low %v4698_v25, %v4705_v59  ;;  %v5856_v28 = vrot.slane %v5834_v20, %v9563_v41  ;;  %v5881_v46 = vcombine.low %v5092_v42, %v5093_v35  ;;  %v10060_v50 = vmul.f32 %v7686_v14, %v7686_v14 }
 0x2b6   :  { %v5863_v40 = vrot.slane %v5835_v47, %v9563_v41  ;;  %v6416_v11 = vadd.f32 %v6415_v61, %v6401_v21  ;;  %7019 = vst [vmem:[%s10198_s7 + $0x28] sm:$0xff] %v6996_v10   ;;  %v3063_v33 = vadd.f32 %v9740_v62, %v9555_v16  ;;  %v3812_v9 = vcombine.high %v3808_v54, %v3808_v54 }
 0x2b7   :  { %v4721_v29 = vrot.slane %v4707_v57, %v9563_v41  ;;  %v10070_v53 = vrot.slane %v5881_v46, %v9563_v41  ;;  %v6991_v12 = vpack.c.bf16 %v6263_v22, %v6260_v19  ;;  %v6379_v51 = vadd.f32 %v6378_v8, %v6263_v22 }
 0x2b8   :  { %v5865_v15 = vcombine.low %v5856_v28, %v5863_v40  ;;  %v3813_v17 = vcombine.high %v3063_v33, %v3063_v33  ;;  %v3820_v4 = vrot.slane %v3063_v33, %v9563_v41  ;;  %v5094_v56 = vmul.f32 %v3812_v9, %v3812_v9  ;;  %v10107_v33 = vpop.f32.mrf.mxu1 }
 0x2b9   :  { %v10075_v39 = vcombine.low %v4714_v32, %v4721_v29  ;;  %7018 = vst [vmem:[%s10198_s7 + $0x20] sm:$0xff] %v6991_v12   ;;  %v6380_v16 = vadd.f32 %v10003_v58, %v6379_v51  ;;  %v6402_v62 = vmul.f32 %v6263_v22, %v6263_v22  ;;  %v10083_v19 = vmul.f32 %v10073_v3, %v10073_v3 }
 0x2ba   :  { %v5879_v8 = vrot.slane %v5865_v15, %v9563_v41  ;;  %v3827_v26 = vrot.slane %v3813_v17, %v9563_v41  ;;  %v3828_v24 = vcombine.high %v3820_v4, %v3820_v4  ;;  %v3836_v55 = vrot.slane %v3820_v4, %v9563_v41 }
 0x2bb   :  { %v4977_v32 = vadd.f32 %v4976_v30, %v10075_v39  ;;  %v6417_v13 = vadd.f32 %v6416_v11, %v6402_v62  ;;  %v3064_v1 = vadd.f32 %v9753_v6, %v9558_v43  ;;  %v6381_v60 = vadd.f32 %v7686_v14, %v6380_v16 }
 0x2bc   :  { %v5880_v58 = vcombine.low %v10043_v0, %v5879_v8  ;;  %v3829_v2 = vcombine.high %v3827_v26, %v3827_v26  ;;  %v3843_v49 = vrot.slane %v3827_v26, %v9563_v41  ;;  %v3850_v37 = vrot.slane %v3828_v24, %v9563_v41 }
 0x2bd   :  { %v3858_v5 = vcombine.high %v3836_v55, %v3836_v55  ;;  %v4724_v54 = vcombine.low %v3812_v9, %v3836_v55  ;;  %v5095_v44 = vmul.f32 %v3836_v55, %v3836_v55  ;;  %v6418_v52 = vadd.f32 %v6417_v13, %v10008_v31 }
 0x2be   :  { %v3857_v34 = vrot.slane %v3829_v2, %v9563_v41  ;;  %v3859_v30 = vcombine.high %v3843_v49, %v3843_v49  ;;  %v3860_v45 = vcombine.high %v3850_v37, %v3850_v37  ;;  %v5096_v36 = vmul.f32 %v3850_v37, %v3850_v37 }
 0x2bf   :  { %v4725_v38 = vcombine.low %v3850_v37, %v3858_v5  ;;  %v4740_v43 = vrot.slane %v4724_v54, %v9563_v41  ;;  %v5097_v6 = vmul.f32 %v3858_v5, %v3858_v5  ;;  %v5099_v0 = vmul.f32 %v3843_v49, %v3843_v49 }
 0x2c0   :  { %v3861_v14 = vcombine.high %v3857_v34, %v3857_v34  ;;  %v4726_v25 = vcombine.low %v3860_v45, %v3843_v49  ;;  %v6846_v18 = vcombine.high %v3843_v49, %v3857_v34  ;;  %v5098_v23 = vmul.f32 %v3860_v45, %v3860_v45 }
 0x2c1   :  { %v4747_v42 = vrot.slane %v4725_v38, %v9563_v41  ;;  %v4755_v59 = vcombine.low %v10054_v7, %v4740_v43  ;;  %v5100_v35 = vmul.f32 %v3859_v30, %v3859_v30  ;;  %v5882_v31 = vcombine.low %v5094_v56, %v5095_v44  ;;  %v10129_v38 = vpop.f32.mrf.mxu1 }
 0x2c2   :  { %v4754_v20 = vrot.slane %v4726_v25, %v9563_v41  ;;  %v10101_v21 = vrot.slane %v6846_v18, %v9563_v41  ;;  %v5101_v47 = vmul.f32 %v3861_v14, %v3861_v14  ;;  %v5883_v61 = vcombine.low %v5096_v36, %v5097_v6 }
 0x2c3   :  { %v4763_v10 = vrot.slane %v4755_v59, %v9563_v41  ;;  %v5884_v22 = vcombine.low %v5098_v23, %v5099_v0  ;;  %v5898_v57 = vrot.slane %v5882_v31, %v9563_v41  ;;  %v6055_v28 = vadd.f32 %v10049_v48, %v5880_v58 }
 0x2c4   :  { %v4756_v46 = vcombine.low %v4747_v42, %v4754_v20  ;;  %v5905_v40 = vrot.slane %v5883_v61, %v9563_v41  ;;  %v5930_v7 = vcombine.low %v5100_v35, %v5101_v47  ;;  %v3862_v11 = vcombine.high %v3064_v1, %v3064_v1 }
 0x2c5   :  { %v5912_v9 = vrot.slane %v5884_v22, %v9563_v41  ;;  %v5913_v29 = vcombine.low %v10070_v53, %v5898_v57  ;;  %v3869_v12 = vrot.slane %v3064_v1, %v9563_v41  ;;  %v6382_v51 = vadd.f32 %v6381_v60, %v10107_v33 }
 0x2c6   :  { %v4770_v15 = vrot.slane %v4756_v46, %v9563_v41  ;;  %v5940_v17 = vrot.slane %v5930_v7, %v9563_v41  ;;  %v3876_v48 = vrot.slane %v3862_v11, %v9563_v41  ;;  %v6405_v4 = vmul.f32 %v10107_v33, %v10107_v33 }
 0x2c7   :  { %v5914_v56 = vcombine.low %v5905_v40, %v5912_v9  ;;  %v5921_v16 = vrot.slane %v5913_v29, %v9563_v41  ;;  %v3877_v62 = vcombine.high %v3869_v12, %v3869_v12  ;;  %v3885_v8 = vrot.slane %v3869_v12, %v9563_v41 }
 0x2c8   :  { %v4771_v53 = vcombine.low %v4763_v10, %v4770_v15  ;;  %v3878_v26 = vcombine.high %v3876_v48, %v3876_v48  ;;  %v3892_v24 = vrot.slane %v3876_v48, %v9563_v41  ;;  %v6419_v55 = vadd.f32 %v6418_v52, %v10060_v50  ;;  %v6279_v10 = vpop.f32.mrf.mxu1 }
 0x2c9   :  { %v5928_v13 = vrot.slane %v5914_v56, %v9563_v41  ;;  %v3899_v1 = vrot.slane %v3877_v62, %v9563_v41  ;;  %v3907_v60 = vcombine.high %v3885_v8, %v3885_v8  ;;  %v5102_v58 = vmul.f32 %v3885_v8, %v3885_v8 }
 0x2ca   :  { %v6961_v2 = vpack.c.bf16 %v4771_v53, %v10075_v39  ;;  %v4978_v49 = vadd.f32 %v4977_v32, %v4771_v53  ;;  %v3906_v37 = vrot.slane %v3878_v26, %v9563_v41  ;;  %v5106_v5 = vmul.f32 %v3892_v24, %v3892_v24 }
 0x2cb   :  { %v5929_v54 = vcombine.low %v5921_v16, %v5928_v13  ;;  %v3908_v44 = vcombine.high %v3899_v1, %v3899_v1  ;;  %v4773_v34 = vcombine.low %v3885_v8, %v3899_v1  ;;  %v6847_v30 = vcombine.high %v3885_v8, %v3899_v1 }
 0x2cc   :  { %7013 = vst [vmem:[%s10199_s4 + $0x30] sm:$0xff] %v6961_v2   ;;  %v4775_v50 = vcombine.low %v3892_v24, %v3906_v37  ;;  %v5103_v52 = vmul.f32 %v3899_v1, %v3899_v1  ;;  %v5104_v45 = vmul.f32 %v3907_v60, %v3907_v60  ;;  %v5107_v36 = vmul.f32 %v3906_v37, %v3906_v37 }
 0x2cd   :  { %v6056_v43 = vadd.f32 %v6055_v28, %v5929_v54  ;;  %v4789_v39 = vrot.slane %v4773_v34, %v9563_v41  ;;  %v4796_v32 = vrot.slane %v6847_v30, %v9563_v41  ;;  %v5105_v6 = vmul.f32 %v3908_v44, %v3908_v44 }
 0x2ce   :  { %v4803_v0 = vrot.slane %v4775_v50, %v9563_v41  ;;  %v5931_v14 = vcombine.low %v5102_v58, %v5103_v52  ;;  %v5933_v25 = vcombine.low %v5106_v5, %v5107_v36  ;;  %v6420_v18 = vadd.f32 %v6419_v55, %v6405_v4 }
 0x2cf   :  { %v4804_v23 = vcombine.low %v10101_v21, %v4789_v39  ;;  %v5932_v42 = vcombine.low %v5104_v45, %v5105_v6  ;;  %v7006_v59 = vpack.c.bf16 %v10129_v38, %v10073_v3  ;;  %v10139_v35 = vmul.f32 %v10129_v38, %v10129_v38 }
 0x2d0   :  { %v4805_v31 = vcombine.low %v4796_v32, %v4803_v0  ;;  %v5947_v20 = vrot.slane %v5931_v14, %v9563_v41  ;;  %v5961_v47 = vrot.slane %v5933_v25, %v9563_v41  ;;  %v3065_v61 = vadd.f32 %v9783_v63, %v9561_v27 }
 0x2d1   :  { %v4812_v22 = vrot.slane %v4804_v23, %v9563_v41  ;;  %v5954_v21 = vrot.slane %v5932_v42, %v9563_v41  ;;  %7021 = vst [vmem:[%s10198_s7 + $0x38] sm:$0xff] %v7006_v59   ;;  %v3909_v57 = vcombine.high %v3906_v37, %v3906_v37  ;;  %v7001_v28 = vpack.c.bf16 %v6279_v10, %v10107_v33 }
 0x2d2   :  { %v4819_v46 = vrot.slane %v4805_v31, %v9563_v41  ;;  %v5962_v40 = vcombine.low %v5940_v17, %v5947_v20  ;;  %v3910_v7 = vcombine.high %v3065_v61, %v3065_v61  ;;  %v3917_v11 = vrot.slane %v3065_v61, %v9563_v41 }
 0x2d3   :  { %v5963_v9 = vcombine.low %v5954_v21, %v5961_v47  ;;  %v5108_v27 = vmul.f32 %v3909_v57, %v3909_v57  ;;  %7020 = vst [vmem:[%s10198_s7 + $0x30] sm:$0xff] %v7001_v28   ;;  %v6383_v63 = vadd.f32 %v6382_v51, %v6279_v10  ;;  %v6406_v29 = vmul.f32 %v6279_v10, %v6279_v10 }
 0x2d4   :  { %v4820_v12 = vcombine.low %v4812_v22, %v4819_v46  ;;  %v5970_v15 = vrot.slane %v5962_v40, %v9563_v41  ;;  %v3924_v48 = vrot.slane %v3910_v7, %v9563_v41  ;;  %v3925_v33 = vcombine.high %v3917_v11, %v3917_v11 }
 0x2d5   :  { %v5977_v4 = vrot.slane %v5963_v9, %v9563_v41  ;;  %v3933_v17 = vrot.slane %v3917_v11, %v9563_v41  ;;  %v6384_v56 = vadd.f32 %v10073_v3, %v6383_v63  ;;  %v6421_v16 = vadd.f32 %v6420_v18, %v6406_v29 }
 0x2d6   :  { %v4979_v62 = vadd.f32 %v4978_v49, %v4820_v12  ;;  %v3926_v8 = vcombine.high %v3924_v48, %v3924_v48  ;;  %v3940_v53 = vrot.slane %v3924_v48, %v9563_v41  ;;  %v3947_v51 = vrot.slane %v3925_v33, %v9563_v41 }
 0x2d7   :  { %v5978_v26 = vcombine.low %v5970_v15, %v5977_v4  ;;  %v3955_v24 = vcombine.high %v3933_v17, %v3933_v17  ;;  %v4821_v55 = vcombine.low %v3909_v57, %v3933_v17  ;;  %v5109_v13 = vmul.f32 %v3933_v17, %v3933_v17 }
 0x2d8   :  { %v3954_v1 = vrot.slane %v3926_v8, %v9563_v41  ;;  %v3956_v60 = vcombine.high %v3940_v53, %v3940_v53  ;;  %v3957_v58 = vcombine.high %v3947_v51, %v3947_v51  ;;  %v5110_v2 = vmul.f32 %v3947_v51, %v3947_v51 }
 0x2d9   :  { %v6057_v37 = vadd.f32 %v6056_v43, %v5978_v26  ;;  %v4822_v5 = vcombine.low %v3947_v51, %v3955_v24  ;;  %v4831_v3 = vrot.slane %v4821_v55, %v9563_v41  ;;  %v5111_v54 = vmul.f32 %v3955_v24, %v3955_v24 }
 0x2da   :  { %v4823_v49 = vcombine.low %v3957_v58, %v3940_v53  ;;  %v4824_v44 = vcombine.low %v3954_v1, %v3956_v60  ;;  %v5112_v34 = vmul.f32 %v3957_v58, %v3957_v58  ;;  %v5113_v30 = vmul.f32 %v3940_v53, %v3940_v53 }
 0x2db   :  { %v4838_v50 = vrot.slane %v4822_v5, %v9563_v41  ;;  %v5114_v52 = vmul.f32 %v3954_v1, %v3954_v1  ;;  %v5115_v45 = vmul.f32 %v3956_v60, %v3956_v60  ;;  %v5979_v36 = vcombine.low %v5108_v27, %v5109_v13 }
 0x2dc   :  { %v4845_v39 = vrot.slane %v4823_v49, %v9563_v41  ;;  %v4852_v32 = vrot.slane %v4824_v44, %v9563_v41  ;;  %v5980_v6 = vcombine.low %v5110_v2, %v5111_v54  ;;  %v5981_v0 = vcombine.low %v5112_v34, %v5113_v30 }
 0x2dd   :  { %v4853_v43 = vcombine.low %v4831_v3, %v4838_v50  ;;  %v5982_v14 = vcombine.low %v5114_v52, %v5115_v45  ;;  %v5989_v25 = vrot.slane %v5979_v36, %v9563_v41  ;;  %v6385_v18 = vadd.f32 %v10129_v38, %v6384_v56 }
 0x2de   :  { %v4854_v23 = vcombine.low %v4845_v39, %v4852_v32  ;;  %v5996_v42 = vrot.slane %v5980_v6, %v9563_v41  ;;  %v6003_v59 = vrot.slane %v5981_v0, %v9563_v41  ;;  %v6422_v31 = vadd.f32 %v6421_v16, %v10083_v19 }
 0x2df   :  { %v6010_v20 = vrot.slane %v5982_v14, %v9563_v41  ;;  %v6386_v47 = vrot.slane %v6385_v18, 4  ;;  %v4861_v61 = vrot.slane %v4853_v43, %v9563_v41 }
 0x2e0   :  { %v4868_v10 = vrot.slane %v4854_v23, %v9563_v41  ;;  %v6011_v22 = vcombine.low %v5989_v25, %v5996_v42  ;;  %v6423_v21 = vadd.f32 %v6422_v31, %v10139_v35 }
 0x2e1   :  { %v6012_v57 = vcombine.low %v6003_v59, %v6010_v20  ;;  %v6387_v28 = vadd.f32 %v6386_v47, %v6385_v18 }
 0x2e2   :  { %v4869_v38 = vcombine.low %v4861_v61, %v4868_v10  ;;  %v6424_v46 = vrot.slane %v6423_v21, 4  ;;  %v6019_v40 = vrot.slane %v6011_v22, %v9563_v41 }
 0x2e3   :  { %v6026_v7 = vrot.slane %v6012_v57, %v9563_v41  ;;  %v6388_v11 = vrot.slane %v6387_v28, 2 }
 0x2e4   :  { %v6966_v19 = vpack.c.bf16 %v4869_v38, %v4820_v12  ;;  %v4980_v9 = vadd.f32 %v4979_v62, %v4869_v38  ;;  %v6425_v27 = vadd.f32 %v6424_v46, %v6423_v21 }
 0x2e5   :  { %v6027_v63 = vcombine.low %v6019_v40, %v6026_v7  ;;  %v6389_v29 = vadd.f32 %v6388_v11, %v6387_v28 }
 0x2e6   :  { %7014 = vst [vmem:[%s10199_s4 + $0x38] sm:$0xff] %v6966_v19   ;;  %v4981_v15 = vrot.slane %v4980_v9, 4  ;;  %v6426_v35 = vrot.slane %v6425_v27, 2 }
 0x2e7   :  { %v6058_v48 = vadd.f32 %v6057_v37, %v6027_v63  ;;  %v6390_v33 = vrot.slane %v6389_v29, 1 }
 0x2e8   :  { %v4982_v4 = vadd.f32 %v4981_v15, %v4980_v9  ;;  %v6427_v17 = vadd.f32 %v6426_v35, %v6425_v27 }
 0x2e9   :  { %v6059_v56 = vrot.slane %v6058_v48, 4  ;;  %v6391_v16 = vadd.f32 %v6390_v33, %v6389_v29 }
 0x2ea   :  { %v4983_v8 = vrot.slane %v4982_v4, 2  ;;  %v6428_v41 = vrot.slane %v6427_v17, 1 }
 0x2eb   :  { %v6060_v53 = vadd.f32 %v6059_v56, %v6058_v48  ;;  %6392 = vst [vmem:[%s10200_s8] sm:$0x1] %v6391_v16 }
 0x2ec   :  { %v4984_v12 = vadd.f32 %v4983_v8, %v4982_v4  ;;  %v6429_v62 = vadd.f32 %v6428_v41, %v6427_v17 }
 0x2ed   :  { %v6061_v51 = vrot.slane %v6060_v53, 2 }
 0x2ee   :  { %v4985_v26 = vrot.slane %v4984_v12, 1  ;;  %6430 = vst [vmem:[%s10201_s9] sm:$0x1] %v6429_v62 }
 0x2ef   :  { %v6062_v24 = vadd.f32 %v6061_v51, %v6060_v53 }
 0x2f0   :  { %v4986_v55 = vadd.f32 %v4985_v26, %v4984_v12 }
 0x2f1   :  { %v6063_v13 = vrot.slane %v6062_v24, 1 }
 0x2f2   :  { %4987 = vst [vmem:[%s10202_s5] sm:$0x1] %v4986_v55 }
 0x2f3   :  { %v6064_v1 = vadd.f32 %v6063_v13, %v6062_v24 }
 0x2f5   :  { %6065 = vst [vmem:[%s10203_s6] sm:$0x1] %v6064_v1 }

</bundles_post_ra>
